<compile_context>
chip_gen: v5e
topology: v5e:2x2
jax: 0.10.0
libtpu: 0.0.40
codegen_flags: <defaults>
</compile_context>

<pallas_src>
import functools

import jax
import jax.numpy as jnp
from jax.experimental import pallas as pl
from jax.experimental.pallas import tpu as pltpu

C_PAD = 128  # every channel-like dim is padded to one lane width


# --------------------------------------------------------------------------
# The fused Pallas kernel
# --------------------------------------------------------------------------
def _net_kernel(a1_ref, w1_ref, b1_ref, w2_ref, b2_ref,
                wf1_ref, bf1_ref, wf2_ref, bf2_ref, wf3_ref, bf3_ref,
                out_ref, p1pad_scr, y2_scr, *, B, H2, W2, H4, W4):
    C = C_PAD
    NPOS = B * H2 * W2          # number of pooled-conv1 spatial positions

    # ---- conv1 (im2col matmul) + bias + ReLU -----------------------------
    # a1 rows are ordered (ph, pw, b, h2, w2): the four 2x2-pool partners of
    # each output position sit in four contiguous NPOS-row blocks.
    y1 = jnp.dot(a1_ref[...], w1_ref[...], preferred_element_type=jnp.float32)
    y1 = jnp.maximum(y1 + b1_ref[...], 0.0)               # (4*NPOS, 128)

    # ---- pool1: max over the four partner blocks -------------------------
    p1 = jnp.maximum(
        jnp.maximum(y1[0 * NPOS:1 * NPOS], y1[1 * NPOS:2 * NPOS]),
        jnp.maximum(y1[2 * NPOS:3 * NPOS], y1[3 * NPOS:4 * NPOS]))
    # p1: (NPOS, 128), rows ordered (b, h2, w2)

    # ---- build zero-padded conv2 input in VMEM scratch --------------------
    # Logical pad of 2 on each spatial side; data stored at W-offset 8 so the
    # interior store is sublane-aligned (unmasked full-tile stores).
    p1pad_scr[...] = jnp.zeros(p1pad_scr.shape, jnp.float32)
    p1pad_scr[:, pl.ds(2, H2), pl.ds(8, W2), :] = p1.reshape(B, H2, W2, C)

    # ---- conv2: 25 accumulated matmuls over shifted windows + ReLU --------
    acc = jnp.zeros((NPOS, C), jnp.float32)
    for dy in range(5):
        for dx in range(5):
            win = p1pad_scr[:, pl.ds(dy, H2), pl.ds(6 + dx, W2), :]
            acc = acc + jnp.dot(win.reshape(NPOS, C), w2_ref[dy * 5 + dx],
                                preferred_element_type=jnp.float32)
    y2 = jnp.maximum(acc + b2_ref[...], 0.0)               # (NPOS, 128)
    y2_scr[...] = y2.reshape(B, H2, W2, C)

    # ---- pool2 fused into fc1: 16 pooled chunks x (B,128)@(128,512) -------
    NF1 = wf1_ref.shape[2]
    h = jnp.zeros((B, NF1), jnp.float32)
    for i in range(H4):
        for j in range(W4):
            c00 = y2_scr[:, 2 * i,     2 * j,     :]
            c01 = y2_scr[:, 2 * i,     2 * j + 1, :]
            c10 = y2_scr[:, 2 * i + 1, 2 * j,     :]
            c11 = y2_scr[:, 2 * i + 1, 2 * j + 1, :]
            pooled = jnp.maximum(jnp.maximum(c00, c01),
                                 jnp.maximum(c10, c11))    # (B, 128)
            h = h + jnp.dot(pooled, wf1_ref[i * W4 + j],
                            preferred_element_type=jnp.float32)
    h = jnp.maximum(h + bf1_ref[...], 0.0)                 # (B, 512)

    # ---- fc2 + ReLU, fc3 (N padded to 128) --------------------------------
    h = jnp.maximum(jnp.dot(h, wf2_ref[...], preferred_element_type=jnp.float32)
                    + bf2_ref[...], 0.0)                   # (B, 256)
    o = jnp.dot(h, wf3_ref[...], preferred_element_type=jnp.float32) + bf3_ref[...]
    out_ref[...] = o.astype(out_ref.dtype)                 # (B, 128)


# --------------------------------------------------------------------------
# JAX glue: conv1 im2col with pool-partner-block row ordering, K padded to 32
# --------------------------------------------------------------------------
def _build_conv1_cols(x_bhw):
    B, H, W = x_bhw.shape
    H2, W2 = H // 2, W // 2
    xp = jnp.pad(x_bhw, ((0, 0), (2, 2), (2, 2)))
    taps = [xp[:, dy:dy + H, dx:dx + W]
            for dy in range(5) for dx in range(5)]
    P = jnp.stack(taps, axis=-1)                          # (B, H, W, 25)
    P = P.reshape(B, H2, 2, W2, 2, 25)                    # (b, h2, ph, w2, pw, t)
    P = P.transpose(2, 4, 0, 1, 3, 5)                     # (ph, pw, b, h2, w2, t)
    P = P.reshape(4 * B * H2 * W2, 25)
    return jnp.pad(P, ((0, 0), (0, 7)))                   # K: 25 -> 32


# --------------------------------------------------------------------------
# Forward pass (single pallas_call)
# --------------------------------------------------------------------------
@jax.jit
def net_forward(x_nchw, params):
    B, _, H, W = x_nchw.shape
    assert H % 4 == 0 and W % 4 == 0
    H2, W2 = H // 2, W // 2
    H4, W4 = H2 // 2, W2 // 2
    f32 = jnp.float32
    C = C_PAD

    # ---- weight / bias padding & permutation (tiny, done in XLA) ----------
    w1 = params["w_conv1"].reshape(25, 32)
    w1p = jnp.zeros((32, C), f32).at[:25, :32].set(w1)
    b1p = jnp.zeros((1, C), f32).at[0, :32].set(params["b_conv1"])

    w2 = params["w_conv2"].reshape(25, 32, 64)
    w2p = jnp.zeros((25, C, C), f32).at[:, :32, :64].set(w2)
    b2p = jnp.zeros((1, C), f32).at[0, :64].set(params["b_conv2"])

    nf1 = params["w_fc1"].shape[1]
    # w_fc1 rows are in PyTorch NCHW-flatten order (c*H4*W4 + h*W4 + w);
    # permute to (h, w, c_padded) chunks for the in-kernel NHWC accumulation.
    wf1 = params["w_fc1"].reshape(64, H4, W4, nf1).transpose(1, 2, 0, 3)
    wf1p = jnp.zeros((H4, W4, C, nf1), f32).at[:, :, :64, :].set(wf1)
    wf1p = wf1p.reshape(H4 * W4, C, nf1)
    bf1 = params["b_fc1"].reshape(1, nf1)

    wf2 = params["w_fc2"]
    nf2 = wf2.shape[1]
    bf2 = params["b_fc2"].reshape(1, nf2)

    A = params["w_fc3"].shape[1]
    wf3p = jnp.zeros((nf2, C), f32).at[:, :A].set(params["w_fc3"])
    bf3p = jnp.zeros((1, C), f32).at[0, :A].set(params["b_fc3"])

    # ---- conv1 im2col (rows grouped by 2x2 pool partner) ------------------
    a1 = _build_conv1_cols(x_nchw[:, 0, :, :])            # (4*B*H2*W2, 32)

    kernel = functools.partial(_net_kernel, B=B, H2=H2, W2=W2, H4=H4, W4=W4)

    out = pl.pallas_call(
        kernel,
        out_shape=jax.ShapeDtypeStruct((B, C), f32),
        grid_spec=pltpu.PrefetchScalarGridSpec(
            num_scalar_prefetch=0,
            grid=(1,),
            in_specs=[
                pl.BlockSpec(a1.shape, lambda i: (0, 0)),
                pl.BlockSpec((32, C), lambda i: (0, 0)),
                pl.BlockSpec((1, C), lambda i: (0, 0)),
                pl.BlockSpec((25, C, C), lambda i: (0, 0, 0)),
                pl.BlockSpec((1, C), lambda i: (0, 0)),
                pl.BlockSpec((H4 * W4, C, nf1), lambda i: (0, 0, 0)),
                pl.BlockSpec((1, nf1), lambda i: (0, 0)),
                pl.BlockSpec((nf1, nf2), lambda i: (0, 0)),
                pl.BlockSpec((1, nf2), lambda i: (0, 0)),
                pl.BlockSpec((nf2, C), lambda i: (0, 0)),
                pl.BlockSpec((1, C), lambda i: (0, 0)),
            ],
            out_specs=pl.BlockSpec((B, C), lambda i: (0, 0)),
            scratch_shapes=[
                pltpu.VMEM((B, H2 + 4, W2 + 16, C), f32),   # padded conv2 input
                pltpu.VMEM((B, H2, W2, C), f32),            # conv2 output
            ],
        ),
        compiler_params=pltpu.CompilerParams(
            dimension_semantics=("arbitrary",),
            vmem_limit_bytes=32 * 1024 * 1024,
        ),
    )(a1, w1p, b1p, w2p, b2p, wf1p, bf1, wf2, bf2, wf3p, bf3p)

    return out[:, :A]


# --------------------------------------------------------------------------
# Pure-JAX reference (matches NET.forward semantics), for self-check
# --------------------------------------------------------------------------
def net_reference(x_nchw, params):
    hp = jax.lax.Precision.HIGHEST
    B, _, H, W = x_nchw.shape
    H2, W2 = H // 2, W // 2
    x = x_nchw[:, 0]
    xp = jnp.pad(x, ((0, 0), (2, 2), (2, 2)))
    pat1 = jnp.stack([xp[:, dy:dy + H, dx:dx + W]
                      for dy in range(5) for dx in range(5)], axis=-1)
    y1 = jnp.einsum("bhwt,tc->bhwc", pat1, params["w_conv1"].reshape(25, 32),
                    precision=hp) + params["b_conv1"]
    y1 = jnp.maximum(y1, 0.0)
    p1 = jnp.max(y1.reshape(B, H2, 2, W2, 2, 32), axis=(2, 4))
    p1p = jnp.pad(p1, ((0, 0), (2, 2), (2, 2), (0, 0)))
    pat2 = jnp.stack([p1p[:, dy:dy + H2, dx:dx + W2, :]
                      for dy in range(5) for dx in range(5)], axis=3)
    y2 = jnp.einsum("bhwtc,tcd->bhwd", pat2, params["w_conv2"].reshape(25, 32, 64),
                    precision=hp) + params["b_conv2"]
    y2 = jnp.maximum(y2, 0.0)
    p2 = jnp.max(y2.reshape(B, H2 // 2, 2, W2 // 2, 2, 64), axis=(2, 4))
    feat = jnp.transpose(p2, (0, 3, 1, 2)).reshape(B, -1)   # NCHW flatten
    h = jnp.maximum(jnp.dot(feat, params["w_fc1"], precision=hp)
                    + params["b_fc1"], 0.0)
    h = jnp.maximum(jnp.dot(h, params["w_fc2"], precision=hp)
                    + params["b_fc2"], 0.0)
    return jnp.dot(h, params["w_fc3"], precision=hp) + params["b_fc3"]


# --------------------------------------------------------------------------
# Deterministic in-script parameter construction
# --------------------------------------------------------------------------
def init_params(obs_h, obs_w, action_space, key):
    ks = jax.random.split(key, 10)
    flat_dim = (obs_h // 4) * (obs_w // 4) * 64

    def uniform(k, shape, fan_in):
        bound = 1.0 / jnp.sqrt(jnp.float32(fan_in))
        return jax.random.uniform(k, shape, jnp.float32, -bound, bound)

    return {
        "w_conv1": uniform(ks[0], (5, 5, 32), 25),            # (kh, kw, cout), cin=1
        "b_conv1": uniform(ks[1], (32,), 25),
        "w_conv2": uniform(ks[2], (5, 5, 32, 64), 25 * 32),   # (kh, kw, cin, cout)
        "b_conv2": uniform(ks[3], (64,), 25 * 32),
        "w_fc1": uniform(ks[4], (flat_dim, 512), flat_dim),   # rows in NCHW-flatten order
        "b_fc1": uniform(ks[5], (512,), flat_dim),
        "w_fc2": uniform(ks[6], (512, 256), 512),
        "b_fc2": uniform(ks[7], (256,), 512),
        "w_fc3": uniform(ks[8], (256, action_space), 256),
        "b_fc3": uniform(ks[9], (action_space,), 256),
    }


# --------------------------------------------------------------------------
if __name__ == "__main__":
    OBS_H, OBS_W = 16, 16
    ACTION_SPACE = 4
    BATCH = 2

    key = jax.random.PRNGKey(0)
    k_x, k_p = jax.random.split(key)
    x = jax.random.normal(k_x, (BATCH, 1, OBS_H, OBS_W), dtype=jnp.float32)
    params = init_params(OBS_H, OBS_W, ACTION_SPACE, k_p)

    out = net_forward(x, params)
    out = jax.block_until_ready(out)
    assert out.shape == (BATCH, ACTION_SPACE), out.shape
    assert bool(jnp.all(jnp.isfinite(out)))

    ref = net_reference(x, params)
    assert bool(jnp.allclose(out, ref, rtol=2e-2, atol=2e-2)), (out, ref)

    print("KERNEL_OK")
</pallas_src>

<mosaic_0001>
module attributes {stable_mosaic.version = 11 : i64} {
  func.func @_net_kernel(%arg0: i32, %arg1: memref<512x32xf32, #tpu.memory_space<vmem>>, %arg2: memref<32x128xf32, #tpu.memory_space<vmem>>, %arg3: memref<1x128xf32, #tpu.memory_space<vmem>>, %arg4: memref<25x128x128xf32, #tpu.memory_space<vmem>>, %arg5: memref<1x128xf32, #tpu.memory_space<vmem>>, %arg6: memref<16x128x512xf32, #tpu.memory_space<vmem>>, %arg7: memref<1x512xf32, #tpu.memory_space<vmem>>, %arg8: memref<512x256xf32, #tpu.memory_space<vmem>>, %arg9: memref<1x256xf32, #tpu.memory_space<vmem>>, %arg10: memref<256x128xf32, #tpu.memory_space<vmem>>, %arg11: memref<1x128xf32, #tpu.memory_space<vmem>>, %arg12: memref<2x128xf32, #tpu.memory_space<vmem>>, %arg13: memref<2x12x24x128xf32, #tpu.memory_space<vmem>>, %arg14: memref<2x8x8x128xf32, #tpu.memory_space<vmem>>) attributes {dimension_semantics = [#tpu.dimension_semantics<arbitrary>], iteration_bounds = array<i64: 1>, scalar_prefetch = 0 : i64, scratch_operands = 2 : i64, tpu.core_type = #tpu.core_type<tc>, window_params = [{pipeline_mode = #tpu.pipeline_mode<synchronous>, transform_indices = @transform_0, window_bounds = array<i64: 512, 32>}, {pipeline_mode = #tpu.pipeline_mode<synchronous>, transform_indices = @transform_1, window_bounds = array<i64: 32, 128>}, {pipeline_mode = #tpu.pipeline_mode<synchronous>, transform_indices = @transform_2, window_bounds = array<i64: 1, 128>}, {pipeline_mode = #tpu.pipeline_mode<synchronous>, transform_indices = @transform_3, window_bounds = array<i64: 25, 128, 128>}, {pipeline_mode = #tpu.pipeline_mode<synchronous>, transform_indices = @transform_4, window_bounds = array<i64: 1, 128>}, {pipeline_mode = #tpu.pipeline_mode<synchronous>, transform_indices = @transform_5, window_bounds = array<i64: 16, 128, 512>}, {pipeline_mode = #tpu.pipeline_mode<synchronous>, transform_indices = @transform_6, window_bounds = array<i64: 1, 512>}, {pipeline_mode = #tpu.pipeline_mode<synchronous>, transform_indices = @transform_7, window_bounds = array<i64: 512, 256>}, {pipeline_mode = #tpu.pipeline_mode<synchronous>, transform_indices = @transform_8, window_bounds = array<i64: 1, 256>}, {pipeline_mode = #tpu.pipeline_mode<synchronous>, transform_indices = @transform_9, window_bounds = array<i64: 256, 128>}, {pipeline_mode = #tpu.pipeline_mode<synchronous>, transform_indices = @transform_10, window_bounds = array<i64: 1, 128>}, {pipeline_mode = #tpu.pipeline_mode<synchronous>, transform_indices = @transform_11, window_bounds = array<i64: 2, 128>}]} {
    %c0 = arith.constant 0 : index
    %c0_0 = arith.constant 0 : index
    %0 = vector.load %arg1[%c0, %c0_0] : memref<512x32xf32, #tpu.memory_space<vmem>>, vector<512x32xf32>
    %c0_1 = arith.constant 0 : index
    %c0_2 = arith.constant 0 : index
    %1 = vector.load %arg2[%c0_1, %c0_2] : memref<32x128xf32, #tpu.memory_space<vmem>>, vector<32x128xf32>
    %cst = arith.constant dense<0.000000e+00> : vector<512x128xf32>
    %2 = tpu.matmul %0, %1, %cst {dimension_numbers = #tpu.dot_dimension_numbers<[1], [0], [0], [1], [0, 0, 1, 1], [], []>} : vector<512x32xf32>, vector<32x128xf32>, vector<512x128xf32> -> vector<512x128xf32>
    %c0_3 = arith.constant 0 : index
    %c0_4 = arith.constant 0 : index
    %3 = vector.load %arg3[%c0_3, %c0_4] : memref<1x128xf32, #tpu.memory_space<vmem>>, vector<1x128xf32>
    %4 = vector.broadcast %3 : vector<1x128xf32> to vector<512x128xf32>
    %5 = arith.addf %2, %4 : vector<512x128xf32>
    %cst_5 = arith.constant 0.000000e+00 : f32
    %6 = vector.broadcast %cst_5 : f32 to vector<512x128xf32>
    %7 = arith.maximumf %5, %6 : vector<512x128xf32>
    %8 = vector.extract_strided_slice %7 {offsets = [0, 0], sizes = [128, 128], strides = [1, 1]} : vector<512x128xf32> to vector<128x128xf32>
    %9 = vector.extract_strided_slice %7 {offsets = [128, 0], sizes = [128, 128], strides = [1, 1]} : vector<512x128xf32> to vector<128x128xf32>
    %10 = arith.maximumf %8, %9 : vector<128x128xf32>
    %11 = vector.extract_strided_slice %7 {offsets = [256, 0], sizes = [128, 128], strides = [1, 1]} : vector<512x128xf32> to vector<128x128xf32>
    %12 = vector.extract_strided_slice %7 {offsets = [384, 0], sizes = [128, 128], strides = [1, 1]} : vector<512x128xf32> to vector<128x128xf32>
    %13 = arith.maximumf %11, %12 : vector<128x128xf32>
    %14 = arith.maximumf %10, %13 : vector<128x128xf32>
    %cst_6 = arith.constant 0.000000e+00 : f32
    %15 = vector.broadcast %cst_6 : f32 to vector<2x12x24x128xf32>
    %c0_7 = arith.constant 0 : index
    %c0_8 = arith.constant 0 : index
    %c0_9 = arith.constant 0 : index
    %c0_10 = arith.constant 0 : index
    %16 = vector.load %arg13[%c0_7, %c0_8, %c0_9, %c0_10] : memref<2x12x24x128xf32, #tpu.memory_space<vmem>>, vector<2x12x24x128xf32>
    tpu.vector_store %arg13[%c0_7, %c0_8, %c0_9, %c0_10], %15 {strides = array<i32>} : memref<2x12x24x128xf32, #tpu.memory_space<vmem>>, vector<2x12x24x128xf32>,
    %17 = vector.shape_cast %14 : vector<128x128xf32> to vector<2x8x8x128xf32>
    %c0_11 = arith.constant 0 : index
    %c2 = arith.constant 2 : index
    %c8 = arith.constant 8 : index
    %c0_12 = arith.constant 0 : index
    %18 = vector.load %arg13[%c0_11, %c2, %c8, %c0_12] : memref<2x12x24x128xf32, #tpu.memory_space<vmem>>, vector<2x8x8x128xf32>
    tpu.vector_store %arg13[%c0_11, %c2, %c8, %c0_12], %17 {strides = array<i32>} : memref<2x12x24x128xf32, #tpu.memory_space<vmem>>, vector<2x8x8x128xf32>,
    %cst_13 = arith.constant 0.000000e+00 : f32
    %19 = vector.broadcast %cst_13 : f32 to vector<128x128xf32>
    %c0_14 = arith.constant 0 : index
    %c0_15 = arith.constant 0 : index
    %c6 = arith.constant 6 : index
    %c0_16 = arith.constant 0 : index
    %20 = vector.load %arg13[%c0_14, %c0_15, %c6, %c0_16] : memref<2x12x24x128xf32, #tpu.memory_space<vmem>>, vector<2x8x8x128xf32>
    %21 = vector.shape_cast %20 : vector<2x8x8x128xf32> to vector<128x128xf32>
    %c0_17 = arith.constant 0 : index
    %c0_18 = arith.constant 0 : index
    %c0_19 = arith.constant 0 : index
    %22 = vector.load %arg4[%c0_17, %c0_18, %c0_19] : memref<25x128x128xf32, #tpu.memory_space<vmem>>, vector<1x128x128xf32>
    %23 = vector.shape_cast %22 : vector<1x128x128xf32> to vector<128x128xf32>
    %cst_20 = arith.constant dense<0.000000e+00> : vector<128x128xf32>
    %24 = tpu.matmul %21, %23, %cst_20 {dimension_numbers = #tpu.dot_dimension_numbers<[1], [0], [0], [1], [0, 0, 1, 1], [], []>} : vector<128x128xf32>, vector<128x128xf32>, vector<128x128xf32> -> vector<128x128xf32>
    %25 = arith.addf %19, %24 : vector<128x128xf32>
    %c0_21 = arith.constant 0 : index
    %c0_22 = arith.constant 0 : index
    %c7 = arith.constant 7 : index
    %c0_23 = arith.constant 0 : index
    %26 = vector.load %arg13[%c0_21, %c0_22, %c7, %c0_23] : memref<2x12x24x128xf32, #tpu.memory_space<vmem>>, vector<2x8x8x128xf32>
    %27 = vector.shape_cast %26 : vector<2x8x8x128xf32> to vector<128x128xf32>
    %c1 = arith.constant 1 : index
    %c0_24 = arith.constant 0 : index
    %c0_25 = arith.constant 0 : index
    %28 = vector.load %arg4[%c1, %c0_24, %c0_25] : memref<25x128x128xf32, #tpu.memory_space<vmem>>, vector<1x128x128xf32>
    %29 = vector.shape_cast %28 : vector<1x128x128xf32> to vector<128x128xf32>
    %cst_26 = arith.constant dense<0.000000e+00> : vector<128x128xf32>
    %30 = tpu.matmul %27, %29, %cst_26 {dimension_numbers = #tpu.dot_dimension_numbers<[1], [0], [0], [1], [0, 0, 1, 1], [], []>} : vector<128x128xf32>, vector<128x128xf32>, vector<128x128xf32> -> vector<128x128xf32>
    %31 = arith.addf %25, %30 : vector<128x128xf32>
    %c0_27 = arith.constant 0 : index
    %c0_28 = arith.constant 0 : index
    %c8_29 = arith.constant 8 : index
    %c0_30 = arith.constant 0 : index
    %32 = vector.load %arg13[%c0_27, %c0_28, %c8_29, %c0_30] : memref<2x12x24x128xf32, #tpu.memory_space<vmem>>, vector<2x8x8x128xf32>
    %33 = vector.shape_cast %32 : vector<2x8x8x128xf32> to vector<128x128xf32>
    %c2_31 = arith.constant 2 : index
    %c0_32 = arith.constant 0 : index
    %c0_33 = arith.constant 0 : index
    %34 = vector.load %arg4[%c2_31, %c0_32, %c0_33] : memref<25x128x128xf32, #tpu.memory_space<vmem>>, vector<1x128x128xf32>
    %35 = vector.shape_cast %34 : vector<1x128x128xf32> to vector<128x128xf32>
    %cst_34 = arith.constant dense<0.000000e+00> : vector<128x128xf32>
    %36 = tpu.matmul %33, %35, %cst_34 {dimension_numbers = #tpu.dot_dimension_numbers<[1], [0], [0], [1], [0, 0, 1, 1], [], []>} : vector<128x128xf32>, vector<128x128xf32>, vector<128x128xf32> -> vector<128x128xf32>
    %37 = arith.addf %31, %36 : vector<128x128xf32>
    %c0_35 = arith.constant 0 : index
    %c0_36 = arith.constant 0 : index
    %c9 = arith.constant 9 : index
    %c0_37 = arith.constant 0 : index
    %38 = vector.load %arg13[%c0_35, %c0_36, %c9, %c0_37] : memref<2x12x24x128xf32, #tpu.memory_space<vmem>>, vector<2x8x8x128xf32>
    %39 = vector.shape_cast %38 : vector<2x8x8x128xf32> to vector<128x128xf32>
    %c3 = arith.constant 3 : index
    %c0_38 = arith.constant 0 : index
    %c0_39 = arith.constant 0 : index
    %40 = vector.load %arg4[%c3, %c0_38, %c0_39] : memref<25x128x128xf32, #tpu.memory_space<vmem>>, vector<1x128x128xf32>
    %41 = vector.shape_cast %40 : vector<1x128x128xf32> to vector<128x128xf32>
    %cst_40 = arith.constant dense<0.000000e+00> : vector<128x128xf32>
    %42 = tpu.matmul %39, %41, %cst_40 {dimension_numbers = #tpu.dot_dimension_numbers<[1], [0], [0], [1], [0, 0, 1, 1], [], []>} : vector<128x128xf32>, vector<128x128xf32>, vector<128x128xf32> -> vector<128x128xf32>
    %43 = arith.addf %37, %42 : vector<128x128xf32>
    %c0_41 = arith.constant 0 : index
    %c0_42 = arith.constant 0 : index
    %c10 = arith.constant 10 : index
    %c0_43 = arith.constant 0 : index
    %44 = vector.load %arg13[%c0_41, %c0_42, %c10, %c0_43] : memref<2x12x24x128xf32, #tpu.memory_space<vmem>>, vector<2x8x8x128xf32>
    %45 = vector.shape_cast %44 : vector<2x8x8x128xf32> to vector<128x128xf32>
    %c4 = arith.constant 4 : index
    %c0_44 = arith.constant 0 : index
    %c0_45 = arith.constant 0 : index
    %46 = vector.load %arg4[%c4, %c0_44, %c0_45] : memref<25x128x128xf32, #tpu.memory_space<vmem>>, vector<1x128x128xf32>
    %47 = vector.shape_cast %46 : vector<1x128x128xf32> to vector<128x128xf32>
    %cst_46 = arith.constant dense<0.000000e+00> : vector<128x128xf32>
    %48 = tpu.matmul %45, %47, %cst_46 {dimension_numbers = #tpu.dot_dimension_numbers<[1], [0], [0], [1], [0, 0, 1, 1], [], []>} : vector<128x128xf32>, vector<128x128xf32>, vector<128x128xf32> -> vector<128x128xf32>
    %49 = arith.addf %43, %48 : vector<128x128xf32>
    %c0_47 = arith.constant 0 : index
    %c1_48 = arith.constant 1 : index
    %c6_49 = arith.constant 6 : index
    %c0_50 = arith.constant 0 : index
    %50 = vector.load %arg13[%c0_47, %c1_48, %c6_49, %c0_50] : memref<2x12x24x128xf32, #tpu.memory_space<vmem>>, vector<2x8x8x128xf32>
    %51 = vector.shape_cast %50 : vector<2x8x8x128xf32> to vector<128x128xf32>
    %c5 = arith.constant 5 : index
    %c0_51 = arith.constant 0 : index
    %c0_52 = arith.constant 0 : index
    %52 = vector.load %arg4[%c5, %c0_51, %c0_52] : memref<25x128x128xf32, #tpu.memory_space<vmem>>, vector<1x128x128xf32>
    %53 = vector.shape_cast %52 : vector<1x128x128xf32> to vector<128x128xf32>
    %cst_53 = arith.constant dense<0.000000e+00> : vector<128x128xf32>
    %54 = tpu.matmul %51, %53, %cst_53 {dimension_numbers = #tpu.dot_dimension_numbers<[1], [0], [0], [1], [0, 0, 1, 1], [], []>} : vector<128x128xf32>, vector<128x128xf32>, vector<128x128xf32> -> vector<128x128xf32>
    %55 = arith.addf %49, %54 : vector<128x128xf32>
    %c0_54 = arith.constant 0 : index
    %c1_55 = arith.constant 1 : index
    %c7_56 = arith.constant 7 : index
    %c0_57 = arith.constant 0 : index
    %56 = vector.load %arg13[%c0_54, %c1_55, %c7_56, %c0_57] : memref<2x12x24x128xf32, #tpu.memory_space<vmem>>, vector<2x8x8x128xf32>
    %57 = vector.shape_cast %56 : vector<2x8x8x128xf32> to vector<128x128xf32>
    %c6_58 = arith.constant 6 : index
    %c0_59 = arith.constant 0 : index
    %c0_60 = arith.constant 0 : index
    %58 = vector.load %arg4[%c6_58, %c0_59, %c0_60] : memref<25x128x128xf32, #tpu.memory_space<vmem>>, vector<1x128x128xf32>
    %59 = vector.shape_cast %58 : vector<1x128x128xf32> to vector<128x128xf32>
    %cst_61 = arith.constant dense<0.000000e+00> : vector<128x128xf32>
    %60 = tpu.matmul %57, %59, %cst_61 {dimension_numbers = #tpu.dot_dimension_numbers<[1], [0], [0], [1], [0, 0, 1, 1], [], []>} : vector<128x128xf32>, vector<128x128xf32>, vector<128x128xf32> -> vector<128x128xf32>
    %61 = arith.addf %55, %60 : vector<128x128xf32>
    %c0_62 = arith.constant 0 : index
    %c1_63 = arith.constant 1 : index
    %c8_64 = arith.constant 8 : index
    %c0_65 = arith.constant 0 : index
    %62 = vector.load %arg13[%c0_62, %c1_63, %c8_64, %c0_65] : memref<2x12x24x128xf32, #tpu.memory_space<vmem>>, vector<2x8x8x128xf32>
    %63 = vector.shape_cast %62 : vector<2x8x8x128xf32> to vector<128x128xf32>
    %c7_66 = arith.constant 7 : index
    %c0_67 = arith.constant 0 : index
    %c0_68 = arith.constant 0 : index
    %64 = vector.load %arg4[%c7_66, %c0_67, %c0_68] : memref<25x128x128xf32, #tpu.memory_space<vmem>>, vector<1x128x128xf32>
    %65 = vector.shape_cast %64 : vector<1x128x128xf32> to vector<128x128xf32>
    %cst_69 = arith.constant dense<0.000000e+00> : vector<128x128xf32>
    %66 = tpu.matmul %63, %65, %cst_69 {dimension_numbers = #tpu.dot_dimension_numbers<[1], [0], [0], [1], [0, 0, 1, 1], [], []>} : vector<128x128xf32>, vector<128x128xf32>, vector<128x128xf32> -> vector<128x128xf32>
    %67 = arith.addf %61, %66 : vector<128x128xf32>
    %c0_70 = arith.constant 0 : index
    %c1_71 = arith.constant 1 : index
    %c9_72 = arith.constant 9 : index
    %c0_73 = arith.constant 0 : index
    %68 = vector.load %arg13[%c0_70, %c1_71, %c9_72, %c0_73] : memref<2x12x24x128xf32, #tpu.memory_space<vmem>>, vector<2x8x8x128xf32>
    %69 = vector.shape_cast %68 : vector<2x8x8x128xf32> to vector<128x128xf32>
    %c8_74 = arith.constant 8 : index
    %c0_75 = arith.constant 0 : index
    %c0_76 = arith.constant 0 : index
    %70 = vector.load %arg4[%c8_74, %c0_75, %c0_76] : memref<25x128x128xf32, #tpu.memory_space<vmem>>, vector<1x128x128xf32>
    %71 = vector.shape_cast %70 : vector<1x128x128xf32> to vector<128x128xf32>
    %cst_77 = arith.constant dense<0.000000e+00> : vector<128x128xf32>
    %72 = tpu.matmul %69, %71, %cst_77 {dimension_numbers = #tpu.dot_dimension_numbers<[1], [0], [0], [1], [0, 0, 1, 1], [], []>} : vector<128x128xf32>, vector<128x128xf32>, vector<128x128xf32> -> vector<128x128xf32>
    %73 = arith.addf %67, %72 : vector<128x128xf32>
    %c0_78 = arith.constant 0 : index
    %c1_79 = arith.constant 1 : index
    %c10_80 = arith.constant 10 : index
    %c0_81 = arith.constant 0 : index
    %74 = vector.load %arg13[%c0_78, %c1_79, %c10_80, %c0_81] : memref<2x12x24x128xf32, #tpu.memory_space<vmem>>, vector<2x8x8x128xf32>
    %75 = vector.shape_cast %74 : vector<2x8x8x128xf32> to vector<128x128xf32>
    %c9_82 = arith.constant 9 : index
    %c0_83 = arith.constant 0 : index
    %c0_84 = arith.constant 0 : index
    %76 = vector.load %arg4[%c9_82, %c0_83, %c0_84] : memref<25x128x128xf32, #tpu.memory_space<vmem>>, vector<1x128x128xf32>
    %77 = vector.shape_cast %76 : vector<1x128x128xf32> to vector<128x128xf32>
    %cst_85 = arith.constant dense<0.000000e+00> : vector<128x128xf32>
    %78 = tpu.matmul %75, %77, %cst_85 {dimension_numbers = #tpu.dot_dimension_numbers<[1], [0], [0], [1], [0, 0, 1, 1], [], []>} : vector<128x128xf32>, vector<128x128xf32>, vector<128x128xf32> -> vector<128x128xf32>
    %79 = arith.addf %73, %78 : vector<128x128xf32>
    %c0_86 = arith.constant 0 : index
    %c2_87 = arith.constant 2 : index
    %c6_88 = arith.constant 6 : index
    %c0_89 = arith.constant 0 : index
    %80 = vector.load %arg13[%c0_86, %c2_87, %c6_88, %c0_89] : memref<2x12x24x128xf32, #tpu.memory_space<vmem>>, vector<2x8x8x128xf32>
    %81 = vector.shape_cast %80 : vector<2x8x8x128xf32> to vector<128x128xf32>
    %c10_90 = arith.constant 10 : index
    %c0_91 = arith.constant 0 : index
    %c0_92 = arith.constant 0 : index
    %82 = vector.load %arg4[%c10_90, %c0_91, %c0_92] : memref<25x128x128xf32, #tpu.memory_space<vmem>>, vector<1x128x128xf32>
    %83 = vector.shape_cast %82 : vector<1x128x128xf32> to vector<128x128xf32>
    %cst_93 = arith.constant dense<0.000000e+00> : vector<128x128xf32>
    %84 = tpu.matmul %81, %83, %cst_93 {dimension_numbers = #tpu.dot_dimension_numbers<[1], [0], [0], [1], [0, 0, 1, 1], [], []>} : vector<128x128xf32>, vector<128x128xf32>, vector<128x128xf32> -> vector<128x128xf32>
    %85 = arith.addf %79, %84 : vector<128x128xf32>
    %c0_94 = arith.constant 0 : index
    %c2_95 = arith.constant 2 : index
    %c7_96 = arith.constant 7 : index
    %c0_97 = arith.constant 0 : index
    %86 = vector.load %arg13[%c0_94, %c2_95, %c7_96, %c0_97] : memref<2x12x24x128xf32, #tpu.memory_space<vmem>>, vector<2x8x8x128xf32>
    %87 = vector.shape_cast %86 : vector<2x8x8x128xf32> to vector<128x128xf32>
    %c11 = arith.constant 11 : index
    %c0_98 = arith.constant 0 : index
    %c0_99 = arith.constant 0 : index
    %88 = vector.load %arg4[%c11, %c0_98, %c0_99] : memref<25x128x128xf32, #tpu.memory_space<vmem>>, vector<1x128x128xf32>
    %89 = vector.shape_cast %88 : vector<1x128x128xf32> to vector<128x128xf32>
    %cst_100 = arith.constant dense<0.000000e+00> : vector<128x128xf32>
    %90 = tpu.matmul %87, %89, %cst_100 {dimension_numbers = #tpu.dot_dimension_numbers<[1], [0], [0], [1], [0, 0, 1, 1], [], []>} : vector<128x128xf32>, vector<128x128xf32>, vector<128x128xf32> -> vector<128x128xf32>
    %91 = arith.addf %85, %90 : vector<128x128xf32>
    %c0_101 = arith.constant 0 : index
    %c2_102 = arith.constant 2 : index
    %c8_103 = arith.constant 8 : index
    %c0_104 = arith.constant 0 : index
    %92 = vector.load %arg13[%c0_101, %c2_102, %c8_103, %c0_104] : memref<2x12x24x128xf32, #tpu.memory_space<vmem>>, vector<2x8x8x128xf32>
    %93 = vector.shape_cast %92 : vector<2x8x8x128xf32> to vector<128x128xf32>
    %c12 = arith.constant 12 : index
    %c0_105 = arith.constant 0 : index
    %c0_106 = arith.constant 0 : index
    %94 = vector.load %arg4[%c12, %c0_105, %c0_106] : memref<25x128x128xf32, #tpu.memory_space<vmem>>, vector<1x128x128xf32>
    %95 = vector.shape_cast %94 : vector<1x128x128xf32> to vector<128x128xf32>
    %cst_107 = arith.constant dense<0.000000e+00> : vector<128x128xf32>
    %96 = tpu.matmul %93, %95, %cst_107 {dimension_numbers = #tpu.dot_dimension_numbers<[1], [0], [0], [1], [0, 0, 1, 1], [], []>} : vector<128x128xf32>, vector<128x128xf32>, vector<128x128xf32> -> vector<128x128xf32>
    %97 = arith.addf %91, %96 : vector<128x128xf32>
    %c0_108 = arith.constant 0 : index
    %c2_109 = arith.constant 2 : index
    %c9_110 = arith.constant 9 : index
    %c0_111 = arith.constant 0 : index
    %98 = vector.load %arg13[%c0_108, %c2_109, %c9_110, %c0_111] : memref<2x12x24x128xf32, #tpu.memory_space<vmem>>, vector<2x8x8x128xf32>
    %99 = vector.shape_cast %98 : vector<2x8x8x128xf32> to vector<128x128xf32>
    %c13 = arith.constant 13 : index
    %c0_112 = arith.constant 0 : index
    %c0_113 = arith.constant 0 : index
    %100 = vector.load %arg4[%c13, %c0_112, %c0_113] : memref<25x128x128xf32, #tpu.memory_space<vmem>>, vector<1x128x128xf32>
    %101 = vector.shape_cast %100 : vector<1x128x128xf32> to vector<128x128xf32>
    %cst_114 = arith.constant dense<0.000000e+00> : vector<128x128xf32>
    %102 = tpu.matmul %99, %101, %cst_114 {dimension_numbers = #tpu.dot_dimension_numbers<[1], [0], [0], [1], [0, 0, 1, 1], [], []>} : vector<128x128xf32>, vector<128x128xf32>, vector<128x128xf32> -> vector<128x128xf32>
    %103 = arith.addf %97, %102 : vector<128x128xf32>
    %c0_115 = arith.constant 0 : index
    %c2_116 = arith.constant 2 : index
    %c10_117 = arith.constant 10 : index
    %c0_118 = arith.constant 0 : index
    %104 = vector.load %arg13[%c0_115, %c2_116, %c10_117, %c0_118] : memref<2x12x24x128xf32, #tpu.memory_space<vmem>>, vector<2x8x8x128xf32>
    %105 = vector.shape_cast %104 : vector<2x8x8x128xf32> to vector<128x128xf32>
    %c14 = arith.constant 14 : index
    %c0_119 = arith.constant 0 : index
    %c0_120 = arith.constant 0 : index
    %106 = vector.load %arg4[%c14, %c0_119, %c0_120] : memref<25x128x128xf32, #tpu.memory_space<vmem>>, vector<1x128x128xf32>
    %107 = vector.shape_cast %106 : vector<1x128x128xf32> to vector<128x128xf32>
    %cst_121 = arith.constant dense<0.000000e+00> : vector<128x128xf32>
    %108 = tpu.matmul %105, %107, %cst_121 {dimension_numbers = #tpu.dot_dimension_numbers<[1], [0], [0], [1], [0, 0, 1, 1], [], []>} : vector<128x128xf32>, vector<128x128xf32>, vector<128x128xf32> -> vector<128x128xf32>
    %109 = arith.addf %103, %108 : vector<128x128xf32>
    %c0_122 = arith.constant 0 : index
    %c3_123 = arith.constant 3 : index
    %c6_124 = arith.constant 6 : index
    %c0_125 = arith.constant 0 : index
    %110 = vector.load %arg13[%c0_122, %c3_123, %c6_124, %c0_125] : memref<2x12x24x128xf32, #tpu.memory_space<vmem>>, vector<2x8x8x128xf32>
    %111 = vector.shape_cast %110 : vector<2x8x8x128xf32> to vector<128x128xf32>
    %c15 = arith.constant 15 : index
    %c0_126 = arith.constant 0 : index
    %c0_127 = arith.constant 0 : index
    %112 = vector.load %arg4[%c15, %c0_126, %c0_127] : memref<25x128x128xf32, #tpu.memory_space<vmem>>, vector<1x128x128xf32>
    %113 = vector.shape_cast %112 : vector<1x128x128xf32> to vector<128x128xf32>
    %cst_128 = arith.constant dense<0.000000e+00> : vector<128x128xf32>
    %114 = tpu.matmul %111, %113, %cst_128 {dimension_numbers = #tpu.dot_dimension_numbers<[1], [0], [0], [1], [0, 0, 1, 1], [], []>} : vector<128x128xf32>, vector<128x128xf32>, vector<128x128xf32> -> vector<128x128xf32>
    %115 = arith.addf %109, %114 : vector<128x128xf32>
    %c0_129 = arith.constant 0 : index
    %c3_130 = arith.constant 3 : index
    %c7_131 = arith.constant 7 : index
    %c0_132 = arith.constant 0 : index
    %116 = vector.load %arg13[%c0_129, %c3_130, %c7_131, %c0_132] : memref<2x12x24x128xf32, #tpu.memory_space<vmem>>, vector<2x8x8x128xf32>
    %117 = vector.shape_cast %116 : vector<2x8x8x128xf32> to vector<128x128xf32>
    %c16 = arith.constant 16 : index
    %c0_133 = arith.constant 0 : index
    %c0_134 = arith.constant 0 : index
    %118 = vector.load %arg4[%c16, %c0_133, %c0_134] : memref<25x128x128xf32, #tpu.memory_space<vmem>>, vector<1x128x128xf32>
    %119 = vector.shape_cast %118 : vector<1x128x128xf32> to vector<128x128xf32>
    %cst_135 = arith.constant dense<0.000000e+00> : vector<128x128xf32>
    %120 = tpu.matmul %117, %119, %cst_135 {dimension_numbers = #tpu.dot_dimension_numbers<[1], [0], [0], [1], [0, 0, 1, 1], [], []>} : vector<128x128xf32>, vector<128x128xf32>, vector<128x128xf32> -> vector<128x128xf32>
    %121 = arith.addf %115, %120 : vector<128x128xf32>
    %c0_136 = arith.constant 0 : index
    %c3_137 = arith.constant 3 : index
    %c8_138 = arith.constant 8 : index
    %c0_139 = arith.constant 0 : index
    %122 = vector.load %arg13[%c0_136, %c3_137, %c8_138, %c0_139] : memref<2x12x24x128xf32, #tpu.memory_space<vmem>>, vector<2x8x8x128xf32>
    %123 = vector.shape_cast %122 : vector<2x8x8x128xf32> to vector<128x128xf32>
    %c17 = arith.constant 17 : index
    %c0_140 = arith.constant 0 : index
    %c0_141 = arith.constant 0 : index
    %124 = vector.load %arg4[%c17, %c0_140, %c0_141] : memref<25x128x128xf32, #tpu.memory_space<vmem>>, vector<1x128x128xf32>
    %125 = vector.shape_cast %124 : vector<1x128x128xf32> to vector<128x128xf32>
    %cst_142 = arith.constant dense<0.000000e+00> : vector<128x128xf32>
    %126 = tpu.matmul %123, %125, %cst_142 {dimension_numbers = #tpu.dot_dimension_numbers<[1], [0], [0], [1], [0, 0, 1, 1], [], []>} : vector<128x128xf32>, vector<128x128xf32>, vector<128x128xf32> -> vector<128x128xf32>
    %127 = arith.addf %121, %126 : vector<128x128xf32>
    %c0_143 = arith.constant 0 : index
    %c3_144 = arith.constant 3 : index
    %c9_145 = arith.constant 9 : index
    %c0_146 = arith.constant 0 : index
    %128 = vector.load %arg13[%c0_143, %c3_144, %c9_145, %c0_146] : memref<2x12x24x128xf32, #tpu.memory_space<vmem>>, vector<2x8x8x128xf32>
    %129 = vector.shape_cast %128 : vector<2x8x8x128xf32> to vector<128x128xf32>
    %c18 = arith.constant 18 : index
    %c0_147 = arith.constant 0 : index
    %c0_148 = arith.constant 0 : index
    %130 = vector.load %arg4[%c18, %c0_147, %c0_148] : memref<25x128x128xf32, #tpu.memory_space<vmem>>, vector<1x128x128xf32>
    %131 = vector.shape_cast %130 : vector<1x128x128xf32> to vector<128x128xf32>
    %cst_149 = arith.constant dense<0.000000e+00> : vector<128x128xf32>
    %132 = tpu.matmul %129, %131, %cst_149 {dimension_numbers = #tpu.dot_dimension_numbers<[1], [0], [0], [1], [0, 0, 1, 1], [], []>} : vector<128x128xf32>, vector<128x128xf32>, vector<128x128xf32> -> vector<128x128xf32>
    %133 = arith.addf %127, %132 : vector<128x128xf32>
    %c0_150 = arith.constant 0 : index
    %c3_151 = arith.constant 3 : index
    %c10_152 = arith.constant 10 : index
    %c0_153 = arith.constant 0 : index
    %134 = vector.load %arg13[%c0_150, %c3_151, %c10_152, %c0_153] : memref<2x12x24x128xf32, #tpu.memory_space<vmem>>, vector<2x8x8x128xf32>
    %135 = vector.shape_cast %134 : vector<2x8x8x128xf32> to vector<128x128xf32>
    %c19 = arith.constant 19 : index
    %c0_154 = arith.constant 0 : index
    %c0_155 = arith.constant 0 : index
    %136 = vector.load %arg4[%c19, %c0_154, %c0_155] : memref<25x128x128xf32, #tpu.memory_space<vmem>>, vector<1x128x128xf32>
    %137 = vector.shape_cast %136 : vector<1x128x128xf32> to vector<128x128xf32>
    %cst_156 = arith.constant dense<0.000000e+00> : vector<128x128xf32>
    %138 = tpu.matmul %135, %137, %cst_156 {dimension_numbers = #tpu.dot_dimension_numbers<[1], [0], [0], [1], [0, 0, 1, 1], [], []>} : vector<128x128xf32>, vector<128x128xf32>, vector<128x128xf32> -> vector<128x128xf32>
    %139 = arith.addf %133, %138 : vector<128x128xf32>
    %c0_157 = arith.constant 0 : index
    %c4_158 = arith.constant 4 : index
    %c6_159 = arith.constant 6 : index
    %c0_160 = arith.constant 0 : index
    %140 = vector.load %arg13[%c0_157, %c4_158, %c6_159, %c0_160] : memref<2x12x24x128xf32, #tpu.memory_space<vmem>>, vector<2x8x8x128xf32>
    %141 = vector.shape_cast %140 : vector<2x8x8x128xf32> to vector<128x128xf32>
    %c20 = arith.constant 20 : index
    %c0_161 = arith.constant 0 : index
    %c0_162 = arith.constant 0 : index
    %142 = vector.load %arg4[%c20, %c0_161, %c0_162] : memref<25x128x128xf32, #tpu.memory_space<vmem>>, vector<1x128x128xf32>
    %143 = vector.shape_cast %142 : vector<1x128x128xf32> to vector<128x128xf32>
    %cst_163 = arith.constant dense<0.000000e+00> : vector<128x128xf32>
    %144 = tpu.matmul %141, %143, %cst_163 {dimension_numbers = #tpu.dot_dimension_numbers<[1], [0], [0], [1], [0, 0, 1, 1], [], []>} : vector<128x128xf32>, vector<128x128xf32>, vector<128x128xf32> -> vector<128x128xf32>
    %145 = arith.addf %139, %144 : vector<128x128xf32>
    %c0_164 = arith.constant 0 : index
    %c4_165 = arith.constant 4 : index
    %c7_166 = arith.constant 7 : index
    %c0_167 = arith.constant 0 : index
    %146 = vector.load %arg13[%c0_164, %c4_165, %c7_166, %c0_167] : memref<2x12x24x128xf32, #tpu.memory_space<vmem>>, vector<2x8x8x128xf32>
    %147 = vector.shape_cast %146 : vector<2x8x8x128xf32> to vector<128x128xf32>
    %c21 = arith.constant 21 : index
    %c0_168 = arith.constant 0 : index
    %c0_169 = arith.constant 0 : index
    %148 = vector.load %arg4[%c21, %c0_168, %c0_169] : memref<25x128x128xf32, #tpu.memory_space<vmem>>, vector<1x128x128xf32>
    %149 = vector.shape_cast %148 : vector<1x128x128xf32> to vector<128x128xf32>
    %cst_170 = arith.constant dense<0.000000e+00> : vector<128x128xf32>
    %150 = tpu.matmul %147, %149, %cst_170 {dimension_numbers = #tpu.dot_dimension_numbers<[1], [0], [0], [1], [0, 0, 1, 1], [], []>} : vector<128x128xf32>, vector<128x128xf32>, vector<128x128xf32> -> vector<128x128xf32>
    %151 = arith.addf %145, %150 : vector<128x128xf32>
    %c0_171 = arith.constant 0 : index
    %c4_172 = arith.constant 4 : index
    %c8_173 = arith.constant 8 : index
    %c0_174 = arith.constant 0 : index
    %152 = vector.load %arg13[%c0_171, %c4_172, %c8_173, %c0_174] : memref<2x12x24x128xf32, #tpu.memory_space<vmem>>, vector<2x8x8x128xf32>
    %153 = vector.shape_cast %152 : vector<2x8x8x128xf32> to vector<128x128xf32>
    %c22 = arith.constant 22 : index
    %c0_175 = arith.constant 0 : index
    %c0_176 = arith.constant 0 : index
    %154 = vector.load %arg4[%c22, %c0_175, %c0_176] : memref<25x128x128xf32, #tpu.memory_space<vmem>>, vector<1x128x128xf32>
    %155 = vector.shape_cast %154 : vector<1x128x128xf32> to vector<128x128xf32>
    %cst_177 = arith.constant dense<0.000000e+00> : vector<128x128xf32>
    %156 = tpu.matmul %153, %155, %cst_177 {dimension_numbers = #tpu.dot_dimension_numbers<[1], [0], [0], [1], [0, 0, 1, 1], [], []>} : vector<128x128xf32>, vector<128x128xf32>, vector<128x128xf32> -> vector<128x128xf32>
    %157 = arith.addf %151, %156 : vector<128x128xf32>
    %c0_178 = arith.constant 0 : index
    %c4_179 = arith.constant 4 : index
    %c9_180 = arith.constant 9 : index
    %c0_181 = arith.constant 0 : index
    %158 = vector.load %arg13[%c0_178, %c4_179, %c9_180, %c0_181] : memref<2x12x24x128xf32, #tpu.memory_space<vmem>>, vector<2x8x8x128xf32>
    %159 = vector.shape_cast %158 : vector<2x8x8x128xf32> to vector<128x128xf32>
    %c23 = arith.constant 23 : index
    %c0_182 = arith.constant 0 : index
    %c0_183 = arith.constant 0 : index
    %160 = vector.load %arg4[%c23, %c0_182, %c0_183] : memref<25x128x128xf32, #tpu.memory_space<vmem>>, vector<1x128x128xf32>
    %161 = vector.shape_cast %160 : vector<1x128x128xf32> to vector<128x128xf32>
    %cst_184 = arith.constant dense<0.000000e+00> : vector<128x128xf32>
    %162 = tpu.matmul %159, %161, %cst_184 {dimension_numbers = #tpu.dot_dimension_numbers<[1], [0], [0], [1], [0, 0, 1, 1], [], []>} : vector<128x128xf32>, vector<128x128xf32>, vector<128x128xf32> -> vector<128x128xf32>
    %163 = arith.addf %157, %162 : vector<128x128xf32>
    %c0_185 = arith.constant 0 : index
    %c4_186 = arith.constant 4 : index
    %c10_187 = arith.constant 10 : index
    %c0_188 = arith.constant 0 : index
    %164 = vector.load %arg13[%c0_185, %c4_186, %c10_187, %c0_188] : memref<2x12x24x128xf32, #tpu.memory_space<vmem>>, vector<2x8x8x128xf32>
    %165 = vector.shape_cast %164 : vector<2x8x8x128xf32> to vector<128x128xf32>
    %c24 = arith.constant 24 : index
    %c0_189 = arith.constant 0 : index
    %c0_190 = arith.constant 0 : index
    %166 = vector.load %arg4[%c24, %c0_189, %c0_190] : memref<25x128x128xf32, #tpu.memory_space<vmem>>, vector<1x128x128xf32>
    %167 = vector.shape_cast %166 : vector<1x128x128xf32> to vector<128x128xf32>
    %cst_191 = arith.constant dense<0.000000e+00> : vector<128x128xf32>
    %168 = tpu.matmul %165, %167, %cst_191 {dimension_numbers = #tpu.dot_dimension_numbers<[1], [0], [0], [1], [0, 0, 1, 1], [], []>} : vector<128x128xf32>, vector<128x128xf32>, vector<128x128xf32> -> vector<128x128xf32>
    %169 = arith.addf %163, %168 : vector<128x128xf32>
    %c0_192 = arith.constant 0 : index
    %c0_193 = arith.constant 0 : index
    %170 = vector.load %arg5[%c0_192, %c0_193] : memref<1x128xf32, #tpu.memory_space<vmem>>, vector<1x128xf32>
    %171 = vector.broadcast %170 : vector<1x128xf32> to vector<128x128xf32>
    %172 = arith.addf %169, %171 : vector<128x128xf32>
    %cst_194 = arith.constant 0.000000e+00 : f32
    %173 = vector.broadcast %cst_194 : f32 to vector<128x128xf32>
    %174 = arith.maximumf %172, %173 : vector<128x128xf32>
    %175 = vector.shape_cast %174 : vector<128x128xf32> to vector<2x8x8x128xf32>
    %c0_195 = arith.constant 0 : index
    %c0_196 = arith.constant 0 : index
    %c0_197 = arith.constant 0 : index
    %c0_198 = arith.constant 0 : index
    %176 = vector.load %arg14[%c0_195, %c0_196, %c0_197, %c0_198] : memref<2x8x8x128xf32, #tpu.memory_space<vmem>>, vector<2x8x8x128xf32>
    tpu.vector_store %arg14[%c0_195, %c0_196, %c0_197, %c0_198], %175 {strides = array<i32>} : memref<2x8x8x128xf32, #tpu.memory_space<vmem>>, vector<2x8x8x128xf32>,
    %cst_199 = arith.constant 0.000000e+00 : f32
    %177 = vector.broadcast %cst_199 : f32 to vector<2x512xf32>
    %c0_200 = arith.constant 0 : index
    %c0_201 = arith.constant 0 : index
    %c0_202 = arith.constant 0 : index
    %c0_203 = arith.constant 0 : index
    %178 = vector.load %arg14[%c0_200, %c0_201, %c0_202, %c0_203] : memref<2x8x8x128xf32, #tpu.memory_space<vmem>>, vector<2x1x1x128xf32>
    %179 = vector.shape_cast %178 : vector<2x1x1x128xf32> to vector<2x128xf32>
    %c0_204 = arith.constant 0 : index
    %c0_205 = arith.constant 0 : index
    %c1_206 = arith.constant 1 : index
    %c0_207 = arith.constant 0 : index
    %180 = vector.load %arg14[%c0_204, %c0_205, %c1_206, %c0_207] : memref<2x8x8x128xf32, #tpu.memory_space<vmem>>, vector<2x1x1x128xf32>
    %181 = vector.shape_cast %180 : vector<2x1x1x128xf32> to vector<2x128xf32>
    %c0_208 = arith.constant 0 : index
    %c1_209 = arith.constant 1 : index
    %c0_210 = arith.constant 0 : index
    %c0_211 = arith.constant 0 : index
    %182 = vector.load %arg14[%c0_208, %c1_209, %c0_210, %c0_211] : memref<2x8x8x128xf32, #tpu.memory_space<vmem>>, vector<2x1x1x128xf32>
    %183 = vector.shape_cast %182 : vector<2x1x1x128xf32> to vector<2x128xf32>
    %c0_212 = arith.constant 0 : index
    %c1_213 = arith.constant 1 : index
    %c1_214 = arith.constant 1 : index
    %c0_215 = arith.constant 0 : index
    %184 = vector.load %arg14[%c0_212, %c1_213, %c1_214, %c0_215] : memref<2x8x8x128xf32, #tpu.memory_space<vmem>>, vector<2x1x1x128xf32>
    %185 = vector.shape_cast %184 : vector<2x1x1x128xf32> to vector<2x128xf32>
    %186 = arith.maximumf %179, %181 : vector<2x128xf32>
    %187 = arith.maximumf %183, %185 : vector<2x128xf32>
    %188 = arith.maximumf %186, %187 : vector<2x128xf32>
    %c0_216 = arith.constant 0 : index
    %c0_217 = arith.constant 0 : index
    %c0_218 = arith.constant 0 : index
    %189 = vector.load %arg6[%c0_216, %c0_217, %c0_218] : memref<16x128x512xf32, #tpu.memory_space<vmem>>, vector<1x128x512xf32>
    %190 = vector.shape_cast %189 : vector<1x128x512xf32> to vector<128x512xf32>
    %cst_219 = arith.constant dense<0.000000e+00> : vector<2x512xf32>
    %191 = tpu.matmul %188, %190, %cst_219 {dimension_numbers = #tpu.dot_dimension_numbers<[1], [0], [0], [1], [0, 0, 1, 1], [], []>} : vector<2x128xf32>, vector<128x512xf32>, vector<2x512xf32> -> vector<2x512xf32>
    %192 = arith.addf %177, %191 : vector<2x512xf32>
    %c0_220 = arith.constant 0 : index
    %c0_221 = arith.constant 0 : index
    %c2_222 = arith.constant 2 : index
    %c0_223 = arith.constant 0 : index
    %193 = vector.load %arg14[%c0_220, %c0_221, %c2_222, %c0_223] : memref<2x8x8x128xf32, #tpu.memory_space<vmem>>, vector<2x1x1x128xf32>
    %194 = vector.shape_cast %193 : vector<2x1x1x128xf32> to vector<2x128xf32>
    %c0_224 = arith.constant 0 : index
    %c0_225 = arith.constant 0 : index
    %c3_226 = arith.constant 3 : index
    %c0_227 = arith.constant 0 : index
    %195 = vector.load %arg14[%c0_224, %c0_225, %c3_226, %c0_227] : memref<2x8x8x128xf32, #tpu.memory_space<vmem>>, vector<2x1x1x128xf32>
    %196 = vector.shape_cast %195 : vector<2x1x1x128xf32> to vector<2x128xf32>
    %c0_228 = arith.constant 0 : index
    %c1_229 = arith.constant 1 : index
    %c2_230 = arith.constant 2 : index
    %c0_231 = arith.constant 0 : index
    %197 = vector.load %arg14[%c0_228, %c1_229, %c2_230, %c0_231] : memref<2x8x8x128xf32, #tpu.memory_space<vmem>>, vector<2x1x1x128xf32>
    %198 = vector.shape_cast %197 : vector<2x1x1x128xf32> to vector<2x128xf32>
    %c0_232 = arith.constant 0 : index
    %c1_233 = arith.constant 1 : index
    %c3_234 = arith.constant 3 : index
    %c0_235 = arith.constant 0 : index
    %199 = vector.load %arg14[%c0_232, %c1_233, %c3_234, %c0_235] : memref<2x8x8x128xf32, #tpu.memory_space<vmem>>, vector<2x1x1x128xf32>
    %200 = vector.shape_cast %199 : vector<2x1x1x128xf32> to vector<2x128xf32>
    %201 = arith.maximumf %194, %196 : vector<2x128xf32>
    %202 = arith.maximumf %198, %200 : vector<2x128xf32>
    %203 = arith.maximumf %201, %202 : vector<2x128xf32>
    %c1_236 = arith.constant 1 : index
    %c0_237 = arith.constant 0 : index
    %c0_238 = arith.constant 0 : index
    %204 = vector.load %arg6[%c1_236, %c0_237, %c0_238] : memref<16x128x512xf32, #tpu.memory_space<vmem>>, vector<1x128x512xf32>
    %205 = vector.shape_cast %204 : vector<1x128x512xf32> to vector<128x512xf32>
    %cst_239 = arith.constant dense<0.000000e+00> : vector<2x512xf32>
    %206 = tpu.matmul %203, %205, %cst_239 {dimension_numbers = #tpu.dot_dimension_numbers<[1], [0], [0], [1], [0, 0, 1, 1], [], []>} : vector<2x128xf32>, vector<128x512xf32>, vector<2x512xf32> -> vector<2x512xf32>
    %207 = arith.addf %192, %206 : vector<2x512xf32>
    %c0_240 = arith.constant 0 : index
    %c0_241 = arith.constant 0 : index
    %c4_242 = arith.constant 4 : index
    %c0_243 = arith.constant 0 : index
    %208 = vector.load %arg14[%c0_240, %c0_241, %c4_242, %c0_243] : memref<2x8x8x128xf32, #tpu.memory_space<vmem>>, vector<2x1x1x128xf32>
    %209 = vector.shape_cast %208 : vector<2x1x1x128xf32> to vector<2x128xf32>
    %c0_244 = arith.constant 0 : index
    %c0_245 = arith.constant 0 : index
    %c5_246 = arith.constant 5 : index
    %c0_247 = arith.constant 0 : index
    %210 = vector.load %arg14[%c0_244, %c0_245, %c5_246, %c0_247] : memref<2x8x8x128xf32, #tpu.memory_space<vmem>>, vector<2x1x1x128xf32>
    %211 = vector.shape_cast %210 : vector<2x1x1x128xf32> to vector<2x128xf32>
    %c0_248 = arith.constant 0 : index
    %c1_249 = arith.constant 1 : index
    %c4_250 = arith.constant 4 : index
    %c0_251 = arith.constant 0 : index
    %212 = vector.load %arg14[%c0_248, %c1_249, %c4_250, %c0_251] : memref<2x8x8x128xf32, #tpu.memory_space<vmem>>, vector<2x1x1x128xf32>
    %213 = vector.shape_cast %212 : vector<2x1x1x128xf32> to vector<2x128xf32>
    %c0_252 = arith.constant 0 : index
    %c1_253 = arith.constant 1 : index
    %c5_254 = arith.constant 5 : index
    %c0_255 = arith.constant 0 : index
    %214 = vector.load %arg14[%c0_252, %c1_253, %c5_254, %c0_255] : memref<2x8x8x128xf32, #tpu.memory_space<vmem>>, vector<2x1x1x128xf32>
    %215 = vector.shape_cast %214 : vector<2x1x1x128xf32> to vector<2x128xf32>
    %216 = arith.maximumf %209, %211 : vector<2x128xf32>
    %217 = arith.maximumf %213, %215 : vector<2x128xf32>
    %218 = arith.maximumf %216, %217 : vector<2x128xf32>
    %c2_256 = arith.constant 2 : index
    %c0_257 = arith.constant 0 : index
    %c0_258 = arith.constant 0 : index
    %219 = vector.load %arg6[%c2_256, %c0_257, %c0_258] : memref<16x128x512xf32, #tpu.memory_space<vmem>>, vector<1x128x512xf32>
    %220 = vector.shape_cast %219 : vector<1x128x512xf32> to vector<128x512xf32>
    %cst_259 = arith.constant dense<0.000000e+00> : vector<2x512xf32>
    %221 = tpu.matmul %218, %220, %cst_259 {dimension_numbers = #tpu.dot_dimension_numbers<[1], [0], [0], [1], [0, 0, 1, 1], [], []>} : vector<2x128xf32>, vector<128x512xf32>, vector<2x512xf32> -> vector<2x512xf32>
    %222 = arith.addf %207, %221 : vector<2x512xf32>
    %c0_260 = arith.constant 0 : index
    %c0_261 = arith.constant 0 : index
    %c6_262 = arith.constant 6 : index
    %c0_263 = arith.constant 0 : index
    %223 = vector.load %arg14[%c0_260, %c0_261, %c6_262, %c0_263] : memref<2x8x8x128xf32, #tpu.memory_space<vmem>>, vector<2x1x1x128xf32>
    %224 = vector.shape_cast %223 : vector<2x1x1x128xf32> to vector<2x128xf32>
    %c0_264 = arith.constant 0 : index
    %c0_265 = arith.constant 0 : index
    %c7_266 = arith.constant 7 : index
    %c0_267 = arith.constant 0 : index
    %225 = vector.load %arg14[%c0_264, %c0_265, %c7_266, %c0_267] : memref<2x8x8x128xf32, #tpu.memory_space<vmem>>, vector<2x1x1x128xf32>
    %226 = vector.shape_cast %225 : vector<2x1x1x128xf32> to vector<2x128xf32>
    %c0_268 = arith.constant 0 : index
    %c1_269 = arith.constant 1 : index
    %c6_270 = arith.constant 6 : index
    %c0_271 = arith.constant 0 : index
    %227 = vector.load %arg14[%c0_268, %c1_269, %c6_270, %c0_271] : memref<2x8x8x128xf32, #tpu.memory_space<vmem>>, vector<2x1x1x128xf32>
    %228 = vector.shape_cast %227 : vector<2x1x1x128xf32> to vector<2x128xf32>
    %c0_272 = arith.constant 0 : index
    %c1_273 = arith.constant 1 : index
    %c7_274 = arith.constant 7 : index
    %c0_275 = arith.constant 0 : index
    %229 = vector.load %arg14[%c0_272, %c1_273, %c7_274, %c0_275] : memref<2x8x8x128xf32, #tpu.memory_space<vmem>>, vector<2x1x1x128xf32>
    %230 = vector.shape_cast %229 : vector<2x1x1x128xf32> to vector<2x128xf32>
    %231 = arith.maximumf %224, %226 : vector<2x128xf32>
    %232 = arith.maximumf %228, %230 : vector<2x128xf32>
    %233 = arith.maximumf %231, %232 : vector<2x128xf32>
    %c3_276 = arith.constant 3 : index
    %c0_277 = arith.constant 0 : index
    %c0_278 = arith.constant 0 : index
    %234 = vector.load %arg6[%c3_276, %c0_277, %c0_278] : memref<16x128x512xf32, #tpu.memory_space<vmem>>, vector<1x128x512xf32>
    %235 = vector.shape_cast %234 : vector<1x128x512xf32> to vector<128x512xf32>
    %cst_279 = arith.constant dense<0.000000e+00> : vector<2x512xf32>
    %236 = tpu.matmul %233, %235, %cst_279 {dimension_numbers = #tpu.dot_dimension_numbers<[1], [0], [0], [1], [0, 0, 1, 1], [], []>} : vector<2x128xf32>, vector<128x512xf32>, vector<2x512xf32> -> vector<2x512xf32>
    %237 = arith.addf %222, %236 : vector<2x512xf32>
    %c0_280 = arith.constant 0 : index
    %c2_281 = arith.constant 2 : index
    %c0_282 = arith.constant 0 : index
    %c0_283 = arith.constant 0 : index
    %238 = vector.load %arg14[%c0_280, %c2_281, %c0_282, %c0_283] : memref<2x8x8x128xf32, #tpu.memory_space<vmem>>, vector<2x1x1x128xf32>
    %239 = vector.shape_cast %238 : vector<2x1x1x128xf32> to vector<2x128xf32>
    %c0_284 = arith.constant 0 : index
    %c2_285 = arith.constant 2 : index
    %c1_286 = arith.constant 1 : index
    %c0_287 = arith.constant 0 : index
    %240 = vector.load %arg14[%c0_284, %c2_285, %c1_286, %c0_287] : memref<2x8x8x128xf32, #tpu.memory_space<vmem>>, vector<2x1x1x128xf32>
    %241 = vector.shape_cast %240 : vector<2x1x1x128xf32> to vector<2x128xf32>
    %c0_288 = arith.constant 0 : index
    %c3_289 = arith.constant 3 : index
    %c0_290 = arith.constant 0 : index
    %c0_291 = arith.constant 0 : index
    %242 = vector.load %arg14[%c0_288, %c3_289, %c0_290, %c0_291] : memref<2x8x8x128xf32, #tpu.memory_space<vmem>>, vector<2x1x1x128xf32>
    %243 = vector.shape_cast %242 : vector<2x1x1x128xf32> to vector<2x128xf32>
    %c0_292 = arith.constant 0 : index
    %c3_293 = arith.constant 3 : index
    %c1_294 = arith.constant 1 : index
    %c0_295 = arith.constant 0 : index
    %244 = vector.load %arg14[%c0_292, %c3_293, %c1_294, %c0_295] : memref<2x8x8x128xf32, #tpu.memory_space<vmem>>, vector<2x1x1x128xf32>
    %245 = vector.shape_cast %244 : vector<2x1x1x128xf32> to vector<2x128xf32>
    %246 = arith.maximumf %239, %241 : vector<2x128xf32>
    %247 = arith.maximumf %243, %245 : vector<2x128xf32>
    %248 = arith.maximumf %246, %247 : vector<2x128xf32>
    %c4_296 = arith.constant 4 : index
    %c0_297 = arith.constant 0 : index
    %c0_298 = arith.constant 0 : index
    %249 = vector.load %arg6[%c4_296, %c0_297, %c0_298] : memref<16x128x512xf32, #tpu.memory_space<vmem>>, vector<1x128x512xf32>
    %250 = vector.shape_cast %249 : vector<1x128x512xf32> to vector<128x512xf32>
    %cst_299 = arith.constant dense<0.000000e+00> : vector<2x512xf32>
    %251 = tpu.matmul %248, %250, %cst_299 {dimension_numbers = #tpu.dot_dimension_numbers<[1], [0], [0], [1], [0, 0, 1, 1], [], []>} : vector<2x128xf32>, vector<128x512xf32>, vector<2x512xf32> -> vector<2x512xf32>
    %252 = arith.addf %237, %251 : vector<2x512xf32>
    %c0_300 = arith.constant 0 : index
    %c2_301 = arith.constant 2 : index
    %c2_302 = arith.constant 2 : index
    %c0_303 = arith.constant 0 : index
    %253 = vector.load %arg14[%c0_300, %c2_301, %c2_302, %c0_303] : memref<2x8x8x128xf32, #tpu.memory_space<vmem>>, vector<2x1x1x128xf32>
    %254 = vector.shape_cast %253 : vector<2x1x1x128xf32> to vector<2x128xf32>
    %c0_304 = arith.constant 0 : index
    %c2_305 = arith.constant 2 : index
    %c3_306 = arith.constant 3 : index
    %c0_307 = arith.constant 0 : index
    %255 = vector.load %arg14[%c0_304, %c2_305, %c3_306, %c0_307] : memref<2x8x8x128xf32, #tpu.memory_space<vmem>>, vector<2x1x1x128xf32>
    %256 = vector.shape_cast %255 : vector<2x1x1x128xf32> to vector<2x128xf32>
    %c0_308 = arith.constant 0 : index
    %c3_309 = arith.constant 3 : index
    %c2_310 = arith.constant 2 : index
    %c0_311 = arith.constant 0 : index
    %257 = vector.load %arg14[%c0_308, %c3_309, %c2_310, %c0_311] : memref<2x8x8x128xf32, #tpu.memory_space<vmem>>, vector<2x1x1x128xf32>
    %258 = vector.shape_cast %257 : vector<2x1x1x128xf32> to vector<2x128xf32>
    %c0_312 = arith.constant 0 : index
    %c3_313 = arith.constant 3 : index
    %c3_314 = arith.constant 3 : index
    %c0_315 = arith.constant 0 : index
    %259 = vector.load %arg14[%c0_312, %c3_313, %c3_314, %c0_315] : memref<2x8x8x128xf32, #tpu.memory_space<vmem>>, vector<2x1x1x128xf32>
    %260 = vector.shape_cast %259 : vector<2x1x1x128xf32> to vector<2x128xf32>
    %261 = arith.maximumf %254, %256 : vector<2x128xf32>
    %262 = arith.maximumf %258, %260 : vector<2x128xf32>
    %263 = arith.maximumf %261, %262 : vector<2x128xf32>
    %c5_316 = arith.constant 5 : index
    %c0_317 = arith.constant 0 : index
    %c0_318 = arith.constant 0 : index
    %264 = vector.load %arg6[%c5_316, %c0_317, %c0_318] : memref<16x128x512xf32, #tpu.memory_space<vmem>>, vector<1x128x512xf32>
    %265 = vector.shape_cast %264 : vector<1x128x512xf32> to vector<128x512xf32>
    %cst_319 = arith.constant dense<0.000000e+00> : vector<2x512xf32>
    %266 = tpu.matmul %263, %265, %cst_319 {dimension_numbers = #tpu.dot_dimension_numbers<[1], [0], [0], [1], [0, 0, 1, 1], [], []>} : vector<2x128xf32>, vector<128x512xf32>, vector<2x512xf32> -> vector<2x512xf32>
    %267 = arith.addf %252, %266 : vector<2x512xf32>
    %c0_320 = arith.constant 0 : index
    %c2_321 = arith.constant 2 : index
    %c4_322 = arith.constant 4 : index
    %c0_323 = arith.constant 0 : index
    %268 = vector.load %arg14[%c0_320, %c2_321, %c4_322, %c0_323] : memref<2x8x8x128xf32, #tpu.memory_space<vmem>>, vector<2x1x1x128xf32>
    %269 = vector.shape_cast %268 : vector<2x1x1x128xf32> to vector<2x128xf32>
    %c0_324 = arith.constant 0 : index
    %c2_325 = arith.constant 2 : index
    %c5_326 = arith.constant 5 : index
    %c0_327 = arith.constant 0 : index
    %270 = vector.load %arg14[%c0_324, %c2_325, %c5_326, %c0_327] : memref<2x8x8x128xf32, #tpu.memory_space<vmem>>, vector<2x1x1x128xf32>
    %271 = vector.shape_cast %270 : vector<2x1x1x128xf32> to vector<2x128xf32>
    %c0_328 = arith.constant 0 : index
    %c3_329 = arith.constant 3 : index
    %c4_330 = arith.constant 4 : index
    %c0_331 = arith.constant 0 : index
    %272 = vector.load %arg14[%c0_328, %c3_329, %c4_330, %c0_331] : memref<2x8x8x128xf32, #tpu.memory_space<vmem>>, vector<2x1x1x128xf32>
    %273 = vector.shape_cast %272 : vector<2x1x1x128xf32> to vector<2x128xf32>
    %c0_332 = arith.constant 0 : index
    %c3_333 = arith.constant 3 : index
    %c5_334 = arith.constant 5 : index
    %c0_335 = arith.constant 0 : index
    %274 = vector.load %arg14[%c0_332, %c3_333, %c5_334, %c0_335] : memref<2x8x8x128xf32, #tpu.memory_space<vmem>>, vector<2x1x1x128xf32>
    %275 = vector.shape_cast %274 : vector<2x1x1x128xf32> to vector<2x128xf32>
    %276 = arith.maximumf %269, %271 : vector<2x128xf32>
    %277 = arith.maximumf %273, %275 : vector<2x128xf32>
    %278 = arith.maximumf %276, %277 : vector<2x128xf32>
    %c6_336 = arith.constant 6 : index
    %c0_337 = arith.constant 0 : index
    %c0_338 = arith.constant 0 : index
    %279 = vector.load %arg6[%c6_336, %c0_337, %c0_338] : memref<16x128x512xf32, #tpu.memory_space<vmem>>, vector<1x128x512xf32>
    %280 = vector.shape_cast %279 : vector<1x128x512xf32> to vector<128x512xf32>
    %cst_339 = arith.constant dense<0.000000e+00> : vector<2x512xf32>
    %281 = tpu.matmul %278, %280, %cst_339 {dimension_numbers = #tpu.dot_dimension_numbers<[1], [0], [0], [1], [0, 0, 1, 1], [], []>} : vector<2x128xf32>, vector<128x512xf32>, vector<2x512xf32> -> vector<2x512xf32>
    %282 = arith.addf %267, %281 : vector<2x512xf32>
    %c0_340 = arith.constant 0 : index
    %c2_341 = arith.constant 2 : index
    %c6_342 = arith.constant 6 : index
    %c0_343 = arith.constant 0 : index
    %283 = vector.load %arg14[%c0_340, %c2_341, %c6_342, %c0_343] : memref<2x8x8x128xf32, #tpu.memory_space<vmem>>, vector<2x1x1x128xf32>
    %284 = vector.shape_cast %283 : vector<2x1x1x128xf32> to vector<2x128xf32>
    %c0_344 = arith.constant 0 : index
    %c2_345 = arith.constant 2 : index
    %c7_346 = arith.constant 7 : index
    %c0_347 = arith.constant 0 : index
    %285 = vector.load %arg14[%c0_344, %c2_345, %c7_346, %c0_347] : memref<2x8x8x128xf32, #tpu.memory_space<vmem>>, vector<2x1x1x128xf32>
    %286 = vector.shape_cast %285 : vector<2x1x1x128xf32> to vector<2x128xf32>
    %c0_348 = arith.constant 0 : index
    %c3_349 = arith.constant 3 : index
    %c6_350 = arith.constant 6 : index
    %c0_351 = arith.constant 0 : index
    %287 = vector.load %arg14[%c0_348, %c3_349, %c6_350, %c0_351] : memref<2x8x8x128xf32, #tpu.memory_space<vmem>>, vector<2x1x1x128xf32>
    %288 = vector.shape_cast %287 : vector<2x1x1x128xf32> to vector<2x128xf32>
    %c0_352 = arith.constant 0 : index
    %c3_353 = arith.constant 3 : index
    %c7_354 = arith.constant 7 : index
    %c0_355 = arith.constant 0 : index
    %289 = vector.load %arg14[%c0_352, %c3_353, %c7_354, %c0_355] : memref<2x8x8x128xf32, #tpu.memory_space<vmem>>, vector<2x1x1x128xf32>
    %290 = vector.shape_cast %289 : vector<2x1x1x128xf32> to vector<2x128xf32>
    %291 = arith.maximumf %284, %286 : vector<2x128xf32>
    %292 = arith.maximumf %288, %290 : vector<2x128xf32>
    %293 = arith.maximumf %291, %292 : vector<2x128xf32>
    %c7_356 = arith.constant 7 : index
    %c0_357 = arith.constant 0 : index
    %c0_358 = arith.constant 0 : index
    %294 = vector.load %arg6[%c7_356, %c0_357, %c0_358] : memref<16x128x512xf32, #tpu.memory_space<vmem>>, vector<1x128x512xf32>
    %295 = vector.shape_cast %294 : vector<1x128x512xf32> to vector<128x512xf32>
    %cst_359 = arith.constant dense<0.000000e+00> : vector<2x512xf32>
    %296 = tpu.matmul %293, %295, %cst_359 {dimension_numbers = #tpu.dot_dimension_numbers<[1], [0], [0], [1], [0, 0, 1, 1], [], []>} : vector<2x128xf32>, vector<128x512xf32>, vector<2x512xf32> -> vector<2x512xf32>
    %297 = arith.addf %282, %296 : vector<2x512xf32>
    %c0_360 = arith.constant 0 : index
    %c4_361 = arith.constant 4 : index
    %c0_362 = arith.constant 0 : index
    %c0_363 = arith.constant 0 : index
    %298 = vector.load %arg14[%c0_360, %c4_361, %c0_362, %c0_363] : memref<2x8x8x128xf32, #tpu.memory_space<vmem>>, vector<2x1x1x128xf32>
    %299 = vector.shape_cast %298 : vector<2x1x1x128xf32> to vector<2x128xf32>
    %c0_364 = arith.constant 0 : index
    %c4_365 = arith.constant 4 : index
    %c1_366 = arith.constant 1 : index
    %c0_367 = arith.constant 0 : index
    %300 = vector.load %arg14[%c0_364, %c4_365, %c1_366, %c0_367] : memref<2x8x8x128xf32, #tpu.memory_space<vmem>>, vector<2x1x1x128xf32>
    %301 = vector.shape_cast %300 : vector<2x1x1x128xf32> to vector<2x128xf32>
    %c0_368 = arith.constant 0 : index
    %c5_369 = arith.constant 5 : index
    %c0_370 = arith.constant 0 : index
    %c0_371 = arith.constant 0 : index
    %302 = vector.load %arg14[%c0_368, %c5_369, %c0_370, %c0_371] : memref<2x8x8x128xf32, #tpu.memory_space<vmem>>, vector<2x1x1x128xf32>
    %303 = vector.shape_cast %302 : vector<2x1x1x128xf32> to vector<2x128xf32>
    %c0_372 = arith.constant 0 : index
    %c5_373 = arith.constant 5 : index
    %c1_374 = arith.constant 1 : index
    %c0_375 = arith.constant 0 : index
    %304 = vector.load %arg14[%c0_372, %c5_373, %c1_374, %c0_375] : memref<2x8x8x128xf32, #tpu.memory_space<vmem>>, vector<2x1x1x128xf32>
    %305 = vector.shape_cast %304 : vector<2x1x1x128xf32> to vector<2x128xf32>
    %306 = arith.maximumf %299, %301 : vector<2x128xf32>
    %307 = arith.maximumf %303, %305 : vector<2x128xf32>
    %308 = arith.maximumf %306, %307 : vector<2x128xf32>
    %c8_376 = arith.constant 8 : index
    %c0_377 = arith.constant 0 : index
    %c0_378 = arith.constant 0 : index
    %309 = vector.load %arg6[%c8_376, %c0_377, %c0_378] : memref<16x128x512xf32, #tpu.memory_space<vmem>>, vector<1x128x512xf32>
    %310 = vector.shape_cast %309 : vector<1x128x512xf32> to vector<128x512xf32>
    %cst_379 = arith.constant dense<0.000000e+00> : vector<2x512xf32>
    %311 = tpu.matmul %308, %310, %cst_379 {dimension_numbers = #tpu.dot_dimension_numbers<[1], [0], [0], [1], [0, 0, 1, 1], [], []>} : vector<2x128xf32>, vector<128x512xf32>, vector<2x512xf32> -> vector<2x512xf32>
    %312 = arith.addf %297, %311 : vector<2x512xf32>
    %c0_380 = arith.constant 0 : index
    %c4_381 = arith.constant 4 : index
    %c2_382 = arith.constant 2 : index
    %c0_383 = arith.constant 0 : index
    %313 = vector.load %arg14[%c0_380, %c4_381, %c2_382, %c0_383] : memref<2x8x8x128xf32, #tpu.memory_space<vmem>>, vector<2x1x1x128xf32>
    %314 = vector.shape_cast %313 : vector<2x1x1x128xf32> to vector<2x128xf32>
    %c0_384 = arith.constant 0 : index
    %c4_385 = arith.constant 4 : index
    %c3_386 = arith.constant 3 : index
    %c0_387 = arith.constant 0 : index
    %315 = vector.load %arg14[%c0_384, %c4_385, %c3_386, %c0_387] : memref<2x8x8x128xf32, #tpu.memory_space<vmem>>, vector<2x1x1x128xf32>
    %316 = vector.shape_cast %315 : vector<2x1x1x128xf32> to vector<2x128xf32>
    %c0_388 = arith.constant 0 : index
    %c5_389 = arith.constant 5 : index
    %c2_390 = arith.constant 2 : index
    %c0_391 = arith.constant 0 : index
    %317 = vector.load %arg14[%c0_388, %c5_389, %c2_390, %c0_391] : memref<2x8x8x128xf32, #tpu.memory_space<vmem>>, vector<2x1x1x128xf32>
    %318 = vector.shape_cast %317 : vector<2x1x1x128xf32> to vector<2x128xf32>
    %c0_392 = arith.constant 0 : index
    %c5_393 = arith.constant 5 : index
    %c3_394 = arith.constant 3 : index
    %c0_395 = arith.constant 0 : index
    %319 = vector.load %arg14[%c0_392, %c5_393, %c3_394, %c0_395] : memref<2x8x8x128xf32, #tpu.memory_space<vmem>>, vector<2x1x1x128xf32>
    %320 = vector.shape_cast %319 : vector<2x1x1x128xf32> to vector<2x128xf32>
    %321 = arith.maximumf %314, %316 : vector<2x128xf32>
    %322 = arith.maximumf %318, %320 : vector<2x128xf32>
    %323 = arith.maximumf %321, %322 : vector<2x128xf32>
    %c9_396 = arith.constant 9 : index
    %c0_397 = arith.constant 0 : index
    %c0_398 = arith.constant 0 : index
    %324 = vector.load %arg6[%c9_396, %c0_397, %c0_398] : memref<16x128x512xf32, #tpu.memory_space<vmem>>, vector<1x128x512xf32>
    %325 = vector.shape_cast %324 : vector<1x128x512xf32> to vector<128x512xf32>
    %cst_399 = arith.constant dense<0.000000e+00> : vector<2x512xf32>
    %326 = tpu.matmul %323, %325, %cst_399 {dimension_numbers = #tpu.dot_dimension_numbers<[1], [0], [0], [1], [0, 0, 1, 1], [], []>} : vector<2x128xf32>, vector<128x512xf32>, vector<2x512xf32> -> vector<2x512xf32>
    %327 = arith.addf %312, %326 : vector<2x512xf32>
    %c0_400 = arith.constant 0 : index
    %c4_401 = arith.constant 4 : index
    %c4_402 = arith.constant 4 : index
    %c0_403 = arith.constant 0 : index
    %328 = vector.load %arg14[%c0_400, %c4_401, %c4_402, %c0_403] : memref<2x8x8x128xf32, #tpu.memory_space<vmem>>, vector<2x1x1x128xf32>
    %329 = vector.shape_cast %328 : vector<2x1x1x128xf32> to vector<2x128xf32>
    %c0_404 = arith.constant 0 : index
    %c4_405 = arith.constant 4 : index
    %c5_406 = arith.constant 5 : index
    %c0_407 = arith.constant 0 : index
    %330 = vector.load %arg14[%c0_404, %c4_405, %c5_406, %c0_407] : memref<2x8x8x128xf32, #tpu.memory_space<vmem>>, vector<2x1x1x128xf32>
    %331 = vector.shape_cast %330 : vector<2x1x1x128xf32> to vector<2x128xf32>
    %c0_408 = arith.constant 0 : index
    %c5_409 = arith.constant 5 : index
    %c4_410 = arith.constant 4 : index
    %c0_411 = arith.constant 0 : index
    %332 = vector.load %arg14[%c0_408, %c5_409, %c4_410, %c0_411] : memref<2x8x8x128xf32, #tpu.memory_space<vmem>>, vector<2x1x1x128xf32>
    %333 = vector.shape_cast %332 : vector<2x1x1x128xf32> to vector<2x128xf32>
    %c0_412 = arith.constant 0 : index
    %c5_413 = arith.constant 5 : index
    %c5_414 = arith.constant 5 : index
    %c0_415 = arith.constant 0 : index
    %334 = vector.load %arg14[%c0_412, %c5_413, %c5_414, %c0_415] : memref<2x8x8x128xf32, #tpu.memory_space<vmem>>, vector<2x1x1x128xf32>
    %335 = vector.shape_cast %334 : vector<2x1x1x128xf32> to vector<2x128xf32>
    %336 = arith.maximumf %329, %331 : vector<2x128xf32>
    %337 = arith.maximumf %333, %335 : vector<2x128xf32>
    %338 = arith.maximumf %336, %337 : vector<2x128xf32>
    %c10_416 = arith.constant 10 : index
    %c0_417 = arith.constant 0 : index
    %c0_418 = arith.constant 0 : index
    %339 = vector.load %arg6[%c10_416, %c0_417, %c0_418] : memref<16x128x512xf32, #tpu.memory_space<vmem>>, vector<1x128x512xf32>
    %340 = vector.shape_cast %339 : vector<1x128x512xf32> to vector<128x512xf32>
    %cst_419 = arith.constant dense<0.000000e+00> : vector<2x512xf32>
    %341 = tpu.matmul %338, %340, %cst_419 {dimension_numbers = #tpu.dot_dimension_numbers<[1], [0], [0], [1], [0, 0, 1, 1], [], []>} : vector<2x128xf32>, vector<128x512xf32>, vector<2x512xf32> -> vector<2x512xf32>
    %342 = arith.addf %327, %341 : vector<2x512xf32>
    %c0_420 = arith.constant 0 : index
    %c4_421 = arith.constant 4 : index
    %c6_422 = arith.constant 6 : index
    %c0_423 = arith.constant 0 : index
    %343 = vector.load %arg14[%c0_420, %c4_421, %c6_422, %c0_423] : memref<2x8x8x128xf32, #tpu.memory_space<vmem>>, vector<2x1x1x128xf32>
    %344 = vector.shape_cast %343 : vector<2x1x1x128xf32> to vector<2x128xf32>
    %c0_424 = arith.constant 0 : index
    %c4_425 = arith.constant 4 : index
    %c7_426 = arith.constant 7 : index
    %c0_427 = arith.constant 0 : index
    %345 = vector.load %arg14[%c0_424, %c4_425, %c7_426, %c0_427] : memref<2x8x8x128xf32, #tpu.memory_space<vmem>>, vector<2x1x1x128xf32>
    %346 = vector.shape_cast %345 : vector<2x1x1x128xf32> to vector<2x128xf32>
    %c0_428 = arith.constant 0 : index
    %c5_429 = arith.constant 5 : index
    %c6_430 = arith.constant 6 : index
    %c0_431 = arith.constant 0 : index
    %347 = vector.load %arg14[%c0_428, %c5_429, %c6_430, %c0_431] : memref<2x8x8x128xf32, #tpu.memory_space<vmem>>, vector<2x1x1x128xf32>
    %348 = vector.shape_cast %347 : vector<2x1x1x128xf32> to vector<2x128xf32>
    %c0_432 = arith.constant 0 : index
    %c5_433 = arith.constant 5 : index
    %c7_434 = arith.constant 7 : index
    %c0_435 = arith.constant 0 : index
    %349 = vector.load %arg14[%c0_432, %c5_433, %c7_434, %c0_435] : memref<2x8x8x128xf32, #tpu.memory_space<vmem>>, vector<2x1x1x128xf32>
    %350 = vector.shape_cast %349 : vector<2x1x1x128xf32> to vector<2x128xf32>
    %351 = arith.maximumf %344, %346 : vector<2x128xf32>
    %352 = arith.maximumf %348, %350 : vector<2x128xf32>
    %353 = arith.maximumf %351, %352 : vector<2x128xf32>
    %c11_436 = arith.constant 11 : index
    %c0_437 = arith.constant 0 : index
    %c0_438 = arith.constant 0 : index
    %354 = vector.load %arg6[%c11_436, %c0_437, %c0_438] : memref<16x128x512xf32, #tpu.memory_space<vmem>>, vector<1x128x512xf32>
    %355 = vector.shape_cast %354 : vector<1x128x512xf32> to vector<128x512xf32>
    %cst_439 = arith.constant dense<0.000000e+00> : vector<2x512xf32>
    %356 = tpu.matmul %353, %355, %cst_439 {dimension_numbers = #tpu.dot_dimension_numbers<[1], [0], [0], [1], [0, 0, 1, 1], [], []>} : vector<2x128xf32>, vector<128x512xf32>, vector<2x512xf32> -> vector<2x512xf32>
    %357 = arith.addf %342, %356 : vector<2x512xf32>
    %c0_440 = arith.constant 0 : index
    %c6_441 = arith.constant 6 : index
    %c0_442 = arith.constant 0 : index
    %c0_443 = arith.constant 0 : index
    %358 = vector.load %arg14[%c0_440, %c6_441, %c0_442, %c0_443] : memref<2x8x8x128xf32, #tpu.memory_space<vmem>>, vector<2x1x1x128xf32>
    %359 = vector.shape_cast %358 : vector<2x1x1x128xf32> to vector<2x128xf32>
    %c0_444 = arith.constant 0 : index
    %c6_445 = arith.constant 6 : index
    %c1_446 = arith.constant 1 : index
    %c0_447 = arith.constant 0 : index
    %360 = vector.load %arg14[%c0_444, %c6_445, %c1_446, %c0_447] : memref<2x8x8x128xf32, #tpu.memory_space<vmem>>, vector<2x1x1x128xf32>
    %361 = vector.shape_cast %360 : vector<2x1x1x128xf32> to vector<2x128xf32>
    %c0_448 = arith.constant 0 : index
    %c7_449 = arith.constant 7 : index
    %c0_450 = arith.constant 0 : index
    %c0_451 = arith.constant 0 : index
    %362 = vector.load %arg14[%c0_448, %c7_449, %c0_450, %c0_451] : memref<2x8x8x128xf32, #tpu.memory_space<vmem>>, vector<2x1x1x128xf32>
    %363 = vector.shape_cast %362 : vector<2x1x1x128xf32> to vector<2x128xf32>
    %c0_452 = arith.constant 0 : index
    %c7_453 = arith.constant 7 : index
    %c1_454 = arith.constant 1 : index
    %c0_455 = arith.constant 0 : index
    %364 = vector.load %arg14[%c0_452, %c7_453, %c1_454, %c0_455] : memref<2x8x8x128xf32, #tpu.memory_space<vmem>>, vector<2x1x1x128xf32>
    %365 = vector.shape_cast %364 : vector<2x1x1x128xf32> to vector<2x128xf32>
    %366 = arith.maximumf %359, %361 : vector<2x128xf32>
    %367 = arith.maximumf %363, %365 : vector<2x128xf32>
    %368 = arith.maximumf %366, %367 : vector<2x128xf32>
    %c12_456 = arith.constant 12 : index
    %c0_457 = arith.constant 0 : index
    %c0_458 = arith.constant 0 : index
    %369 = vector.load %arg6[%c12_456, %c0_457, %c0_458] : memref<16x128x512xf32, #tpu.memory_space<vmem>>, vector<1x128x512xf32>
    %370 = vector.shape_cast %369 : vector<1x128x512xf32> to vector<128x512xf32>
    %cst_459 = arith.constant dense<0.000000e+00> : vector<2x512xf32>
    %371 = tpu.matmul %368, %370, %cst_459 {dimension_numbers = #tpu.dot_dimension_numbers<[1], [0], [0], [1], [0, 0, 1, 1], [], []>} : vector<2x128xf32>, vector<128x512xf32>, vector<2x512xf32> -> vector<2x512xf32>
    %372 = arith.addf %357, %371 : vector<2x512xf32>
    %c0_460 = arith.constant 0 : index
    %c6_461 = arith.constant 6 : index
    %c2_462 = arith.constant 2 : index
    %c0_463 = arith.constant 0 : index
    %373 = vector.load %arg14[%c0_460, %c6_461, %c2_462, %c0_463] : memref<2x8x8x128xf32, #tpu.memory_space<vmem>>, vector<2x1x1x128xf32>
    %374 = vector.shape_cast %373 : vector<2x1x1x128xf32> to vector<2x128xf32>
    %c0_464 = arith.constant 0 : index
    %c6_465 = arith.constant 6 : index
    %c3_466 = arith.constant 3 : index
    %c0_467 = arith.constant 0 : index
    %375 = vector.load %arg14[%c0_464, %c6_465, %c3_466, %c0_467] : memref<2x8x8x128xf32, #tpu.memory_space<vmem>>, vector<2x1x1x128xf32>
    %376 = vector.shape_cast %375 : vector<2x1x1x128xf32> to vector<2x128xf32>
    %c0_468 = arith.constant 0 : index
    %c7_469 = arith.constant 7 : index
    %c2_470 = arith.constant 2 : index
    %c0_471 = arith.constant 0 : index
    %377 = vector.load %arg14[%c0_468, %c7_469, %c2_470, %c0_471] : memref<2x8x8x128xf32, #tpu.memory_space<vmem>>, vector<2x1x1x128xf32>
    %378 = vector.shape_cast %377 : vector<2x1x1x128xf32> to vector<2x128xf32>
    %c0_472 = arith.constant 0 : index
    %c7_473 = arith.constant 7 : index
    %c3_474 = arith.constant 3 : index
    %c0_475 = arith.constant 0 : index
    %379 = vector.load %arg14[%c0_472, %c7_473, %c3_474, %c0_475] : memref<2x8x8x128xf32, #tpu.memory_space<vmem>>, vector<2x1x1x128xf32>
    %380 = vector.shape_cast %379 : vector<2x1x1x128xf32> to vector<2x128xf32>
    %381 = arith.maximumf %374, %376 : vector<2x128xf32>
    %382 = arith.maximumf %378, %380 : vector<2x128xf32>
    %383 = arith.maximumf %381, %382 : vector<2x128xf32>
    %c13_476 = arith.constant 13 : index
    %c0_477 = arith.constant 0 : index
    %c0_478 = arith.constant 0 : index
    %384 = vector.load %arg6[%c13_476, %c0_477, %c0_478] : memref<16x128x512xf32, #tpu.memory_space<vmem>>, vector<1x128x512xf32>
    %385 = vector.shape_cast %384 : vector<1x128x512xf32> to vector<128x512xf32>
    %cst_479 = arith.constant dense<0.000000e+00> : vector<2x512xf32>
    %386 = tpu.matmul %383, %385, %cst_479 {dimension_numbers = #tpu.dot_dimension_numbers<[1], [0], [0], [1], [0, 0, 1, 1], [], []>} : vector<2x128xf32>, vector<128x512xf32>, vector<2x512xf32> -> vector<2x512xf32>
    %387 = arith.addf %372, %386 : vector<2x512xf32>
    %c0_480 = arith.constant 0 : index
    %c6_481 = arith.constant 6 : index
    %c4_482 = arith.constant 4 : index
    %c0_483 = arith.constant 0 : index
    %388 = vector.load %arg14[%c0_480, %c6_481, %c4_482, %c0_483] : memref<2x8x8x128xf32, #tpu.memory_space<vmem>>, vector<2x1x1x128xf32>
    %389 = vector.shape_cast %388 : vector<2x1x1x128xf32> to vector<2x128xf32>
    %c0_484 = arith.constant 0 : index
    %c6_485 = arith.constant 6 : index
    %c5_486 = arith.constant 5 : index
    %c0_487 = arith.constant 0 : index
    %390 = vector.load %arg14[%c0_484, %c6_485, %c5_486, %c0_487] : memref<2x8x8x128xf32, #tpu.memory_space<vmem>>, vector<2x1x1x128xf32>
    %391 = vector.shape_cast %390 : vector<2x1x1x128xf32> to vector<2x128xf32>
    %c0_488 = arith.constant 0 : index
    %c7_489 = arith.constant 7 : index
    %c4_490 = arith.constant 4 : index
    %c0_491 = arith.constant 0 : index
    %392 = vector.load %arg14[%c0_488, %c7_489, %c4_490, %c0_491] : memref<2x8x8x128xf32, #tpu.memory_space<vmem>>, vector<2x1x1x128xf32>
    %393 = vector.shape_cast %392 : vector<2x1x1x128xf32> to vector<2x128xf32>
    %c0_492 = arith.constant 0 : index
    %c7_493 = arith.constant 7 : index
    %c5_494 = arith.constant 5 : index
    %c0_495 = arith.constant 0 : index
    %394 = vector.load %arg14[%c0_492, %c7_493, %c5_494, %c0_495] : memref<2x8x8x128xf32, #tpu.memory_space<vmem>>, vector<2x1x1x128xf32>
    %395 = vector.shape_cast %394 : vector<2x1x1x128xf32> to vector<2x128xf32>
    %396 = arith.maximumf %389, %391 : vector<2x128xf32>
    %397 = arith.maximumf %393, %395 : vector<2x128xf32>
    %398 = arith.maximumf %396, %397 : vector<2x128xf32>
    %c14_496 = arith.constant 14 : index
    %c0_497 = arith.constant 0 : index
    %c0_498 = arith.constant 0 : index
    %399 = vector.load %arg6[%c14_496, %c0_497, %c0_498] : memref<16x128x512xf32, #tpu.memory_space<vmem>>, vector<1x128x512xf32>
    %400 = vector.shape_cast %399 : vector<1x128x512xf32> to vector<128x512xf32>
    %cst_499 = arith.constant dense<0.000000e+00> : vector<2x512xf32>
    %401 = tpu.matmul %398, %400, %cst_499 {dimension_numbers = #tpu.dot_dimension_numbers<[1], [0], [0], [1], [0, 0, 1, 1], [], []>} : vector<2x128xf32>, vector<128x512xf32>, vector<2x512xf32> -> vector<2x512xf32>
    %402 = arith.addf %387, %401 : vector<2x512xf32>
    %c0_500 = arith.constant 0 : index
    %c6_501 = arith.constant 6 : index
    %c6_502 = arith.constant 6 : index
    %c0_503 = arith.constant 0 : index
    %403 = vector.load %arg14[%c0_500, %c6_501, %c6_502, %c0_503] : memref<2x8x8x128xf32, #tpu.memory_space<vmem>>, vector<2x1x1x128xf32>
    %404 = vector.shape_cast %403 : vector<2x1x1x128xf32> to vector<2x128xf32>
    %c0_504 = arith.constant 0 : index
    %c6_505 = arith.constant 6 : index
    %c7_506 = arith.constant 7 : index
    %c0_507 = arith.constant 0 : index
    %405 = vector.load %arg14[%c0_504, %c6_505, %c7_506, %c0_507] : memref<2x8x8x128xf32, #tpu.memory_space<vmem>>, vector<2x1x1x128xf32>
    %406 = vector.shape_cast %405 : vector<2x1x1x128xf32> to vector<2x128xf32>
    %c0_508 = arith.constant 0 : index
    %c7_509 = arith.constant 7 : index
    %c6_510 = arith.constant 6 : index
    %c0_511 = arith.constant 0 : index
    %407 = vector.load %arg14[%c0_508, %c7_509, %c6_510, %c0_511] : memref<2x8x8x128xf32, #tpu.memory_space<vmem>>, vector<2x1x1x128xf32>
    %408 = vector.shape_cast %407 : vector<2x1x1x128xf32> to vector<2x128xf32>
    %c0_512 = arith.constant 0 : index
    %c7_513 = arith.constant 7 : index
    %c7_514 = arith.constant 7 : index
    %c0_515 = arith.constant 0 : index
    %409 = vector.load %arg14[%c0_512, %c7_513, %c7_514, %c0_515] : memref<2x8x8x128xf32, #tpu.memory_space<vmem>>, vector<2x1x1x128xf32>
    %410 = vector.shape_cast %409 : vector<2x1x1x128xf32> to vector<2x128xf32>
    %411 = arith.maximumf %404, %406 : vector<2x128xf32>
    %412 = arith.maximumf %408, %410 : vector<2x128xf32>
    %413 = arith.maximumf %411, %412 : vector<2x128xf32>
    %c15_516 = arith.constant 15 : index
    %c0_517 = arith.constant 0 : index
    %c0_518 = arith.constant 0 : index
    %414 = vector.load %arg6[%c15_516, %c0_517, %c0_518] : memref<16x128x512xf32, #tpu.memory_space<vmem>>, vector<1x128x512xf32>
    %415 = vector.shape_cast %414 : vector<1x128x512xf32> to vector<128x512xf32>
    %cst_519 = arith.constant dense<0.000000e+00> : vector<2x512xf32>
    %416 = tpu.matmul %413, %415, %cst_519 {dimension_numbers = #tpu.dot_dimension_numbers<[1], [0], [0], [1], [0, 0, 1, 1], [], []>} : vector<2x128xf32>, vector<128x512xf32>, vector<2x512xf32> -> vector<2x512xf32>
    %417 = arith.addf %402, %416 : vector<2x512xf32>
    %c0_520 = arith.constant 0 : index
    %c0_521 = arith.constant 0 : index
    %418 = vector.load %arg7[%c0_520, %c0_521] : memref<1x512xf32, #tpu.memory_space<vmem>>, vector<1x512xf32>
    %419 = vector.broadcast %418 : vector<1x512xf32> to vector<2x512xf32>
    %420 = arith.addf %417, %419 : vector<2x512xf32>
    %cst_522 = arith.constant 0.000000e+00 : f32
    %421 = vector.broadcast %cst_522 : f32 to vector<2x512xf32>
    %422 = arith.maximumf %420, %421 : vector<2x512xf32>
    %c0_523 = arith.constant 0 : index
    %c0_524 = arith.constant 0 : index
    %423 = vector.load %arg8[%c0_523, %c0_524] : memref<512x256xf32, #tpu.memory_space<vmem>>, vector<512x256xf32>
    %cst_525 = arith.constant dense<0.000000e+00> : vector<2x256xf32>
    %424 = tpu.matmul %422, %423, %cst_525 {dimension_numbers = #tpu.dot_dimension_numbers<[1], [0], [0], [1], [0, 0, 1, 1], [], []>} : vector<2x512xf32>, vector<512x256xf32>, vector<2x256xf32> -> vector<2x256xf32>
    %c0_526 = arith.constant 0 : index
    %c0_527 = arith.constant 0 : index
    %425 = vector.load %arg9[%c0_526, %c0_527] : memref<1x256xf32, #tpu.memory_space<vmem>>, vector<1x256xf32>
    %426 = vector.broadcast %425 : vector<1x256xf32> to vector<2x256xf32>
    %427 = arith.addf %424, %426 : vector<2x256xf32>
    %cst_528 = arith.constant 0.000000e+00 : f32
    %428 = vector.broadcast %cst_528 : f32 to vector<2x256xf32>
    %429 = arith.maximumf %427, %428 : vector<2x256xf32>
    %c0_529 = arith.constant 0 : index
    %c0_530 = arith.constant 0 : index
    %430 = vector.load %arg10[%c0_529, %c0_530] : memref<256x128xf32, #tpu.memory_space<vmem>>, vector<256x128xf32>
    %cst_531 = arith.constant dense<0.000000e+00> : vector<2x128xf32>
    %431 = tpu.matmul %429, %430, %cst_531 {dimension_numbers = #tpu.dot_dimension_numbers<[1], [0], [0], [1], [0, 0, 1, 1], [], []>} : vector<2x256xf32>, vector<256x128xf32>, vector<2x128xf32> -> vector<2x128xf32>
    %c0_532 = arith.constant 0 : index
    %c0_533 = arith.constant 0 : index
    %432 = vector.load %arg11[%c0_532, %c0_533] : memref<1x128xf32, #tpu.memory_space<vmem>>, vector<1x128xf32>
    %433 = vector.broadcast %432 : vector<1x128xf32> to vector<2x128xf32>
    %434 = arith.addf %431, %433 : vector<2x128xf32>
    %c0_534 = arith.constant 0 : index
    %c0_535 = arith.constant 0 : index
    %435 = vector.load %arg12[%c0_534, %c0_535] : memref<2x128xf32, #tpu.memory_space<vmem>>, vector<2x128xf32>
    tpu.vector_store %arg12[%c0_534, %c0_535], %434 {strides = array<i32>} : memref<2x128xf32, #tpu.memory_space<vmem>>, vector<2x128xf32>,
    return
  }
  func.func @transform_0(%arg0: i32) -> (i32, i32) {
    %c0_i32 = arith.constant 0 : i32
    %c0_i32_0 = arith.constant 0 : i32
    %c0_i32_1 = arith.constant 0 : i32
    return %c0_i32, %c0_i32_0 : i32, i32
  }
  func.func @transform_1(%arg0: i32) -> (i32, i32) {
    %c0_i32 = arith.constant 0 : i32
    %c0_i32_0 = arith.constant 0 : i32
    %c0_i32_1 = arith.constant 0 : i32
    return %c0_i32, %c0_i32_0 : i32, i32
  }
  func.func @transform_2(%arg0: i32) -> (i32, i32) {
    %c0_i32 = arith.constant 0 : i32
    %c0_i32_0 = arith.constant 0 : i32
    %c0_i32_1 = arith.constant 0 : i32
    return %c0_i32, %c0_i32_0 : i32, i32
  }
  func.func @transform_3(%arg0: i32) -> (i32, i32, i32) {
    %c0_i32 = arith.constant 0 : i32
    %c0_i32_0 = arith.constant 0 : i32
    %c0_i32_1 = arith.constant 0 : i32
    %c0_i32_2 = arith.constant 0 : i32
    return %c0_i32, %c0_i32_0, %c0_i32_1 : i32, i32, i32
  }
  func.func @transform_4(%arg0: i32) -> (i32, i32) {
    %c0_i32 = arith.constant 0 : i32
    %c0_i32_0 = arith.constant 0 : i32
    %c0_i32_1 = arith.constant 0 : i32
    return %c0_i32, %c0_i32_0 : i32, i32
  }
  func.func @transform_5(%arg0: i32) -> (i32, i32, i32) {
    %c0_i32 = arith.constant 0 : i32
    %c0_i32_0 = arith.constant 0 : i32
    %c0_i32_1 = arith.constant 0 : i32
    %c0_i32_2 = arith.constant 0 : i32
    return %c0_i32, %c0_i32_0, %c0_i32_1 : i32, i32, i32
  }
  func.func @transform_6(%arg0: i32) -> (i32, i32) {
    %c0_i32 = arith.constant 0 : i32
    %c0_i32_0 = arith.constant 0 : i32
    %c0_i32_1 = arith.constant 0 : i32
    return %c0_i32, %c0_i32_0 : i32, i32
  }
  func.func @transform_7(%arg0: i32) -> (i32, i32) {
    %c0_i32 = arith.constant 0 : i32
    %c0_i32_0 = arith.constant 0 : i32
    %c0_i32_1 = arith.constant 0 : i32
    return %c0_i32, %c0_i32_0 : i32, i32
  }
  func.func @transform_8(%arg0: i32) -> (i32, i32) {
    %c0_i32 = arith.constant 0 : i32
    %c0_i32_0 = arith.constant 0 : i32
    %c0_i32_1 = arith.constant 0 : i32
    return %c0_i32, %c0_i32_0 : i32, i32
  }
  func.func @transform_9(%arg0: i32) -> (i32, i32) {
    %c0_i32 = arith.constant 0 : i32
    %c0_i32_0 = arith.constant 0 : i32
    %c0_i32_1 = arith.constant 0 : i32
    return %c0_i32, %c0_i32_0 : i32, i32
  }
  func.func @transform_10(%arg0: i32) -> (i32, i32) {
    %c0_i32 = arith.constant 0 : i32
    %c0_i32_0 = arith.constant 0 : i32
    %c0_i32_1 = arith.constant 0 : i32
    return %c0_i32, %c0_i32_0 : i32, i32
  }
  func.func @transform_11(%arg0: i32) -> (i32, i32) {
    %c0_i32 = arith.constant 0 : i32
    %c0_i32_0 = arith.constant 0 : i32
    %c0_i32_1 = arith.constant 0 : i32
    return %c0_i32, %c0_i32_0 : i32, i32
  }
}

</mosaic_0001>

<bundles_post_ra>
// kernel: net_forward.1
= control target key start
LH: loop header
LB: loop body
LE: loop exit
PB: predicated region body
PF: predicated region fallthrough
CT: control target
= control target key end

     0   :  { %s14835_s0 = inlined_call_operand.vmem [shape: f32[512,32], index: 0, kind: input, shape index: {}]   ;;  %s14836_s1 = inlined_call_operand.vmem [shape: f32[32,128], index: 1, kind: input, shape index: {}]   ;;  %s14837_s2 = inlined_call_operand.vmem [shape: f32[1,128], index: 2, kind: input, shape index: {}]   ;;  %s14838_s3 = inlined_call_operand.vmem [shape: f32[25,128,128], index: 3, kind: input, shape index: {}]   ;;  %s14839_s4 = inlined_call_operand.vmem [shape: f32[1,128], index: 4, kind: input, shape index: {}]   ;;  %s14840_s5 = inlined_call_operand.vmem [shape: f32[16,128,512], index: 5, kind: input, shape index: {}]   ;;  %s14841_s6 = inlined_call_operand.vmem [shape: f32[1,512], index: 6, kind: input, shape index: {}]   ;;  %s14842_s7 = inlined_call_operand.vmem [shape: f32[512,256], index: 7, kind: input, shape index: {}]   ;;  %s14843_s8 = inlined_call_operand.vmem [shape: f32[1,256], index: 8, kind: input, shape index: {}]   ;;  %s14844_s9 = inlined_call_operand.vmem [shape: f32[256,128], index: 9, kind: input, shape index: {}]   ;;  %s14845_s10 = inlined_call_operand.vmem [shape: f32[1,128], index: 10, kind: input, shape index: {}]   ;;  %s14846_s11 = inlined_call_operand.hbm [shape: f32[2,128], index: 11, kind: output, shape index: {}]  }
   0x1   :  { %v106_v0 = vld [vmem:[%s14836_s1 + $0x18] sm:$0xff]  ;;  %v105_v1 = vld [vmem:[%s14836_s1 + $0x10] sm:$0xff]  ;;  %v104_v2 = vld [vmem:[%s14836_s1 + $0x8] sm:$0xff] }
   0x2   :  { %316 = vmatpush.msra.mxu0 %v106_v0  ;;  %v103_v3 = vld [vmem:[%s14836_s1] sm:$0xff] }
   0x4   :  { %317 = vmatpush.msra.mxu0 %v105_v1 }
   0x5   :  { %16 = vsyncpa [#allocation5], 0  ;;  %v39_v4 = vld [vmem:[%s14835_s0] sm:$0xff]  ;;  %vm111_vm0 = vcmask 261120   ;;  %v40_v5 = vld [vmem:[%s14835_s0 + $0x8] sm:$0xff]  ;;  %vm3747_vm1 = vcmask 1041409  }
   0x6   :  { %318 = vmatpush.msra.mxu0 %v104_v2  ;;  %v41_v6 = vld [vmem:[%s14835_s0 + $0x10] sm:$0xff]  ;;  %v42_v7 = vld [vmem:[%s14835_s0 + $0x18] sm:$0xff]  ;;  %v43_v8 = vld [vmem:[%s14835_s0 + $0x20] sm:$0xff]  ;;  %s8123_s23 = smov [#allocation4]  }
   0x7   :  { %v44_v9 = vld [vmem:[%s14835_s0 + $0x28] sm:$0xff]  ;;  %v45_v10 = vld [vmem:[%s14835_s0 + $0x30] sm:$0xff]  ;;  %v46_v11 = vld [vmem:[%s14835_s0 + $0x38] sm:$0xff]  ;;  %s6669_s24 = sshll.u32 %s8123_s23, 4  ;;  %s6670_s24 = int_to_ptr.vmem [resolvable:$true] %s6669_s24 }
   0x8   :  { %319 = vmatpush.msra.mxu0 %v103_v3  ;;  %v47_v12 = vld [vmem:[%s14835_s0 + $0x40] sm:$0xff]  ;;  %v48_v13 = vld [vmem:[%s14835_s0 + $0x48] sm:$0xff]  ;;  %v49_v14 = vld [vmem:[%s14835_s0 + $0x50] sm:$0xff] }
   0x9   :  { %6680 = vmatmul.msk.f32.vlgmr.msra.gmra.mxu0 %vm111_vm0, %v39_v4  ;;  %v50_v15 = vld [vmem:[%s14835_s0 + $0x58] sm:$0xff]  ;;  %v51_v16 = vld [vmem:[%s14835_s0 + $0x60] sm:$0xff]  ;;  %v52_v17 = vld [vmem:[%s14835_s0 + $0x68] sm:$0xff] }
   0xa   :  { %v53_v18 = vld [vmem:[%s14835_s0 + $0x70] sm:$0xff]  ;;  %v54_v19 = vld [vmem:[%s14835_s0 + $0x78] sm:$0xff]  ;;  %v55_v21 = vld [vmem:[%s14835_s0 + $0x80] sm:$0xff] }
   0xb   :  { %v56_v23 = vld [vmem:[%s14835_s0 + $0x88] sm:$0xff]  ;;  %v57_v25 = vld [vmem:[%s14835_s0 + $0x90] sm:$0xff]  ;;  %v58_v27 = vld [vmem:[%s14835_s0 + $0x98] sm:$0xff] }
   0xc   :  { %v59_v29 = vld [vmem:[%s14835_s0 + $0xa0] sm:$0xff]  ;;  %v60_v31 = vld [vmem:[%s14835_s0 + $0xa8] sm:$0xff]  ;;  %v61_v33 = vld [vmem:[%s14835_s0 + $0xb0] sm:$0xff] }
   0xd   :  { %v62_v35 = vld [vmem:[%s14835_s0 + $0xb8] sm:$0xff]  ;;  %v63_v37 = vld [vmem:[%s14835_s0 + $0xc0] sm:$0xff]  ;;  %v64_v39 = vld [vmem:[%s14835_s0 + $0xc8] sm:$0xff] }
   0xe   :  { %v65_v41 = vld [vmem:[%s14835_s0 + $0xd0] sm:$0xff]  ;;  %v66_v43 = vld [vmem:[%s14835_s0 + $0xd8] sm:$0xff]  ;;  %v67_v45 = vld [vmem:[%s14835_s0 + $0xe0] sm:$0xff] }
   0xf   :  { %v68_v47 = vld [vmem:[%s14835_s0 + $0xe8] sm:$0xff]  ;;  %v69_v49 = vld [vmem:[%s14835_s0 + $0xf0] sm:$0xff]  ;;  %v70_v51 = vld [vmem:[%s14835_s0 + $0xf8] sm:$0xff] }
  0x10   :  { %v71_v53 = vld [vmem:[%s14835_s0 + $0x100] sm:$0xff]  ;;  %v72_v55 = vld [vmem:[%s14835_s0 + $0x108] sm:$0xff]  ;;  %v73_v57 = vld [vmem:[%s14835_s0 + $0x110] sm:$0xff] }
  0x11   :  { %6681 = vmatmul.msk.f32.gmra.mxu0 %vm111_vm0, %v40_v5  ;;  %v74_v59 = vld [vmem:[%s14835_s0 + $0x118] sm:$0xff]  ;;  %v75_v61 = vld [vmem:[%s14835_s0 + $0x120] sm:$0xff]  ;;  %v76_v63 = vld [vmem:[%s14835_s0 + $0x128] sm:$0xff] }
  0x12   :  { %v77_v1 = vld [vmem:[%s14835_s0 + $0x130] sm:$0xff]  ;;  %v78_v3 = vld [vmem:[%s14835_s0 + $0x138] sm:$0xff]  ;;  %v79_v5 = vld [vmem:[%s14835_s0 + $0x140] sm:$0xff] }
  0x19   :  { %6682 = vmatmul.msk.f32.gmra.mxu0 %vm111_vm0, %v41_v6 }
  0x21   :  { %6683 = vmatmul.msk.f32.gmra.mxu0 %vm111_vm0, %v42_v7  ;;  %v80_v7 = vld [vmem:[%s14835_s0 + $0x148] sm:$0xff] }
  0x29   :  { %6684 = vmatmul.msk.f32.gmra.mxu0 %vm111_vm0, %v43_v8 }
  0x31   :  { %6685 = vmatmul.msk.f32.gmra.mxu0 %vm111_vm0, %v44_v9  ;;  %v81_v9 = vld [vmem:[%s14835_s0 + $0x150] sm:$0xff] }
  0x39   :  { %6686 = vmatmul.msk.f32.gmra.mxu0 %vm111_vm0, %v45_v10 }
  0x41   :  { %6687 = vmatmul.msk.f32.gmra.mxu0 %vm111_vm0, %v46_v11  ;;  %v82_v11 = vld [vmem:[%s14835_s0 + $0x158] sm:$0xff] }
  0x49   :  { %6688 = vmatmul.msk.f32.gmra.mxu0 %vm111_vm0, %v47_v12 }
  0x51   :  { %6689 = vmatmul.msk.f32.gmra.mxu0 %vm111_vm0, %v48_v13  ;;  %v83_v13 = vld [vmem:[%s14835_s0 + $0x160] sm:$0xff] }
  0x59   :  { %6690 = vmatmul.msk.f32.gmra.mxu0 %vm111_vm0, %v49_v14 }
  0x61   :  { %6691 = vmatmul.msk.f32.gmra.mxu0 %vm111_vm0, %v50_v15  ;;  %v84_v15 = vld [vmem:[%s14835_s0 + $0x168] sm:$0xff] }
  0x69   :  { %6692 = vmatmul.msk.f32.gmra.mxu0 %vm111_vm0, %v51_v16 }
  0x71   :  { %6693 = vmatmul.msk.f32.gmra.mxu0 %vm111_vm0, %v52_v17  ;;  %v85_v17 = vld [vmem:[%s14835_s0 + $0x170] sm:$0xff] }
  0x79   :  { %6694 = vmatmul.msk.f32.gmra.mxu0 %vm111_vm0, %v53_v18 }
  0x81   :  { %6695 = vmatmul.msk.f32.gmra.mxu0 %vm111_vm0, %v54_v19  ;;  %v86_v19 = vld [vmem:[%s14835_s0 + $0x178] sm:$0xff] }
  0x86   :  { %v8260_v20 = vpop.f32.mrf.mxu0 }
  0x89   :  { %6696 = vmatmul.msk.f32.gmra.mxu0 %vm111_vm0, %v55_v21 }
  0x8e   :  { %v8266_v22 = vpop.f32.mrf.mxu0 }
  0x91   :  { %6697 = vmatmul.msk.f32.gmra.mxu0 %vm111_vm0, %v56_v23  ;;  %v87_v23 = vld [vmem:[%s14835_s0 + $0x180] sm:$0xff] }
  0x96   :  { %v8272_v24 = vpop.f32.mrf.mxu0 }
  0x99   :  { %6698 = vmatmul.msk.f32.gmra.mxu0 %vm111_vm0, %v57_v25 }
  0x9e   :  { %v8278_v26 = vpop.f32.mrf.mxu0 }
  0xa1   :  { %6699 = vmatmul.msk.f32.gmra.mxu0 %vm111_vm0, %v58_v27  ;;  %v88_v27 = vld [vmem:[%s14835_s0 + $0x188] sm:$0xff] }
  0xa6   :  { %v8284_v28 = vpop.f32.mrf.mxu0 }
  0xa9   :  { %6700 = vmatmul.msk.f32.gmra.mxu0 %vm111_vm0, %v59_v29 }
  0xae   :  { %v8290_v30 = vpop.f32.mrf.mxu0 }
  0xb1   :  { %6701 = vmatmul.msk.f32.gmra.mxu0 %vm111_vm0, %v60_v31  ;;  %v89_v31 = vld [vmem:[%s14835_s0 + $0x190] sm:$0xff] }
  0xb6   :  { %v8296_v32 = vpop.f32.mrf.mxu0 }
  0xb9   :  { %6702 = vmatmul.msk.f32.gmra.mxu0 %vm111_vm0, %v61_v33 }
  0xbe   :  { %v8302_v34 = vpop.f32.mrf.mxu0 }
  0xc1   :  { %6703 = vmatmul.msk.f32.gmra.mxu0 %vm111_vm0, %v62_v35  ;;  %v90_v35 = vld [vmem:[%s14835_s0 + $0x198] sm:$0xff] }
  0xc6   :  { %v8308_v36 = vpop.f32.mrf.mxu0 }
  0xc9   :  { %6704 = vmatmul.msk.f32.gmra.mxu0 %vm111_vm0, %v63_v37 }
  0xce   :  { %v8314_v38 = vpop.f32.mrf.mxu0 }
  0xd1   :  { %6705 = vmatmul.msk.f32.gmra.mxu0 %vm111_vm0, %v64_v39  ;;  %v91_v39 = vld [vmem:[%s14835_s0 + $0x1a0] sm:$0xff] }
  0xd6   :  { %v8320_v40 = vpop.f32.mrf.mxu0 }
  0xd9   :  { %6706 = vmatmul.msk.f32.gmra.mxu0 %vm111_vm0, %v65_v41 }
  0xde   :  { %v8326_v42 = vpop.f32.mrf.mxu0 }
  0xe1   :  { %6707 = vmatmul.msk.f32.gmra.mxu0 %vm111_vm0, %v66_v43  ;;  %v92_v43 = vld [vmem:[%s14835_s0 + $0x1a8] sm:$0xff] }
  0xe6   :  { %v8332_v44 = vpop.f32.mrf.mxu0 }
  0xe9   :  { %6708 = vmatmul.msk.f32.gmra.mxu0 %vm111_vm0, %v67_v45 }
  0xee   :  { %v8338_v46 = vpop.f32.mrf.mxu0 }
  0xf1   :  { %6709 = vmatmul.msk.f32.gmra.mxu0 %vm111_vm0, %v68_v47  ;;  %v93_v47 = vld [vmem:[%s14835_s0 + $0x1b0] sm:$0xff] }
  0xf6   :  { %v8344_v48 = vpop.f32.mrf.mxu0 }
  0xf9   :  { %6710 = vmatmul.msk.f32.gmra.mxu0 %vm111_vm0, %v69_v49 }
  0xfe   :  { %v8350_v50 = vpop.f32.mrf.mxu0 }
 0x101   :  { %6711 = vmatmul.msk.f32.gmra.mxu0 %vm111_vm0, %v70_v51  ;;  %v94_v51 = vld [vmem:[%s14835_s0 + $0x1b8] sm:$0xff] }
 0x106   :  { %v8356_v52 = vpop.f32.mrf.mxu0 }
 0x109   :  { %6712 = vmatmul.msk.f32.gmra.mxu0 %vm111_vm0, %v71_v53  ;;  %v6775_v53 = vld [vmem:[%s14838_s3 + $0x178] sm:$0xff] }
 0x10a   :  { %942 = vmatpush.msra.mxu3 %v6775_v53  ;;  %v6935_v53 = vld [vmem:[%s14838_s3 + $0x678] sm:$0xff] }
 0x10b   :  { %2083 = vmatpush.msrb.mxu0 %v6935_v53  ;;  %v6931_v53 = vld [vmem:[%s14838_s3 + $0x658] sm:$0xff] }
 0x10e   :  { %v8362_v54 = vpop.f32.mrf.mxu0 }
 0x111   :  { %6713 = vmatmul.msk.f32.gmra.mxu0 %vm111_vm0, %v72_v55  ;;  %v6774_v55 = vld [vmem:[%s14838_s3 + $0x170] sm:$0xff] }
 0x112   :  { %943 = vmatpush.msra.mxu3 %v6774_v55  ;;  %v6754_v55 = vld [vmem:[%s14838_s3 + $0xd0] sm:$0xff] }
 0x116   :  { %v8368_v56 = vpop.f32.mrf.mxu0 }
 0x119   :  { %6714 = vmatmul.msk.f32.gmra.mxu0 %vm111_vm0, %v73_v57  ;;  %v6773_v57 = vld [vmem:[%s14838_s3 + $0x168] sm:$0xff] }
 0x11a   :  { %944 = vmatpush.msra.mxu3 %v6773_v57  ;;  %v739_v57 = vld [vmem:[%s14838_s3 + $0x48] sm:$0xff] }
 0x11e   :  { %v8374_v58 = vpop.f32.mrf.mxu0 }
 0x121   :  { %6715 = vmatmul.msk.f32.gmra.mxu0 %vm111_vm0, %v74_v59  ;;  %v745_v59 = vld [vmem:[%s14838_s3 + $0x78] sm:$0xff] }
 0x122   :  { %844 = vmatpush.msra.mxu2 %v745_v59  ;;  %v6753_v59 = vld [vmem:[%s14838_s3 + $0xc8] sm:$0xff] }
 0x126   :  { %v8380_v60 = vpop.f32.mrf.mxu0 }
 0x129   :  { %6716 = vmatmul.msk.f32.gmra.mxu0 %vm111_vm0, %v75_v61  ;;  %v6772_v61 = vld [vmem:[%s14838_s3 + $0x160] sm:$0xff] }
 0x12a   :  { %945 = vmatpush.msra.mxu3 %v6772_v61  ;;  %v738_v61 = vld [vmem:[%s14838_s3 + $0x40] sm:$0xff] }
 0x12e   :  { %v8386_v62 = vpop.f32.mrf.mxu0 }
 0x131   :  { %6717 = vmatmul.msk.f32.gmra.mxu0 %vm111_vm0, %v76_v63 }
 0x136   :  { %v8392_v0 = vpop.f32.mrf.mxu0 }
 0x139   :  { %6718 = vmatmul.msk.f32.gmra.mxu0 %vm111_vm0, %v77_v1  ;;  %v95_v1 = vld [vmem:[%s14835_s0 + $0x1c0] sm:$0xff] }
 0x13e   :  { %v8398_v2 = vpop.f32.mrf.mxu0 }
 0x141   :  { %6719 = vmatmul.msk.f32.gmra.mxu0 %vm111_vm0, %v78_v3  ;;  %v6759_v3 = vld [vmem:[%s14838_s3 + $0xf8] sm:$0xff] }
 0x142   :  { %779 = vmatpush.msra.mxu1 %v6759_v3  ;;  %v6934_v3 = vld [vmem:[%s14838_s3 + $0x670] sm:$0xff] }
 0x143   :  { %2084 = vmatpush.msrb.mxu0 %v6934_v3  ;;  %v8122_v3 = vmov 0.0  }
 0x144   :  { %625 = vst [vmem:[#allocation2] sm:$0xff] %v8122_v3 }
 0x145   :  { %626 = vst [vmem:[#allocation2 + $0x8] sm:$0xff] %v8122_v3 }
 0x146   :  { %v8404_v4 = vpop.f32.mrf.mxu0  ;;  %627 = vst [vmem:[#allocation2 + $0x10] sm:$0xff] %v8122_v3 }
 0x147   :  { %628 = vst [vmem:[#allocation2 + $0x18] sm:$0xff] %v8122_v3 }
 0x148   :  { %629 = vst [vmem:[#allocation2 + $0x20] sm:$0xff] %v8122_v3 }
 0x149   :  { %6720 = vmatmul.msk.f32.gmra.mxu0 %vm111_vm0, %v79_v5  ;;  %v744_v5 = vld [vmem:[%s14838_s3 + $0x70] sm:$0xff]  ;;  %630 = vst [vmem:[#allocation2 + $0x28] sm:$0xff] %v8122_v3 }
 0x14a   :  { %845 = vmatpush.msra.mxu2 %v744_v5  ;;  %v6765_v5 = vld [vmem:[%s14838_s3 + $0x128] sm:$0xff]  ;;  %631 = vst [vmem:[#allocation2 + $0x30] sm:$0xff] %v8122_v3 }
 0x14b   :  { %633 = vst [vmem:[#allocation2 + $0x40] sm:$0xff] %v8122_v3 }
 0x14c   :  { %634 = vst [vmem:[#allocation2 + $0x48] sm:$0xff] %v8122_v3 }
 0x14d   :  { %636 = vst [vmem:[#allocation2 + $0x58] sm:$0xff] %v8122_v3 }
 0x14e   :  { %v8410_v6 = vpop.f32.mrf.mxu0  ;;  %637 = vst [vmem:[#allocation2 + $0x60] sm:$0xff] %v8122_v3 }
 0x14f   :  { %639 = vst [vmem:[#allocation2 + $0x70] sm:$0xff] %v8122_v3 }
 0x150   :  { %640 = vst [vmem:[#allocation2 + $0x78] sm:$0xff] %v8122_v3 }
 0x151   :  { %6721 = vmatmul.msk.f32.gmra.mxu0 %vm111_vm0, %v80_v7  ;;  %v6771_v7 = vld [vmem:[%s14838_s3 + $0x158] sm:$0xff]  ;;  %642 = vst [vmem:[#allocation2 + $0x88] sm:$0xff] %v8122_v3 }
 0x152   :  { %946 = vmatpush.msra.mxu3 %v6771_v7  ;;  %v6933_v7 = vld [vmem:[%s14838_s3 + $0x668] sm:$0xff]  ;;  %643 = vst [vmem:[#allocation2 + $0x90] sm:$0xff] %v8122_v3 }
 0x153   :  { %2085 = vmatpush.msrb.mxu0 %v6933_v7  ;;  %v98_v7 = vld [vmem:[%s14835_s0 + $0x1d8] sm:$0xff]  ;;  %645 = vst [vmem:[#allocation2 + $0xa0] sm:$0xff] %v8122_v3 }
 0x154   :  { %646 = vst [vmem:[#allocation2 + $0xa8] sm:$0xff] %v8122_v3 }
 0x155   :  { %648 = vst [vmem:[#allocation2 + $0xb8] sm:$0xff] %v8122_v3 }
 0x156   :  { %v8416_v8 = vpop.f32.mrf.mxu0  ;;  %649 = vst [vmem:[#allocation2 + $0xc0] sm:$0xff] %v8122_v3 }
 0x157   :  { %651 = vst [vmem:[#allocation2 + $0xd0] sm:$0xff] %v8122_v3 }
 0x158   :  { %652 = vst [vmem:[#allocation2 + $0xd8] sm:$0xff] %v8122_v3 }
 0x159   :  { %6722 = vmatmul.msk.f32.gmra.mxu0 %vm111_vm0, %v81_v9  ;;  %v6758_v9 = vld [vmem:[%s14838_s3 + $0xf0] sm:$0xff]  ;;  %654 = vst [vmem:[#allocation2 + $0xe8] sm:$0xff] %v8122_v3 }
 0x15a   :  { %780 = vmatpush.msra.mxu1 %v6758_v9  ;;  %v6752_v9 = vld [vmem:[%s14838_s3 + $0xc0] sm:$0xff]  ;;  %655 = vst [vmem:[#allocation2 + $0xf0] sm:$0xff] %v8122_v3 }
 0x15b   :  { %656 = vst [vmem:[#allocation2 + $0xf8] sm:$0xff] %v8122_v3 }
 0x15c   :  { %657 = vst [vmem:[#allocation2 + $0x100] sm:$0xff] %v8122_v3 }
 0x15d   :  { %658 = vst [vmem:[#allocation2 + $0x108] sm:$0xff] %v8122_v3 }
 0x15e   :  { %v8422_v10 = vpop.f32.mrf.mxu0  ;;  %659 = vst [vmem:[#allocation2 + $0x110] sm:$0xff] %v8122_v3 }
 0x15f   :  { %660 = vst [vmem:[#allocation2 + $0x118] sm:$0xff] %v8122_v3 }
 0x160   :  { %661 = vst [vmem:[#allocation2 + $0x120] sm:$0xff] %v8122_v3 }
 0x161   :  { %6723 = vmatmul.msk.f32.gmra.mxu0 %vm111_vm0, %v82_v11  ;;  %v743_v11 = vld [vmem:[%s14838_s3 + $0x68] sm:$0xff]  ;;  %662 = vst [vmem:[#allocation2 + $0x128] sm:$0xff] %v8122_v3 }
 0x162   :  { %846 = vmatpush.msra.mxu2 %v743_v11  ;;  %v737_v11 = vld [vmem:[%s14838_s3 + $0x38] sm:$0xff]  ;;  %663 = vst [vmem:[#allocation2 + $0x130] sm:$0xff] %v8122_v3 }
 0x163   :  { %664 = vst [vmem:[#allocation2 + $0x138] sm:$0xff] %v8122_v3 }
 0x164   :  { %665 = vst [vmem:[#allocation2 + $0x140] sm:$0xff] %v8122_v3 }
 0x165   :  { %666 = vst [vmem:[#allocation2 + $0x148] sm:$0xff] %v8122_v3 }
 0x166   :  { %v8428_v12 = vpop.f32.mrf.mxu0  ;;  %667 = vst [vmem:[#allocation2 + $0x150] sm:$0xff] %v8122_v3 }
 0x167   :  { %669 = vst [vmem:[#allocation2 + $0x160] sm:$0xff] %v8122_v3 }
 0x168   :  { %670 = vst [vmem:[#allocation2 + $0x168] sm:$0xff] %v8122_v3 }
 0x169   :  { %6724 = vmatmul.msk.f32.gmra.mxu0 %vm111_vm0, %v83_v13  ;;  %v6757_v13 = vld [vmem:[%s14838_s3 + $0xe8] sm:$0xff]  ;;  %672 = vst [vmem:[#allocation2 + $0x178] sm:$0xff] %v8122_v3 }
 0x16a   :  { %781 = vmatpush.msra.mxu1 %v6757_v13  ;;  %v6764_v13 = vld [vmem:[%s14838_s3 + $0x120] sm:$0xff]  ;;  %673 = vst [vmem:[#allocation2 + $0x180] sm:$0xff] %v8122_v3 }
 0x16b   :  { %675 = vst [vmem:[#allocation2 + $0x190] sm:$0xff] %v8122_v3 }
 0x16c   :  { %676 = vst [vmem:[#allocation2 + $0x198] sm:$0xff] %v8122_v3 }
 0x16d   :  { %678 = vst [vmem:[#allocation2 + $0x1a8] sm:$0xff] %v8122_v3 }
 0x16e   :  { %v8434_v14 = vpop.f32.mrf.mxu0  ;;  %679 = vst [vmem:[#allocation2 + $0x1b0] sm:$0xff] %v8122_v3 }
 0x16f   :  { %681 = vst [vmem:[#allocation2 + $0x1c0] sm:$0xff] %v8122_v3 }
 0x170   :  { %682 = vst [vmem:[#allocation2 + $0x1c8] sm:$0xff] %v8122_v3 }
 0x171   :  { %6725 = vmatmul.msk.f32.gmra.mxu0 %vm111_vm0, %v84_v15  ;;  %v742_v15 = vld [vmem:[%s14838_s3 + $0x60] sm:$0xff]  ;;  %684 = vst [vmem:[#allocation2 + $0x1d8] sm:$0xff] %v8122_v3 }
 0x172   :  { %847 = vmatpush.msra.mxu2 %v742_v15  ;;  %685 = vst [vmem:[#allocation2 + $0x1e0] sm:$0xff] %v8122_v3 }
 0x173   :  { %687 = vst [vmem:[#allocation2 + $0x1f0] sm:$0xff] %v8122_v3 }
 0x174   :  { %688 = vst [vmem:[#allocation2 + $0x1f8] sm:$0xff] %v8122_v3 }
 0x175   :  { %690 = vst [vmem:[#allocation2 + $0x208] sm:$0xff] %v8122_v3 }
 0x176   :  { %v8440_v16 = vpop.f32.mrf.mxu0  ;;  %691 = vst [vmem:[#allocation2 + $0x210] sm:$0xff] %v8122_v3 }
 0x177   :  { %692 = vst [vmem:[#allocation2 + $0x218] sm:$0xff] %v8122_v3 }
 0x178   :  { %693 = vst [vmem:[#allocation2 + $0x220] sm:$0xff] %v8122_v3 }
 0x179   :  { %6726 = vmatmul.msk.f32.gmra.mxu0 %vm111_vm0, %v85_v17  ;;  %v6770_v17 = vld [vmem:[%s14838_s3 + $0x150] sm:$0xff]  ;;  %694 = vst [vmem:[#allocation2 + $0x228] sm:$0xff] %v8122_v3 }
 0x17a   :  { %947 = vmatpush.msra.mxu3 %v6770_v17  ;;  %v97_v17 = vld [vmem:[%s14835_s0 + $0x1d0] sm:$0xff]  ;;  %695 = vst [vmem:[#allocation2 + $0x230] sm:$0xff] %v8122_v3 }
 0x17b   :  { %696 = vst [vmem:[#allocation2 + $0x238] sm:$0xff] %v8122_v3 }
 0x17e   :  { %v8446_v18 = vpop.f32.mrf.mxu0 }
 0x181   :  { %6727 = vmatmul.msk.f32.gmra.mxu0 %vm111_vm0, %v86_v19  ;;  %v6769_v19 = vld [vmem:[%s14838_s3 + $0x148] sm:$0xff] }
 0x182   :  { %948 = vmatpush.msra.mxu3 %v6769_v19  ;;  %v6751_v19 = vld [vmem:[%s14838_s3 + $0xb8] sm:$0xff] }
 0x186   :  { %v8452_v21 = vpop.f32.mrf.mxu0 }
 0x189   :  { %6728 = vmatmul.msk.f32.gmra.mxu0 %vm111_vm0, %v87_v23  ;;  %v6756_v23 = vld [vmem:[%s14838_s3 + $0xe0] sm:$0xff] }
 0x18a   :  { %782 = vmatpush.msra.mxu1 %v6756_v23  ;;  %v736_v23 = vld [vmem:[%s14838_s3 + $0x30] sm:$0xff] }
 0x18e   :  { %v8458_v25 = vpop.f32.mrf.mxu0 }
 0x191   :  { %6729 = vmatmul.msk.f32.gmra.mxu0 %vm111_vm0, %v88_v27  ;;  %v741_v27 = vld [vmem:[%s14838_s3 + $0x58] sm:$0xff] }
 0x192   :  { %848 = vmatpush.msra.mxu2 %v741_v27  ;;  %v6763_v27 = vld [vmem:[%s14838_s3 + $0x118] sm:$0xff] }
 0x196   :  { %v8464_v29 = vpop.f32.mrf.mxu0 }
 0x199   :  { %6730 = vmatmul.msk.f32.gmra.mxu0 %vm111_vm0, %v89_v31  ;;  %v6768_v31 = vld [vmem:[%s14838_s3 + $0x140] sm:$0xff] }
 0x19a   :  { %949 = vmatpush.msra.mxu3 %v6768_v31  ;;  %v6932_v31 = vld [vmem:[%s14838_s3 + $0x660] sm:$0xff] }
 0x19b   :  { %2086 = vmatpush.msrb.mxu0 %v6932_v31  ;;  %v6760_v31 = vld [vmem:[%s14838_s3 + $0x100] sm:$0xff] }
 0x19d   :  { %2087 = vmatpush.msrb.mxu0 %v6931_v53  ;;  %v99_v53 = vld [vmem:[%s14835_s0 + $0x1e0] sm:$0xff] }
 0x19e   :  { %v8470_v33 = vpop.f32.mrf.mxu0 }
 0x1a1   :  { %6731 = vmatmul.msk.f32.gmra.mxu0 %vm111_vm0, %v90_v35 }
 0x1a6   :  { %v8476_v37 = vpop.f32.mrf.mxu0 }
 0x1a9   :  { %6732 = vmatmul.msk.f32.gmra.mxu0 %vm111_vm0, %v91_v39  ;;  %v96_v39 = vld [vmem:[%s14835_s0 + $0x1c8] sm:$0xff] }
 0x1ae   :  { %v8482_v41 = vpop.f32.mrf.mxu0 }
 0x1b1   :  { %6733 = vmatmul.msk.f32.gmra.mxu0 %vm111_vm0, %v92_v43  ;;  %v6755_v43 = vld [vmem:[%s14838_s3 + $0xd8] sm:$0xff] }
 0x1b2   :  { %783 = vmatpush.msra.mxu1 %v6755_v43  ;;  %v735_v43 = vld [vmem:[%s14838_s3 + $0x28] sm:$0xff] }
 0x1b4   :  { %784 = vmatpush.msra.mxu1 %v6754_v55  ;;  %v6762_v55 = vld [vmem:[%s14838_s3 + $0x110] sm:$0xff] }
 0x1b6   :  { %v8488_v45 = vpop.f32.mrf.mxu0  ;;  %785 = vmatpush.msra.mxu1 %v6753_v59  ;;  %v6930_v59 = vld [vmem:[%s14838_s3 + $0x650] sm:$0xff] }
 0x1b7   :  { %2088 = vmatpush.msrb.mxu0 %v6930_v59  ;;  %v6744_v59 = vld [vmem:[%s14838_s3 + $0x80] sm:$0xff] }
 0x1b8   :  { %786 = vmatpush.msra.mxu1 %v6752_v9  ;;  %v6747_v9 = vld [vmem:[%s14838_s3 + $0x98] sm:$0xff] }
 0x1b9   :  { %6734 = vmatmul.msk.f32.gmra.mxu0 %vm111_vm0, %v93_v47  ;;  %v740_v47 = vld [vmem:[%s14838_s3 + $0x50] sm:$0xff] }
 0x1ba   :  { %849 = vmatpush.msra.mxu2 %v740_v47  ;;  %787 = vmatpush.msra.mxu1 %v6751_v19  ;;  %v6749_v47 = vld [vmem:[%s14838_s3 + $0xa8] sm:$0xff] }
 0x1bb   :  { %v731_v19 = vld [vmem:[%s14838_s3 + $0x8] sm:$0xff] }
 0x1bc   :  { %850 = vmatpush.msra.mxu2 %v739_v57  ;;  %v6761_v57 = vld [vmem:[%s14838_s3 + $0x108] sm:$0xff] }
 0x1be   :  { %v8494_v49 = vpop.f32.mrf.mxu0  ;;  %851 = vmatpush.msra.mxu2 %v738_v61  ;;  %v6748_v61 = vld [vmem:[%s14838_s3 + $0xa0] sm:$0xff] }
 0x1c0   :  { %852 = vmatpush.msra.mxu2 %v737_v11  ;;  %v732_v11 = vld [vmem:[%s14838_s3 + $0x10] sm:$0xff] }
 0x1c1   :  { %6735 = vmatmul.msk.f32.gmra.mxu0 %vm111_vm0, %v94_v51  ;;  %v6767_v51 = vld [vmem:[%s14838_s3 + $0x138] sm:$0xff] }
 0x1c2   :  { %950 = vmatpush.msra.mxu3 %v6767_v51  ;;  %853 = vmatpush.msra.mxu2 %v736_v23  ;;  %v734_v51 = vld [vmem:[%s14838_s3 + $0x20] sm:$0xff]  ;;  %v6745_v23 = vld [vmem:[%s14838_s3 + $0x88] sm:$0xff] }
 0x1c4   :  { %854 = vmatpush.msra.mxu2 %v735_v43  ;;  %v714_v43 = vld [vmem:[#allocation2 + $0x6] sm:$0xff] }
 0x1c6   :  { %v8515_v63 = vpop.f32.mrf.mxu0  ;;  %855 = vmatpush.msra.mxu2 %v734_v51 }
 0x1c9   :  { %6736 = vmatmul.msk.f32.gmra.mxu0 %vm111_vm0, %v95_v1  ;;  %v6766_v1 = vld [vmem:[%s14838_s3 + $0x130] sm:$0xff] }
 0x1ca   :  { %951 = vmatpush.msra.mxu3 %v6766_v1  ;;  %v733_v1 = vld [vmem:[%s14838_s3 + $0x18] sm:$0xff] }
 0x1cb   :  { %856 = vmatpush.msra.mxu2 %v733_v1  ;;  %v746_v1 = vld [vmem:[#allocation2 + $0x7] sm:$0xff] }
 0x1cc   :  { %952 = vmatpush.msra.mxu3 %v6765_v5 }
 0x1cd   :  { %857 = vmatpush.msra.mxu2 %v732_v11  ;;  %v100_v11 = vld [vmem:[%s14835_s0 + $0x1e8] sm:$0xff] }
 0x1ce   :  { %v8557_v35 = vpop.f32.mrf.mxu0  ;;  %953 = vmatpush.msra.mxu3 %v6764_v13  ;;  %v6929_v13 = vld [vmem:[%s14838_s3 + $0x648] sm:$0xff] }
 0x1cf   :  { %858 = vmatpush.msra.mxu2 %v731_v19  ;;  %2089 = vmatpush.msrb.mxu0 %v6929_v13  ;;  %v6922_v13 = vld [vmem:[%s14838_s3 + $0x610] sm:$0xff]  ;;  %v8749_v19 = vld [vmem:[#allocation2 + $0x1e] sm:$0xff] }
 0x1d0   :  { %954 = vmatpush.msra.mxu3 %v6763_v27  ;;  %v730_v27 = vld [vmem:[%s14838_s3] sm:$0xff] }
 0x1d1   :  { %6737 = vmatmul.msk.f32.gmra.mxu0 %vm111_vm0, %v96_v39  ;;  %v6750_v39 = vld [vmem:[%s14838_s3 + $0xb0] sm:$0xff]  ;;  %859 = vmatpush.msra.mxu2 %v730_v27  ;;  %v747_v27 = vld [vmem:[#allocation2 + $0x1f] sm:$0xff] }
 0x1d2   :  { %788 = vmatpush.msra.mxu1 %v6750_v39  ;;  %955 = vmatpush.msra.mxu3 %v6762_v55  ;;  %v6928_v39 = vld [vmem:[%s14838_s3 + $0x640] sm:$0xff]  ;;  %v6926_v55 = vld [vmem:[%s14838_s3 + $0x630] sm:$0xff] }
 0x1d3   :  { %2090 = vmatpush.msrb.mxu0 %v6928_v39  ;;  %860 = vmatmul.f32.vlgmr.msra.gmra.mxu2 %v714_v43  ;;  %v101_v39 = vld [vmem:[%s14835_s0 + $0x1f0] sm:$0xff] }
 0x1d4   :  { %789 = vmatpush.msra.mxu1 %v6749_v47  ;;  %956 = vmatpush.msra.mxu3 %v6761_v57  ;;  %v6927_v47 = vld [vmem:[%s14838_s3 + $0x638] sm:$0xff]  ;;  %v6925_v57 = vld [vmem:[%s14838_s3 + $0x628] sm:$0xff] }
 0x1d5   :  { %2091 = vmatpush.msrb.mxu0 %v6927_v47  ;;  %v102_v47 = vld [vmem:[%s14835_s0 + $0x1f8] sm:$0xff] }
 0x1d6   :  { %v8608_v15 = vpop.f32.mrf.mxu0  ;;  %790 = vmatpush.msra.mxu1 %v6748_v61  ;;  %957 = vmatpush.msra.mxu3 %v6760_v31  ;;  %v6924_v61 = vld [vmem:[%s14838_s3 + $0x620] sm:$0xff] }
 0x1d7   :  { %958 = vmatmul.f32.vlgmr.msra.gmra.mxu3 %v8122_v3  ;;  %2092 = vmatpush.msrb.mxu0 %v6926_v55 }
 0x1d8   :  { %791 = vmatpush.msra.mxu1 %v6747_v9 }
 0x1d9   :  { %6738 = vmatmul.msk.f32.gmra.mxu0 %vm111_vm0, %v97_v17  ;;  %v6746_v17 = vld [vmem:[%s14838_s3 + $0x90] sm:$0xff] }
 0x1da   :  { %792 = vmatpush.msra.mxu1 %v6746_v17  ;;  %2093 = vmatpush.msrb.mxu0 %v6925_v57  ;;  %v6921_v17 = vld [vmem:[%s14838_s3 + $0x608] sm:$0xff] }
 0x1db   :  { %863 = vmatmul.f32.gmra.mxu2 %v8749_v19 }
 0x1dc   :  { %793 = vmatpush.msra.mxu1 %v6745_v23  ;;  %2094 = vmatpush.msrb.mxu0 %v6924_v61  ;;  %v6920_v23 = vld [vmem:[%s14838_s3 + $0x600] sm:$0xff] }
 0x1de   :  { %v8657_v5 = vpop.f32.mrf.mxu0  ;;  %794 = vmatpush.msra.mxu1 %v6744_v59 }
 0x1df   :  { %795 = vmatmul.f32.vlgmr.msra.gmra.mxu1 %v746_v1  ;;  %961 = vmatmul.f32.gmra.mxu3 %v8122_v3 }
 0x1e1   :  { %6739 = vmatmul.msk.f32.gmra.mxu0 %vm111_vm0, %v98_v7  ;;  %v6923_v7 = vld [vmem:[%s14838_s3 + $0x618] sm:$0xff] }
 0x1e2   :  { %2095 = vmatpush.msrb.mxu0 %v6923_v7 }
 0x1e4   :  { %2096 = vmatpush.msrb.mxu0 %v6922_v13 }
 0x1e6   :  { %v8701_v51 = vpop.f32.mrf.mxu0  ;;  %2097 = vmatpush.msrb.mxu0 %v6921_v17 }
 0x1e7   :  { %798 = vmatmul.f32.gmra.mxu1 %v747_v27 }
 0x1e8   :  { %2098 = vmatpush.msrb.mxu0 %v6920_v23 }
 0x1e9   :  { %6740 = vmatmul.msk.f32.gmra.mxu0 %vm111_vm0, %v99_v53  ;;  %v8783_v53 = vld [vmem:[%s14837_s2] ss:$0 sm:$0xff] }
 0x1ea   :  { %v370_v55 = vadd.f32 %v8783_v53, %v8356_v52  ;;  %v322_v57 = vadd.f32 %v8783_v53, %v8260_v20  ;;  %v418_v59 = vadd.f32 %v8783_v53, %v8452_v21  ;;  %v373_v13 = vadd.f32 %v8783_v53, %v8362_v54 }
 0x1eb   :  { %v325_v23 = vadd.f32 %v8783_v53, %v8266_v22  ;;  %v421_v27 = vadd.f32 %v8783_v53, %v8458_v25 }
 0x1ec   :  { %v529_v1 = vmax.f32 %v370_v55, 0.0  ;;  %v513_v7 = vmax.f32 %v322_v57, 0.0  ;;  %v530_v55 = vmax.f32 %v373_v13, 0.0 }
 0x1ed   :  { %v514_v57 = vmax.f32 %v325_v23, 0.0  ;;  %v546_v22 = vmax.f32 %v421_v27, 0.0 }
 0x1ee   :  { %v8731_v9 = vpop.f32.mrf.mxu0  ;;  %v577_v21 = vmax.f32 %v513_v7, %v529_v1  ;;  %v424_v7 = vadd.f32 %v8783_v53, %v8464_v29  ;;  %v331_v29 = vadd.f32 %v8783_v53, %v8278_v26 }
 0x1f1   :  { %6741 = vmatmul.msk.f32.gmra.mxu0 %vm111_vm0, %v100_v11  ;;  %v545_v11 = vmax.f32 %v418_v59, 0.0  ;;  %v578_v59 = vmax.f32 %v514_v57, %v530_v55 }
 0x1f6   :  { %v8758_v31 = vpop.f32.mrf.mxu0 }
 0x1f9   :  { %6742 = vmatmul.msk.f32.gmra.mxu0 %vm111_vm0, %v101_v39 }
 0x1fe   :  { %v8772_v43 = vpop.f32.mrf.mxu0 }
 0x201   :  { %6743 = vmatmul.msk.f32.gmra.mxu0 %vm111_vm0, %v102_v47 }
 0x206   :  { %v465_v61 = vpop.f32.mrf.mxu0 }
 0x207   :  { %v466_v52 = vadd.f32 %v8783_v53, %v465_v61  ;;  %v376_v61 = vadd.f32 %v8783_v53, %v8368_v56 }
 0x209   :  { %v561_v20 = vmax.f32 %v466_v52, 0.0  ;;  %v328_v52 = vadd.f32 %v8783_v53, %v8272_v24 }
 0x20b   :  { %v593_v17 = vmax.f32 %v545_v11, %v561_v20  ;;  %v515_v56 = vmax.f32 %v328_v52, 0.0 }
 0x20d   :  { %v609_v39 = vmax.f32 %v577_v21, %v593_v17  ;;  %v531_v21 = vmax.f32 %v376_v61, 0.0  ;;  %v547_v17 = vmax.f32 %v424_v7, 0.0 }
 0x20e   :  { %v468_v47 = vpop.f32.mrf.mxu0 }
 0x20f   :  { %v469_v54 = vadd.f32 %v8783_v53, %v468_v47  ;;  %964 = vmatmul.f32.gmra.mxu3 %v609_v39  ;;  %2099 = vmatmul.f32.vlgmr.msrb.gmra.mxu0 %v609_v39  ;;  %698 = vst [vmem:[#allocation2 + $0x38] sm:$0xff] %v609_v39  ;;  %v579_v27 = vmax.f32 %v515_v56, %v531_v21 }
 0x210   :  { %v379_v47 = vadd.f32 %v8783_v53, %v8374_v58  ;;  %v427_v39 = vadd.f32 %v8783_v53, %v8470_v33  ;;  %v516_v58 = vmax.f32 %v331_v29, 0.0  ;;  %v382_v33 = vadd.f32 %v8783_v53, %v8380_v60 }
 0x211   :  { %v562_v25 = vmax.f32 %v469_v54, 0.0  ;;  %v430_v21 = vadd.f32 %v8783_v53, %v8476_v37 }
 0x212   :  { %v548_v61 = vmax.f32 %v427_v39, 0.0  ;;  %v337_v39 = vadd.f32 %v8783_v53, %v8290_v30 }
 0x213   :  { %v594_v1 = vmax.f32 %v546_v22, %v562_v25  ;;  %v532_v25 = vmax.f32 %v379_v47, 0.0 }
 0x215   :  { %v610_v11 = vmax.f32 %v578_v59, %v594_v1  ;;  %v580_v7 = vmax.f32 %v516_v58, %v532_v25 }
 0x216   :  { %v471_v20 = vpop.f32.mrf.mxu0  ;;  %v748_v55 = vld [vmem:[#allocation2 + $0x37] sm:$0xff] }
 0x217   :  { %699 = vst [vmem:[#allocation2 + $0x50] sm:$0xff] %v610_v11  ;;  %v472_v13 = vadd.f32 %v8783_v53, %v471_v20  ;;  %967 = vmatmul.f32.gmra.mxu3 %v610_v11  ;;  %2102 = vmatmul.f32.gmra.mxu0 %v610_v11  ;;  %v8829_v54 = vld [vmem:[#allocation2 + $0x36] sm:$0xff]  ;;  %v334_v20 = vadd.f32 %v8783_v53, %v8284_v28 }
 0x218   :  { %801 = vmatmul.f32.gmra.mxu1 %v748_v55  ;;  %866 = vmatmul.f32.gmra.mxu2 %v8829_v54  ;;  %v385_v55 = vadd.f32 %v8783_v53, %v8386_v62  ;;  %v518_v62 = vmax.f32 %v337_v39, 0.0  ;;  %v439_v39 = vadd.f32 %v8783_v53, %v8494_v49 }
 0x219   :  { %v563_v23 = vmax.f32 %v472_v13, 0.0  ;;  %v517_v60 = vmax.f32 %v334_v20, 0.0  ;;  %v340_v20 = vadd.f32 %v8783_v53, %v8296_v32 }
 0x21b   :  { %v595_v24 = vmax.f32 %v547_v17, %v563_v23  ;;  %v533_v17 = vmax.f32 %v382_v33, 0.0  ;;  %v388_v33 = vadd.f32 %v8783_v53, %v8392_v0  ;;  %v519_v0 = vmax.f32 %v340_v20, 0.0 }
 0x21d   :  { %v611_v57 = vmax.f32 %v579_v27, %v595_v24  ;;  %v549_v27 = vmax.f32 %v430_v21, 0.0  ;;  %v581_v37 = vmax.f32 %v517_v60, %v533_v17  ;;  %v436_v21 = vadd.f32 %v8783_v53, %v8488_v45 }
 0x21e   :  { %v474_v22 = vpop.f32.mrf.mxu0  ;;  %v8837_v52 = vld [vmem:[#allocation2 + $0x4f] sm:$0xff]  ;;  %v535_v17 = vmax.f32 %v388_v33, 0.0  ;;  %v346_v33 = vadd.f32 %v8783_v53, %v8308_v36 }
 0x21f   :  { %700 = vst [vmem:[#allocation2 + $0x68] sm:$0xff] %v611_v57  ;;  %v475_v59 = vadd.f32 %v8783_v53, %v474_v22  ;;  %970 = vmatmul.f32.gmra.mxu3 %v611_v57  ;;  %2105 = vmatmul.f32.gmra.mxu0 %v611_v57  ;;  %v8839_v26 = vld [vmem:[#allocation2 + $0x4e] sm:$0xff]  ;;  %v433_v57 = vadd.f32 %v8783_v53, %v8482_v41  ;;  %v551_v60 = vmax.f32 %v436_v21, 0.0  ;;  %v6823_v21 = vld [vmem:[%s14838_s3 + $0x2f8] sm:$0xff] }
 0x220   :  { %804 = vmatmul.f32.gmra.mxu1 %v8837_v52  ;;  %869 = vmatmul.f32.gmra.mxu2 %v8839_v26  ;;  %v583_v45 = vmax.f32 %v519_v0, %v535_v17  ;;  %v6822_v36 = vld [vmem:[%s14838_s3 + $0x2f0] sm:$0xff]  ;;  %v6821_v0 = vld [vmem:[%s14838_s3 + $0x2e8] sm:$0xff] }
 0x221   :  { %v564_v1 = vmax.f32 %v475_v59, 0.0  ;;  %v534_v59 = vmax.f32 %v385_v55, 0.0  ;;  %1285 = vmatpush.msrb.mxu3 %v6823_v21  ;;  %v8947_v21 = vld [vmem:[#allocation2 + $0x13e] sm:$0xff] }
 0x223   :  { %v596_v11 = vmax.f32 %v548_v61, %v564_v1  ;;  %v550_v61 = vmax.f32 %v433_v57, 0.0  ;;  %v582_v41 = vmax.f32 %v518_v62, %v534_v59  ;;  %1286 = vmatpush.msrb.mxu3 %v6822_v36  ;;  %v6788_v36 = vld [vmem:[%s14838_s3 + $0x1e0] sm:$0xff] }
 0x225   :  { %v612_v13 = vmax.f32 %v580_v7, %v596_v11  ;;  %1287 = vmatpush.msrb.mxu3 %v6821_v0 }
 0x226   :  { %v477_v56 = vpop.f32.mrf.mxu0  ;;  %v8850_v24 = vld [vmem:[#allocation2 + $0x67] sm:$0xff] }
 0x227   :  { %701 = vst [vmem:[#allocation2 + $0x80] sm:$0xff] %v612_v13  ;;  %v478_v23 = vadd.f32 %v8783_v53, %v477_v56  ;;  %973 = vmatmul.f32.gmra.mxu3 %v612_v13  ;;  %2108 = vmatmul.f32.gmra.mxu0 %v612_v13  ;;  %v8852_v28 = vld [vmem:[#allocation2 + $0x66] sm:$0xff] }
 0x228   :  { %807 = vmatmul.f32.gmra.mxu1 %v8850_v24  ;;  %872 = vmatmul.f32.gmra.mxu2 %v8852_v28 }
 0x229   :  { %v565_v47 = vmax.f32 %v478_v23, 0.0 }
 0x22b   :  { %v597_v29 = vmax.f32 %v549_v27, %v565_v47 }
 0x22d   :  { %v613_v22 = vmax.f32 %v581_v37, %v597_v29  ;;  %v391_v37 = vadd.f32 %v8783_v53, %v8398_v2  ;;  %v343_v29 = vadd.f32 %v8783_v53, %v8302_v34 }
 0x22e   :  { %v480_v25 = vpop.f32.mrf.mxu0  ;;  %v8863_v7 = vld [vmem:[#allocation2 + $0x7f] sm:$0xff] }
 0x22f   :  { %702 = vst [vmem:[#allocation2 + $0x98] sm:$0xff] %v613_v22  ;;  %v481_v58 = vadd.f32 %v8783_v53, %v480_v25  ;;  %976 = vmatmul.f32.gmra.mxu3 %v613_v22  ;;  %2111 = vmatmul.f32.gmra.mxu0 %v613_v22  ;;  %v8865_v30 = vld [vmem:[#allocation2 + $0x7e] sm:$0xff]  ;;  %v536_v25 = vmax.f32 %v391_v37, 0.0  ;;  %v520_v2 = vmax.f32 %v343_v29, 0.0  ;;  %v349_v29 = vadd.f32 %v8783_v53, %v8314_v38 }
 0x230   :  { %810 = vmatmul.f32.gmra.mxu1 %v8863_v7  ;;  %875 = vmatmul.f32.gmra.mxu2 %v8865_v30  ;;  %v6819_v38 = vld [vmem:[%s14838_s3 + $0x2d8] sm:$0xff] }
 0x231   :  { %v566_v1 = vmax.f32 %v481_v58, 0.0  ;;  %v552_v58 = vmax.f32 %v439_v39, 0.0  ;;  %v584_v49 = vmax.f32 %v520_v2, %v536_v25  ;;  %v445_v39 = vadd.f32 %v8783_v53, %v8557_v35  ;;  %v6790_v2 = vld [vmem:[%s14838_s3 + $0x1f0] sm:$0xff] }
 0x233   :  { %v598_v11 = vmax.f32 %v550_v61, %v566_v1  ;;  %v394_v1 = vadd.f32 %v8783_v53, %v8404_v4 }
 0x235   :  { %v614_v13 = vmax.f32 %v582_v41, %v598_v11  ;;  %v442_v11 = vadd.f32 %v8783_v53, %v8515_v63  ;;  %v521_v63 = vmax.f32 %v346_v33, 0.0  ;;  %v554_v33 = vmax.f32 %v445_v39, 0.0  ;;  %v6801_v39 = vld [vmem:[%s14838_s3 + $0x248] sm:$0xff] }
 0x236   :  { %v483_v56 = vpop.f32.mrf.mxu0  ;;  %v8876_v47 = vld [vmem:[#allocation2 + $0x97] sm:$0xff] }
 0x237   :  { %703 = vst [vmem:[#allocation2 + $0xb0] sm:$0xff] %v614_v13  ;;  %v484_v23 = vadd.f32 %v8783_v53, %v483_v56  ;;  %979 = vmatmul.f32.gmra.mxu3 %v614_v13  ;;  %2114 = vmatmul.f32.gmra.mxu0 %v614_v13  ;;  %v8878_v32 = vld [vmem:[#allocation2 + $0x96] sm:$0xff]  ;;  %v537_v56 = vmax.f32 %v394_v1, 0.0  ;;  %v553_v17 = vmax.f32 %v442_v11, 0.0 }
 0x238   :  { %813 = vmatmul.f32.gmra.mxu1 %v8876_v47  ;;  %878 = vmatmul.f32.gmra.mxu2 %v8878_v32  ;;  %v6818_v1 = vld [vmem:[%s14838_s3 + $0x2d0] sm:$0xff] }
 0x239   :  { %v567_v27 = vmax.f32 %v484_v23, 0.0 }
 0x23b   :  { %v599_v55 = vmax.f32 %v551_v60, %v567_v27  ;;  %v754_v60 = vld [vmem:[#allocation2 + $0x127] sm:$0xff] }
 0x23c   :  { %v722_v27 = vld [vmem:[#allocation2 + $0x126] sm:$0xff] }
 0x23d   :  { %v615_v57 = vmax.f32 %v583_v45, %v599_v55  ;;  %v585_v45 = vmax.f32 %v521_v63, %v537_v56  ;;  %v6820_v55 = vld [vmem:[%s14838_s3 + $0x2e0] sm:$0xff]  ;;  %v400_v56 = vadd.f32 %v8783_v53, %v8416_v8  ;;  %v6787_v8 = vld [vmem:[%s14838_s3 + $0x1d8] sm:$0xff] }
 0x23e   :  { %v486_v22 = vpop.f32.mrf.mxu0  ;;  %v8890_v34 = vld [vmem:[#allocation2 + $0xaf] sm:$0xff]  ;;  %1288 = vmatpush.msrb.mxu3 %v6820_v55  ;;  %v6804_v63 = vld [vmem:[%s14838_s3 + $0x260] sm:$0xff] }
 0x23f   :  { %704 = vst [vmem:[#allocation2 + $0xc8] sm:$0xff] %v615_v57  ;;  %v487_v59 = vadd.f32 %v8783_v53, %v486_v22  ;;  %982 = vmatmul.f32.gmra.mxu3 %v8122_v3  ;;  %2117 = vmatmul.f32.gmra.mxu0 %v615_v57  ;;  %v8892_v61 = vld [vmem:[#allocation2 + $0xae] sm:$0xff]  ;;  %v6791_v22 = vld [vmem:[%s14838_s3 + $0x1f8] sm:$0xff] }
 0x240   :  { %816 = vmatmul.f32.gmra.mxu1 %v8890_v34  ;;  %881 = vmatmul.f32.gmra.mxu2 %v8892_v61  ;;  %v6802_v55 = vld [vmem:[%s14838_s3 + $0x250] sm:$0xff] }
 0x241   :  { %v568_v62 = vmax.f32 %v487_v59, 0.0  ;;  %1056 = vmatpush.msrb.mxu1 %v6791_v22  ;;  %1289 = vmatpush.msrb.mxu3 %v6819_v38  ;;  %v6998_v22 = vld [vmem:[%s14838_s3 + $0x870] sm:$0xff] }
 0x243   :  { %v600_v41 = vmax.f32 %v552_v58, %v568_v62  ;;  %v6806_v58 = vld [vmem:[%s14838_s3 + $0x270] sm:$0xff]  ;;  %v6789_v62 = vld [vmem:[%s14838_s3 + $0x1e8] sm:$0xff]  ;;  %1057 = vmatpush.msrb.mxu1 %v6790_v2  ;;  %1290 = vmatpush.msrb.mxu3 %v6818_v1  ;;  %v6800_v1 = vld [vmem:[%s14838_s3 + $0x240] sm:$0xff] }
 0x245   :  { %v616_v20 = vmax.f32 %v584_v49, %v600_v41  ;;  %v6805_v49 = vld [vmem:[%s14838_s3 + $0x268] sm:$0xff]  ;;  %v522_v41 = vmax.f32 %v349_v29, 0.0  ;;  %1058 = vmatpush.msrb.mxu1 %v6789_v62 }
 0x246   :  { %v489_v13 = vpop.f32.mrf.mxu0  ;;  %v6785_v29 = vld [vmem:[%s14838_s3 + $0x1c8] sm:$0xff] }
 0x247   :  { %705 = vst [vmem:[#allocation2 + $0xe0] sm:$0xff] %v616_v20  ;;  %v490_v4 = vadd.f32 %v8783_v53, %v489_v13  ;;  %985 = vmatmul.f32.gmra.mxu3 %v8122_v3  ;;  %2120 = vmatmul.f32.gmra.mxu0 %v616_v20  ;;  %v397_v3 = vadd.f32 %v8783_v53, %v8410_v6  ;;  %v6807_v6 = vld [vmem:[%s14838_s3 + $0x278] sm:$0xff] }
 0x248   :  { %819 = vmatmul.f32.gmra.mxu1 %v754_v60  ;;  %884 = vmatmul.f32.gmra.mxu2 %v722_v27  ;;  %v755_v20 = vld [vmem:[#allocation2 + $0x13f] sm:$0xff] }
 0x249   :  { %v569_v23 = vmax.f32 %v490_v4, 0.0  ;;  %1170 = vmatpush.msrb.mxu2 %v6807_v6  ;;  %v538_v59 = vmax.f32 %v397_v3, 0.0  ;;  %1059 = vmatpush.msrb.mxu1 %v6788_v36  ;;  %v6803_v60 = vld [vmem:[%s14838_s3 + $0x258] sm:$0xff] }
 0x24b   :  { %v601_v37 = vmax.f32 %v553_v17, %v569_v23  ;;  %1171 = vmatpush.msrb.mxu2 %v6806_v58  ;;  %v586_v13 = vmax.f32 %v522_v41, %v538_v59  ;;  %v352_v17 = vadd.f32 %v8783_v53, %v8320_v40  ;;  %v448_v23 = vadd.f32 %v8783_v53, %v8608_v15  ;;  %v6817_v40 = vld [vmem:[%s14838_s3 + $0x2c8] sm:$0xff]  ;;  %v6999_v15 = vld [vmem:[%s14838_s3 + $0x878] sm:$0xff] }
 0x24c   :  { %1060 = vmatpush.msrb.mxu1 %v6787_v8  ;;  %1291 = vmatpush.msrb.mxu3 %v6817_v40  ;;  %v403_v58 = vadd.f32 %v8783_v53, %v8422_v10  ;;  %v355_v41 = vadd.f32 %v8783_v53, %v8326_v42  ;;  %v6996_v8 = vld [vmem:[%s14838_s3 + $0x860] sm:$0xff] }
 0x24d   :  { %v617_v57 = vmax.f32 %v585_v45, %v601_v37  ;;  %1172 = vmatpush.msrb.mxu2 %v6805_v49  ;;  %v539_v45 = vmax.f32 %v400_v56, 0.0  ;;  %v6786_v37 = vld [vmem:[%s14838_s3 + $0x1d0] sm:$0xff]  ;;  %v523_v6 = vmax.f32 %v352_v17, 0.0  ;;  %2540 = vmatpush.msra.mxu0 %v6999_v15  ;;  %v6784_v49 = vld [vmem:[%s14838_s3 + $0x1c0] sm:$0xff]  ;;  %v6997_v56 = vld [vmem:[%s14838_s3 + $0x868] sm:$0xff] }
 0x24e   :  { %v492_v25 = vpop.f32.mrf.mxu0  ;;  %1061 = vmatpush.msrb.mxu1 %v6786_v37  ;;  %v6798_v17 = vld [vmem:[%s14838_s3 + $0x230] sm:$0xff]  ;;  %v6813_v15 = vld [vmem:[%s14838_s3 + $0x2a8] sm:$0xff] }
 0x24f   :  { %706 = vst [vmem:[#allocation2 + $0x158] sm:$0xff] %v617_v57  ;;  %v493_v35 = vadd.f32 %v8783_v53, %v492_v25  ;;  %988 = vmatmul.f32.gmra.mxu3 %v617_v57  ;;  %2123 = vmatmul.f32.gmra.mxu0 %v617_v57  ;;  %v6816_v57 = vld [vmem:[%s14838_s3 + $0x2c0] sm:$0xff]  ;;  %v555_v25 = vmax.f32 %v448_v23, 0.0  ;;  %v587_v2 = vmax.f32 %v523_v6, %v539_v45  ;;  %v6781_v23 = vld [vmem:[%s14838_s3 + $0x1a8] sm:$0xff] }
 0x250   :  { %1173 = vmatpush.msrb.mxu2 %v6804_v63  ;;  %822 = vmatmul.f32.gmra.mxu1 %v755_v20  ;;  %v6799_v20 = vld [vmem:[%s14838_s3 + $0x238] sm:$0xff]  ;;  %v6782_v63 = vld [vmem:[%s14838_s3 + $0x1b0] sm:$0xff]  ;;  %v454_v6 = vadd.f32 %v8783_v53, %v8701_v51 }
 0x251   :  { %v570_v11 = vmax.f32 %v493_v35, 0.0  ;;  %887 = vmatmul.f32.gmra.mxu2 %v8947_v21  ;;  %1062 = vmatpush.msrb.mxu1 %v6785_v29  ;;  %v6995_v51 = vld [vmem:[%s14838_s3 + $0x858] sm:$0xff] }
 0x252   :  { %1174 = vmatpush.msrb.mxu2 %v6803_v60  ;;  %1292 = vmatpush.msrb.mxu3 %v6816_v57  ;;  %v524_v60 = vmax.f32 %v355_v41, 0.0  ;;  %v6796_v57 = vld [vmem:[%s14838_s3 + $0x220] sm:$0xff]  ;;  %v6810_v41 = vld [vmem:[%s14838_s3 + $0x290] sm:$0xff] }
 0x253   :  { %v602_v4 = vmax.f32 %v554_v33, %v570_v11  ;;  %2541 = vmatpush.msra.mxu0 %v6998_v22  ;;  %1063 = vmatpush.msrb.mxu1 %v6784_v49  ;;  %v451_v33 = vadd.f32 %v8783_v53, %v8657_v5  ;;  %v6783_v11 = vld [vmem:[%s14838_s3 + $0x1b8] sm:$0xff]  ;;  %v6814_v5 = vld [vmem:[%s14838_s3 + $0x2b0] sm:$0xff]  ;;  %v6812_v22 = vld [vmem:[%s14838_s3 + $0x2a0] sm:$0xff] }
 0x254   :  { %1175 = vmatpush.msrb.mxu2 %v6802_v55  ;;  %v406_v55 = vadd.f32 %v8783_v53, %v8428_v12  ;;  %v358_v12 = vadd.f32 %v8783_v53, %v8332_v44  ;;  %v6811_v44 = vld [vmem:[%s14838_s3 + $0x298] sm:$0xff]  ;;  %v6778_v49 = vld [vmem:[%s14838_s3 + $0x190] sm:$0xff] }
 0x255   :  { %v618_v0 = vmax.f32 %v586_v13, %v602_v4  ;;  %v6815_v13 = vld [vmem:[%s14838_s3 + $0x2b8] sm:$0xff]  ;;  %1064 = vmatpush.msrb.mxu1 %v6783_v11  ;;  %v540_v4 = vmax.f32 %v403_v58, 0.0  ;;  %2542 = vmatpush.msra.mxu0 %v6997_v56  ;;  %v557_v11 = vmax.f32 %v454_v6, 0.0 }
 0x256   :  { %v495_v27 = vpop.f32.mrf.mxu0  ;;  %v756_v59 = vld [vmem:[#allocation2 + $0x157] sm:$0xff]  ;;  %1176 = vmatpush.msrb.mxu2 %v6801_v39  ;;  %1293 = vmatpush.msrb.mxu3 %v6815_v13  ;;  %v6780_v39 = vld [vmem:[%s14838_s3 + $0x1a0] sm:$0xff]  ;;  %v541_v58 = vmax.f32 %v406_v55, 0.0  ;;  %v6777_v13 = vld [vmem:[%s14838_s3 + $0x188] sm:$0xff] }
 0x257   :  { %707 = vst [vmem:[#allocation2 + $0x170] sm:$0xff] %v618_v0  ;;  %v496_v3 = vadd.f32 %v8783_v53, %v495_v27  ;;  %991 = vmatmul.f32.gmra.mxu3 %v618_v0  ;;  %2126 = vmatmul.f32.gmra.mxu0 %v618_v0  ;;  %v8993_v35 = vld [vmem:[#allocation2 + $0x156] sm:$0xff]  ;;  %v6797_v0 = vld [vmem:[%s14838_s3 + $0x228] sm:$0xff]  ;;  %v556_v27 = vmax.f32 %v451_v33, 0.0  ;;  %v588_v37 = vmax.f32 %v524_v60, %v540_v4  ;;  %v6776_v60 = vld [vmem:[%s14838_s3 + $0x180] sm:$0xff] }
 0x258   :  { %1177 = vmatpush.msrb.mxu2 %v6800_v1  ;;  %825 = vmatmul.f32.gmra.mxu1 %v756_v59  ;;  %v6795_v59 = vld [vmem:[%s14838_s3 + $0x218] sm:$0xff]  ;;  %v6794_v1 = vld [vmem:[%s14838_s3 + $0x210] sm:$0xff] }
 0x259   :  { %v571_v38 = vmax.f32 %v496_v3, 0.0  ;;  %890 = vmatmul.f32.gmra.mxu2 %v8993_v35  ;;  %1065 = vmatpush.msrb.mxu1 %v6782_v63  ;;  %v6994_v33 = vld [vmem:[%s14838_s3 + $0x850] sm:$0xff]  ;;  %v6991_v55 = vld [vmem:[%s14838_s3 + $0x838] sm:$0xff] }
 0x25a   :  { %1178 = vmatpush.msrb.mxu2 %v6799_v20  ;;  %1294 = vmatpush.msrb.mxu3 %v6814_v5 }
 0x25b   :  { %v603_v62 = vmax.f32 %v555_v25, %v571_v38  ;;  %1066 = vmatpush.msrb.mxu1 %v6781_v23  ;;  %2543 = vmatpush.msra.mxu0 %v6996_v8  ;;  %v6779_v38 = vld [vmem:[%s14838_s3 + $0x198] sm:$0xff]  ;;  %v6993_v23 = vld [vmem:[%s14838_s3 + $0x848] sm:$0xff]  ;;  %v457_v8 = vadd.f32 %v8783_v53, %v8731_v9  ;;  %v6992_v9 = vld [vmem:[%s14838_s3 + $0x840] sm:$0xff] }
 0x25c   :  { %1179 = vmatpush.msrb.mxu2 %v6798_v17  ;;  %1295 = vmatpush.msrb.mxu3 %v6813_v15  ;;  %v6809_v17 = vld [vmem:[%s14838_s3 + $0x288] sm:$0xff] }
 0x25d   :  { %v619_v10 = vmax.f32 %v587_v2, %v603_v62  ;;  %1067 = vmatpush.msrb.mxu1 %v6780_v39  ;;  %2544 = vmatpush.msra.mxu0 %v6995_v51  ;;  %v558_v39 = vmax.f32 %v457_v8, 0.0 }
 0x25e   :  { %v498_v42 = vpop.f32.mrf.mxu0  ;;  %v9042_v45 = vld [vmem:[#allocation2 + $0x16f] sm:$0xff]  ;;  %1180 = vmatpush.msrb.mxu2 %v6797_v0  ;;  %1296 = vmatpush.msrb.mxu3 %v6812_v22  ;;  %v361_v0 = vadd.f32 %v8783_v53, %v8338_v46  ;;  %v6808_v46 = vld [vmem:[%s14838_s3 + $0x280] sm:$0xff] }
 0x25f   :  { %708 = vst [vmem:[#allocation2 + $0x188] sm:$0xff] %v619_v10  ;;  %v499_v36 = vadd.f32 %v8783_v53, %v498_v42  ;;  %994 = vmatmul.f32.gmra.mxu3 %v619_v10  ;;  %2129 = vmatmul.f32.gmra.mxu0 %v619_v10  ;;  %v9044_v3 = vld [vmem:[#allocation2 + $0x16e] sm:$0xff]  ;;  %v525_v10 = vmax.f32 %v358_v12, 0.0 }
 0x260   :  { %828 = vmatmul.f32.gmra.mxu1 %v9042_v45  ;;  %1181 = vmatpush.msrb.mxu2 %v6796_v57  ;;  %v6793_v42 = vld [vmem:[%s14838_s3 + $0x208] sm:$0xff] }
 0x261   :  { %v572_v40 = vmax.f32 %v499_v36, 0.0  ;;  %893 = vmatmul.f32.gmra.mxu2 %v9044_v3  ;;  %1068 = vmatpush.msrb.mxu1 %v6779_v38  ;;  %v589_v4 = vmax.f32 %v525_v10, %v541_v58  ;;  %v409_v36 = vadd.f32 %v8783_v53, %v8434_v14 }
 0x262   :  { %1182 = vmatpush.msrb.mxu2 %v6795_v59  ;;  %1297 = vmatpush.msrb.mxu3 %v6811_v44  ;;  %v6990_v59 = vld [vmem:[%s14838_s3 + $0x830] sm:$0xff]  ;;  %v460_v44 = vadd.f32 %v8783_v53, %v8758_v31 }
 0x263   :  { %v604_v29 = vmax.f32 %v556_v27, %v572_v40  ;;  %1069 = vmatpush.msrb.mxu1 %v6778_v49  ;;  %2545 = vmatpush.msra.mxu0 %v6994_v33  ;;  %v6792_v27 = vld [vmem:[%s14838_s3 + $0x200] sm:$0xff]  ;;  %v542_v15 = vmax.f32 %v409_v36, 0.0  ;;  %v6987_v33 = vld [vmem:[%s14838_s3 + $0x818] sm:$0xff]  ;;  %v367_v36 = vadd.f32 %v8783_v53, %v8350_v50 }
 0x264   :  { %1183 = vmatpush.msrb.mxu2 %v6794_v1  ;;  %1298 = vmatpush.msrb.mxu3 %v6810_v41  ;;  %v559_v1 = vmax.f32 %v460_v44, 0.0 }
 0x265   :  { %v620_v25 = vmax.f32 %v588_v37, %v604_v29  ;;  %1070 = vmatpush.msrb.mxu1 %v6777_v13  ;;  %2546 = vmatpush.msra.mxu0 %v6993_v23  ;;  %v526_v29 = vmax.f32 %v361_v0, 0.0  ;;  %v415_v13 = vadd.f32 %v8783_v53, %v8446_v18  ;;  %v6985_v18 = vld [vmem:[%s14838_s3 + $0x808] sm:$0xff]  ;;  %v9171_v0 = vpop.f32.mrf.mxu3 }
 0x266   :  { %v501_v2 = vpop.f32.mrf.mxu0  ;;  %v9094_v5 = vld [vmem:[#allocation2 + $0x187] sm:$0xff]  ;;  %1184 = vmatpush.msrb.mxu2 %v6793_v42  ;;  %1299 = vmatpush.msrb.mxu3 %v6809_v17 }
 0x267   :  { %709 = vst [vmem:[#allocation2 + $0x1a0] sm:$0xff] %v620_v25  ;;  %v502_v62 = vadd.f32 %v8783_v53, %v501_v2  ;;  %997 = vmatmul.f32.gmra.mxu3 %v620_v25  ;;  %2132 = vmatmul.f32.gmra.mxu0 %v620_v25  ;;  %v9096_v56 = vld [vmem:[#allocation2 + $0x186] sm:$0xff]  ;;  %v590_v6 = vmax.f32 %v526_v29, %v542_v15  ;;  %v544_v8 = vmax.f32 %v415_v13, 0.0 }
 0x268   :  { %831 = vmatmul.f32.gmra.mxu1 %v9094_v5  ;;  %1185 = vmatpush.msrb.mxu2 %v6792_v27  ;;  %v412_v25 = vadd.f32 %v8783_v53, %v8440_v16  ;;  %v364_v2 = vadd.f32 %v8783_v53, %v8344_v48  ;;  %v6989_v16 = vld [vmem:[%s14838_s3 + $0x828] sm:$0xff]  ;;  %v6988_v48 = vld [vmem:[%s14838_s3 + $0x820] sm:$0xff] }
 0x269   :  { %v573_v20 = vmax.f32 %v502_v62, 0.0  ;;  %896 = vmatmul.f32.gmra.mxu2 %v9096_v56  ;;  %1071 = vmatpush.msrb.mxu1 %v6776_v60  ;;  %v1137_v29 = vld [vmem:[#allocation2 + $0xa] sm:$0xff] }
 0x26a   :  { %1300 = vmatpush.msrb.mxu3 %v6808_v46  ;;  %2547 = vmatpush.msra.mxu0 %v6992_v9  ;;  %v543_v62 = vmax.f32 %v412_v25, 0.0  ;;  %v527_v31 = vmax.f32 %v364_v2, 0.0  ;;  %v9197_v25 = vld [vmem:[#allocation2 + $0x21] sm:$0xff]  ;;  %v9224_v13 = vld [vmem:[#allocation2 + $0x69] sm:$0xff] }
 0x26b   :  { %v605_v63 = vmax.f32 %v557_v11, %v573_v20 }
 0x26c   :  { %2548 = vmatpush.msra.mxu0 %v6991_v55  ;;  %v591_v20 = vmax.f32 %v527_v31, %v543_v62  ;;  %v1023_v55 = vld [vmem:[#allocation2 + $0x9] sm:$0xff]  ;;  %v1140_v31 = vld [vmem:[#allocation2 + $0x52] sm:$0xff] }
 0x26d   :  { %v621_v14 = vmax.f32 %v589_v4, %v605_v63  ;;  %v6986_v4 = vld [vmem:[%s14838_s3 + $0x810] sm:$0xff]  ;;  %v463_v63 = vadd.f32 %v8783_v53, %v8772_v43  ;;  %v6984_v43 = vld [vmem:[%s14838_s3 + $0x800] sm:$0xff] }
 0x26e   :  { %v504_v40 = vpop.f32.mrf.mxu0  ;;  %v9128_v22 = vld [vmem:[#allocation2 + $0x19f] sm:$0xff]  ;;  %2549 = vmatpush.msra.mxu0 %v6990_v59 }
 0x26f   :  { %710 = vst [vmem:[#allocation2 + $0x1b8] sm:$0xff] %v621_v14  ;;  %v505_v37 = vadd.f32 %v8783_v53, %v504_v40  ;;  %1000 = vmatmul.f32.gmra.mxu3 %v621_v14  ;;  %2135 = vmatmul.f32.gmra.mxu0 %v621_v14  ;;  %v9130_v12 = vld [vmem:[#allocation2 + $0x19e] sm:$0xff]  ;;  %v528_v14 = vmax.f32 %v367_v36, 0.0  ;;  %v560_v60 = vmax.f32 %v463_v63, 0.0 }
 0x270   :  { %834 = vmatmul.f32.gmra.mxu1 %v9128_v22  ;;  %2550 = vmatpush.msra.mxu0 %v6989_v16 }
 0x271   :  { %v574_v57 = vmax.f32 %v505_v37, 0.0  ;;  %899 = vmatmul.f32.gmra.mxu2 %v9130_v12  ;;  %v592_v9 = vmax.f32 %v528_v14, %v544_v8  ;;  %v9236_v8 = vld [vmem:[#allocation2 + $0xc6] sm:$0xff] }
 0x272   :  { %2551 = vmatpush.msra.mxu0 %v6988_v48  ;;  %v9215_v48 = vld [vmem:[#allocation2 + $0x51] sm:$0xff] }
 0x273   :  { %v606_v38 = vmax.f32 %v558_v39, %v574_v57  ;;  %v9191_v57 = vpop.f32.mrf.mxu2 }
 0x274   :  { %2552 = vmatpush.msra.mxu0 %v6987_v33 }
 0x275   :  { %v622_v51 = vmax.f32 %v590_v6, %v606_v38 }
 0x276   :  { %v507_v58 = vpop.f32.mrf.mxu0  ;;  %v9153_v10 = vld [vmem:[#allocation2 + $0x1b7] sm:$0xff]  ;;  %2553 = vmatpush.msra.mxu0 %v6986_v4 }
 0x277   :  { %711 = vst [vmem:[#allocation2 + $0x1d0] sm:$0xff] %v622_v51  ;;  %v508_v49 = vadd.f32 %v8783_v53, %v507_v58  ;;  %1003 = vmatmul.f32.gmra.mxu3 %v622_v51  ;;  %2138 = vmatmul.f32.gmra.mxu0 %v622_v51  ;;  %v9155_v11 = vld [vmem:[#allocation2 + $0x1b6] sm:$0xff] }
 0x278   :  { %837 = vmatmul.f32.gmra.mxu1 %v9153_v10  ;;  %2554 = vmatpush.msra.mxu0 %v6985_v18  ;;  %v1139_v51 = vld [vmem:[#allocation2 + $0x3a] sm:$0xff] }
 0x279   :  { %v575_v41 = vmax.f32 %v508_v49, 0.0  ;;  %902 = vmatmul.f32.gmra.mxu2 %v9155_v11  ;;  %v9233_v18 = vld [vmem:[#allocation2 + $0x81] sm:$0xff] }
 0x27a   :  { %2555 = vmatpush.msra.mxu0 %v6984_v43 }
 0x27b   :  { %v607_v42 = vmax.f32 %v559_v1, %v575_v41  ;;  %v9204_v2 = vpop.f32.mrf.mxu2 }
 0x27d   :  { %v623_v17 = vmax.f32 %v591_v20, %v607_v42  ;;  %v1141_v42 = vld [vmem:[#allocation2 + $0x6a] sm:$0xff] }
 0x27e   :  { %v510_v23 = vpop.f32.mrf.mxu0  ;;  %v9178_v40 = vld [vmem:[#allocation2 + $0x1cf] sm:$0xff] }
 0x27f   :  { %712 = vst [vmem:[#allocation2 + $0x1e8] sm:$0xff] %v623_v17  ;;  %v511_v50 = vadd.f32 %v8783_v53, %v510_v23  ;;  %1301 = vmatmul.f32.vlgmr.msrb.gmra.mxu3 %v8749_v19  ;;  %2141 = vmatmul.f32.gmra.mxu0 %v623_v17  ;;  %v9180_v46 = vld [vmem:[#allocation2 + $0x1ce] sm:$0xff]  ;;  %v9184_v19 = vpop.f32.mrf.mxu1  ;;  %v9187_v53 = vpop.f32.mrf.mxu3  ;;  %v1142_v23 = vld [vmem:[#allocation2 + $0x82] sm:$0xff] }
 0x280   :  { %840 = vmatmul.f32.gmra.mxu1 %v9178_v40 }
 0x281   :  { %v576_v27 = vmax.f32 %v511_v50, 0.0  ;;  %905 = vmatmul.f32.gmra.mxu2 %v9180_v46  ;;  %v9238_v50 = vld [vmem:[#allocation2 + $0xc7] sm:$0xff] }
 0x283   :  { %v608_v15 = vmax.f32 %v560_v60, %v576_v27 }
 0x285   :  { %v624_v37 = vmax.f32 %v592_v9, %v608_v15  ;;  %v9246_v9 = vld [vmem:[#allocation2 + $0x99] sm:$0xff] }
 0x286   :  { %v1143_v15 = vld [vmem:[#allocation2 + $0x9a] sm:$0xff] }
 0x287   :  { %713 = vst [vmem:[#allocation2 + $0x200] sm:$0xff] %v624_v37  ;;  %1304 = vmatmul.f32.gmra.mxu3 %v8829_v54  ;;  %2144 = vmatmul.f32.gmra.mxu0 %v624_v37  ;;  %v9195_v6 = vpop.f32.mrf.mxu1  ;;  %v1138_v54 = vld [vmem:[#allocation2 + $0x22] sm:$0xff] }
 0x288   :  { %1072 = vmatmul.f32.vlgmr.msrb.gmra.mxu1 %v1023_v55  ;;  %v2513_v37 = vld [vmem:[#allocation2 + $0xdf] sm:$0xff] }
 0x289   :  { %1186 = vmatmul.f32.vlgmr.msrb.gmra.mxu2 %v1137_v29 }
 0x28c   :  { %v9189_v39 = vpop.f32.mrf.mxu0 }
 0x28f   :  { %1307 = vmatmul.f32.gmra.mxu3 %v8839_v26  ;;  %2556 = vmatmul.f32.vlgmr.msra.gmra.mxu0 %v8837_v52  ;;  %v9206_v52 = vld [vmem:[#allocation2 + $0x39] sm:$0xff] }
 0x290   :  { %1075 = vmatmul.f32.gmra.mxu1 %v9197_v25 }
 0x291   :  { %1189 = vmatmul.f32.gmra.mxu2 %v1138_v54 }
 0x292   :  { %v965_v38 = vpop.f32.mrf.mxu3 }
 0x294   :  { %v9199_v59 = vpop.f32.mrf.mxu0 }
 0x295   :  { %v802_v26 = vpop.f32.mrf.mxu1 }
 0x297   :  { %1310 = vmatmul.f32.gmra.mxu3 %v8852_v28  ;;  %2559 = vmatmul.f32.gmra.mxu0 %v8850_v24 }
 0x298   :  { %1078 = vmatmul.f32.gmra.mxu1 %v9206_v52 }
 0x299   :  { %1192 = vmatmul.f32.gmra.mxu2 %v1139_v51  ;;  %v9254_v51 = vld [vmem:[#allocation2 + $0xb1] sm:$0xff] }
 0x29a   :  { %v968_v44 = vpop.f32.mrf.mxu3 }
 0x29b   :  { %v867_v58 = vpop.f32.mrf.mxu2 }
 0x29c   :  { %v9208_v16 = vpop.f32.mrf.mxu0  ;;  %v868_v28 = vadd.f32 %v867_v58, %v802_v26  ;;  %v1144_v58 = vld [vmem:[#allocation2 + $0xb2] sm:$0xff] }
 0x29d   :  { %v805_v62 = vpop.f32.mrf.mxu1 }
 0x29e   :  { %v9213_v49 = vadd.f32 %v965_v38, %v868_v28  ;;  %v2514_v28 = vld [vmem:[#allocation2 + $0xf7] sm:$0xff] }
 0x29f   :  { %1313 = vmatmul.f32.gmra.mxu3 %v8865_v30  ;;  %2562 = vmatmul.f32.gmra.mxu0 %v8863_v7 }
 0x2a0   :  { %1081 = vmatmul.f32.gmra.mxu1 %v9215_v48 }
 0x2a1   :  { %1195 = vmatmul.f32.gmra.mxu2 %v1140_v31 }
 0x2a2   :  { %v971_v24 = vpop.f32.mrf.mxu3 }
 0x2a3   :  { %v870_v30 = vpop.f32.mrf.mxu2 }
 0x2a4   :  { %v9217_v1 = vpop.f32.mrf.mxu0  ;;  %v871_v7 = vadd.f32 %v870_v30, %v805_v62 }
 0x2a5   :  { %v808_v41 = vpop.f32.mrf.mxu1 }
 0x2a6   :  { %v9222_v20 = vadd.f32 %v968_v44, %v871_v7  ;;  %v1031_v7 = vld [vmem:[#allocation2 + $0x129] sm:$0xff] }
 0x2a7   :  { %1316 = vmatmul.f32.gmra.mxu3 %v8878_v32  ;;  %2565 = vmatmul.f32.gmra.mxu0 %v8876_v47 }
 0x2a8   :  { %1084 = vmatmul.f32.gmra.mxu1 %v9224_v13 }
 0x2a9   :  { %1198 = vmatmul.f32.gmra.mxu2 %v1141_v42  ;;  %v6869_v42 = vld [vmem:[%s14838_s3 + $0x468] sm:$0xff] }
 0x2aa   :  { %v974_v33 = vpop.f32.mrf.mxu3 }
 0x2ab   :  { %v873_v32 = vpop.f32.mrf.mxu2 }
 0x2ac   :  { %v9227_v4 = vpop.f32.mrf.mxu0  ;;  %v874_v47 = vadd.f32 %v873_v32, %v808_v41  ;;  %v1145_v41 = vld [vmem:[#allocation2 + $0x12a] sm:$0xff] }
 0x2ad   :  { %v811_v36 = vpop.f32.mrf.mxu1 }
 0x2ae   :  { %v9231_v17 = vadd.f32 %v971_v24, %v874_v47  ;;  %v6870_v24 = vld [vmem:[%s14838_s3 + $0x470] sm:$0xff]  ;;  %v6839_v47 = vld [vmem:[%s14838_s3 + $0x378] sm:$0xff] }
 0x2af   :  { %1319 = vmatmul.f32.gmra.mxu3 %v8892_v61  ;;  %2568 = vmatmul.f32.gmra.mxu0 %v8890_v34 }
 0x2b0   :  { %1087 = vmatmul.f32.gmra.mxu1 %v9233_v18 }
 0x2b1   :  { %1201 = vmatmul.f32.gmra.mxu2 %v1142_v23  ;;  %1399 = vmatpush.msra.mxu1 %v6839_v47  ;;  %v6867_v23 = vld [vmem:[%s14838_s3 + $0x458] sm:$0xff]  ;;  %v6864_v47 = vld [vmem:[%s14838_s3 + $0x440] sm:$0xff] }
 0x2b2   :  { %v977_v63 = vpop.f32.mrf.mxu3 }
 0x2b3   :  { %v876_v34 = vpop.f32.mrf.mxu2 }
 0x2b4   :  { %v9240_v43 = vpop.f32.mrf.mxu0  ;;  %v877_v61 = vadd.f32 %v876_v34, %v811_v36  ;;  %v6855_v36 = vld [vmem:[%s14838_s3 + $0x3f8] sm:$0xff] }
 0x2b5   :  { %v814_v14 = vpop.f32.mrf.mxu1  ;;  %1513 = vmatpush.msra.mxu2 %v6855_v36 }
 0x2b6   :  { %v9244_v27 = vadd.f32 %v974_v33, %v877_v61  ;;  %v6838_v61 = vld [vmem:[%s14838_s3 + $0x370] sm:$0xff] }
 0x2b7   :  { %1322 = vmatmul.f32.gmra.mxu3 %v9236_v8  ;;  %2571 = vmatmul.f32.gmra.mxu0 %v9238_v50 }
 0x2b8   :  { %1090 = vmatmul.f32.gmra.mxu1 %v9246_v9 }
 0x2b9   :  { %1204 = vmatmul.f32.gmra.mxu2 %v1143_v15  ;;  %v9293_v15 = vld [vmem:[#allocation2 + $0x141] sm:$0xff]  ;;  %1400 = vmatpush.msra.mxu1 %v6838_v61 }
 0x2ba   :  { %v980_v60 = vpop.f32.mrf.mxu3 }
 0x2bb   :  { %v879_v55 = vpop.f32.mrf.mxu2 }
 0x2bc   :  { %v880_v29 = vadd.f32 %v879_v55, %v814_v14  ;;  %v9250_v54 = vpop.f32.mrf.mxu0  ;;  %v6854_v14 = vld [vmem:[%s14838_s3 + $0x3f0] sm:$0xff] }
 0x2bd   :  { %v817_v38 = vpop.f32.mrf.mxu1  ;;  %1514 = vmatpush.msra.mxu2 %v6854_v14  ;;  %v6832_v14 = vld [vmem:[%s14838_s3 + $0x340] sm:$0xff] }
 0x2be   :  { %v9252_v44 = vadd.f32 %v977_v63, %v880_v29  ;;  %v6868_v63 = vld [vmem:[%s14838_s3 + $0x460] sm:$0xff]  ;;  %v6837_v29 = vld [vmem:[%s14838_s3 + $0x368] sm:$0xff] }
 0x2bf   :  { %1325 = vmatmul.f32.gmra.mxu3 %v8947_v21  ;;  %2574 = vmatmul.f32.gmra.mxu0 %v2513_v37  ;;  %v6871_v21 = vld [vmem:[%s14838_s3 + $0x478] sm:$0xff]  ;;  %v1146_v37 = vld [vmem:[#allocation2 + $0x142] sm:$0xff] }
 0x2c0   :  { %1093 = vmatmul.f32.gmra.mxu1 %v9254_v51  ;;  %1627 = vmatpush.msra.mxu3 %v6871_v21  ;;  %v6852_v21 = vld [vmem:[%s14838_s3 + $0x3e0] sm:$0xff] }
 0x2c1   :  { %1207 = vmatmul.f32.gmra.mxu2 %v1144_v58  ;;  %1401 = vmatpush.msra.mxu1 %v6837_v29  ;;  %v6863_v29 = vld [vmem:[%s14838_s3 + $0x438] sm:$0xff] }
 0x2c2   :  { %v983_v26 = vpop.f32.mrf.mxu3  ;;  %1628 = vmatpush.msra.mxu3 %v6870_v24  ;;  %v6851_v24 = vld [vmem:[%s14838_s3 + $0x3d8] sm:$0xff] }
 0x2c3   :  { %v882_v62 = vpop.f32.mrf.mxu2 }
 0x2c4   :  { %v883_v31 = vadd.f32 %v882_v62, %v817_v38  ;;  %1629 = vmatpush.msra.mxu3 %v6869_v42  ;;  %v6853_v38 = vld [vmem:[%s14838_s3 + $0x3e8] sm:$0xff]  ;;  %v6850_v42 = vld [vmem:[%s14838_s3 + $0x3d0] sm:$0xff] }
 0x2c5   :  { %v820_v30 = vpop.f32.mrf.mxu1  ;;  %1515 = vmatpush.msra.mxu2 %v6853_v38  ;;  %v7061_v38 = vld [vmem:[%s14838_s3 + $0xa68] sm:$0xff] }
 0x2c6   :  { %v9269_v32 = vadd.f32 %v980_v60, %v883_v31  ;;  %1630 = vmatpush.msra.mxu3 %v6868_v63  ;;  %v6865_v31 = vld [vmem:[%s14838_s3 + $0x448] sm:$0xff] }
 0x2c7   :  { %1328 = vmatmul.f32.gmra.mxu3 %v8993_v35  ;;  %2577 = vmatmul.f32.gmra.mxu0 %v2514_v28  ;;  %v9271_v35 = vpop.f32.mrf.mxu0  ;;  %v6836_v28 = vld [vmem:[%s14838_s3 + $0x360] sm:$0xff] }
 0x2c8   :  { %1096 = vmatmul.f32.gmra.mxu1 %v1031_v7  ;;  %1631 = vmatpush.msra.mxu3 %v6867_v23  ;;  %v6833_v23 = vld [vmem:[%s14838_s3 + $0x348] sm:$0xff] }
 0x2c9   :  { %1210 = vmatmul.f32.gmra.mxu2 %v1145_v41  ;;  %1402 = vmatpush.msra.mxu1 %v6836_v28  ;;  %v6834_v41 = vld [vmem:[%s14838_s3 + $0x350] sm:$0xff] }
 0x2ca   :  { %v9264_v33 = vpop.f32.mrf.mxu3  ;;  %1516 = vmatpush.msra.mxu2 %v6852_v21  ;;  %v6862_v21 = vld [vmem:[%s14838_s3 + $0x430] sm:$0xff] }
 0x2cb   :  { %v885_v34 = vpop.f32.mrf.mxu2 }
 0x2cc   :  { %v886_v60 = vadd.f32 %v885_v34, %v820_v30  ;;  %v7063_v30 = vld [vmem:[%s14838_s3 + $0xa78] sm:$0xff]  ;;  %1517 = vmatpush.msra.mxu2 %v6851_v24  ;;  %v6849_v34 = vld [vmem:[%s14838_s3 + $0x3c8] sm:$0xff]  ;;  %v6830_v24 = vld [vmem:[%s14838_s3 + $0x330] sm:$0xff] }
 0x2cd   :  { %2997 = vmatpush.msrb.mxu0 %v7063_v30 }
 0x2ce   :  { %v9306_v58 = vadd.f32 %v983_v26, %v886_v60  ;;  %v6835_v26 = vld [vmem:[%s14838_s3 + $0x358] sm:$0xff]  ;;  %1518 = vmatpush.msra.mxu2 %v6850_v42  ;;  %v6848_v60 = vld [vmem:[%s14838_s3 + $0x3c0] sm:$0xff]  ;;  %v6845_v42 = vld [vmem:[%s14838_s3 + $0x3a8] sm:$0xff] }
 0x2cf   :  { %1331 = vmatmul.f32.gmra.mxu3 %v9044_v3  ;;  %2580 = vmatmul.f32.gmra.mxu0 %v9042_v45  ;;  %v6866_v45 = vld [vmem:[%s14838_s3 + $0x450] sm:$0xff]  ;;  %v823_v3 = vpop.f32.mrf.mxu1  ;;  %v9315_v62 = vpop.f32.mrf.mxu0 }
 0x2d0   :  { %1632 = vmatpush.msra.mxu3 %v6866_v45  ;;  %1099 = vmatmul.f32.gmra.mxu1 %v9293_v15  ;;  %v9360_v45 = vld [vmem:[#allocation2 + $0x159] sm:$0xff] }
 0x2d1   :  { %1213 = vmatmul.f32.gmra.mxu2 %v1146_v37  ;;  %1403 = vmatpush.msra.mxu1 %v6835_v26  ;;  %v6847_v37 = vld [vmem:[%s14838_s3 + $0x3b8] sm:$0xff] }
 0x2d2   :  { %v9298_v55 = vpop.f32.mrf.mxu3  ;;  %1633 = vmatpush.msra.mxu3 %v6865_v31  ;;  %1519 = vmatpush.msra.mxu2 %v6849_v34  ;;  %v6846_v31 = vld [vmem:[%s14838_s3 + $0x3b0] sm:$0xff]  ;;  %v6860_v34 = vld [vmem:[%s14838_s3 + $0x420] sm:$0xff] }
 0x2d3   :  { %1404 = vmatpush.msra.mxu1 %v6834_v41  ;;  %v6829_v41 = vld [vmem:[%s14838_s3 + $0x328] sm:$0xff] }
 0x2d4   :  { %v888_v7 = vpop.f32.mrf.mxu2  ;;  %1634 = vmatpush.msra.mxu3 %v6864_v47  ;;  %1520 = vmatpush.msra.mxu2 %v6848_v60  ;;  %v7059_v60 = vld [vmem:[%s14838_s3 + $0xa58] sm:$0xff] }
 0x2d5   :  { %v889_v36 = vadd.f32 %v888_v7, %v823_v3  ;;  %v1147_v3 = vld [vmem:[#allocation2 + $0x15a] sm:$0xff]  ;;  %1405 = vmatpush.msra.mxu1 %v6833_v23  ;;  %v1148_v23 = vld [vmem:[#allocation2 + $0x172] sm:$0xff] }
 0x2d6   :  { %1521 = vmatpush.msra.mxu2 %v6847_v37  ;;  %1635 = vmatpush.msra.mxu3 %v6863_v29  ;;  %v6826_v29 = vld [vmem:[%s14838_s3 + $0x310] sm:$0xff] }
 0x2d7   :  { %1334 = vmatmul.f32.gmra.mxu3 %v9096_v56  ;;  %2583 = vmatmul.f32.gmra.mxu0 %v9094_v5  ;;  %v7062_v5 = vld [vmem:[%s14838_s3 + $0xa70] sm:$0xff]  ;;  %v826_v56 = vpop.f32.mrf.mxu1  ;;  %v9352_v61 = vadd.f32 %v9264_v33, %v889_v36  ;;  %v6831_v33 = vld [vmem:[%s14838_s3 + $0x338] sm:$0xff]  ;;  %v9375_v28 = vpop.f32.mrf.mxu0  ;;  %v6861_v36 = vld [vmem:[%s14838_s3 + $0x428] sm:$0xff] }
 0x2d8   :  { %2998 = vmatpush.msrb.mxu0 %v7062_v5  ;;  %1102 = vmatmul.f32.gmra.mxu1 %v9360_v45  ;;  %v6828_v5 = vld [vmem:[%s14838_s3 + $0x320] sm:$0xff] }
 0x2d9   :  { %1216 = vmatmul.f32.gmra.mxu2 %v1147_v3  ;;  %1406 = vmatpush.msra.mxu1 %v6832_v14  ;;  %v6827_v14 = vld [vmem:[%s14838_s3 + $0x318] sm:$0xff] }
 0x2da   :  { %v9343_v63 = vpop.f32.mrf.mxu3  ;;  %2999 = vmatpush.msrb.mxu0 %v7061_v38  ;;  %1522 = vmatpush.msra.mxu2 %v6846_v31  ;;  %v6843_v3 = vld [vmem:[%s14838_s3 + $0x398] sm:$0xff] }
 0x2db   :  { %1407 = vmatpush.msra.mxu1 %v6831_v33  ;;  %1636 = vmatpush.msra.mxu3 %v6862_v21  ;;  %v6859_v33 = vld [vmem:[%s14838_s3 + $0x418] sm:$0xff]  ;;  %v6842_v21 = vld [vmem:[%s14838_s3 + $0x390] sm:$0xff] }
 0x2dc   :  { %v891_v26 = vpop.f32.mrf.mxu2  ;;  %1523 = vmatpush.msra.mxu2 %v6845_v42  ;;  %v1149_v42 = vld [vmem:[#allocation2 + $0x18a] sm:$0xff] }
 0x2dd   :  { %1408 = vmatpush.msra.mxu1 %v6830_v24  ;;  %1637 = vmatpush.msra.mxu3 %v6861_v36  ;;  %v7057_v36 = vld [vmem:[%s14838_s3 + $0xa48] sm:$0xff] }
 0x2df   :  { %1337 = vmatmul.f32.gmra.mxu3 %v9130_v12  ;;  %2586 = vmatmul.f32.gmra.mxu0 %v9128_v22  ;;  %v7060_v12 = vld [vmem:[%s14838_s3 + $0xa60] sm:$0xff]  ;;  %v892_v22 = vadd.f32 %v891_v26, %v826_v56  ;;  %v829_v30 = vpop.f32.mrf.mxu1  ;;  %v9408_v56 = vld [vmem:[#allocation2 + $0x171] sm:$0xff]  ;;  %v9437_v38 = vpop.f32.mrf.mxu0 }
 0x2e0   :  { %3000 = vmatpush.msrb.mxu0 %v7060_v12  ;;  %1409 = vmatpush.msra.mxu1 %v6829_v41  ;;  %14847 = vst [vmem:[#allocation7_spill] sm:$0xff] %v9437_v38  ;;  %v6858_v26 = vld [vmem:[%s14838_s3 + $0x410] sm:$0xff] }
 0x2e1   :  { %v9400_v47 = vadd.f32 %v9298_v55, %v892_v22  ;;  %1105 = vmatmul.f32.gmra.mxu1 %v9408_v56  ;;  %1219 = vmatmul.f32.gmra.mxu2 %v1148_v23  ;;  %v6844_v55 = vld [vmem:[%s14838_s3 + $0x3a0] sm:$0xff]  ;;  %v6825_v22 = vld [vmem:[%s14838_s3 + $0x308] sm:$0xff] }
 0x2e2   :  { %v9391_v7 = vpop.f32.mrf.mxu3  ;;  %1410 = vmatpush.msra.mxu1 %v6828_v5  ;;  %1524 = vmatpush.msra.mxu2 %v6844_v55  ;;  %v9454_v41 = vld [vmem:[#allocation2 + $0x189] sm:$0xff]  ;;  %v6824_v5 = vld [vmem:[%s14838_s3 + $0x300] sm:$0xff] }
 0x2e3   :  { %1638 = vmatpush.msra.mxu3 %v6860_v34  ;;  %3001 = vmatpush.msrb.mxu0 %v7059_v60  ;;  %v6840_v23 = vld [vmem:[%s14838_s3 + $0x380] sm:$0xff]  ;;  %v2979_v38 = vld [vmem:[#allocation2 + $0x22e] sm:$0xff] }
 0x2e4   :  { %v894_v37 = vpop.f32.mrf.mxu2  ;;  %1411 = vmatpush.msra.mxu1 %v6827_v14  ;;  %1525 = vmatpush.msra.mxu2 %v6843_v3  ;;  %v6856_v55 = vld [vmem:[%s14838_s3 + $0x400] sm:$0xff] }
 0x2e5   :  { %1639 = vmatpush.msra.mxu3 %v6859_v33  ;;  %v7056_v34 = vld [vmem:[%s14838_s3 + $0xa40] sm:$0xff] }
 0x2e6   :  { %1412 = vmatpush.msra.mxu1 %v6826_v29  ;;  %1526 = vmatpush.msra.mxu2 %v6842_v21  ;;  %v7054_v29 = vld [vmem:[%s14838_s3 + $0xa30] sm:$0xff]  ;;  %v7053_v21 = vld [vmem:[%s14838_s3 + $0xa28] sm:$0xff] }
 0x2e7   :  { %1340 = vmatmul.f32.gmra.mxu3 %v9155_v11  ;;  %2589 = vmatmul.f32.gmra.mxu0 %v9153_v10  ;;  %v7058_v11 = vld [vmem:[%s14838_s3 + $0xa50] sm:$0xff]  ;;  %v895_v10 = vadd.f32 %v894_v37, %v829_v30  ;;  %v832_v24 = vpop.f32.mrf.mxu1  ;;  %v6841_v30 = vld [vmem:[%s14838_s3 + $0x388] sm:$0xff]  ;;  %v9483_v37 = vpop.f32.mrf.mxu0 }
 0x2e8   :  { %3002 = vmatpush.msrb.mxu0 %v7058_v11  ;;  %1640 = vmatpush.msra.mxu3 %v6858_v26  ;;  %14848 = vst [vmem:[#allocation8_spill] sm:$0xff] %v9483_v37  ;;  %v9488_v11 = vld [vmem:[#allocation2 + $0x1a1] sm:$0xff] }
 0x2e9   :  { %v9446_v12 = vadd.f32 %v9343_v63, %v895_v10  ;;  %1108 = vmatmul.f32.gmra.mxu1 %v9454_v41  ;;  %1222 = vmatmul.f32.gmra.mxu2 %v1149_v42  ;;  %v6857_v63 = vld [vmem:[%s14838_s3 + $0x408] sm:$0xff]  ;;  %v7051_v42 = vld [vmem:[%s14838_s3 + $0xa18] sm:$0xff] }
 0x2ea   :  { %v998_v31 = vpop.f32.mrf.mxu3  ;;  %1413 = vmatpush.msra.mxu1 %v6825_v22  ;;  %1527 = vmatpush.msra.mxu2 %v6841_v30  ;;  %v1150_v10 = vld [vmem:[#allocation2 + $0x1a2] sm:$0xff] }
 0x2eb   :  { %1641 = vmatpush.msra.mxu3 %v6857_v63  ;;  %3003 = vmatpush.msrb.mxu0 %v7057_v36  ;;  %v9494_v26 = vld [vmem:[#allocation2 + $0x1e6] sm:$0xff] }
 0x2ec   :  { %v897_v14 = vpop.f32.mrf.mxu2  ;;  %1414 = vmatpush.msra.mxu1 %v6824_v5  ;;  %1528 = vmatpush.msra.mxu2 %v6840_v23  ;;  %v7050_v23 = vld [vmem:[%s14838_s3 + $0xa10] sm:$0xff] }
 0x2ed   :  { %v898_v60 = vadd.f32 %v897_v14, %v832_v24  ;;  %1642 = vmatpush.msra.mxu3 %v6856_v55  ;;  %3004 = vmatpush.msrb.mxu0 %v7056_v34  ;;  %v7052_v24 = vld [vmem:[%s14838_s3 + $0xa20] sm:$0xff] }
 0x2ee   :  { %v9511_v55 = vld [vmem:[#allocation2 + $0x1b9] sm:$0xff] }
 0x2ef   :  { %1343 = vmatmul.f32.gmra.mxu3 %v9180_v46  ;;  %2592 = vmatmul.f32.gmra.mxu0 %v9178_v40  ;;  %v7055_v46 = vld [vmem:[%s14838_s3 + $0xa38] sm:$0xff]  ;;  %v835_v3 = vpop.f32.mrf.mxu1  ;;  %v9481_v33 = vadd.f32 %v9391_v7, %v898_v60  ;;  %v9496_v7 = vld [vmem:[#allocation2 + $0x1e7] sm:$0xff]  ;;  %v9513_v14 = vpop.f32.mrf.mxu0 }
 0x2f0   :  { %3005 = vmatpush.msrb.mxu0 %v7055_v46  ;;  %v1151_v34 = vld [vmem:[#allocation2 + $0x1ba] sm:$0xff]  ;;  %14849 = vst [vmem:[#allocation9_spill] sm:$0xff] %v9513_v14  ;;  %v7049_v60 = vld [vmem:[%s14838_s3 + $0xa08] sm:$0xff] }
 0x2f1   :  { %1111 = vmatmul.f32.gmra.mxu1 %v9488_v11  ;;  %1225 = vmatmul.f32.gmra.mxu2 %v1150_v10  ;;  %v2521_v46 = vld [vmem:[#allocation2 + $0x1ff] sm:$0xff]  ;;  %v2971_v14 = vld [vmem:[#allocation2 + $0x10e] sm:$0xff] }
 0x2f2   :  { %v1001_v40 = vpop.f32.mrf.mxu3  ;;  %3006 = vmatpush.msrb.mxu0 %v7054_v29 }
 0x2f4   :  { %v900_v22 = vpop.f32.mrf.mxu2  ;;  %3007 = vmatpush.msrb.mxu0 %v7053_v21 }
 0x2f5   :  { %v901_v30 = vadd.f32 %v900_v22, %v835_v3  ;;  %v9525_v22 = vld [vmem:[#allocation2 + $0x1d1] sm:$0xff] }
 0x2f6   :  { %3008 = vmatpush.msrb.mxu0 %v7052_v24 }
 0x2f7   :  { %1346 = vmatmul.f32.gmra.mxu3 %v9494_v26  ;;  %2595 = vmatmul.f32.gmra.mxu0 %v9496_v7  ;;  %v838_v63 = vpop.f32.mrf.mxu1  ;;  %v9506_v5 = vadd.f32 %v998_v31, %v901_v30  ;;  %v7048_v31 = vld [vmem:[%s14838_s3 + $0xa00] sm:$0xff]  ;;  %v1152_v30 = vld [vmem:[#allocation2 + $0x1d2] sm:$0xff] }
 0x2f8   :  { %3009 = vmatpush.msrb.mxu0 %v7051_v42  ;;  %v2522_v42 = vld [vmem:[#allocation2 + $0x217] sm:$0xff] }
 0x2f9   :  { %1114 = vmatmul.f32.gmra.mxu1 %v9511_v55  ;;  %1228 = vmatmul.f32.gmra.mxu2 %v1151_v34 }
 0x2fa   :  { %v1004_v36 = vpop.f32.mrf.mxu3  ;;  %3010 = vmatpush.msrb.mxu0 %v7050_v23 }
 0x2fc   :  { %v903_v3 = vpop.f32.mrf.mxu2  ;;  %3011 = vmatpush.msrb.mxu0 %v7049_v60 }
 0x2fd   :  { %v904_v29 = vadd.f32 %v903_v3, %v838_v63  ;;  %v862_v63 = vadd.f32 %v9191_v57, %v9184_v19  ;;  %v865_v57 = vadd.f32 %v9204_v2, %v9195_v6 }
 0x2fe   :  { %3012 = vmatpush.msrb.mxu0 %v7048_v31 }
 0x2ff   :  { %1643 = vmatmul.f32.vlgmr.msra.gmra.mxu3 %v9197_v25  ;;  %2598 = vmatmul.f32.gmra.mxu0 %v2521_v46  ;;  %v841_v10 = vpop.f32.mrf.mxu1  ;;  %v9523_v24 = vadd.f32 %v1001_v40, %v904_v29  ;;  %v9528_v25 = vpop.f32.mrf.mxu0  ;;  %v1366_v40 = vld [vmem:[#allocation2 + $0x1f] sm:$0xff]  ;;  %v1007_v3 = vadd.f32 %v9171_v0, %v862_v63  ;;  %v9549_v63 = vld [vmem:[#allocation2 + $0x37] sm:$0xff] }
 0x300   :  { %14850 = vst [vmem:[#allocation10_spill] sm:$0xff] %v9528_v25  ;;  %v9536_v29 = vld [vmem:[#allocation2] sm:$0xff]  ;;  %v1486_v25 = vld [vmem:[#allocation2 + $0xb0] sm:$0xff] }
 0x301   :  { %1117 = vmatmul.f32.gmra.mxu1 %v9525_v22  ;;  %1231 = vmatmul.f32.gmra.mxu2 %v1152_v30  ;;  %v9539_v30 = vld [vmem:[#allocation2 + $0x66] sm:$0xff] }
 0x302   :  { %v1302_v21 = vpop.f32.mrf.mxu3 }
 0x304   :  { %v906_v23 = vpop.f32.mrf.mxu2 }
 0x305   :  { %v907_v34 = vadd.f32 %v906_v23, %v841_v10 }
 0x307   :  { %1646 = vmatmul.f32.gmra.mxu3 %v9206_v52  ;;  %2601 = vmatmul.f32.gmra.mxu0 %v2522_v42  ;;  %v1073_v60 = vpop.f32.mrf.mxu1  ;;  %v9533_v31 = vadd.f32 %v1004_v36, %v907_v34  ;;  %v9545_v36 = vpop.f32.mrf.mxu0  ;;  %v1481_v34 = vld [vmem:[#allocation2 + $0x38] sm:$0xff] }
 0x308   :  { %v1121_v52 = vadd.f32 %v1073_v60, %v1007_v3  ;;  %14851 = vst [vmem:[#allocation11_spill] sm:$0xff] %v9545_v36  ;;  %v1008_v60 = vadd.f32 %v9187_v53, %v865_v57  ;;  %v1482_v53 = vld [vmem:[#allocation2 + $0x50] sm:$0xff]  ;;  %v1485_v36 = vld [vmem:[#allocation2 + $0x98] sm:$0xff] }
 0x309   :  { %1415 = vmatmul.f32.vlgmr.msra.gmra.mxu1 %v1366_v40  ;;  %1529 = vmatmul.f32.vlgmr.msra.gmra.mxu2 %v9536_v29  ;;  %v9564_v57 = vld [vmem:[#allocation2 + $0x96] sm:$0xff] }
 0x30a   :  { %v1305_v46 = vpop.f32.mrf.mxu3 }
 0x30c   :  { %v1187_v19 = vpop.f32.mrf.mxu2 }
 0x30d   :  { %v1235_v10 = vadd.f32 %v1187_v19, %v1121_v52 }
 0x30f   :  { %1649 = vmatmul.f32.gmra.mxu3 %v9215_v48  ;;  %3013 = vmatmul.f32.vlgmr.msrb.gmra.mxu0 %v9539_v30  ;;  %v1076_v0 = vpop.f32.mrf.mxu1  ;;  %v9547_v23 = vadd.f32 %v1302_v21, %v1235_v10  ;;  %v9553_v48 = vld [vmem:[#allocation2 + $0x7e] sm:$0xff]  ;;  %v9557_v52 = vpop.f32.mrf.mxu0  ;;  %v9561_v10 = vld [vmem:[#allocation2 + $0x4f] sm:$0xff] }
 0x310   :  { %v1122_v40 = vadd.f32 %v1076_v0, %v1008_v60  ;;  %14852 = vst [vmem:[#allocation12_spill] sm:$0xff] %v9557_v52 }
 0x311   :  { %1418 = vmatmul.f32.gmra.mxu1 %v9549_v63  ;;  %1532 = vmatmul.f32.gmra.mxu2 %v1481_v34 }
 0x312   :  { %v1308_v42 = vpop.f32.mrf.mxu3 }
 0x314   :  { %v1190_v6 = vpop.f32.mrf.mxu2 }
 0x315   :  { %v1236_v2 = vadd.f32 %v1190_v6, %v1122_v40  ;;  %v9571_v6 = vld [vmem:[#allocation2 + $0x67] sm:$0xff] }
 0x317   :  { %1652 = vmatmul.f32.gmra.mxu3 %v9224_v13  ;;  %3016 = vmatmul.f32.gmra.mxu0 %v9553_v48  ;;  %v1079_v3 = vpop.f32.mrf.mxu1  ;;  %v9559_v19 = vadd.f32 %v1305_v46, %v1236_v2  ;;  %v1483_v2 = vld [vmem:[#allocation2 + $0x68] sm:$0xff]  ;;  %v9573_v52 = vpop.f32.mrf.mxu0 }
 0x318   :  { %v1123_v13 = vadd.f32 %v1079_v3, %v9213_v49  ;;  %14853 = vst [vmem:[#allocation13_spill] sm:$0xff] %v9573_v52  ;;  %v1484_v52 = vld [vmem:[#allocation2 + $0x80] sm:$0xff] }
 0x319   :  { %1421 = vmatmul.f32.gmra.mxu1 %v9561_v10  ;;  %1535 = vmatmul.f32.gmra.mxu2 %v1482_v53  ;;  %v9576_v53 = vld [vmem:[#allocation2 + $0xae] sm:$0xff] }
 0x31a   :  { %v1311_v21 = vpop.f32.mrf.mxu3 }
 0x31c   :  { %v1193_v0 = vpop.f32.mrf.mxu2 }
 0x31d   :  { %v1237_v34 = vadd.f32 %v1193_v0, %v1123_v13 }
 0x31f   :  { %1655 = vmatmul.f32.gmra.mxu3 %v9233_v18  ;;  %3019 = vmatmul.f32.gmra.mxu0 %v9564_v57  ;;  %v1082_v60 = vpop.f32.mrf.mxu1  ;;  %v9569_v46 = vadd.f32 %v1308_v42, %v1237_v34  ;;  %v9583_v34 = vld [vmem:[#allocation2 + $0x7f] sm:$0xff] }
 0x320   :  { %v1124_v49 = vadd.f32 %v1082_v60, %v9222_v20 }
 0x321   :  { %1424 = vmatmul.f32.gmra.mxu1 %v9571_v6  ;;  %1538 = vmatmul.f32.gmra.mxu2 %v1483_v2  ;;  %v9586_v2 = vpop.f32.mrf.mxu0 }
 0x322   :  { %v1314_v40 = vpop.f32.mrf.mxu3  ;;  %14854 = vst [vmem:[#allocation14_spill] sm:$0xff] %v9586_v2  ;;  %v9596_v2 = vld [vmem:[#allocation2 + $0xde] sm:$0xff] }
 0x324   :  { %v1196_v18 = vpop.f32.mrf.mxu2 }
 0x325   :  { %v1238_v3 = vadd.f32 %v1196_v18, %v1124_v49 }
 0x327   :  { %1658 = vmatmul.f32.gmra.mxu3 %v9246_v9  ;;  %3022 = vmatmul.f32.gmra.mxu0 %v9576_v53  ;;  %v1085_v42 = vpop.f32.mrf.mxu1  ;;  %v9581_v0 = vadd.f32 %v1311_v21, %v1238_v3  ;;  %v9593_v3 = vld [vmem:[#allocation2 + $0x97] sm:$0xff] }
 0x328   :  { %v1125_v20 = vadd.f32 %v1085_v42, %v9231_v17 }
 0x329   :  { %1427 = vmatmul.f32.gmra.mxu1 %v9583_v34  ;;  %1541 = vmatmul.f32.gmra.mxu2 %v1484_v52  ;;  %v1601_v52 = vld [vmem:[#allocation2 + $0xc9] sm:$0xff] }
 0x32a   :  { %v1317_v13 = vpop.f32.mrf.mxu3 }
 0x32c   :  { %v1199_v9 = vpop.f32.mrf.mxu2 }
 0x32d   :  { %v1239_v60 = vadd.f32 %v1199_v9, %v1125_v20 }
 0x32f   :  { %1661 = vmatmul.f32.gmra.mxu3 %v9254_v51  ;;  %3025 = vmatmul.f32.gmra.mxu0 %v9236_v8  ;;  %v1088_v49 = vpop.f32.mrf.mxu1  ;;  %v9591_v21 = vadd.f32 %v1314_v40, %v1239_v60  ;;  %v9600_v51 = vpop.f32.mrf.mxu0  ;;  %v9604_v60 = vld [vmem:[#allocation2 + $0xaf] sm:$0xff] }
 0x330   :  { %v1126_v17 = vadd.f32 %v1088_v49, %v9244_v27  ;;  %14855 = vst [vmem:[#allocation15_spill] sm:$0xff] %v9600_v51 }
 0x331   :  { %1430 = vmatmul.f32.gmra.mxu1 %v9593_v3  ;;  %1544 = vmatmul.f32.gmra.mxu2 %v1485_v36  ;;  %v2970_v36 = vld [vmem:[#allocation2 + $0xf6] sm:$0xff] }
 0x332   :  { %v1320_v18 = vpop.f32.mrf.mxu3 }
 0x334   :  { %v1202_v8 = vpop.f32.mrf.mxu2 }
 0x335   :  { %v1240_v42 = vadd.f32 %v1202_v8, %v1126_v17 }
 0x337   :  { %1664 = vmatmul.f32.gmra.mxu3 %v1601_v52  ;;  %3028 = vmatmul.f32.gmra.mxu0 %v9596_v2  ;;  %v1091_v40 = vpop.f32.mrf.mxu1  ;;  %v9602_v9 = vadd.f32 %v1317_v13, %v1240_v42  ;;  %v9609_v8 = vpop.f32.mrf.mxu0  ;;  %v1487_v42 = vld [vmem:[#allocation2 + $0xc8] sm:$0xff] }
 0x338   :  { %v1127_v27 = vadd.f32 %v1091_v40, %v9252_v44  ;;  %14856 = vst [vmem:[#allocation16_spill] sm:$0xff] %v9609_v8  ;;  %v6919_v44 = vld [vmem:[%s14838_s3 + $0x5f8] sm:$0xff] }
 0x339   :  { %1433 = vmatmul.f32.gmra.mxu1 %v9604_v60  ;;  %1547 = vmatmul.f32.gmra.mxu2 %v1486_v25 }
 0x33a   :  { %v1323_v20 = vpop.f32.mrf.mxu3  ;;  %1969 = vmatpush.msrb.mxu3 %v6919_v44 }
 0x33c   :  { %v1205_v49 = vpop.f32.mrf.mxu2 }
 0x33d   :  { %v1241_v52 = vadd.f32 %v1205_v49, %v1127_v27  ;;  %v1374_v27 = vld [vmem:[#allocation2 + $0x13f] sm:$0xff]  ;;  %v6917_v49 = vld [vmem:[%s14838_s3 + $0x5e8] sm:$0xff] }
 0x33f   :  { %1667 = vmatmul.f32.gmra.mxu3 %v9293_v15  ;;  %3031 = vmatmul.f32.gmra.mxu0 %v2970_v36  ;;  %v1094_v51 = vpop.f32.mrf.mxu1  ;;  %v9611_v13 = vadd.f32 %v1320_v18, %v1241_v52  ;;  %v6918_v18 = vld [vmem:[%s14838_s3 + $0x5f0] sm:$0xff]  ;;  %v6916_v52 = vld [vmem:[%s14838_s3 + $0x5e0] sm:$0xff] }
 0x340   :  { %v1128_v15 = vadd.f32 %v1094_v51, %v9269_v32  ;;  %1970 = vmatpush.msrb.mxu3 %v6918_v18  ;;  %v6903_v51 = vld [vmem:[%s14838_s3 + $0x578] sm:$0xff] }
 0x341   :  { %1436 = vmatmul.f32.gmra.mxu1 %v9238_v50  ;;  %1550 = vmatmul.f32.gmra.mxu2 %v1487_v42 }
 0x342   :  { %v1326_v17 = vpop.f32.mrf.mxu3  ;;  %1971 = vmatpush.msrb.mxu3 %v6917_v49  ;;  %1855 = vmatpush.msrb.mxu2 %v6903_v51  ;;  %v6900_v51 = vld [vmem:[%s14838_s3 + $0x560] sm:$0xff] }
 0x344   :  { %v1208_v25 = vpop.f32.mrf.mxu2  ;;  %1972 = vmatpush.msrb.mxu3 %v6916_v52  ;;  %v9674_v52 = vld [vmem:[#allocation2 + $0x157] sm:$0xff] }
 0x345   :  { %v1242_v40 = vadd.f32 %v1208_v25, %v1128_v15  ;;  %v6886_v15 = vld [vmem:[%s14838_s3 + $0x4f0] sm:$0xff] }
 0x346   :  { %v6902_v25 = vld [vmem:[%s14838_s3 + $0x570] sm:$0xff] }
 0x347   :  { %1670 = vmatmul.f32.gmra.mxu3 %v9360_v45  ;;  %3034 = vmatmul.f32.gmra.mxu0 %v2971_v14  ;;  %v1097_v36 = vpop.f32.mrf.mxu1  ;;  %v9627_v32 = vadd.f32 %v1323_v20, %v1242_v40  ;;  %v9629_v45 = vpop.f32.mrf.mxu0  ;;  %v6887_v14 = vld [vmem:[%s14838_s3 + $0x4f8] sm:$0xff]  ;;  %v9641_v20 = vld [vmem:[#allocation2 + $0x186] sm:$0xff] }
 0x348   :  { %14857 = vst [vmem:[#allocation17_spill] sm:$0xff] %v9629_v45  ;;  %1741 = vmatpush.msrb.mxu1 %v6887_v14  ;;  %v1129_v42 = vadd.f32 %v1097_v36, %v9306_v58  ;;  %1856 = vmatpush.msrb.mxu2 %v6902_v25  ;;  %v6914_v58 = vld [vmem:[%s14838_s3 + $0x5d0] sm:$0xff]  ;;  %v6885_v36 = vld [vmem:[%s14838_s3 + $0x4e8] sm:$0xff]  ;;  %v6884_v14 = vld [vmem:[%s14838_s3 + $0x4e0] sm:$0xff] }
 0x349   :  { %1439 = vmatmul.f32.gmra.mxu1 %v1374_v27  ;;  %1553 = vmatmul.f32.gmra.mxu2 %v9536_v29  ;;  %v6915_v29 = vld [vmem:[%s14838_s3 + $0x5d8] sm:$0xff]  ;;  %v6901_v27 = vld [vmem:[%s14838_s3 + $0x568] sm:$0xff] }
 0x34a   :  { %v9622_v50 = vpop.f32.mrf.mxu3  ;;  %1742 = vmatpush.msrb.mxu1 %v6886_v15  ;;  %1973 = vmatpush.msrb.mxu3 %v6915_v29  ;;  %v6899_v29 = vld [vmem:[%s14838_s3 + $0x558] sm:$0xff]  ;;  %v6913_v15 = vld [vmem:[%s14838_s3 + $0x5c8] sm:$0xff] }
 0x34b   :  { %1857 = vmatpush.msrb.mxu2 %v6901_v27  ;;  %v7127_v25 = vld [vmem:[%s14838_s3 + $0xc78] sm:$0xff]  ;;  %v6882_v27 = vld [vmem:[%s14838_s3 + $0x4d0] sm:$0xff]  ;;  %v6893_v45 = vld [vmem:[%s14838_s3 + $0x528] sm:$0xff] }
 0x34c   :  { %v1211_v44 = vpop.f32.mrf.mxu2  ;;  %1743 = vmatpush.msrb.mxu1 %v6885_v36  ;;  %1974 = vmatpush.msrb.mxu3 %v6914_v58 }
 0x34d   :  { %v1243_v18 = vadd.f32 %v1211_v44, %v1129_v42  ;;  %v1489_v42 = vld [vmem:[#allocation2 + $0x158] sm:$0xff]  ;;  %1858 = vmatpush.msrb.mxu2 %v6900_v51  ;;  %v6912_v51 = vld [vmem:[%s14838_s3 + $0x5c0] sm:$0xff]  ;;  %3453 = vmatpush.msra.mxu0 %v7127_v25 }
 0x34e   :  { %v9683_v44 = vld [vmem:[#allocation2 + $0x19e] sm:$0xff]  ;;  %1744 = vmatpush.msrb.mxu1 %v6884_v14  ;;  %v6898_v14 = vld [vmem:[%s14838_s3 + $0x550] sm:$0xff]  ;;  %1975 = vmatpush.msrb.mxu3 %v6913_v15 }
 0x34f   :  { %1673 = vmatmul.f32.gmra.mxu3 %v9408_v56  ;;  %3037 = vmatmul.f32.gmra.mxu0 %v9641_v20  ;;  %v1100_v56 = vpop.f32.mrf.mxu1  ;;  %v9666_v49 = vadd.f32 %v1326_v17, %v1243_v18  ;;  %v6883_v17 = vld [vmem:[%s14838_s3 + $0x4d8] sm:$0xff]  ;;  %v9691_v18 = vpop.f32.mrf.mxu0  ;;  %v6880_v25 = vld [vmem:[%s14838_s3 + $0x4c0] sm:$0xff] }
 0x350   :  { %14858 = vst [vmem:[#allocation18_spill] sm:$0xff] %v9691_v18  ;;  %v1130_v58 = vadd.f32 %v1100_v56, %v9352_v61  ;;  %1745 = vmatpush.msrb.mxu1 %v6883_v17  ;;  %1859 = vmatpush.msrb.mxu2 %v6899_v29  ;;  %v6881_v17 = vld [vmem:[%s14838_s3 + $0x4c8] sm:$0xff] }
 0x351   :  { %1442 = vmatmul.f32.gmra.mxu1 %v9674_v52  ;;  %1556 = vmatmul.f32.gmra.mxu2 %v1489_v42  ;;  %v6897_v29 = vld [vmem:[%s14838_s3 + $0x548] sm:$0xff] }
 0x352   :  { %v9658_v40 = vpop.f32.mrf.mxu3  ;;  %1746 = vmatpush.msrb.mxu1 %v6882_v27  ;;  %1860 = vmatpush.msrb.mxu2 %v6898_v14  ;;  %v1490_v27 = vld [vmem:[#allocation2 + $0x170] sm:$0xff]  ;;  %v6895_v14 = vld [vmem:[%s14838_s3 + $0x538] sm:$0xff] }
 0x353   :  { %1976 = vmatpush.msrb.mxu3 %v6912_v51  ;;  %v6911_v51 = vld [vmem:[%s14838_s3 + $0x5b8] sm:$0xff] }
 0x354   :  { %v1214_v36 = vpop.f32.mrf.mxu2  ;;  %1747 = vmatpush.msrb.mxu1 %v6881_v17  ;;  %1861 = vmatpush.msrb.mxu2 %v6897_v29  ;;  %v6910_v29 = vld [vmem:[%s14838_s3 + $0x5b0] sm:$0xff] }
 0x355   :  { %v1244_v61 = vadd.f32 %v1214_v36, %v1130_v58  ;;  %v6896_v58 = vld [vmem:[%s14838_s3 + $0x540] sm:$0xff]  ;;  %v9725_v36 = vld [vmem:[#allocation2 + $0x16f] sm:$0xff]  ;;  %1977 = vmatpush.msrb.mxu3 %v6911_v51 }
 0x356   :  { %1748 = vmatpush.msrb.mxu1 %v6880_v25  ;;  %1862 = vmatpush.msrb.mxu2 %v6896_v58  ;;  %v6878_v58 = vld [vmem:[%s14838_s3 + $0x4b0] sm:$0xff]  ;;  %v6909_v51 = vld [vmem:[%s14838_s3 + $0x5a8] sm:$0xff] }
 0x357   :  { %1676 = vmatmul.f32.gmra.mxu3 %v9454_v41  ;;  %3040 = vmatmul.f32.gmra.mxu0 %v9683_v44  ;;  %v7126_v41 = vld [vmem:[%s14838_s3 + $0xc70] sm:$0xff]  ;;  %v1103_v56 = vpop.f32.mrf.mxu1  ;;  %v9717_v15 = vadd.f32 %v9622_v50, %v1244_v61  ;;  %v6879_v50 = vld [vmem:[%s14838_s3 + $0x4b8] sm:$0xff] }
 0x358   :  { %3454 = vmatpush.msra.mxu0 %v7126_v41  ;;  %v9734_v61 = vld [vmem:[#allocation2 + $0x1b6] sm:$0xff]  ;;  %v7125_v41 = vld [vmem:[%s14838_s3 + $0xc68] sm:$0xff]  ;;  %v1131_v17 = vadd.f32 %v1103_v56, %v9400_v47  ;;  %1749 = vmatpush.msrb.mxu1 %v6879_v50  ;;  %v7124_v47 = vld [vmem:[%s14838_s3 + $0xc60] sm:$0xff] }
 0x359   :  { %1445 = vmatmul.f32.gmra.mxu1 %v9725_v36  ;;  %1559 = vmatmul.f32.gmra.mxu2 %v1490_v27  ;;  %v6894_v27 = vld [vmem:[%s14838_s3 + $0x530] sm:$0xff] }
 0x35a   :  { %v9708_v42 = vpop.f32.mrf.mxu3  ;;  %1863 = vmatpush.msrb.mxu2 %v6895_v14  ;;  %3455 = vmatpush.msra.mxu0 %v7125_v41  ;;  %v6877_v14 = vld [vmem:[%s14838_s3 + $0x4a8] sm:$0xff]  ;;  %v6876_v41 = vld [vmem:[%s14838_s3 + $0x4a0] sm:$0xff] }
 0x35b   :  { %1750 = vmatpush.msrb.mxu1 %v6878_v58  ;;  %1978 = vmatpush.msrb.mxu3 %v6910_v29  ;;  %v6908_v29 = vld [vmem:[%s14838_s3 + $0x5a0] sm:$0xff]  ;;  %v9785_v58 = vld [vmem:[#allocation2 + $0x1ce] sm:$0xff] }
 0x35c   :  { %v1217_v25 = vpop.f32.mrf.mxu2  ;;  %1864 = vmatpush.msrb.mxu2 %v6894_v27  ;;  %3456 = vmatpush.msra.mxu0 %v7124_v47  ;;  %v6875_v27 = vld [vmem:[%s14838_s3 + $0x498] sm:$0xff] }
 0x35d   :  { %v1245_v56 = vadd.f32 %v1217_v25, %v1131_v17  ;;  %v9776_v17 = vld [vmem:[#allocation2 + $0x187] sm:$0xff]  ;;  %1751 = vmatpush.msrb.mxu1 %v6877_v14  ;;  %1979 = vmatpush.msrb.mxu3 %v6909_v51  ;;  %v6907_v14 = vld [vmem:[%s14838_s3 + $0x598] sm:$0xff] }
 0x35e   :  { %v1491_v25 = vld [vmem:[#allocation2 + $0x188] sm:$0xff]  ;;  %1865 = vmatpush.msrb.mxu2 %v6893_v45  ;;  %v7123_v45 = vld [vmem:[%s14838_s3 + $0xc58] sm:$0xff] }
 0x35f   :  { %1679 = vmatmul.f32.gmra.mxu3 %v9488_v11  ;;  %3043 = vmatmul.f32.gmra.mxu0 %v9734_v61  ;;  %v9757_v11 = vpop.f32.mrf.mxu0  ;;  %v1106_v18 = vpop.f32.mrf.mxu1  ;;  %v9768_v8 = vadd.f32 %v9658_v40, %v1245_v56  ;;  %v6892_v40 = vld [vmem:[%s14838_s3 + $0x520] sm:$0xff]  ;;  %v6891_v56 = vld [vmem:[%s14838_s3 + $0x518] sm:$0xff] }
 0x360   :  { %14859 = vst [vmem:[#allocation19_spill] sm:$0xff] %v9757_v11  ;;  %1752 = vmatpush.msrb.mxu1 %v6876_v41  ;;  %v1132_v47 = vadd.f32 %v1106_v18, %v9446_v12  ;;  %1866 = vmatpush.msrb.mxu2 %v6892_v40  ;;  %v6874_v41 = vld [vmem:[%s14838_s3 + $0x490] sm:$0xff] }
 0x361   :  { %1448 = vmatmul.f32.gmra.mxu1 %v9776_v17  ;;  %1562 = vmatmul.f32.gmra.mxu2 %v1491_v25  ;;  %v7122_v12 = vld [vmem:[%s14838_s3 + $0xc50] sm:$0xff] }
 0x362   :  { %v9759_v50 = vpop.f32.mrf.mxu3  ;;  %1980 = vmatpush.msrb.mxu3 %v6908_v29  ;;  %1753 = vmatpush.msrb.mxu1 %v6875_v27  ;;  %v6890_v18 = vld [vmem:[%s14838_s3 + $0x510] sm:$0xff]  ;;  %v6873_v27 = vld [vmem:[%s14838_s3 + $0x488] sm:$0xff] }
 0x363   :  { %3457 = vmatpush.msra.mxu0 %v7123_v45  ;;  %v6906_v25 = vld [vmem:[%s14838_s3 + $0x590] sm:$0xff]  ;;  %1867 = vmatpush.msrb.mxu2 %v6891_v56  ;;  %v6889_v45 = vld [vmem:[%s14838_s3 + $0x508] sm:$0xff] }
 0x364   :  { %v1220_v51 = vpop.f32.mrf.mxu2  ;;  %1981 = vmatpush.msrb.mxu3 %v6907_v14  ;;  %1754 = vmatpush.msrb.mxu1 %v6874_v41  ;;  %v7121_v56 = vld [vmem:[%s14838_s3 + $0xc48] sm:$0xff]  ;;  %v6872_v14 = vld [vmem:[%s14838_s3 + $0x480] sm:$0xff] }
 0x365   :  { %3458 = vmatpush.msra.mxu0 %v7122_v12  ;;  %1868 = vmatpush.msrb.mxu2 %v6890_v18  ;;  %v6888_v41 = vld [vmem:[%s14838_s3 + $0x500] sm:$0xff] }
 0x366   :  { %1982 = vmatpush.msrb.mxu3 %v6906_v25  ;;  %1755 = vmatpush.msrb.mxu1 %v6873_v27  ;;  %v7120_v18 = vld [vmem:[%s14838_s3 + $0xc40] sm:$0xff] }
 0x367   :  { %1682 = vmatmul.f32.gmra.mxu3 %v9511_v55  ;;  %3046 = vmatmul.f32.gmra.mxu0 %v9785_v58  ;;  %v1246_v55 = vadd.f32 %v1220_v51, %v1132_v47  ;;  %v1109_v40 = vpop.f32.mrf.mxu1  ;;  %v9814_v11 = vpop.f32.mrf.mxu0  ;;  %v9825_v47 = vld [vmem:[#allocation2 + $0x19f] sm:$0xff] }
 0x368   :  { %14860 = vst [vmem:[#allocation20_spill] sm:$0xff] %v9814_v11  ;;  %v1492_v51 = vld [vmem:[#allocation2 + $0x1a0] sm:$0xff]  ;;  %1869 = vmatpush.msrb.mxu2 %v6889_v45  ;;  %v1133_v12 = vadd.f32 %v1109_v40, %v9481_v33  ;;  %3459 = vmatpush.msra.mxu0 %v7121_v56  ;;  %v7119_v33 = vld [vmem:[%s14838_s3 + $0xc38] sm:$0xff]  ;;  %v7118_v45 = vld [vmem:[%s14838_s3 + $0xc30] sm:$0xff] }
 0x369   :  { %v9817_v37 = vadd.f32 %v9708_v42, %v1246_v55  ;;  %1451 = vmatmul.f32.gmra.mxu1 %v9825_v47  ;;  %1565 = vmatmul.f32.gmra.mxu2 %v1492_v51  ;;  %v6905_v42 = vld [vmem:[%s14838_s3 + $0x588] sm:$0xff]  ;;  %v6904_v55 = vld [vmem:[%s14838_s3 + $0x580] sm:$0xff]  ;;  %v9858_v51 = vld [vmem:[#allocation2 + $0x1b7] sm:$0xff] }
 0x36a   :  { %v1341_v29 = vpop.f32.mrf.mxu3  ;;  %1983 = vmatpush.msrb.mxu3 %v6905_v42  ;;  %1756 = vmatpush.msrb.mxu1 %v6872_v14  ;;  %v1493_v42 = vld [vmem:[#allocation2 + $0x1b8] sm:$0xff]  ;;  %v7117_v14 = vld [vmem:[%s14838_s3 + $0xc28] sm:$0xff] }
 0x36b   :  { %1870 = vmatpush.msrb.mxu2 %v6888_v41  ;;  %3460 = vmatpush.msra.mxu0 %v7120_v18  ;;  %v1609_v41 = vld [vmem:[#allocation2 + $0x1e9] sm:$0xff] }
 0x36c   :  { %v1223_v25 = vpop.f32.mrf.mxu2  ;;  %1984 = vmatpush.msrb.mxu3 %v6904_v55  ;;  %v7116_v55 = vld [vmem:[%s14838_s3 + $0xc20] sm:$0xff] }
 0x36d   :  { %v1247_v27 = vadd.f32 %v1223_v25, %v1133_v12  ;;  %3461 = vmatpush.msra.mxu0 %v7119_v33 }
 0x36f   :  { %1685 = vmatmul.f32.gmra.mxu3 %v9525_v22  ;;  %3049 = vmatmul.f32.gmra.mxu0 %v9494_v26  ;;  %v1112_v22 = vpop.f32.mrf.mxu1  ;;  %v9853_v40 = vadd.f32 %v9759_v50, %v1247_v27  ;;  %v9860_v56 = vpop.f32.mrf.mxu0  ;;  %v9866_v50 = vld [vmem:[#allocation2 + $0x1fe] sm:$0xff] }
 0x370   :  { %14861 = vst [vmem:[#allocation21_spill] sm:$0xff] %v9860_v56  ;;  %3462 = vmatpush.msra.mxu0 %v7118_v45  ;;  %v1134_v12 = vadd.f32 %v1112_v22, %v9506_v5  ;;  %v7115_v27 = vld [vmem:[%s14838_s3 + $0xc18] sm:$0xff]  ;;  %v7114_v5 = vld [vmem:[%s14838_s3 + $0xc10] sm:$0xff] }
 0x371   :  { %1454 = vmatmul.f32.gmra.mxu1 %v9858_v51  ;;  %1568 = vmatmul.f32.gmra.mxu2 %v1493_v42  ;;  %v9881_v22 = vld [vmem:[#allocation2 + $0x1cf] sm:$0xff] }
 0x372   :  { %v1344_v26 = vpop.f32.mrf.mxu3  ;;  %3463 = vmatpush.msra.mxu0 %v7117_v14  ;;  %v2978_v56 = vld [vmem:[#allocation2 + $0x216] sm:$0xff]  ;;  %v7113_v14 = vld [vmem:[%s14838_s3 + $0xc08] sm:$0xff] }
 0x374   :  { %v1226_v18 = vpop.f32.mrf.mxu2  ;;  %3464 = vmatpush.msra.mxu0 %v7116_v55  ;;  %v7112_v55 = vld [vmem:[%s14838_s3 + $0xc00] sm:$0xff] }
 0x375   :  { %v1248_v25 = vadd.f32 %v1226_v18, %v1134_v12 }
 0x376   :  { %3465 = vmatpush.msra.mxu0 %v7115_v27 }
 0x377   :  { %1688 = vmatmul.f32.gmra.mxu3 %v1609_v41  ;;  %3052 = vmatmul.f32.gmra.mxu0 %v9866_v50  ;;  %v1115_v33 = vpop.f32.mrf.mxu1  ;;  %v9876_v45 = vadd.f32 %v1341_v29, %v1248_v25  ;;  %v1494_v41 = vld [vmem:[#allocation2 + $0x1d0] sm:$0xff]  ;;  %v9887_v12 = vpop.f32.mrf.mxu0 }
 0x378   :  { %3466 = vmatpush.msra.mxu0 %v7114_v5  ;;  %14862 = vst [vmem:[#allocation22_spill] sm:$0xff] %v9887_v12  ;;  %v1135_v29 = vadd.f32 %v1115_v33, %v9523_v24  ;;  %v1495_v5 = vld [vmem:[#allocation2 + $0x1e8] sm:$0xff] }
 0x379   :  { %1457 = vmatmul.f32.gmra.mxu1 %v9881_v22  ;;  %1571 = vmatmul.f32.gmra.mxu2 %v1494_v41 }
 0x37a   :  { %v1347_v42 = vpop.f32.mrf.mxu3  ;;  %3467 = vmatpush.msra.mxu0 %v7113_v14 }
 0x37c   :  { %v1229_v18 = vpop.f32.mrf.mxu2  ;;  %3468 = vmatpush.msra.mxu0 %v7112_v55 }
 0x37d   :  { %v1249_v25 = vadd.f32 %v1229_v18, %v1135_v29  ;;  %v1708_v29 = vld [vmem:[#allocation2 + $0x22] sm:$0xff] }
 0x37f   :  { %1985 = vmatmul.f32.vlgmr.msrb.gmra.mxu3 %v9549_v63  ;;  %3055 = vmatmul.f32.gmra.mxu0 %v2978_v56  ;;  %v1118_v27 = vpop.f32.mrf.mxu1  ;;  %v9894_v11 = vadd.f32 %v1344_v26, %v1249_v25  ;;  %v9899_v56 = vpop.f32.mrf.mxu0  ;;  %v1822_v26 = vld [vmem:[#allocation2 + $0x36] sm:$0xff]  ;;  %v9903_v25 = vld [vmem:[#allocation2 + $0x6a] sm:$0xff] }
 0x380   :  { %v1136_v24 = vadd.f32 %v1118_v27, %v9533_v31  ;;  %14863 = vst [vmem:[#allocation23_spill] sm:$0xff] %v9899_v56 }
 0x381   :  { %1460 = vmatmul.f32.gmra.mxu1 %v9496_v7  ;;  %1574 = vmatmul.f32.gmra.mxu2 %v1495_v5 }
 0x382   :  { %v1644_v41 = vpop.f32.mrf.mxu3 }
 0x384   :  { %v1232_v63 = vpop.f32.mrf.mxu2 }
 0x385   :  { %v1250_v33 = vadd.f32 %v1232_v63, %v1136_v24  ;;  %v9914_v63 = vld [vmem:[#allocation2 + $0x4e] sm:$0xff] }
 0x387   :  { %1988 = vmatmul.f32.gmra.mxu3 %v9561_v10  ;;  %3058 = vmatmul.f32.gmra.mxu0 %v2979_v38  ;;  %v1416_v14 = vpop.f32.mrf.mxu1  ;;  %v9901_v55 = vadd.f32 %v1347_v42, %v1250_v33  ;;  %v9908_v5 = vpop.f32.mrf.mxu0  ;;  %v9912_v42 = vld [vmem:[#allocation2 + $0x3a] sm:$0xff] }
 0x388   :  { %v1464_v7 = vadd.f32 %v1416_v14, %v9547_v23  ;;  %14864 = vst [vmem:[#allocation24_spill] sm:$0xff] %v9908_v5  ;;  %v9918_v23 = vld [vmem:[#allocation2 + $0x82] sm:$0xff] }
 0x389   :  { %1757 = vmatmul.f32.vlgmr.msrb.gmra.mxu1 %v1708_v29  ;;  %1871 = vmatmul.f32.vlgmr.msrb.gmra.mxu2 %v1822_v26 }
 0x38a   :  { %v1647_v18 = vpop.f32.mrf.mxu3 }
 0x38c   :  { %v1530_v38 = vpop.f32.mrf.mxu2 }
 0x38d   :  { %v1578_v31 = vadd.f32 %v1530_v38, %v1464_v7  ;;  %v9925_v7 = vld [vmem:[#allocation2 + $0x52] sm:$0xff] }
 0x38f   :  { %1991 = vmatmul.f32.gmra.mxu3 %v9571_v6  ;;  %3469 = vmatmul.f32.vlgmr.msra.gmra.mxu0 %v9903_v25  ;;  %v1419_v10 = vpop.f32.mrf.mxu1  ;;  %v9910_v24 = vadd.f32 %v1644_v41, %v1578_v31  ;;  %v9927_v38 = vpop.f32.mrf.mxu0  ;;  %v9931_v31 = vld [vmem:[#allocation2 + $0x9a] sm:$0xff] }
 0x390   :  { %v1465_v6 = vadd.f32 %v1419_v10, %v9559_v19  ;;  %14865 = vst [vmem:[#allocation25_spill] sm:$0xff] %v9927_v38  ;;  %v3426_v38 = vld [vmem:[#allocation2 + $0xfa] sm:$0xff] }
 0x391   :  { %1760 = vmatmul.f32.gmra.mxu1 %v9912_v42  ;;  %1874 = vmatmul.f32.gmra.mxu2 %v9914_v63 }
 0x392   :  { %v1650_v27 = vpop.f32.mrf.mxu3 }
 0x394   :  { %v1533_v33 = vpop.f32.mrf.mxu2 }
 0x395   :  { %v1579_v14 = vadd.f32 %v1533_v33, %v1465_v6 }
 0x397   :  { %1994 = vmatmul.f32.gmra.mxu3 %v9583_v34  ;;  %3472 = vmatmul.f32.gmra.mxu0 %v9918_v23  ;;  %v1422_v41 = vpop.f32.mrf.mxu1  ;;  %v9923_v26 = vadd.f32 %v1647_v18, %v1579_v14  ;;  %v9940_v14 = vld [vmem:[#allocation2 + $0xb2] sm:$0xff] }
 0x398   :  { %v1466_v19 = vadd.f32 %v1422_v41, %v9569_v46 }
 0x399   :  { %1763 = vmatmul.f32.gmra.mxu1 %v9925_v7  ;;  %1877 = vmatmul.f32.gmra.mxu2 %v9539_v30  ;;  %v9942_v30 = vpop.f32.mrf.mxu0 }
 0x39a   :  { %v1653_v29 = vpop.f32.mrf.mxu3  ;;  %14866 = vst [vmem:[#allocation26_spill] sm:$0xff] %v9942_v30 }
 0x39c   :  { %v1536_v34 = vpop.f32.mrf.mxu2 }
 0x39d   :  { %v1580_v10 = vadd.f32 %v1536_v34, %v1466_v19 }
 0x39f   :  { %1997 = vmatmul.f32.gmra.mxu3 %v9593_v3  ;;  %3475 = vmatmul.f32.gmra.mxu0 %v9931_v31  ;;  %v1425_v18 = vpop.f32.mrf.mxu1  ;;  %v9936_v33 = vadd.f32 %v1650_v27, %v1580_v10  ;;  %v9951_v10 = vld [vmem:[#allocation2 + $0xca] sm:$0xff] }
 0x3a0   :  { %v1467_v46 = vadd.f32 %v1425_v18, %v9581_v0 }
 0x3a1   :  { %1766 = vmatmul.f32.gmra.mxu1 %v9903_v25  ;;  %1880 = vmatmul.f32.gmra.mxu2 %v9553_v48  ;;  %v1942_v48 = vld [vmem:[#allocation2 + $0xc7] sm:$0xff] }
 0x3a2   :  { %v1656_v6 = vpop.f32.mrf.mxu3 }
 0x3a4   :  { %v1539_v3 = vpop.f32.mrf.mxu2 }
 0x3a5   :  { %v1581_v41 = vadd.f32 %v1539_v3, %v1467_v46 }
 0x3a7   :  { %2000 = vmatmul.f32.gmra.mxu3 %v9604_v60  ;;  %3478 = vmatmul.f32.gmra.mxu0 %v9940_v14  ;;  %v1428_v19 = vpop.f32.mrf.mxu1  ;;  %v9947_v27 = vadd.f32 %v1653_v29, %v1581_v41  ;;  %v9955_v60 = vpop.f32.mrf.mxu0  ;;  %v9961_v41 = vld [vmem:[#allocation2 + $0xe2] sm:$0xff] }
 0x3a8   :  { %v1468_v30 = vadd.f32 %v1428_v19, %v9591_v21  ;;  %14867 = vst [vmem:[#allocation27_spill] sm:$0xff] %v9955_v60 }
 0x3a9   :  { %1769 = vmatmul.f32.gmra.mxu1 %v9918_v23  ;;  %1883 = vmatmul.f32.gmra.mxu2 %v9564_v57  ;;  %v1943_v57 = vld [vmem:[#allocation2 + $0xdf] sm:$0xff] }
 0x3aa   :  { %v1659_v34 = vpop.f32.mrf.mxu3 }
 0x3ac   :  { %v1542_v0 = vpop.f32.mrf.mxu2 }
 0x3ad   :  { %v1582_v18 = vadd.f32 %v1542_v0, %v1468_v30 }
 0x3af   :  { %2003 = vmatmul.f32.gmra.mxu3 %v1942_v48  ;;  %3481 = vmatmul.f32.gmra.mxu0 %v9951_v10  ;;  %v1431_v46 = vpop.f32.mrf.mxu1  ;;  %v9957_v29 = vadd.f32 %v1656_v6, %v1582_v18  ;;  %v9965_v0 = vpop.f32.mrf.mxu0  ;;  %v9969_v18 = vld [vmem:[#allocation2 + $0xc6] sm:$0xff] }
 0x3b0   :  { %v1469_v21 = vadd.f32 %v1431_v46, %v9602_v9  ;;  %14868 = vst [vmem:[#allocation28_spill] sm:$0xff] %v9965_v0 }
 0x3b1   :  { %1772 = vmatmul.f32.gmra.mxu1 %v9931_v31  ;;  %1886 = vmatmul.f32.gmra.mxu2 %v9576_v53 }
 0x3b2   :  { %v1662_v3 = vpop.f32.mrf.mxu3 }
 0x3b4   :  { %v1545_v19 = vpop.f32.mrf.mxu2 }
 0x3b5   :  { %v1583_v48 = vadd.f32 %v1545_v19, %v1469_v21 }
 0x3b7   :  { %2006 = vmatmul.f32.gmra.mxu3 %v1943_v57  ;;  %3484 = vmatmul.f32.gmra.mxu0 %v9961_v41  ;;  %v1434_v60 = vpop.f32.mrf.mxu1  ;;  %v9967_v6 = vadd.f32 %v1659_v34, %v1583_v48  ;;  %v3427_v34 = vld [vmem:[#allocation2 + $0x112] sm:$0xff]  ;;  %v9977_v48 = vpop.f32.mrf.mxu0 }
 0x3b8   :  { %v1470_v53 = vadd.f32 %v1434_v60, %v9611_v13 }
 0x3b9   :  { %1775 = vmatmul.f32.gmra.mxu1 %v9940_v14  ;;  %1889 = vmatmul.f32.gmra.mxu2 %v9969_v18 }
 0x3ba   :  { %v1665_v30 = vpop.f32.mrf.mxu3 }
 0x3bc   :  { %v1548_v9 = vpop.f32.mrf.mxu2 }
 0x3bd   :  { %v1584_v46 = vadd.f32 %v1548_v9, %v1470_v53 }
 0x3bf   :  { %2009 = vmatmul.f32.gmra.mxu3 %v9674_v52  ;;  %3487 = vmatmul.f32.gmra.mxu0 %v3426_v38  ;;  %v1437_v57 = vpop.f32.mrf.mxu1  ;;  %v9975_v19 = vadd.f32 %v1662_v3, %v1584_v46  ;;  %v6983_v38 = vld [vmem:[%s14838_s3 + $0x7f8] sm:$0xff]  ;;  %v1716_v3 = vld [vmem:[#allocation2 + $0x142] sm:$0xff]  ;;  %v10000_v46 = vld [vmem:[#allocation2 + $0x18a] sm:$0xff] }
 0x3c0   :  { %v1471_v0 = vadd.f32 %v1437_v57, %v9627_v32  ;;  %2426 = vmatpush.msra.mxu3 %v6983_v38  ;;  %v1830_v32 = vld [vmem:[#allocation2 + $0x156] sm:$0xff]  ;;  %v10002_v57 = vpop.f32.mrf.mxu0 }
 0x3c1   :  { %1778 = vmatmul.f32.gmra.mxu1 %v9951_v10  ;;  %1892 = vmatmul.f32.gmra.mxu2 %v9596_v2  ;;  %v6982_v2 = vld [vmem:[%s14838_s3 + $0x7f0] sm:$0xff] }
 0x3c2   :  { %v1668_v21 = vpop.f32.mrf.mxu3  ;;  %2427 = vmatpush.msra.mxu3 %v6982_v2 }
 0x3c4   :  { %v1551_v13 = vpop.f32.mrf.mxu2 }
 0x3c5   :  { %v1585_v52 = vadd.f32 %v1551_v13, %v1471_v0  ;;  %v6967_v0 = vld [vmem:[%s14838_s3 + $0x778] sm:$0xff]  ;;  %v6980_v13 = vld [vmem:[%s14838_s3 + $0x7e0] sm:$0xff] }
 0x3c6   :  { %2311 = vmatpush.msra.mxu2 %v6967_v0  ;;  %v10025_v0 = vld [vmem:[#allocation2 + $0x16e] sm:$0xff] }
 0x3c7   :  { %2012 = vmatmul.f32.gmra.mxu3 %v9725_v36  ;;  %3490 = vmatmul.f32.gmra.mxu0 %v3427_v34  ;;  %v1440_v60 = vpop.f32.mrf.mxu1  ;;  %v9986_v9 = vadd.f32 %v1665_v30, %v1585_v52  ;;  %v6951_v36 = vld [vmem:[%s14838_s3 + $0x6f8] sm:$0xff]  ;;  %v6981_v30 = vld [vmem:[%s14838_s3 + $0x7e8] sm:$0xff] }
 0x3c8   :  { %2197 = vmatpush.msra.mxu1 %v6951_v36  ;;  %v1472_v34 = vadd.f32 %v1440_v60, %v9666_v49  ;;  %2428 = vmatpush.msra.mxu3 %v6981_v30  ;;  %v6950_v49 = vld [vmem:[%s14838_s3 + $0x6f0] sm:$0xff]  ;;  %v6949_v60 = vld [vmem:[%s14838_s3 + $0x6e8] sm:$0xff]  ;;  %v10023_v36 = vld [vmem:[#allocation2 + $0x15a] sm:$0xff] }
 0x3c9   :  { %1781 = vmatmul.f32.gmra.mxu1 %v1716_v3  ;;  %1895 = vmatmul.f32.gmra.mxu2 %v1830_v32  ;;  %v6948_v30 = vld [vmem:[%s14838_s3 + $0x6e0] sm:$0xff] }
 0x3ca   :  { %v1671_v53 = vpop.f32.mrf.mxu3  ;;  %2429 = vmatpush.msra.mxu3 %v6980_v13  ;;  %2198 = vmatpush.msra.mxu1 %v6950_v49  ;;  %v10038_v13 = vld [vmem:[#allocation2 + $0x1a2] sm:$0xff]  ;;  %v6947_v49 = vld [vmem:[%s14838_s3 + $0x6d8] sm:$0xff] }
 0x3cc   :  { %v1554_v52 = vpop.f32.mrf.mxu2  ;;  %2199 = vmatpush.msra.mxu1 %v6949_v60 }
 0x3cd   :  { %v1586_v38 = vadd.f32 %v1554_v52, %v1472_v34  ;;  %v6964_v34 = vld [vmem:[%s14838_s3 + $0x760] sm:$0xff]  ;;  %v6979_v52 = vld [vmem:[%s14838_s3 + $0x7d8] sm:$0xff] }
 0x3ce   :  { %2200 = vmatpush.msra.mxu1 %v6948_v30  ;;  %2430 = vmatpush.msra.mxu3 %v6979_v52  ;;  %v6946_v30 = vld [vmem:[%s14838_s3 + $0x6d0] sm:$0xff]  ;;  %v6945_v52 = vld [vmem:[%s14838_s3 + $0x6c8] sm:$0xff] }
 0x3cf   :  { %2015 = vmatmul.f32.gmra.mxu3 %v9776_v17  ;;  %3493 = vmatmul.f32.gmra.mxu0 %v10000_v46  ;;  %v1443_v3 = vpop.f32.mrf.mxu1  ;;  %v10012_v32 = vadd.f32 %v1668_v21, %v1586_v38  ;;  %v6966_v17 = vld [vmem:[%s14838_s3 + $0x770] sm:$0xff]  ;;  %v6965_v21 = vld [vmem:[%s14838_s3 + $0x768] sm:$0xff] }
 0x3d0   :  { %2312 = vmatpush.msra.mxu2 %v6966_v17  ;;  %v1473_v38 = vadd.f32 %v1443_v3, %v9717_v15  ;;  %v6963_v17 = vld [vmem:[%s14838_s3 + $0x758] sm:$0xff]  ;;  %v10055_v15 = vpop.f32.mrf.mxu0  ;;  %2201 = vmatpush.msra.mxu1 %v6947_v49  ;;  %v6977_v49 = vld [vmem:[%s14838_s3 + $0x7c8] sm:$0xff] }
 0x3d1   :  { %1784 = vmatmul.f32.gmra.mxu1 %v10023_v36  ;;  %1898 = vmatmul.f32.gmra.mxu2 %v10025_v0  ;;  %14869 = vst [vmem:[#allocation29_spill] sm:$0xff] %v10055_v15 }
 0x3d2   :  { %v10010_v2 = vpop.f32.mrf.mxu3  ;;  %2313 = vmatpush.msra.mxu2 %v6965_v21  ;;  %v6978_v21 = vld [vmem:[%s14838_s3 + $0x7d0] sm:$0xff]  ;;  %2202 = vmatpush.msra.mxu1 %v6946_v30  ;;  %v6943_v30 = vld [vmem:[%s14838_s3 + $0x6b8] sm:$0xff] }
 0x3d3   :  { %2431 = vmatpush.msra.mxu3 %v6978_v21  ;;  %v6960_v21 = vld [vmem:[%s14838_s3 + $0x740] sm:$0xff] }
 0x3d4   :  { %v1557_v60 = vpop.f32.mrf.mxu2  ;;  %2314 = vmatpush.msra.mxu2 %v6964_v34  ;;  %v6962_v34 = vld [vmem:[%s14838_s3 + $0x750] sm:$0xff]  ;;  %2203 = vmatpush.msra.mxu1 %v6945_v52  ;;  %v6959_v52 = vld [vmem:[%s14838_s3 + $0x738] sm:$0xff] }
 0x3d5   :  { %2432 = vmatpush.msra.mxu3 %v6977_v49 }
 0x3d6   :  { %2315 = vmatpush.msra.mxu2 %v6963_v17  ;;  %v6944_v17 = vld [vmem:[%s14838_s3 + $0x6c0] sm:$0xff] }
 0x3d7   :  { %2018 = vmatmul.f32.gmra.mxu3 %v9825_v47  ;;  %3496 = vmatmul.f32.gmra.mxu0 %v10038_v13  ;;  %v1587_v47 = vadd.f32 %v1557_v60, %v1473_v38  ;;  %v1446_v3 = vpop.f32.mrf.mxu1  ;;  %v10070_v38 = vld [vmem:[#allocation2 + $0x172] sm:$0xff]  ;;  %v10083_v60 = vld [vmem:[#allocation2 + $0x1ba] sm:$0xff] }
 0x3d8   :  { %2316 = vmatpush.msra.mxu2 %v6962_v34  ;;  %2204 = vmatpush.msra.mxu1 %v6944_v17  ;;  %v10105_v12 = vpop.f32.mrf.mxu0  ;;  %v6942_v17 = vld [vmem:[%s14838_s3 + $0x6b0] sm:$0xff] }
 0x3d9   :  { %v10059_v56 = vadd.f32 %v1671_v53, %v1587_v47  ;;  %v6961_v53 = vld [vmem:[%s14838_s3 + $0x748] sm:$0xff]  ;;  %1787 = vmatmul.f32.gmra.mxu1 %v10070_v38  ;;  %1901 = vmatmul.f32.gmra.mxu2 %v9641_v20  ;;  %v1474_v47 = vadd.f32 %v1446_v3, %v9768_v8  ;;  %v6976_v20 = vld [vmem:[%s14838_s3 + $0x7c0] sm:$0xff]  ;;  %14870 = vst [vmem:[#allocation30_spill] sm:$0xff] %v10105_v12 }
 0x3da   :  { %v10057_v5 = vpop.f32.mrf.mxu3  ;;  %2317 = vmatpush.msra.mxu2 %v6961_v53  ;;  %2433 = vmatpush.msra.mxu3 %v6976_v20  ;;  %v6957_v20 = vld [vmem:[%s14838_s3 + $0x728] sm:$0xff] }
 0x3db   :  { %2205 = vmatpush.msra.mxu1 %v6943_v30  ;;  %v10127_v30 = vld [vmem:[#allocation2 + $0x1d2] sm:$0xff] }
 0x3dc   :  { %v1560_v34 = vpop.f32.mrf.mxu2  ;;  %2318 = vmatpush.msra.mxu2 %v6960_v21  ;;  %v6958_v21 = vld [vmem:[%s14838_s3 + $0x730] sm:$0xff] }
 0x3dd   :  { %v1588_v8 = vadd.f32 %v1560_v34, %v1474_v47  ;;  %v6974_v47 = vld [vmem:[%s14838_s3 + $0x7b0] sm:$0xff]  ;;  %2206 = vmatpush.msra.mxu1 %v6942_v17  ;;  %v6973_v34 = vld [vmem:[%s14838_s3 + $0x7a8] sm:$0xff]  ;;  %v6972_v17 = vld [vmem:[%s14838_s3 + $0x7a0] sm:$0xff] }
 0x3de   :  { %2319 = vmatpush.msra.mxu2 %v6959_v52 }
 0x3df   :  { %2021 = vmatmul.f32.gmra.mxu3 %v9858_v51  ;;  %3499 = vmatmul.f32.gmra.mxu0 %v10083_v60  ;;  %v6975_v51 = vld [vmem:[%s14838_s3 + $0x7b8] sm:$0xff]  ;;  %v1449_v3 = vpop.f32.mrf.mxu1  ;;  %v10108_v49 = vadd.f32 %v10010_v2, %v1588_v8  ;;  %v6941_v2 = vld [vmem:[%s14838_s3 + $0x6a8] sm:$0xff]  ;;  %v6956_v8 = vld [vmem:[%s14838_s3 + $0x720] sm:$0xff] }
 0x3e0   :  { %2434 = vmatpush.msra.mxu3 %v6975_v51  ;;  %2320 = vmatpush.msra.mxu2 %v6958_v21  ;;  %v1475_v52 = vadd.f32 %v1449_v3, %v9817_v37  ;;  %v6955_v3 = vld [vmem:[%s14838_s3 + $0x718] sm:$0xff] }
 0x3e1   :  { %1790 = vmatmul.f32.gmra.mxu1 %v10000_v46  ;;  %1904 = vmatmul.f32.gmra.mxu2 %v9683_v44  ;;  %v6940_v44 = vld [vmem:[%s14838_s3 + $0x6a0] sm:$0xff] }
 0x3e2   :  { %v10103_v53 = vpop.f32.mrf.mxu3  ;;  %2435 = vmatpush.msra.mxu3 %v6974_v47  ;;  %2207 = vmatpush.msra.mxu1 %v6941_v2 }
 0x3e3   :  { %2321 = vmatpush.msra.mxu2 %v6957_v20  ;;  %v6971_v20 = vld [vmem:[%s14838_s3 + $0x798] sm:$0xff] }
 0x3e4   :  { %v1563_v51 = vpop.f32.mrf.mxu2  ;;  %2436 = vmatpush.msra.mxu3 %v6973_v34  ;;  %2208 = vmatpush.msra.mxu1 %v6940_v44  ;;  %v6938_v34 = vld [vmem:[%s14838_s3 + $0x690] sm:$0xff] }
 0x3e5   :  { %v1589_v37 = vadd.f32 %v1563_v51, %v1475_v52  ;;  %2322 = vmatpush.msra.mxu2 %v6956_v8  ;;  %v10159_v52 = vpop.f32.mrf.mxu0  ;;  %v6970_v44 = vld [vmem:[%s14838_s3 + $0x790] sm:$0xff]  ;;  %v1950_v8 = vld [vmem:[#allocation2 + $0x1e7] sm:$0xff] }
 0x3e6   :  { %2437 = vmatpush.msra.mxu3 %v6972_v17  ;;  %14871 = vst [vmem:[#allocation31_spill] sm:$0xff] %v10159_v52  ;;  %v10169_v51 = vld [vmem:[#allocation2 + $0x1ea] sm:$0xff] }
 0x3e7   :  { %2024 = vmatmul.f32.gmra.mxu3 %v9881_v22  ;;  %3502 = vmatmul.f32.gmra.mxu0 %v10127_v30  ;;  %v6939_v22 = vld [vmem:[%s14838_s3 + $0x698] sm:$0xff]  ;;  %v1452_v21 = vpop.f32.mrf.mxu1  ;;  %v10151_v2 = vadd.f32 %v10057_v5, %v1589_v37  ;;  %v6954_v5 = vld [vmem:[%s14838_s3 + $0x710] sm:$0xff]  ;;  %v6937_v17 = vld [vmem:[%s14838_s3 + $0x688] sm:$0xff] }
 0x3e8   :  { %2209 = vmatpush.msra.mxu1 %v6939_v22  ;;  %2323 = vmatpush.msra.mxu2 %v6955_v3  ;;  %v1476_v37 = vadd.f32 %v1452_v21, %v9853_v40  ;;  %v6969_v22 = vld [vmem:[%s14838_s3 + $0x788] sm:$0xff]  ;;  %v6952_v40 = vld [vmem:[%s14838_s3 + $0x700] sm:$0xff] }
 0x3e9   :  { %1793 = vmatmul.f32.gmra.mxu1 %v10038_v13  ;;  %1907 = vmatmul.f32.gmra.mxu2 %v9734_v61  ;;  %v6953_v61 = vld [vmem:[%s14838_s3 + $0x708] sm:$0xff]  ;;  %v6968_v21 = vld [vmem:[%s14838_s3 + $0x780] sm:$0xff] }
 0x3ea   :  { %v1683_v47 = vpop.f32.mrf.mxu3  ;;  %2438 = vmatpush.msra.mxu3 %v6971_v20  ;;  %2210 = vmatpush.msra.mxu1 %v6938_v34  ;;  %v6936_v20 = vld [vmem:[%s14838_s3 + $0x680] sm:$0xff] }
 0x3eb   :  { %2324 = vmatpush.msra.mxu2 %v6954_v5 }
 0x3ec   :  { %v1566_v3 = vpop.f32.mrf.mxu2  ;;  %2439 = vmatpush.msra.mxu3 %v6970_v44  ;;  %2211 = vmatpush.msra.mxu1 %v6937_v17  ;;  %v1951_v44 = vld [vmem:[#allocation2 + $0x1ff] sm:$0xff] }
 0x3ed   :  { %v1590_v34 = vadd.f32 %v1566_v3, %v1476_v37  ;;  %2325 = vmatpush.msra.mxu2 %v6953_v61  ;;  %v10196_v17 = vld [vmem:[#allocation2 + $0x202] sm:$0xff]  ;;  %v10198_v37 = vpop.f32.mrf.mxu0 }
 0x3ee   :  { %2440 = vmatpush.msra.mxu3 %v6969_v22  ;;  %2212 = vmatpush.msra.mxu1 %v6936_v20  ;;  %14872 = vst [vmem:[#allocation32_spill] sm:$0xff] %v10198_v37 }
 0x3ef   :  { %2027 = vmatmul.f32.gmra.mxu3 %v1950_v8  ;;  %3505 = vmatmul.f32.gmra.mxu0 %v10169_v51  ;;  %v1455_v8 = vpop.f32.mrf.mxu1  ;;  %v10192_v5 = vadd.f32 %v10103_v53, %v1590_v34 }
 0x3f0   :  { %2326 = vmatpush.msra.mxu2 %v6952_v40  ;;  %2441 = vmatpush.msra.mxu3 %v6968_v21  ;;  %v1477_v3 = vadd.f32 %v1455_v8, %v9876_v45  ;;  %v10204_v40 = vld [vmem:[#allocation2 + $0x1e6] sm:$0xff] }
 0x3f1   :  { %1796 = vmatmul.f32.gmra.mxu1 %v10083_v60  ;;  %1910 = vmatmul.f32.gmra.mxu2 %v9785_v58 }
 0x3f2   :  { %v1686_v52 = vpop.f32.mrf.mxu3 }
 0x3f4   :  { %v1569_v61 = vpop.f32.mrf.mxu2 }
 0x3f5   :  { %v1591_v53 = vadd.f32 %v1569_v61, %v1477_v3 }
 0x3f7   :  { %2030 = vmatmul.f32.gmra.mxu3 %v1951_v44  ;;  %3508 = vmatmul.f32.gmra.mxu0 %v10196_v17  ;;  %v1458_v22 = vpop.f32.mrf.mxu1  ;;  %v10202_v34 = vadd.f32 %v1683_v47, %v1591_v53  ;;  %v2394_v47 = vld [vmem:[#allocation2 + $0x66] sm:$0xff] }
 0x3f8   :  { %v1478_v58 = vadd.f32 %v1458_v22, %v9894_v11 }
 0x3f9   :  { %1799 = vmatmul.f32.gmra.mxu1 %v10127_v30  ;;  %1913 = vmatmul.f32.gmra.mxu2 %v10204_v40 }
 0x3fa   :  { %v1689_v20 = vpop.f32.mrf.mxu3 }
 0x3fc   :  { %v1572_v45 = vpop.f32.mrf.mxu2 }
 0x3fd   :  { %v1592_v21 = vadd.f32 %v1572_v45, %v1478_v58 }
 0x3ff   :  { %2442 = vmatmul.f32.vlgmr.msra.gmra.mxu3 %v9914_v63  ;;  %v1461_v8 = vpop.f32.mrf.mxu1  ;;  %v10210_v37 = vadd.f32 %v1686_v52, %v1592_v21  ;;  %v2164_v63 = vld [vmem:[#allocation2 + $0x39] sm:$0xff] }
 0x400   :  { %v1479_v3 = vadd.f32 %v1461_v8, %v9901_v55  ;;  %v2395_v52 = vld [vmem:[#allocation2 + $0x7e] sm:$0xff]  ;;  %v10221_v8 = vld [vmem:[#allocation2 + $0x51] sm:$0xff] }
 0x401   :  { %1802 = vmatmul.f32.gmra.mxu1 %v10169_v51  ;;  %1916 = vmatmul.f32.gmra.mxu2 %v9866_v50 }
 0x402   :  { %v1986_v44 = vpop.f32.mrf.mxu3 }
 0x404   :  { %v1575_v61 = vpop.f32.mrf.mxu2 }
 0x405   :  { %v1593_v53 = vadd.f32 %v1575_v61, %v1479_v3 }
 0x407   :  { %2445 = vmatmul.f32.gmra.mxu3 %v2394_v47  ;;  %v1758_v12 = vpop.f32.mrf.mxu1  ;;  %v10215_v22 = vadd.f32 %v1689_v20, %v1593_v53  ;;  %v2396_v20 = vld [vmem:[#allocation2 + $0x96] sm:$0xff]  ;;  %v10228_v53 = vld [vmem:[#allocation2 + $0x69] sm:$0xff] }
 0x408   :  { %v1806_v58 = vadd.f32 %v1758_v12, %v9910_v24 }
 0x409   :  { %2213 = vmatmul.f32.vlgmr.msra.gmra.mxu1 %v2164_v63  ;;  %2327 = vmatmul.f32.vlgmr.msra.gmra.mxu2 %v9912_v42 }
 0x40a   :  { %v1989_v11 = vpop.f32.mrf.mxu3 }
 0x40c   :  { %v1872_v45 = vpop.f32.mrf.mxu2 }
 0x40d   :  { %v1920_v50 = vadd.f32 %v1872_v45, %v1806_v58 }
 0x40f   :  { %2448 = vmatmul.f32.gmra.mxu3 %v2395_v52  ;;  %v1761_v21 = vpop.f32.mrf.mxu1  ;;  %v10219_v55 = vadd.f32 %v1986_v44, %v1920_v50  ;;  %v2397_v44 = vld [vmem:[#allocation2 + $0xae] sm:$0xff]  ;;  %v10235_v50 = vld [vmem:[#allocation2 + $0x81] sm:$0xff] }
 0x410   :  { %v1807_v47 = vadd.f32 %v1761_v21, %v9923_v26 }
 0x411   :  { %2216 = vmatmul.f32.gmra.mxu1 %v10221_v8  ;;  %2330 = vmatmul.f32.gmra.mxu2 %v9925_v7 }
 0x412   :  { %v1992_v15 = vpop.f32.mrf.mxu3 }
 0x414   :  { %v1875_v42 = vpop.f32.mrf.mxu2 }
 0x415   :  { %v1921_v3 = vadd.f32 %v1875_v42, %v1807_v47  ;;  %v10243_v42 = vld [vmem:[#allocation2 + $0x99] sm:$0xff] }
 0x417   :  { %2451 = vmatmul.f32.gmra.mxu3 %v2396_v20  ;;  %v1764_v12 = vpop.f32.mrf.mxu1  ;;  %v10226_v61 = vadd.f32 %v1989_v11, %v1921_v3 }
 0x418   :  { %v1808_v63 = vadd.f32 %v1764_v12, %v9936_v33 }
 0x419   :  { %2219 = vmatmul.f32.gmra.mxu1 %v10228_v53  ;;  %2333 = vmatmul.f32.gmra.mxu2 %v9903_v25 }
 0x41a   :  { %v1995_v24 = vpop.f32.mrf.mxu3 }
 0x41c   :  { %v1878_v7 = vpop.f32.mrf.mxu2 }
 0x41d   :  { %v1922_v52 = vadd.f32 %v1878_v7, %v1808_v63  ;;  %v10250_v63 = vld [vmem:[#allocation2 + $0xb1] sm:$0xff] }
 0x41f   :  { %2454 = vmatmul.f32.gmra.mxu3 %v2397_v44  ;;  %v1767_v26 = vpop.f32.mrf.mxu1  ;;  %v10233_v45 = vadd.f32 %v1992_v15, %v1922_v52  ;;  %v2399_v15 = vld [vmem:[#allocation2 + $0xde] sm:$0xff] }
 0x420   :  { %v1809_v11 = vadd.f32 %v1767_v26, %v9947_v27 }
 0x421   :  { %2222 = vmatmul.f32.gmra.mxu1 %v10235_v50  ;;  %2336 = vmatmul.f32.gmra.mxu2 %v9918_v23 }
 0x422   :  { %v1998_v58 = vpop.f32.mrf.mxu3 }
 0x424   :  { %v1881_v25 = vpop.f32.mrf.mxu2 }
 0x425   :  { %v1923_v21 = vadd.f32 %v1881_v25, %v1809_v11  ;;  %v10257_v25 = vld [vmem:[#allocation2 + $0xc9] sm:$0xff] }
 0x427   :  { %2457 = vmatmul.f32.gmra.mxu3 %v9969_v18  ;;  %v1770_v33 = vpop.f32.mrf.mxu1  ;;  %v10241_v47 = vadd.f32 %v1995_v24, %v1923_v21  ;;  %v2400_v24 = vld [vmem:[#allocation2 + $0xf6] sm:$0xff] }
 0x428   :  { %v1810_v3 = vadd.f32 %v1770_v33, %v9957_v29 }
 0x429   :  { %2225 = vmatmul.f32.gmra.mxu1 %v10243_v42  ;;  %2339 = vmatmul.f32.gmra.mxu2 %v9931_v31 }
 0x42a   :  { %v2001_v20 = vpop.f32.mrf.mxu3 }
 0x42c   :  { %v1884_v23 = vpop.f32.mrf.mxu2 }
 0x42d   :  { %v1924_v27 = vadd.f32 %v1884_v23, %v1810_v3  ;;  %v10265_v3 = vld [vmem:[#allocation2 + $0xe1] sm:$0xff] }
 0x42f   :  { %2460 = vmatmul.f32.gmra.mxu3 %v2399_v15  ;;  %v1773_v12 = vpop.f32.mrf.mxu1  ;;  %v10248_v44 = vadd.f32 %v1998_v58, %v1924_v27 }
 0x430   :  { %v1811_v7 = vadd.f32 %v1773_v12, %v9967_v6 }
 0x431   :  { %2228 = vmatmul.f32.gmra.mxu1 %v10250_v63  ;;  %2342 = vmatmul.f32.gmra.mxu2 %v9940_v14 }
 0x432   :  { %v2004_v18 = vpop.f32.mrf.mxu3 }
 0x434   :  { %v1887_v31 = vpop.f32.mrf.mxu2 }
 0x435   :  { %v1925_v52 = vadd.f32 %v1887_v31, %v1811_v7  ;;  %v2403_v7 = vld [vmem:[#allocation2 + $0x19e] sm:$0xff] }
 0x437   :  { %2463 = vmatmul.f32.gmra.mxu3 %v2400_v24  ;;  %v1776_v29 = vpop.f32.mrf.mxu1  ;;  %v10255_v11 = vadd.f32 %v2001_v20, %v1925_v52  ;;  %v2402_v20 = vld [vmem:[#allocation2 + $0x186] sm:$0xff]  ;;  %v2172_v24 = vld [vmem:[#allocation2 + $0x159] sm:$0xff] }
 0x438   :  { %v1812_v58 = vadd.f32 %v1776_v29, %v9975_v19 }
 0x439   :  { %2231 = vmatmul.f32.gmra.mxu1 %v10257_v25  ;;  %2345 = vmatmul.f32.gmra.mxu2 %v9951_v10 }
 0x43a   :  { %v2007_v26 = vpop.f32.mrf.mxu3 }
 0x43c   :  { %v1890_v14 = vpop.f32.mrf.mxu2 }
 0x43d   :  { %v1926_v21 = vadd.f32 %v1890_v14, %v1812_v58  ;;  %v7014_v14 = vld [vmem:[%s14838_s3 + $0x8f0] sm:$0xff] }
 0x43f   :  { %2466 = vmatmul.f32.gmra.mxu3 %v10025_v0  ;;  %v1779_v6 = vpop.f32.mrf.mxu1  ;;  %v10263_v15 = vadd.f32 %v2004_v18, %v1926_v21  ;;  %v7015_v18 = vld [vmem:[%s14838_s3 + $0x8f8] sm:$0xff]  ;;  %v7030_v21 = vld [vmem:[%s14838_s3 + $0x970] sm:$0xff] }
 0x440   :  { %v1813_v23 = vadd.f32 %v1779_v6, %v9986_v9  ;;  %v7047_v9 = vld [vmem:[%s14838_s3 + $0x9f8] sm:$0xff]  ;;  %2654 = vmatpush.msrb.mxu1 %v7015_v18 }
 0x441   :  { %2234 = vmatmul.f32.gmra.mxu1 %v10265_v3  ;;  %2348 = vmatmul.f32.gmra.mxu2 %v9961_v41  ;;  %v7031_v41 = vld [vmem:[%s14838_s3 + $0x978] sm:$0xff] }
 0x442   :  { %v2010_v33 = vpop.f32.mrf.mxu3  ;;  %2768 = vmatpush.msrb.mxu2 %v7031_v41  ;;  %2882 = vmatpush.msrb.mxu3 %v7047_v9  ;;  %v10296_v6 = vld [vmem:[#allocation2 + $0x171] sm:$0xff] }
 0x443   :  { %2655 = vmatpush.msrb.mxu1 %v7014_v14  ;;  %v7011_v18 = vld [vmem:[%s14838_s3 + $0x8d8] sm:$0xff]  ;;  %v7026_v14 = vld [vmem:[%s14838_s3 + $0x950] sm:$0xff] }
 0x444   :  { %v1893_v10 = vpop.f32.mrf.mxu2  ;;  %2769 = vmatpush.msrb.mxu2 %v7030_v21  ;;  %v7027_v9 = vld [vmem:[%s14838_s3 + $0x958] sm:$0xff]  ;;  %v7042_v21 = vld [vmem:[%s14838_s3 + $0x9d0] sm:$0xff] }
 0x445   :  { %v1927_v19 = vadd.f32 %v1893_v10, %v1813_v23  ;;  %v7045_v23 = vld [vmem:[%s14838_s3 + $0x9e8] sm:$0xff]  ;;  %v7012_v10 = vld [vmem:[%s14838_s3 + $0x8e0] sm:$0xff] }
 0x447   :  { %2469 = vmatmul.f32.gmra.mxu3 %v2402_v20  ;;  %v1782_v27 = vpop.f32.mrf.mxu1  ;;  %v10270_v12 = vadd.f32 %v2007_v26, %v1927_v19  ;;  %v7029_v20 = vld [vmem:[%s14838_s3 + $0x968] sm:$0xff]  ;;  %v2404_v19 = vld [vmem:[#allocation2 + $0x1b6] sm:$0xff] }
 0x448   :  { %v1814_v31 = vadd.f32 %v1782_v27, %v10012_v32  ;;  %v7046_v32 = vld [vmem:[%s14838_s3 + $0x9f0] sm:$0xff]  ;;  %v7028_v27 = vld [vmem:[%s14838_s3 + $0x960] sm:$0xff]  ;;  %2770 = vmatpush.msrb.mxu2 %v7029_v20  ;;  %v7041_v20 = vld [vmem:[%s14838_s3 + $0x9c8] sm:$0xff] }
 0x449   :  { %2237 = vmatmul.f32.gmra.mxu1 %v2172_v24  ;;  %2351 = vmatmul.f32.gmra.mxu2 %v10023_v36 }
 0x44a   :  { %v2013_v0 = vpop.f32.mrf.mxu3  ;;  %2883 = vmatpush.msrb.mxu3 %v7046_v32  ;;  %2771 = vmatpush.msrb.mxu2 %v7028_v27  ;;  %v10341_v32 = vld [vmem:[#allocation2 + $0x189] sm:$0xff]  ;;  %v7040_v27 = vld [vmem:[%s14838_s3 + $0x9c0] sm:$0xff] }
 0x44c   :  { %v1896_v52 = vpop.f32.mrf.mxu2  ;;  %2884 = vmatpush.msrb.mxu3 %v7045_v23  ;;  %2772 = vmatpush.msrb.mxu2 %v7027_v9  ;;  %v2405_v23 = vld [vmem:[#allocation2 + $0x1ce] sm:$0xff] }
 0x44d   :  { %v1928_v36 = vadd.f32 %v1896_v52, %v1814_v31 }
 0x44e   :  { %2773 = vmatpush.msrb.mxu2 %v7026_v14  ;;  %v10384_v14 = vld [vmem:[#allocation2 + $0x1a1] sm:$0xff] }
 0x44f   :  { %2472 = vmatmul.f32.gmra.mxu3 %v2403_v7  ;;  %v1785_v29 = vpop.f32.mrf.mxu1  ;;  %v10285_v58 = vadd.f32 %v2010_v33, %v1928_v36  ;;  %v7013_v33 = vld [vmem:[%s14838_s3 + $0x8e8] sm:$0xff] }
 0x450   :  { %2656 = vmatpush.msrb.mxu1 %v7013_v33  ;;  %v1815_v24 = vadd.f32 %v1785_v29, %v10059_v56  ;;  %v7043_v56 = vld [vmem:[%s14838_s3 + $0x9d8] sm:$0xff]  ;;  %v7010_v29 = vld [vmem:[%s14838_s3 + $0x8d0] sm:$0xff]  ;;  %v7025_v33 = vld [vmem:[%s14838_s3 + $0x948] sm:$0xff] }
 0x451   :  { %2240 = vmatmul.f32.gmra.mxu1 %v10296_v6  ;;  %2354 = vmatmul.f32.gmra.mxu2 %v10070_v38  ;;  %v7044_v38 = vld [vmem:[%s14838_s3 + $0x9e0] sm:$0xff] }
 0x452   :  { %v10283_v26 = vpop.f32.mrf.mxu3  ;;  %2657 = vmatpush.msrb.mxu1 %v7012_v10  ;;  %2885 = vmatpush.msrb.mxu3 %v7044_v38  ;;  %v7008_v10 = vld [vmem:[%s14838_s3 + $0x8c0] sm:$0xff]  ;;  %v7007_v38 = vld [vmem:[%s14838_s3 + $0x8b8] sm:$0xff] }
 0x453   :  { %2774 = vmatpush.msrb.mxu2 %v7025_v33 }
 0x454   :  { %v1899_v41 = vpop.f32.mrf.mxu2  ;;  %2658 = vmatpush.msrb.mxu1 %v7011_v18  ;;  %2886 = vmatpush.msrb.mxu3 %v7043_v56 }
 0x455   :  { %v1929_v7 = vadd.f32 %v1899_v41, %v1815_v24  ;;  %v7039_v41 = vld [vmem:[%s14838_s3 + $0x9b8] sm:$0xff] }
 0x456   :  { %2659 = vmatpush.msrb.mxu1 %v7010_v29  ;;  %2887 = vmatpush.msrb.mxu3 %v7042_v21  ;;  %v7022_v29 = vld [vmem:[%s14838_s3 + $0x930] sm:$0xff]  ;;  %v7005_v21 = vld [vmem:[%s14838_s3 + $0x8a8] sm:$0xff] }
 0x457   :  { %2475 = vmatmul.f32.gmra.mxu3 %v2404_v19  ;;  %v1788_v31 = vpop.f32.mrf.mxu1  ;;  %v10330_v36 = vadd.f32 %v2013_v0, %v1929_v7  ;;  %v7009_v0 = vld [vmem:[%s14838_s3 + $0x8c8] sm:$0xff] }
 0x458   :  { %v1816_v19 = vadd.f32 %v1788_v31, %v10108_v49  ;;  %2660 = vmatpush.msrb.mxu1 %v7009_v0  ;;  %2888 = vmatpush.msrb.mxu3 %v7041_v20  ;;  %v7023_v49 = vld [vmem:[%s14838_s3 + $0x938] sm:$0xff]  ;;  %v7006_v31 = vld [vmem:[%s14838_s3 + $0x8b0] sm:$0xff]  ;;  %v7021_v0 = vld [vmem:[%s14838_s3 + $0x928] sm:$0xff] }
 0x459   :  { %2243 = vmatmul.f32.gmra.mxu1 %v10341_v32  ;;  %2357 = vmatmul.f32.gmra.mxu2 %v10000_v46  ;;  %v7024_v46 = vld [vmem:[%s14838_s3 + $0x940] sm:$0xff] }
 0x45a   :  { %v10328_v52 = vpop.f32.mrf.mxu3  ;;  %2661 = vmatpush.msrb.mxu1 %v7008_v10  ;;  %2775 = vmatpush.msrb.mxu2 %v7024_v46  ;;  %v7004_v20 = vld [vmem:[%s14838_s3 + $0x8a0] sm:$0xff] }
 0x45b   :  { %2889 = vmatpush.msrb.mxu3 %v7040_v27  ;;  %v7020_v10 = vld [vmem:[%s14838_s3 + $0x920] sm:$0xff] }
 0x45c   :  { %v1902_v24 = vpop.f32.mrf.mxu2  ;;  %2662 = vmatpush.msrb.mxu1 %v7007_v38  ;;  %2776 = vmatpush.msrb.mxu2 %v7023_v49  ;;  %v7019_v38 = vld [vmem:[%s14838_s3 + $0x918] sm:$0xff] }
 0x45d   :  { %v1930_v18 = vadd.f32 %v1902_v24, %v1816_v19  ;;  %2890 = vmatpush.msrb.mxu3 %v7039_v41  ;;  %v10423_v49 = vld [vmem:[#allocation2 + $0x1b9] sm:$0xff]  ;;  %v7002_v41 = vld [vmem:[%s14838_s3 + $0x890] sm:$0xff] }
 0x45e   :  { %2663 = vmatpush.msrb.mxu1 %v7006_v31  ;;  %2777 = vmatpush.msrb.mxu2 %v7022_v29  ;;  %v2407_v31 = vld [vmem:[#allocation2 + $0x1fe] sm:$0xff]  ;;  %v7001_v29 = vld [vmem:[%s14838_s3 + $0x888] sm:$0xff] }
 0x45f   :  { %2478 = vmatmul.f32.gmra.mxu3 %v2405_v23  ;;  %v1791_v9 = vpop.f32.mrf.mxu1  ;;  %v10376_v56 = vadd.f32 %v10283_v26, %v1930_v18  ;;  %v7038_v26 = vld [vmem:[%s14838_s3 + $0x9b0] sm:$0xff]  ;;  %v7035_v18 = vld [vmem:[%s14838_s3 + $0x998] sm:$0xff] }
 0x460   :  { %v1817_v33 = vadd.f32 %v1791_v9, %v10151_v2  ;;  %2891 = vmatpush.msrb.mxu3 %v7038_v26  ;;  %2664 = vmatpush.msrb.mxu1 %v7005_v21  ;;  %v7036_v2 = vld [vmem:[%s14838_s3 + $0x9a0] sm:$0xff]  ;;  %v7034_v9 = vld [vmem:[%s14838_s3 + $0x990] sm:$0xff]  ;;  %v7033_v21 = vld [vmem:[%s14838_s3 + $0x988] sm:$0xff] }
 0x461   :  { %2246 = vmatmul.f32.gmra.mxu1 %v10384_v14  ;;  %2360 = vmatmul.f32.gmra.mxu2 %v10038_v13  ;;  %v7037_v13 = vld [vmem:[%s14838_s3 + $0x9a8] sm:$0xff] }
 0x462   :  { %v10373_v7 = vpop.f32.mrf.mxu3  ;;  %2778 = vmatpush.msrb.mxu2 %v7021_v0  ;;  %2892 = vmatpush.msrb.mxu3 %v7037_v13 }
 0x463   :  { %2665 = vmatpush.msrb.mxu1 %v7004_v20  ;;  %v7032_v20 = vld [vmem:[%s14838_s3 + $0x980] sm:$0xff] }
 0x464   :  { %v1905_v23 = vpop.f32.mrf.mxu2  ;;  %2779 = vmatpush.msrb.mxu2 %v7020_v10  ;;  %2893 = vmatpush.msrb.mxu3 %v7036_v2  ;;  %v10458_v2 = vld [vmem:[#allocation2 + $0x1d1] sm:$0xff] }
 0x465   :  { %v1931_v19 = vadd.f32 %v1905_v23, %v1817_v33  ;;  %v7000_v33 = vld [vmem:[%s14838_s3 + $0x880] sm:$0xff] }
 0x466   :  { %2780 = vmatpush.msrb.mxu2 %v7019_v38  ;;  %2894 = vmatpush.msrb.mxu3 %v7035_v18 }
 0x467   :  { %2481 = vmatmul.f32.gmra.mxu3 %v10204_v40  ;;  %v7003_v40 = vld [vmem:[%s14838_s3 + $0x898] sm:$0xff]  ;;  %v1794_v46 = vpop.f32.mrf.mxu1  ;;  %v10415_v24 = vadd.f32 %v10328_v52, %v1931_v19  ;;  %v7018_v52 = vld [vmem:[%s14838_s3 + $0x910] sm:$0xff] }
 0x468   :  { %2666 = vmatpush.msrb.mxu1 %v7003_v40  ;;  %v1818_v26 = vadd.f32 %v1794_v46, %v10192_v5  ;;  %2781 = vmatpush.msrb.mxu2 %v7018_v52  ;;  %v7016_v5 = vld [vmem:[%s14838_s3 + $0x900] sm:$0xff]  ;;  %v2408_v40 = vld [vmem:[#allocation2 + $0x216] sm:$0xff] }
 0x469   :  { %2249 = vmatmul.f32.gmra.mxu1 %v10423_v49  ;;  %2363 = vmatmul.f32.gmra.mxu2 %v10083_v60  ;;  %v7017_v60 = vld [vmem:[%s14838_s3 + $0x908] sm:$0xff] }
 0x46a   :  { %v2025_v27 = vpop.f32.mrf.mxu3  ;;  %2667 = vmatpush.msrb.mxu1 %v7002_v41  ;;  %2895 = vmatpush.msrb.mxu3 %v7034_v9 }
 0x46b   :  { %2782 = vmatpush.msrb.mxu2 %v7017_v60 }
 0x46c   :  { %v1908_v0 = vpop.f32.mrf.mxu2  ;;  %2668 = vmatpush.msrb.mxu1 %v7001_v29  ;;  %2896 = vmatpush.msrb.mxu3 %v7033_v21 }
 0x46d   :  { %v1932_v13 = vadd.f32 %v1908_v0, %v1818_v26  ;;  %2783 = vmatpush.msrb.mxu2 %v7016_v5  ;;  %v10472_v0 = vld [vmem:[#allocation2 + $0x201] sm:$0xff] }
 0x46e   :  { %2669 = vmatpush.msrb.mxu1 %v7000_v33  ;;  %2897 = vmatpush.msrb.mxu3 %v7032_v20 }
 0x46f   :  { %2484 = vmatmul.f32.gmra.mxu3 %v2407_v31  ;;  %v1797_v23 = vpop.f32.mrf.mxu1  ;;  %v10456_v19 = vadd.f32 %v10373_v7, %v1932_v13  ;;  %v10465_v7 = vld [vmem:[#allocation2 + $0x1e9] sm:$0xff]  ;;  %v2849_v31 = vld [vmem:[#allocation2 + $0x52] sm:$0xff] }
 0x470   :  { %v1819_v46 = vadd.f32 %v1797_v23, %v10202_v34  ;;  %v2621_v23 = vld [vmem:[#allocation2 + $0x50] sm:$0xff] }
 0x471   :  { %2252 = vmatmul.f32.gmra.mxu1 %v10458_v2  ;;  %2366 = vmatmul.f32.gmra.mxu2 %v10127_v30 }
 0x472   :  { %v2028_v10 = vpop.f32.mrf.mxu3 }
 0x474   :  { %v1911_v38 = vpop.f32.mrf.mxu2 }
 0x475   :  { %v1933_v18 = vadd.f32 %v1911_v38, %v1819_v46 }
 0x477   :  { %2487 = vmatmul.f32.gmra.mxu3 %v2408_v40  ;;  %v1800_v41 = vpop.f32.mrf.mxu1  ;;  %v10463_v9 = vadd.f32 %v2025_v27, %v1933_v18  ;;  %v2850_v27 = vld [vmem:[#allocation2 + $0x6a] sm:$0xff]  ;;  %v2851_v40 = vld [vmem:[#allocation2 + $0x82] sm:$0xff] }
 0x478   :  { %v1820_v29 = vadd.f32 %v1800_v41, %v10210_v37 }
 0x479   :  { %2255 = vmatmul.f32.gmra.mxu1 %v10465_v7  ;;  %2369 = vmatmul.f32.gmra.mxu2 %v10169_v51 }
 0x47a   :  { %v2031_v52 = vpop.f32.mrf.mxu3 }
 0x47c   :  { %v1914_v30 = vpop.f32.mrf.mxu2 }
 0x47d   :  { %v1934_v26 = vadd.f32 %v1914_v30, %v1820_v29 }
 0x47f   :  { %2898 = vmatmul.f32.vlgmr.msrb.gmra.mxu3 %v2849_v31  ;;  %v1803_v34 = vpop.f32.mrf.mxu1  ;;  %v10470_v21 = vadd.f32 %v2028_v10, %v1934_v26  ;;  %v2148_v10 = vadd.f32 %v9189_v39, %v10219_v55  ;;  %v10484_v31 = vld [vmem:[#allocation2 + $0x68] sm:$0xff]  ;;  %v2852_v39 = vld [vmem:[#allocation2 + $0x9a] sm:$0xff] }
 0x480   :  { %v1821_v33 = vadd.f32 %v1803_v34, %v10215_v22 }
 0x481   :  { %2258 = vmatmul.f32.gmra.mxu1 %v10472_v0  ;;  %2372 = vmatmul.f32.gmra.mxu2 %v10196_v17 }
 0x482   :  { %v2443_v60 = vpop.f32.mrf.mxu3 }
 0x484   :  { %v1917_v51 = vpop.f32.mrf.mxu2 }
 0x485   :  { %v1935_v13 = vadd.f32 %v1917_v51, %v1821_v33 }
 0x487   :  { %2901 = vmatmul.f32.gmra.mxu3 %v2850_v27  ;;  %v2214_v37 = vpop.f32.mrf.mxu1  ;;  %v10477_v20 = vadd.f32 %v2031_v52, %v1935_v13  ;;  %v2149_v52 = vadd.f32 %v9199_v59, %v10226_v61  ;;  %v2150_v27 = vadd.f32 %v9208_v16, %v10233_v45  ;;  %v2853_v59 = vld [vmem:[#allocation2 + $0xb2] sm:$0xff]  ;;  %v2854_v16 = vld [vmem:[#allocation2 + $0xca] sm:$0xff] }
 0x488   :  { %v2262_v46 = vadd.f32 %v2214_v37, %v2148_v10 }
 0x489   :  { %2670 = vmatmul.f32.vlgmr.msrb.gmra.mxu1 %v2621_v23  ;;  %2784 = vmatmul.f32.vlgmr.msrb.gmra.mxu2 %v10221_v8  ;;  %v2151_v23 = vadd.f32 %v9217_v1, %v10241_v47  ;;  %v2855_v1 = vld [vmem:[#allocation2 + $0xe2] sm:$0xff] }
 0x48a   :  { %v2446_v5 = vpop.f32.mrf.mxu3 }
 0x48c   :  { %v2328_v17 = vpop.f32.mrf.mxu2 }
 0x48d   :  { %v2376_v38 = vadd.f32 %v2328_v17, %v2262_v46 }
 0x48f   :  { %2904 = vmatmul.f32.gmra.mxu3 %v2851_v40  ;;  %v2217_v22 = vpop.f32.mrf.mxu1  ;;  %v10482_v41 = vadd.f32 %v2443_v60, %v2376_v38  ;;  %v10492_v60 = vld [vmem:[#allocation2 + $0x80] sm:$0xff]  ;;  %v10508_v38 = vld [vmem:[#allocation2 + $0xb0] sm:$0xff] }
 0x490   :  { %v2263_v55 = vadd.f32 %v2217_v22, %v2149_v52  ;;  %v2152_v22 = vadd.f32 %v9227_v4, %v10248_v44 }
 0x491   :  { %2673 = vmatmul.f32.gmra.mxu1 %v10484_v31  ;;  %2787 = vmatmul.f32.gmra.mxu2 %v10228_v53 }
 0x492   :  { %v2449_v18 = vpop.f32.mrf.mxu3 }
 0x494   :  { %v2331_v8 = vpop.f32.mrf.mxu2 }
 0x495   :  { %v2377_v29 = vadd.f32 %v2331_v8, %v2263_v55  ;;  %v10516_v8 = vld [vmem:[#allocation2 + $0xc8] sm:$0xff] }
 0x497   :  { %2907 = vmatmul.f32.gmra.mxu3 %v2852_v39  ;;  %v2220_v30 = vpop.f32.mrf.mxu1  ;;  %v10490_v34 = vadd.f32 %v2446_v5, %v2377_v29  ;;  %v10500_v5 = vld [vmem:[#allocation2 + $0x98] sm:$0xff] }
 0x498   :  { %v2264_v61 = vadd.f32 %v2220_v30, %v2150_v27  ;;  %v2856_v29 = vld [vmem:[#allocation2 + $0xfa] sm:$0xff]  ;;  %v2153_v30 = vadd.f32 %v9240_v43, %v10255_v11  ;;  %v2857_v43 = vld [vmem:[#allocation2 + $0x172] sm:$0xff] }
 0x499   :  { %2676 = vmatmul.f32.gmra.mxu1 %v10492_v60  ;;  %2790 = vmatmul.f32.gmra.mxu2 %v10235_v50 }
 0x49a   :  { %v2452_v26 = vpop.f32.mrf.mxu3 }
 0x49c   :  { %v2334_v53 = vpop.f32.mrf.mxu2 }
 0x49d   :  { %v2378_v33 = vadd.f32 %v2334_v53, %v2264_v61  ;;  %v10524_v61 = vld [vmem:[#allocation2 + $0xe0] sm:$0xff]  ;;  %v2154_v53 = vadd.f32 %v9250_v54, %v10263_v15  ;;  %v2858_v54 = vld [vmem:[#allocation2 + $0x18a] sm:$0xff] }
 0x49f   :  { %2910 = vmatmul.f32.gmra.mxu3 %v2853_v59  ;;  %v2223_v51 = vpop.f32.mrf.mxu1  ;;  %v10498_v37 = vadd.f32 %v2449_v18, %v2378_v33 }
 0x4a0   :  { %v2265_v45 = vadd.f32 %v2223_v51, %v2151_v23 }
 0x4a1   :  { %2679 = vmatmul.f32.gmra.mxu1 %v10500_v5  ;;  %2793 = vmatmul.f32.gmra.mxu2 %v10243_v42 }
 0x4a2   :  { %v2455_v13 = vpop.f32.mrf.mxu3 }
 0x4a4   :  { %v2337_v50 = vpop.f32.mrf.mxu2 }
 0x4a5   :  { %v2379_v10 = vadd.f32 %v2337_v50, %v2265_v45  ;;  %v2155_v45 = vadd.f32 %v9271_v35, %v10270_v12  ;;  %v10536_v50 = vld [vmem:[#allocation2] sm:$0xff]  ;;  %v7079_v35 = vld [vmem:[%s14838_s3 + $0xaf8] sm:$0xff] }
 0x4a6   :  { %v7095_v12 = vld [vmem:[%s14838_s3 + $0xb78] sm:$0xff]  ;;  %3111 = vmatpush.msra.mxu1 %v7079_v35  ;;  %v10613_v35 = vld [vmem:[#allocation2 + $0x1a0] sm:$0xff] }
 0x4a7   :  { %2913 = vmatmul.f32.gmra.mxu3 %v2854_v16  ;;  %v2226_v40 = vpop.f32.mrf.mxu1  ;;  %v10506_v17 = vadd.f32 %v2452_v26, %v2379_v10  ;;  %3225 = vmatpush.msra.mxu2 %v7095_v12  ;;  %v14873_v12 = vld [vmem:[#allocation7_spill] sm:$0xff] }
 0x4a8   :  { %v2266_v47 = vadd.f32 %v2226_v40, %v2152_v22 }
 0x4a9   :  { %2682 = vmatmul.f32.gmra.mxu1 %v10508_v38  ;;  %2796 = vmatmul.f32.gmra.mxu2 %v10250_v63 }
 0x4aa   :  { %v2458_v46 = vpop.f32.mrf.mxu3 }
 0x4ac   :  { %v2340_v42 = vpop.f32.mrf.mxu2 }
 0x4ad   :  { %v2380_v18 = vadd.f32 %v2340_v42, %v2266_v47  ;;  %v2156_v47 = vadd.f32 %v9315_v62, %v10285_v58  ;;  %v7111_v42 = vld [vmem:[%s14838_s3 + $0xbf8] sm:$0xff] }
 0x4ae   :  { %3339 = vmatpush.msra.mxu3 %v7111_v42  ;;  %v2158_v42 = vadd.f32 %v14873_v12, %v10376_v56  ;;  %v7100_v12 = vld [vmem:[%s14838_s3 + $0xba0] sm:$0xff] }
 0x4af   :  { %2916 = vmatmul.f32.gmra.mxu3 %v2855_v1  ;;  %v2229_v52 = vpop.f32.mrf.mxu1  ;;  %v10514_v55 = vadd.f32 %v2455_v13, %v2380_v18  ;;  %v10530_v13 = vld [vmem:[#allocation2 + $0xf9] sm:$0xff]  ;;  %v2629_v1 = vld [vmem:[#allocation2 + $0x170] sm:$0xff]  ;;  %v2859_v18 = vld [vmem:[#allocation2 + $0x1a2] sm:$0xff] }
 0x4b0   :  { %v2267_v4 = vadd.f32 %v2229_v52, %v2153_v30  ;;  %v7078_v30 = vld [vmem:[%s14838_s3 + $0xaf0] sm:$0xff] }
 0x4b1   :  { %2685 = vmatmul.f32.gmra.mxu1 %v10516_v8  ;;  %2799 = vmatmul.f32.gmra.mxu2 %v10257_v25 }
 0x4b2   :  { %v2461_v39 = vpop.f32.mrf.mxu3  ;;  %3112 = vmatpush.msra.mxu1 %v7078_v30 }
 0x4b4   :  { %v2343_v44 = vpop.f32.mrf.mxu2 }
 0x4b5   :  { %v2381_v63 = vadd.f32 %v2343_v44, %v2267_v4  ;;  %v7094_v4 = vld [vmem:[%s14838_s3 + $0xb70] sm:$0xff] }
 0x4b6   :  { %v7110_v44 = vld [vmem:[%s14838_s3 + $0xbf0] sm:$0xff]  ;;  %3226 = vmatpush.msra.mxu2 %v7094_v4  ;;  %v7071_v4 = vld [vmem:[%s14838_s3 + $0xab8] sm:$0xff] }
 0x4b7   :  { %2919 = vmatmul.f32.gmra.mxu3 %v2856_v29  ;;  %v2232_v26 = vpop.f32.mrf.mxu1  ;;  %v10522_v59 = vadd.f32 %v2458_v46, %v2381_v63  ;;  %v10567_v63 = vld [vmem:[#allocation2 + $0x188] sm:$0xff] }
 0x4b8   :  { %v2268_v11 = vadd.f32 %v2232_v26, %v2154_v53  ;;  %v7077_v26 = vld [vmem:[%s14838_s3 + $0xae8] sm:$0xff]  ;;  %v2157_v53 = vadd.f32 %v9375_v28, %v10330_v36  ;;  %3340 = vmatpush.msra.mxu3 %v7110_v44  ;;  %v7108_v36 = vld [vmem:[%s14838_s3 + $0xbe0] sm:$0xff] }
 0x4b9   :  { %2688 = vmatmul.f32.gmra.mxu1 %v10524_v61  ;;  %2802 = vmatmul.f32.gmra.mxu2 %v10265_v3 }
 0x4ba   :  { %v2464_v27 = vpop.f32.mrf.mxu3  ;;  %3113 = vmatpush.msra.mxu1 %v7077_v26  ;;  %v7087_v26 = vld [vmem:[%s14838_s3 + $0xb38] sm:$0xff] }
 0x4bc   :  { %v2346_v25 = vpop.f32.mrf.mxu2 }
 0x4bd   :  { %v2382_v33 = vadd.f32 %v2346_v25, %v2268_v11  ;;  %v7076_v11 = vld [vmem:[%s14838_s3 + $0xae0] sm:$0xff] }
 0x4be   :  { %v2860_v25 = vld [vmem:[#allocation2 + $0x1ba] sm:$0xff]  ;;  %3114 = vmatpush.msra.mxu1 %v7076_v11 }
 0x4bf   :  { %2922 = vmatmul.f32.gmra.mxu3 %v2857_v43  ;;  %v2235_v51 = vpop.f32.mrf.mxu1  ;;  %v10532_v16 = vadd.f32 %v2461_v39, %v2382_v33  ;;  %v7109_v43 = vld [vmem:[%s14838_s3 + $0xbe8] sm:$0xff]  ;;  %v7092_v33 = vld [vmem:[%s14838_s3 + $0xb60] sm:$0xff] }
 0x4c0   :  { %v2269_v15 = vadd.f32 %v2235_v51, %v2155_v45  ;;  %3341 = vmatpush.msra.mxu3 %v7109_v43 }
 0x4c1   :  { %2691 = vmatmul.f32.gmra.mxu1 %v10536_v50  ;;  %2805 = vmatmul.f32.gmra.mxu2 %v10530_v13 }
 0x4c2   :  { %v2467_v23 = vpop.f32.mrf.mxu3  ;;  %3342 = vmatpush.msra.mxu3 %v7108_v36  ;;  %v14874_v36 = vld [vmem:[#allocation8_spill] sm:$0xff] }
 0x4c4   :  { %v2349_v3 = vpop.f32.mrf.mxu2 }
 0x4c5   :  { %v2383_v10 = vadd.f32 %v2349_v3, %v2269_v15 }
 0x4c7   :  { %2925 = vmatmul.f32.gmra.mxu3 %v2858_v54  ;;  %v2238_v40 = vpop.f32.mrf.mxu1  ;;  %v10540_v22 = vadd.f32 %v2464_v27, %v2383_v10  ;;  %v7093_v27 = vld [vmem:[%s14838_s3 + $0xb68] sm:$0xff]  ;;  %v7107_v54 = vld [vmem:[%s14838_s3 + $0xbd8] sm:$0xff] }
 0x4c8   :  { %v2270_v52 = vadd.f32 %v2238_v40, %v2156_v47  ;;  %3227 = vmatpush.msra.mxu2 %v7093_v27  ;;  %v7074_v40 = vld [vmem:[%s14838_s3 + $0xad0] sm:$0xff]  ;;  %3343 = vmatpush.msra.mxu3 %v7107_v54  ;;  %v7103_v27 = vld [vmem:[%s14838_s3 + $0xbb8] sm:$0xff]  ;;  %v10672_v54 = vpop.f32.mrf.mxu0 }
 0x4c9   :  { %2694 = vmatmul.f32.gmra.mxu1 %v2629_v1  ;;  %2808 = vmatmul.f32.gmra.mxu2 %v10296_v6  ;;  %v7090_v1 = vld [vmem:[%s14838_s3 + $0xb50] sm:$0xff] }
 0x4ca   :  { %v2470_v46 = vpop.f32.mrf.mxu3  ;;  %3228 = vmatpush.msra.mxu2 %v7092_v33  ;;  %v7106_v47 = vld [vmem:[%s14838_s3 + $0xbd0] sm:$0xff] }
 0x4cb   :  { %3344 = vmatpush.msra.mxu3 %v7106_v47  ;;  %v7086_v33 = vld [vmem:[%s14838_s3 + $0xb30] sm:$0xff]  ;;  %v7084_v47 = vld [vmem:[%s14838_s3 + $0xb20] sm:$0xff] }
 0x4cc   :  { %v2352_v62 = vpop.f32.mrf.mxu2 }
 0x4cd   :  { %v2384_v58 = vadd.f32 %v2352_v62, %v2270_v52  ;;  %v7105_v52 = vld [vmem:[%s14838_s3 + $0xbc8] sm:$0xff]  ;;  %v2861_v62 = vld [vmem:[#allocation2 + $0x1d2] sm:$0xff] }
 0x4ce   :  { %3345 = vmatpush.msra.mxu3 %v7105_v52 }
 0x4cf   :  { %2928 = vmatmul.f32.gmra.mxu3 %v2859_v18  ;;  %v2241_v6 = vpop.f32.mrf.mxu1  ;;  %v10556_v29 = vadd.f32 %v2467_v23, %v2384_v58  ;;  %v7091_v23 = vld [vmem:[%s14838_s3 + $0xb58] sm:$0xff]  ;;  %v7089_v18 = vld [vmem:[%s14838_s3 + $0xb48] sm:$0xff]  ;;  %v7072_v58 = vld [vmem:[%s14838_s3 + $0xac0] sm:$0xff] }
 0x4d0   :  { %v2271_v28 = vadd.f32 %v2241_v6, %v2157_v53  ;;  %3229 = vmatpush.msra.mxu2 %v7091_v23  ;;  %v7104_v6 = vld [vmem:[%s14838_s3 + $0xbc0] sm:$0xff]  ;;  %v2862_v23 = vld [vmem:[#allocation2 + $0x1ea] sm:$0xff] }
 0x4d1   :  { %2697 = vmatmul.f32.gmra.mxu1 %v10567_v63  ;;  %2811 = vmatmul.f32.gmra.mxu2 %v10341_v32  ;;  %v7075_v32 = vld [vmem:[%s14838_s3 + $0xad8] sm:$0xff] }
 0x4d2   :  { %v10554_v39 = vpop.f32.mrf.mxu3  ;;  %3115 = vmatpush.msra.mxu1 %v7075_v32  ;;  %3230 = vmatpush.msra.mxu2 %v7090_v1  ;;  %v2159_v32 = vadd.f32 %v14874_v36, %v10415_v24  ;;  %v2864_v24 = vld [vmem:[#allocation2 + $0x21a] sm:$0xff] }
 0x4d3   :  { %3346 = vmatpush.msra.mxu3 %v7104_v6  ;;  %3511 = vmatmul.f32.gmra.mxu0 %v2864_v24  ;;  %v7066_v6 = vld [vmem:[%s14838_s3 + $0xa90] sm:$0xff] }
 0x4d4   :  { %v2355_v51 = vpop.f32.mrf.mxu2  ;;  %3116 = vmatpush.msra.mxu1 %v7074_v40  ;;  %3231 = vmatpush.msra.mxu2 %v7089_v18  ;;  %v7068_v40 = vld [vmem:[%s14838_s3 + $0xaa0] sm:$0xff] }
 0x4d5   :  { %v2385_v45 = vadd.f32 %v2355_v51, %v2271_v28  ;;  %v10657_v28 = vld [vmem:[#allocation2 + $0x1b8] sm:$0xff]  ;;  %3347 = vmatpush.msra.mxu3 %v7103_v27  ;;  %v7069_v51 = vld [vmem:[%s14838_s3 + $0xaa8] sm:$0xff] }
 0x4d6   :  { %v7065_v27 = vld [vmem:[%s14838_s3 + $0xa88] sm:$0xff] }
 0x4d7   :  { %2931 = vmatmul.f32.gmra.mxu3 %v2860_v25  ;;  %v2244_v15 = vpop.f32.mrf.mxu1  ;;  %v10602_v10 = vadd.f32 %v2470_v46, %v2385_v45  ;;  %v7073_v46 = vld [vmem:[%s14838_s3 + $0xac8] sm:$0xff]  ;;  %v7070_v25 = vld [vmem:[%s14838_s3 + $0xab0] sm:$0xff] }
 0x4d8   :  { %v2272_v56 = vadd.f32 %v2244_v15, %v2158_v42  ;;  %3117 = vmatpush.msra.mxu1 %v7073_v46  ;;  %v7085_v45 = vld [vmem:[%s14838_s3 + $0xb28] sm:$0xff]  ;;  %v7067_v42 = vld [vmem:[%s14838_s3 + $0xa98] sm:$0xff] }
 0x4d9   :  { %2700 = vmatmul.f32.gmra.mxu1 %v10613_v35  ;;  %2814 = vmatmul.f32.gmra.mxu2 %v10384_v14  ;;  %v7088_v14 = vld [vmem:[%s14838_s3 + $0xb40] sm:$0xff] }
 0x4da   :  { %v10600_v3 = vpop.f32.mrf.mxu3  ;;  %3118 = vmatpush.msra.mxu1 %v7072_v58  ;;  %3232 = vmatpush.msra.mxu2 %v7088_v14  ;;  %v7083_v58 = vld [vmem:[%s14838_s3 + $0xb18] sm:$0xff]  ;;  %v10698_v14 = vld [vmem:[#allocation2 + $0x1d0] sm:$0xff] }
 0x4dc   :  { %v2358_v30 = vpop.f32.mrf.mxu2  ;;  %3119 = vmatpush.msra.mxu1 %v7071_v4  ;;  %3233 = vmatpush.msra.mxu2 %v7087_v26  ;;  %v7082_v4 = vld [vmem:[%s14838_s3 + $0xb10] sm:$0xff]  ;;  %v2863_v26 = vld [vmem:[#allocation2 + $0x202] sm:$0xff] }
 0x4dd   :  { %v2386_v44 = vadd.f32 %v2358_v30, %v2272_v56  ;;  %v7099_v56 = vld [vmem:[%s14838_s3 + $0xb98] sm:$0xff] }
 0x4de   :  { %3120 = vmatpush.msra.mxu1 %v7070_v25  ;;  %3234 = vmatpush.msra.mxu2 %v7086_v33  ;;  %v7064_v33 = vld [vmem:[%s14838_s3 + $0xa80] sm:$0xff] }
 0x4df   :  { %2934 = vmatmul.f32.gmra.mxu3 %v2861_v62  ;;  %v2247_v53 = vpop.f32.mrf.mxu1  ;;  %v10649_v11 = vadd.f32 %v10554_v39, %v2386_v44  ;;  %v7102_v39 = vld [vmem:[%s14838_s3 + $0xbb0] sm:$0xff] }
 0x4e0   :  { %v2273_v15 = vadd.f32 %v2247_v53, %v2159_v32  ;;  %3348 = vmatpush.msra.mxu3 %v7102_v39  ;;  %3121 = vmatpush.msra.mxu1 %v7069_v51  ;;  %v7098_v44 = vld [vmem:[%s14838_s3 + $0xb90] sm:$0xff]  ;;  %v7097_v53 = vld [vmem:[%s14838_s3 + $0xb88] sm:$0xff]  ;;  %v7080_v32 = vld [vmem:[%s14838_s3 + $0xb00] sm:$0xff] }
 0x4e1   :  { %2703 = vmatmul.f32.gmra.mxu1 %v10657_v28  ;;  %2817 = vmatmul.f32.gmra.mxu2 %v10423_v49  ;;  %v7101_v49 = vld [vmem:[%s14838_s3 + $0xba8] sm:$0xff]  ;;  %v7096_v39 = vld [vmem:[%s14838_s3 + $0xb80] sm:$0xff] }
 0x4e2   :  { %v10646_v43 = vpop.f32.mrf.mxu3  ;;  %3235 = vmatpush.msra.mxu2 %v7085_v45  ;;  %3349 = vmatpush.msra.mxu3 %v7101_v49  ;;  %v14876_v49 = vld [vmem:[#allocation10_spill] sm:$0xff] }
 0x4e3   :  { %3122 = vmatpush.msra.mxu1 %v7068_v40  ;;  %v2161_v40 = vadd.f32 %v14876_v49, %v10463_v9  ;;  %v3306_v9 = vld [vmem:[#allocation2 + $0x69] sm:$0xff] }
 0x4e4   :  { %v2361_v1 = vpop.f32.mrf.mxu2  ;;  %3236 = vmatpush.msra.mxu2 %v7084_v47  ;;  %3350 = vmatpush.msra.mxu3 %v7100_v12 }
 0x4e5   :  { %v2387_v46 = vadd.f32 %v2361_v1, %v2273_v15  ;;  %3123 = vmatpush.msra.mxu1 %v7067_v42  ;;  %v10734_v15 = vld [vmem:[#allocation2 + $0x1e8] sm:$0xff] }
 0x4e6   :  { %3237 = vmatpush.msra.mxu2 %v7083_v58  ;;  %3351 = vmatpush.msra.mxu3 %v7099_v56  ;;  %v14877_v58 = vld [vmem:[#allocation11_spill] sm:$0xff] }
 0x4e7   :  { %2937 = vmatmul.f32.gmra.mxu3 %v2862_v23  ;;  %v2250_v18 = vpop.f32.mrf.mxu1  ;;  %v10690_v62 = vadd.f32 %v10600_v3, %v2387_v46  ;;  %v14875_v3 = vld [vmem:[#allocation9_spill] sm:$0xff]  ;;  %3124 = vmatpush.msra.mxu1 %v7066_v6  ;;  %v2162_v56 = vadd.f32 %v14877_v58, %v10470_v21  ;;  %v3307_v21 = vld [vmem:[#allocation2 + $0x81] sm:$0xff] }
 0x4e8   :  { %v2160_v30 = vadd.f32 %v14875_v3, %v10456_v19  ;;  %3238 = vmatpush.msra.mxu2 %v7082_v4  ;;  %3352 = vmatpush.msra.mxu3 %v7098_v44  ;;  %v14878_v44 = vld [vmem:[#allocation12_spill] sm:$0xff] }
 0x4e9   :  { %2706 = vmatmul.f32.gmra.mxu1 %v10698_v14  ;;  %2820 = vmatmul.f32.gmra.mxu2 %v10458_v2  ;;  %v7081_v2 = vld [vmem:[%s14838_s3 + $0xb08] sm:$0xff] }
 0x4ea   :  { %v2482_v52 = vpop.f32.mrf.mxu3  ;;  %v2274_v19 = vadd.f32 %v2250_v18, %v2160_v30  ;;  %3125 = vmatpush.msra.mxu1 %v7065_v27  ;;  %3239 = vmatpush.msra.mxu2 %v7081_v2  ;;  %v10742_v18 = vld [vmem:[#allocation2 + $0x200] sm:$0xff] }
 0x4eb   :  { %3353 = vmatpush.msra.mxu3 %v7097_v53  ;;  %v10748_v30 = vld [vmem:[#allocation2 + $0x219] sm:$0xff] }
 0x4ec   :  { %v2364_v25 = vpop.f32.mrf.mxu2  ;;  %3126 = vmatpush.msra.mxu1 %v7064_v33  ;;  %3240 = vmatpush.msra.mxu2 %v7080_v32  ;;  %v3078_v33 = vld [vmem:[#allocation2 + $0x67] sm:$0xff] }
 0x4ed   :  { %v2388_v36 = vadd.f32 %v2364_v25, %v2274_v19  ;;  %3354 = vmatpush.msra.mxu3 %v7096_v39 }
 0x4ef   :  { %2940 = vmatmul.f32.gmra.mxu3 %v2863_v26  ;;  %v2253_v51 = vpop.f32.mrf.mxu1  ;;  %v10732_v45 = vadd.f32 %v10646_v43, %v2388_v36  ;;  %v2163_v26 = vadd.f32 %v14878_v44, %v10477_v20  ;;  %v14880_v36 = vld [vmem:[#allocation13_spill] sm:$0xff] }
 0x4f0   :  { %v2275_v1 = vadd.f32 %v2253_v51, %v2161_v40  ;;  %v2605_v32 = vadd.f32 %v14880_v36, %v10482_v41  ;;  %v3308_v20 = vld [vmem:[#allocation2 + $0x99] sm:$0xff]  ;;  %v3309_v41 = vld [vmem:[#allocation2 + $0xb1] sm:$0xff] }
 0x4f1   :  { %2709 = vmatmul.f32.gmra.mxu1 %v10734_v15  ;;  %2823 = vmatmul.f32.gmra.mxu2 %v10465_v7 }
 0x4f2   :  { %v2485_v23 = vpop.f32.mrf.mxu3 }
 0x4f4   :  { %v2367_v47 = vpop.f32.mrf.mxu2 }
 0x4f5   :  { %v2389_v46 = vadd.f32 %v2367_v47, %v2275_v1  ;;  %v3079_v47 = vld [vmem:[#allocation2 + $0x7f] sm:$0xff] }
 0x4f7   :  { %2943 = vmatmul.f32.gmra.mxu3 %v2864_v24  ;;  %v2256_v12 = vpop.f32.mrf.mxu1  ;;  %v10740_v43 = vadd.f32 %v2482_v52, %v2389_v46  ;;  %v14881_v46 = vld [vmem:[#allocation14_spill] sm:$0xff] }
 0x4f8   :  { %v2276_v6 = vadd.f32 %v2256_v12, %v2162_v56  ;;  %v2606_v12 = vadd.f32 %v14881_v46, %v10490_v34  ;;  %v3310_v34 = vld [vmem:[#allocation2 + $0xc9] sm:$0xff] }
 0x4f9   :  { %2712 = vmatmul.f32.gmra.mxu1 %v10742_v18  ;;  %2826 = vmatmul.f32.gmra.mxu2 %v10472_v0 }
 0x4fa   :  { %v2488_v42 = vpop.f32.mrf.mxu3 }
 0x4fc   :  { %v2370_v7 = vpop.f32.mrf.mxu2 }
 0x4fd   :  { %v2390_v24 = vadd.f32 %v2370_v7, %v2276_v6  ;;  %v10766_v6 = vpop.f32.mrf.mxu0 }
 0x4ff   :  { %3355 = vmatmul.f32.vlgmr.msra.gmra.mxu3 %v3306_v9  ;;  %v2259_v3 = vpop.f32.mrf.mxu1  ;;  %v10750_v52 = vadd.f32 %v2485_v23, %v2390_v24  ;;  %v3080_v24 = vld [vmem:[#allocation2 + $0x97] sm:$0xff] }
 0x500   :  { %v2277_v0 = vadd.f32 %v2259_v3, %v2163_v26  ;;  %v14882_v3 = vld [vmem:[#allocation15_spill] sm:$0xff] }
 0x501   :  { %2715 = vmatmul.f32.gmra.mxu1 %v10536_v50  ;;  %2829 = vmatmul.f32.gmra.mxu2 %v10748_v30 }
 0x502   :  { %v2899_v4 = vpop.f32.mrf.mxu3 }
 0x504   :  { %v2373_v27 = vpop.f32.mrf.mxu2 }
 0x505   :  { %v2391_v19 = vadd.f32 %v2373_v27, %v2277_v0 }
 0x507   :  { %3358 = vmatmul.f32.gmra.mxu3 %v3307_v21  ;;  %v2671_v2 = vpop.f32.mrf.mxu1  ;;  %v10756_v25 = vadd.f32 %v2488_v42, %v2391_v19  ;;  %v3081_v19 = vld [vmem:[#allocation2 + $0xaf] sm:$0xff] }
 0x508   :  { %v2719_v39 = vadd.f32 %v2671_v2, %v2605_v32  ;;  %v10775_v2 = vpop.f32.mrf.mxu0 }
 0x509   :  { %14879 = vst [vmem:[#allocation7_spill] sm:$0xff] %v10756_v25  ;;  %3127 = vmatmul.f32.vlgmr.msra.gmra.mxu1 %v3078_v33  ;;  %3241 = vmatmul.f32.vlgmr.msra.gmra.mxu2 %v10484_v31 }
 0x50a   :  { %v2902_v53 = vpop.f32.mrf.mxu3 }
 0x50c   :  { %v2785_v51 = vpop.f32.mrf.mxu2 }
 0x50d   :  { %v2833_v23 = vadd.f32 %v2785_v51, %v2719_v39 }
 0x50f   :  { %3361 = vmatmul.f32.gmra.mxu3 %v3308_v20  ;;  %v2674_v49 = vpop.f32.mrf.mxu1  ;;  %v10761_v1 = vadd.f32 %v2899_v4, %v2833_v23  ;;  %v2607_v4 = vadd.f32 %v14882_v3, %v10498_v37  ;;  %v3311_v37 = vld [vmem:[#allocation2 + $0xe1] sm:$0xff] }
 0x510   :  { %v2720_v42 = vadd.f32 %v2674_v49, %v2606_v12  ;;  %v3082_v23 = vld [vmem:[#allocation2 + $0xc7] sm:$0xff]  ;;  %v14884_v49 = vld [vmem:[#allocation17_spill] sm:$0xff] }
 0x511   :  { %3130 = vmatmul.f32.gmra.mxu1 %v3079_v47  ;;  %3244 = vmatmul.f32.gmra.mxu2 %v10492_v60 }
 0x512   :  { %v2905_v40 = vpop.f32.mrf.mxu3 }
 0x514   :  { %v2788_v31 = vpop.f32.mrf.mxu2 }
 0x515   :  { %v2834_v58 = vadd.f32 %v2788_v31, %v2720_v42  ;;  %v3083_v31 = vld [vmem:[#allocation2 + $0xdf] sm:$0xff] }
 0x517   :  { %3364 = vmatmul.f32.gmra.mxu3 %v3309_v41  ;;  %v2677_v56 = vpop.f32.mrf.mxu1  ;;  %v10768_v7 = vadd.f32 %v2902_v53, %v2834_v58  ;;  %v14883_v53 = vld [vmem:[#allocation16_spill] sm:$0xff] }
 0x518   :  { %v2721_v60 = vadd.f32 %v2677_v56, %v2607_v4  ;;  %v2608_v33 = vadd.f32 %v14883_v53, %v10506_v17  ;;  %v10785_v17 = vpop.f32.mrf.mxu0  ;;  %v3313_v58 = vld [vmem:[#allocation2 + $0x111] sm:$0xff]  ;;  %v14885_v56 = vld [vmem:[#allocation18_spill] sm:$0xff] }
 0x519   :  { %3133 = vmatmul.f32.gmra.mxu1 %v3080_v24  ;;  %3247 = vmatmul.f32.gmra.mxu2 %v10500_v5  ;;  %v3084_v4 = vld [vmem:[#allocation2 + $0xf7] sm:$0xff]  ;;  %v3085_v53 = vld [vmem:[#allocation2 + $0x10f] sm:$0xff] }
 0x51a   :  { %v2908_v9 = vpop.f32.mrf.mxu3 }
 0x51c   :  { %v2791_v44 = vpop.f32.mrf.mxu2 }
 0x51d   :  { %v2835_v26 = vadd.f32 %v2791_v44, %v2721_v60  ;;  %v14886_v44 = vld [vmem:[#allocation19_spill] sm:$0xff] }
 0x51f   :  { %3367 = vmatmul.f32.gmra.mxu3 %v3310_v34  ;;  %v2680_v21 = vpop.f32.mrf.mxu1  ;;  %v10773_v27 = vadd.f32 %v2905_v40, %v2835_v26  ;;  %v2609_v40 = vadd.f32 %v14884_v49, %v10514_v55  ;;  %v2611_v26 = vadd.f32 %v14886_v44, %v10532_v16  ;;  %v3315_v16 = vld [vmem:[#allocation2 + $0x1a1] sm:$0xff] }
 0x520   :  { %v2722_v5 = vadd.f32 %v2680_v21, %v2608_v33  ;;  %v10793_v24 = vpop.f32.mrf.mxu0 }
 0x521   :  { %3136 = vmatmul.f32.gmra.mxu1 %v3081_v19  ;;  %3250 = vmatmul.f32.gmra.mxu2 %v10508_v38 }
 0x522   :  { %v2911_v0 = vpop.f32.mrf.mxu3 }
 0x524   :  { %v2794_v36 = vpop.f32.mrf.mxu2 }
 0x525   :  { %v2836_v32 = vadd.f32 %v2794_v36, %v2722_v5  ;;  %v14887_v36 = vld [vmem:[#allocation20_spill] sm:$0xff] }
 0x527   :  { %3370 = vmatmul.f32.gmra.mxu3 %v3311_v37  ;;  %v2683_v20 = vpop.f32.mrf.mxu1  ;;  %v10780_v51 = vadd.f32 %v2908_v9, %v2836_v32  ;;  %v2610_v9 = vadd.f32 %v14885_v56, %v10522_v59  ;;  %v3314_v59 = vld [vmem:[#allocation2 + $0x189] sm:$0xff]  ;;  %v2612_v32 = vadd.f32 %v14887_v36, %v10540_v22  ;;  %v3316_v22 = vld [vmem:[#allocation2 + $0x1b9] sm:$0xff]  ;;  %v3317_v56 = vld [vmem:[#allocation2 + $0x1d1] sm:$0xff] }
 0x528   :  { %v2723_v47 = vadd.f32 %v2683_v20, %v2609_v40  ;;  %v10802_v37 = vpop.f32.mrf.mxu0 }
 0x529   :  { %3139 = vmatmul.f32.gmra.mxu1 %v3082_v23  ;;  %3253 = vmatmul.f32.gmra.mxu2 %v10516_v8 }
 0x52a   :  { %v2914_v39 = vpop.f32.mrf.mxu3 }
 0x52c   :  { %v2797_v38 = vpop.f32.mrf.mxu2 }
 0x52d   :  { %v2837_v46 = vadd.f32 %v2797_v38, %v2723_v47  ;;  %v3086_v38 = vld [vmem:[#allocation2 + $0x187] sm:$0xff] }
 0x52f   :  { %3373 = vmatmul.f32.gmra.mxu3 %v10530_v13  ;;  %v2686_v12 = vpop.f32.mrf.mxu1  ;;  %v10788_v42 = vadd.f32 %v2911_v0, %v2837_v46 }
 0x530   :  { %v2724_v55 = vadd.f32 %v2686_v12, %v2610_v9  ;;  %v10815_v46 = vpop.f32.mrf.mxu0 }
 0x531   :  { %3142 = vmatmul.f32.gmra.mxu1 %v3083_v31  ;;  %3256 = vmatmul.f32.gmra.mxu2 %v10524_v61 }
 0x532   :  { %v2917_v41 = vpop.f32.mrf.mxu3 }
 0x534   :  { %v2800_v8 = vpop.f32.mrf.mxu2 }
 0x535   :  { %v2838_v13 = vadd.f32 %v2800_v8, %v2724_v55 }
 0x537   :  { %3376 = vmatmul.f32.gmra.mxu3 %v3313_v58  ;;  %v2689_v3 = vpop.f32.mrf.mxu1  ;;  %v10795_v60 = vadd.f32 %v2914_v39, %v2838_v13  ;;  %v3087_v58 = vld [vmem:[#allocation2 + $0x19f] sm:$0xff]  ;;  %v3088_v13 = vld [vmem:[#allocation2 + $0x1b7] sm:$0xff] }
 0x538   :  { %v2725_v21 = vadd.f32 %v2689_v3, %v2611_v26  ;;  %v10825_v9 = vpop.f32.mrf.mxu0  ;;  %v3318_v3 = vld [vmem:[#allocation2 + $0x1e9] sm:$0xff] }
 0x539   :  { %3145 = vmatmul.f32.gmra.mxu1 %v3084_v4  ;;  %3259 = vmatmul.f32.gmra.mxu2 %v10536_v50  ;;  %v3089_v26 = vld [vmem:[#allocation2 + $0x1cf] sm:$0xff] }
 0x53a   :  { %v2920_v34 = vpop.f32.mrf.mxu3 }
 0x53c   :  { %v2803_v61 = vpop.f32.mrf.mxu2 }
 0x53d   :  { %v2839_v0 = vadd.f32 %v2803_v61, %v2725_v21 }
 0x53f   :  { %3379 = vmatmul.f32.gmra.mxu3 %v3314_v59  ;;  %v2692_v19 = vpop.f32.mrf.mxu1  ;;  %v10804_v5 = vadd.f32 %v2917_v41, %v2839_v0  ;;  %v3319_v59 = vld [vmem:[#allocation2 + $0x201] sm:$0xff] }
 0x540   :  { %v2726_v20 = vadd.f32 %v2692_v19, %v2612_v32  ;;  %v3435_v19 = vld [vmem:[#allocation2 + $0x232] sm:$0xff] }
 0x541   :  { %3148 = vmatmul.f32.gmra.mxu1 %v3085_v53  ;;  %3262 = vmatmul.f32.gmra.mxu2 %v10536_v50  ;;  %v3090_v53 = vld [vmem:[#allocation2 + $0x1e7] sm:$0xff] }
 0x542   :  { %v10800_v33 = vpop.f32.mrf.mxu3  ;;  %3514 = vmatmul.f32.gmra.mxu0 %v3435_v19 }
 0x544   :  { %v2806_v39 = vpop.f32.mrf.mxu2 }
 0x545   :  { %v2840_v23 = vadd.f32 %v2806_v39, %v2726_v20  ;;  %v3321_v20 = vld [vmem:[#allocation2 + $0x231] sm:$0xff] }
 0x547   :  { %3382 = vmatmul.f32.gmra.mxu3 %v3315_v16  ;;  %v10809_v49 = vpop.f32.mrf.mxu1  ;;  %v10813_v47 = vadd.f32 %v2920_v34, %v2840_v23  ;;  %v10836_v34 = vpop.f32.mrf.mxu0  ;;  %v3091_v16 = vld [vmem:[#allocation2 + $0x1ff] sm:$0xff] }
 0x548   :  { %14888 = vst [vmem:[#allocation8_spill] sm:$0xff] %v10836_v34 }
 0x549   :  { %3151 = vmatmul.f32.gmra.mxu1 %v3086_v38  ;;  %3265 = vmatmul.f32.gmra.mxu2 %v10567_v63 }
 0x54a   :  { %v10811_v40 = vpop.f32.mrf.mxu3 }
 0x54c   :  { %v10818_v12 = vpop.f32.mrf.mxu2 }
 0x54f   :  { %3385 = vmatmul.f32.gmra.mxu3 %v3316_v22  ;;  %v10820_v41 = vpop.f32.mrf.mxu1  ;;  %v10849_v0 = vpop.f32.mrf.mxu0 }
 0x550   :  { %14889 = vst [vmem:[#allocation9_spill] sm:$0xff] %v10849_v0 }
 0x551   :  { %3154 = vmatmul.f32.gmra.mxu1 %v3087_v58  ;;  %3268 = vmatmul.f32.gmra.mxu2 %v10613_v35 }
 0x552   :  { %v10822_v31 = vpop.f32.mrf.mxu3 }
 0x554   :  { %v10827_v55 = vpop.f32.mrf.mxu2 }
 0x557   :  { %3388 = vmatmul.f32.gmra.mxu3 %v3317_v56  ;;  %v10829_v8 = vpop.f32.mrf.mxu1  ;;  %v3470_v39 = vpop.f32.mrf.mxu0 }
 0x559   :  { %3157 = vmatmul.f32.gmra.mxu1 %v3088_v13  ;;  %3271 = vmatmul.f32.gmra.mxu2 %v10657_v28  ;;  %v3093_v13 = vld [vmem:[#allocation2 + $0x22f] sm:$0xff] }
 0x55a   :  { %v10831_v63 = vpop.f32.mrf.mxu3 }
 0x55c   :  { %v10834_v4 = vpop.f32.mrf.mxu2 }
 0x55f   :  { %3391 = vmatmul.f32.gmra.mxu3 %v3318_v3  ;;  %v10838_v35 = vpop.f32.mrf.mxu1 }
 0x561   :  { %3160 = vmatmul.f32.gmra.mxu1 %v3089_v26  ;;  %3274 = vmatmul.f32.gmra.mxu2 %v10698_v14 }
 0x562   :  { %v10840_v44 = vpop.f32.mrf.mxu3 }
 0x564   :  { %v10843_v21 = vpop.f32.mrf.mxu2 }
 0x567   :  { %3394 = vmatmul.f32.gmra.mxu3 %v3319_v59  ;;  %v10845_v61 = vpop.f32.mrf.mxu1 }
 0x569   :  { %3163 = vmatmul.f32.gmra.mxu1 %v3090_v53  ;;  %3277 = vmatmul.f32.gmra.mxu2 %v10734_v15  ;;  %v3092_v15 = vld [vmem:[#allocation2 + $0x217] sm:$0xff]  ;;  %v3062_v53 = vadd.f32 %v9977_v48, %v10761_v1 }
 0x56a   :  { %v10847_v28 = vpop.f32.mrf.mxu3 }
 0x56c   :  { %v10853_v36 = vpop.f32.mrf.mxu2 }
 0x56f   :  { %3397 = vmatmul.f32.gmra.mxu3 %v10748_v30  ;;  %v10855_v14 = vpop.f32.mrf.mxu1  ;;  %v3473_v30 = vpop.f32.mrf.mxu0 }
 0x571   :  { %3166 = vmatmul.f32.gmra.mxu1 %v3091_v16  ;;  %3280 = vmatmul.f32.gmra.mxu2 %v10742_v18 }
 0x572   :  { %v10857_v32 = vpop.f32.mrf.mxu3 }
 0x574   :  { %v10860_v23 = vpop.f32.mrf.mxu2 }
 0x577   :  { %3400 = vmatmul.f32.gmra.mxu3 %v3321_v20  ;;  %v10862_v38 = vpop.f32.mrf.mxu1  ;;  %v3476_v26 = vpop.f32.mrf.mxu0 }
 0x579   :  { %3169 = vmatmul.f32.gmra.mxu1 %v3092_v15  ;;  %3283 = vmatmul.f32.gmra.mxu2 %v10536_v50 }
 0x57a   :  { %v10864_v22 = vpop.f32.mrf.mxu3 }
 0x57b   :  { %14890 = vst [vmem:[#allocation10_spill] sm:$0xff] %v10864_v22 }
 0x57c   :  { %v10867_v58 = vpop.f32.mrf.mxu2 }
 0x57f   :  { %v10869_v56 = vpop.f32.mrf.mxu1  ;;  %v10876_v34 = vpop.f32.mrf.mxu0 }
 0x580   :  { %14891 = vst [vmem:[#allocation11_spill] sm:$0xff] %v10869_v56 }
 0x581   :  { %3172 = vmatmul.f32.gmra.mxu1 %v3093_v13  ;;  %3286 = vmatmul.f32.gmra.mxu2 %v10536_v50  ;;  %v10881_v50 = vld [vmem:[%s14839_s4] ss:$0 sm:$0xff] }
 0x582   :  { %v3356_v3 = vpop.f32.mrf.mxu3 }
 0x584   :  { %v10872_v18 = vpop.f32.mrf.mxu2 }
 0x585   :  { %14892 = vst [vmem:[#allocation12_spill] sm:$0xff] %v10872_v18  ;;  %v3063_v18 = vadd.f32 %v10002_v57, %v10768_v7  ;;  %v7190_v57 = vld [vmem:[%s14840_s5 + $0x3f0] sm:$0xff]  ;;  %v7184_v7 = vld [vmem:[%s14840_s5 + $0x3c0] sm:$0xff] }
 0x586   :  { %3790 = vmatpush.msrb.mxu3 %v7190_v57 }
 0x587   :  { %v3128_v59 = vpop.f32.mrf.mxu1 }
 0x588   :  { %v3176_v16 = vadd.f32 %v3128_v59, %v3062_v53 }
 0x58a   :  { %v3359_v19 = vpop.f32.mrf.mxu3 }
 0x58c   :  { %v3242_v20 = vpop.f32.mrf.mxu2 }
 0x58d   :  { %v3290_v15 = vadd.f32 %v3242_v20, %v3176_v16 }
 0x58f   :  { %v3131_v0 = vpop.f32.mrf.mxu1  ;;  %v3404_v56 = vadd.f32 %v3356_v3, %v3290_v15  ;;  %v7188_v15 = vld [vmem:[%s14840_s5 + $0x3e0] sm:$0xff] }
 0x590   :  { %v3177_v48 = vadd.f32 %v3131_v0, %v3063_v18  ;;  %3750 = vmatpush.msrb.mxu1 %v7188_v15  ;;  %v7185_v0 = vld [vmem:[%s14840_s5 + $0x3c8] sm:$0xff] }
 0x591   :  { %v3518_v13 = vadd.f32 %v3470_v39, %v3404_v56  ;;  %v7189_v39 = vld [vmem:[%s14840_s5 + $0x3e8] sm:$0xff]  ;;  %v10906_v56 = vpop.f32.mrf.mxu0 }
 0x592   :  { %v3362_v22 = vpop.f32.mrf.mxu3  ;;  %3770 = vmatpush.msrb.mxu2 %v7189_v39  ;;  %3751 = vmatpush.msrb.mxu1 %v7184_v7  ;;  %v7181_v7 = vld [vmem:[%s14840_s5 + $0x3a8] sm:$0xff] }
 0x593   :  { %v3538_v25 = vadd.f32 %v10881_v50, %v3518_v13 }
 0x594   :  { %v3245_v1 = vpop.f32.mrf.mxu2  ;;  %3771 = vmatpush.msrb.mxu2 %v7185_v0  ;;  %v7308_v0 = vld [vmem:[%s14840_s5 + $0x7a0] sm:$0xff] }
 0x595   :  { %v3554_v59 = vmax.f32 %v3538_v25, 0.0  ;;  %v3291_v53 = vadd.f32 %v3245_v1, %v3177_v48  ;;  %v7316_v25 = vld [vmem:[%s14840_s5 + $0x7e0] sm:$0xff]  ;;  %v7186_v48 = vld [vmem:[%s14840_s5 + $0x3d0] sm:$0xff] }
 0x596   :  { %4167 = vmatpush.msrb.mxu0 %v7316_v25  ;;  %v7312_v1 = vld [vmem:[%s14840_s5 + $0x7c0] sm:$0xff]  ;;  %3791 = vmatpush.msrb.mxu3 %v7186_v48 }
 0x597   :  { %v3134_v16 = vpop.f32.mrf.mxu1  ;;  %3570 = vst [vmem:[#allocation3] sm:$0xff] %v3554_v59  ;;  %v3405_v3 = vadd.f32 %v3359_v19, %v3291_v53  ;;  %v14893_v19 = vld [vmem:[#allocation29_spill] sm:$0xff]  ;;  %v7180_v25 = vld [vmem:[%s14840_s5 + $0x3a0] sm:$0xff]  ;;  %3772 = vmatpush.msrb.mxu2 %v7181_v7  ;;  %v7169_v7 = vld [vmem:[%s14840_s5 + $0x348] sm:$0xff] }
 0x598   :  { %v3064_v13 = vadd.f32 %v14893_v19, %v10773_v27  ;;  %4168 = vmatpush.msrb.mxu0 %v7312_v1  ;;  %3752 = vmatpush.msrb.mxu1 %v7180_v25  ;;  %v7178_v1 = vld [vmem:[%s14840_s5 + $0x390] sm:$0xff]  ;;  %v7168_v25 = vld [vmem:[%s14840_s5 + $0x340] sm:$0xff] }
 0x599   :  { %v3519_v18 = vadd.f32 %v3473_v30, %v3405_v3 }
 0x59a   :  { %v10886_v20 = vpop.f32.mrf.mxu3  ;;  %v3178_v53 = vadd.f32 %v3134_v16, %v3064_v13  ;;  %v7182_v16 = vld [vmem:[%s14840_s5 + $0x3b0] sm:$0xff]  ;;  %v14894_v13 = vld [vmem:[#allocation30_spill] sm:$0xff]  ;;  %4169 = vmatpush.msrb.mxu0 %v7308_v0 }
 0x59b   :  { %v3539_v59 = vadd.f32 %v10881_v50, %v3519_v18  ;;  %v7177_v18 = vld [vmem:[%s14840_s5 + $0x388] sm:$0xff]  ;;  %v3065_v48 = vadd.f32 %v14894_v13, %v10780_v51  ;;  %3792 = vmatpush.msrb.mxu3 %v7182_v16  ;;  %v7170_v0 = vld [vmem:[%s14840_s5 + $0x350] sm:$0xff] }
 0x59c   :  { %v3248_v30 = vpop.f32.mrf.mxu2  ;;  %3773 = vmatpush.msrb.mxu2 %v7177_v18  ;;  %v7173_v51 = vld [vmem:[%s14840_s5 + $0x368] sm:$0xff] }
 0x59d   :  { %v3555_v3 = vmax.f32 %v3539_v59, 0.0  ;;  %v3292_v27 = vadd.f32 %v3248_v30, %v3178_v53  ;;  %v7304_v59 = vld [vmem:[%s14840_s5 + $0x780] sm:$0xff]  ;;  %3793 = vmatpush.msrb.mxu3 %v7178_v1 }
 0x59e   :  { %v7172_v53 = vld [vmem:[%s14840_s5 + $0x360] sm:$0xff]  ;;  %4170 = vmatpush.msrb.mxu0 %v7304_v59  ;;  %3774 = vmatpush.msrb.mxu2 %v7173_v51  ;;  %v7165_v59 = vld [vmem:[%s14840_s5 + $0x328] sm:$0xff] }
 0x59f   :  { %v3137_v15 = vpop.f32.mrf.mxu1  ;;  %3571 = vst [vmem:[#allocation3 + $0x8] sm:$0xff] %v3555_v3  ;;  %v3406_v57 = vadd.f32 %v3362_v22, %v3292_v27  ;;  %v7176_v22 = vld [vmem:[%s14840_s5 + $0x380] sm:$0xff]  ;;  %v10957_v3 = vpop.f32.mrf.mxu0 }
 0x5a0   :  { %3753 = vmatpush.msrb.mxu1 %v7176_v22  ;;  %v7300_v30 = vld [vmem:[%s14840_s5 + $0x760] sm:$0xff]  ;;  %3775 = vmatpush.msrb.mxu2 %v7169_v7 }
 0x5a1   :  { %v3520_v19 = vadd.f32 %v3476_v26, %v3406_v57  ;;  %v7174_v26 = vld [vmem:[%s14840_s5 + $0x370] sm:$0xff]  ;;  %v3179_v57 = vadd.f32 %v3137_v15, %v3065_v48  ;;  %v7296_v15 = vld [vmem:[%s14840_s5 + $0x740] sm:$0xff]  ;;  %4171 = vmatpush.msrb.mxu0 %v7300_v30 }
 0x5a2   :  { %v10917_v39 = vpop.f32.mrf.mxu3  ;;  %3754 = vmatpush.msrb.mxu1 %v7172_v53  ;;  %3794 = vmatpush.msrb.mxu3 %v7174_v26  ;;  %v7164_v1 = vld [vmem:[%s14840_s5 + $0x320] sm:$0xff]  ;;  %v7166_v53 = vld [vmem:[%s14840_s5 + $0x330] sm:$0xff]  ;;  %v7161_v26 = vld [vmem:[%s14840_s5 + $0x308] sm:$0xff] }
 0x5a3   :  { %v3540_v27 = vadd.f32 %v10881_v50, %v3520_v19  ;;  %4172 = vmatpush.msrb.mxu0 %v7296_v15  ;;  %3776 = vmatpush.msrb.mxu2 %v7165_v59  ;;  %v7160_v51 = vld [vmem:[%s14840_s5 + $0x300] sm:$0xff]  ;;  %v7154_v59 = vld [vmem:[%s14840_s5 + $0x2d0] sm:$0xff] }
 0x5a4   :  { %v3251_v16 = vpop.f32.mrf.mxu2  ;;  %3755 = vmatpush.msrb.mxu1 %v7168_v25  ;;  %3795 = vmatpush.msrb.mxu3 %v7170_v0  ;;  %v7162_v25 = vld [vmem:[%s14840_s5 + $0x310] sm:$0xff]  ;;  %v7288_v7 = vld [vmem:[%s14840_s5 + $0x700] sm:$0xff] }
 0x5a5   :  { %v3556_v22 = vmax.f32 %v3540_v27, 0.0  ;;  %v3293_v18 = vadd.f32 %v3251_v16, %v3179_v57  ;;  %v14895_v27 = vld [vmem:[#allocation31_spill] sm:$0xff]  ;;  %3777 = vmatpush.msrb.mxu2 %v7161_v26 }
 0x5a6   :  { %3756 = vmatpush.msrb.mxu1 %v7164_v1  ;;  %v3066_v57 = vadd.f32 %v14895_v27, %v10788_v42  ;;  %3796 = vmatpush.msrb.mxu3 %v7166_v53  ;;  %v7156_v16 = vld [vmem:[%s14840_s5 + $0x2e0] sm:$0xff]  ;;  %v7157_v42 = vld [vmem:[%s14840_s5 + $0x2e8] sm:$0xff] }
 0x5a7   :  { %v3140_v19 = vpop.f32.mrf.mxu1  ;;  %3572 = vst [vmem:[#allocation3 + $0x10] sm:$0xff] %v3556_v22  ;;  %v3407_v48 = vadd.f32 %v10886_v20, %v3293_v18  ;;  %v7292_v20 = vld [vmem:[%s14840_s5 + $0x720] sm:$0xff]  ;;  %3778 = vmatpush.msrb.mxu2 %v7157_v42  ;;  %v11027_v53 = vpop.f32.mrf.mxu0  ;;  %v7145_v42 = vld [vmem:[%s14840_s5 + $0x288] sm:$0xff] }
 0x5a8   :  { %4173 = vmatpush.msrb.mxu0 %v7292_v20  ;;  %3757 = vmatpush.msrb.mxu1 %v7160_v51  ;;  %v7284_v0 = vld [vmem:[%s14840_s5 + $0x6e0] sm:$0xff]  ;;  %v3180_v22 = vadd.f32 %v3140_v19, %v3066_v57 }
 0x5a9   :  { %v3521_v30 = vadd.f32 %v10876_v34, %v3407_v48  ;;  %v7158_v34 = vld [vmem:[%s14840_s5 + $0x2f0] sm:$0xff]  ;;  %3797 = vmatpush.msrb.mxu3 %v7162_v25  ;;  %v7152_v18 = vld [vmem:[%s14840_s5 + $0x2c0] sm:$0xff]  ;;  %v7153_v48 = vld [vmem:[%s14840_s5 + $0x2c8] sm:$0xff] }
 0x5aa   :  { %v10972_v13 = vpop.f32.mrf.mxu3  ;;  %4174 = vmatpush.msrb.mxu0 %v7288_v7  ;;  %3758 = vmatpush.msrb.mxu1 %v7156_v16  ;;  %v7280_v19 = vld [vmem:[%s14840_s5 + $0x6c0] sm:$0xff]  ;;  %v7149_v25 = vld [vmem:[%s14840_s5 + $0x2a8] sm:$0xff]  ;;  %v7150_v7 = vld [vmem:[%s14840_s5 + $0x2b0] sm:$0xff] }
 0x5ab   :  { %v3541_v15 = vadd.f32 %v10881_v50, %v3521_v30  ;;  %3798 = vmatpush.msrb.mxu3 %v7158_v34  ;;  %3779 = vmatpush.msrb.mxu2 %v7153_v48  ;;  %v7148_v57 = vld [vmem:[%s14840_s5 + $0x2a0] sm:$0xff] }
 0x5ac   :  { %v3254_v1 = vpop.f32.mrf.mxu2  ;;  %4175 = vmatpush.msrb.mxu0 %v7284_v0  ;;  %3759 = vmatpush.msrb.mxu1 %v7152_v18  ;;  %v7144_v16 = vld [vmem:[%s14840_s5 + $0x280] sm:$0xff]  ;;  %v14896_v0 = vld [vmem:[#allocation32_spill] sm:$0xff] }
 0x5ad   :  { %v3557_v20 = vmax.f32 %v3541_v15, 0.0  ;;  %v3294_v51 = vadd.f32 %v3254_v1, %v3180_v22  ;;  %3799 = vmatpush.msrb.mxu3 %v7154_v59  ;;  %3780 = vmatpush.msrb.mxu2 %v7149_v25  ;;  %v3067_v15 = vadd.f32 %v14896_v0, %v10795_v60  ;;  %v7146_v22 = vld [vmem:[%s14840_s5 + $0x290] sm:$0xff]  ;;  %v7272_v18 = vld [vmem:[%s14840_s5 + $0x680] sm:$0xff]  ;;  %v7141_v60 = vld [vmem:[%s14840_s5 + $0x268] sm:$0xff] }
 0x5ae   :  { %4176 = vmatpush.msrb.mxu0 %v7280_v19  ;;  %3760 = vmatpush.msrb.mxu1 %v7148_v57  ;;  %v7140_v48 = vld [vmem:[%s14840_s5 + $0x260] sm:$0xff]  ;;  %v7138_v57 = vld [vmem:[%s14840_s5 + $0x250] sm:$0xff]  ;;  %v7133_v0 = vld [vmem:[%s14840_s5 + $0x228] sm:$0xff] }
 0x5af   :  { %v3143_v26 = vpop.f32.mrf.mxu1  ;;  %3573 = vst [vmem:[#allocation3 + $0x18] sm:$0xff] %v3557_v20  ;;  %v3408_v27 = vadd.f32 %v10917_v39, %v3294_v51  ;;  %v7276_v39 = vld [vmem:[%s14840_s5 + $0x6a0] sm:$0xff]  ;;  %3800 = vmatpush.msrb.mxu3 %v7150_v7  ;;  %3781 = vmatpush.msrb.mxu2 %v7145_v42  ;;  %v7137_v51 = vld [vmem:[%s14840_s5 + $0x248] sm:$0xff] }
 0x5b0   :  { %4177 = vmatpush.msrb.mxu0 %v7276_v39  ;;  %3761 = vmatpush.msrb.mxu1 %v7144_v16  ;;  %v7268_v1 = vld [vmem:[%s14840_s5 + $0x660] sm:$0xff]  ;;  %v3181_v19 = vadd.f32 %v3143_v26, %v3067_v15  ;;  %v7134_v15 = vld [vmem:[%s14840_s5 + $0x230] sm:$0xff] }
 0x5b1   :  { %v3522_v34 = vadd.f32 %v10906_v56, %v3408_v27  ;;  %v7142_v56 = vld [vmem:[%s14840_s5 + $0x270] sm:$0xff]  ;;  %3801 = vmatpush.msrb.mxu3 %v7146_v22  ;;  %v7136_v20 = vld [vmem:[%s14840_s5 + $0x240] sm:$0xff]  ;;  %3782 = vmatpush.msrb.mxu2 %v7141_v60  ;;  %v11096_v22 = vpop.f32.mrf.mxu0 }
 0x5b2   :  { %v11029_v30 = vpop.f32.mrf.mxu3  ;;  %4178 = vmatpush.msrb.mxu0 %v7272_v18  ;;  %3762 = vmatpush.msrb.mxu1 %v7140_v48  ;;  %v7264_v26 = vld [vmem:[%s14840_s5 + $0x640] sm:$0xff]  ;;  %v7129_v48 = vld [vmem:[%s14840_s5 + $0x208] sm:$0xff] }
 0x5b3   :  { %v3542_v59 = vadd.f32 %v10881_v50, %v3522_v34  ;;  %3802 = vmatpush.msrb.mxu3 %v7142_v56  ;;  %3783 = vmatpush.msrb.mxu2 %v7137_v51  ;;  %v7132_v34 = vld [vmem:[%s14840_s5 + $0x220] sm:$0xff]  ;;  %v3068_v56 = vadd.f32 %v10672_v54, %v10804_v5  ;;  %v3662_v5 = vld [vmem:[%s14840_s5 + $0x1e8] sm:$0xff] }
 0x5b4   :  { %v3257_v27 = vpop.f32.mrf.mxu2  ;;  %4179 = vmatpush.msrb.mxu0 %v7268_v1  ;;  %3763 = vmatpush.msrb.mxu1 %v7136_v20  ;;  %v7128_v18 = vld [vmem:[%s14840_s5 + $0x200] sm:$0xff]  ;;  %v7130_v1 = vld [vmem:[%s14840_s5 + $0x210] sm:$0xff] }
 0x5b5   :  { %v3558_v25 = vmax.f32 %v3542_v59, 0.0  ;;  %v3295_v7 = vadd.f32 %v3257_v27, %v3181_v19  ;;  %3803 = vmatpush.msrb.mxu3 %v7138_v57  ;;  %3784 = vmatpush.msrb.mxu2 %v7133_v0  ;;  %v7256_v59 = vld [vmem:[%s14840_s5 + $0x600] sm:$0xff]  ;;  %v7191_v19 = vld [vmem:[%s14840_s5 + $0x3f8] sm:$0xff] }
 0x5b6   :  { %4180 = vmatpush.msrb.mxu0 %v7264_v26  ;;  %3764 = vmatpush.msrb.mxu1 %v7132_v34  ;;  %v3661_v54 = vld [vmem:[%s14840_s5 + $0x1e0] sm:$0xff]  ;;  %v7187_v27 = vld [vmem:[%s14840_s5 + $0x3d8] sm:$0xff] }
 0x5b7   :  { %v3146_v39 = vpop.f32.mrf.mxu1  ;;  %3574 = vst [vmem:[#allocation3 + $0x20] sm:$0xff] %v3558_v25  ;;  %v3409_v42 = vadd.f32 %v10972_v13, %v3295_v7  ;;  %v7260_v13 = vld [vmem:[%s14840_s5 + $0x620] sm:$0xff]  ;;  %3804 = vmatpush.msrb.mxu3 %v7134_v15  ;;  %3785 = vmatpush.msrb.mxu2 %v7129_v48  ;;  %v3658_v25 = vld [vmem:[%s14840_s5 + $0x1c8] sm:$0xff]  ;;  %v7183_v15 = vld [vmem:[%s14840_s5 + $0x3b8] sm:$0xff] }
 0x5b8   :  { %4181 = vmatpush.msrb.mxu0 %v7260_v13  ;;  %3765 = vmatpush.msrb.mxu1 %v7128_v18  ;;  %v3182_v51 = vadd.f32 %v3146_v39, %v3068_v56  ;;  %v3657_v57 = vld [vmem:[%s14840_s5 + $0x1c0] sm:$0xff]  ;;  %v14897_v39 = vld [vmem:[#allocation21_spill] sm:$0xff]  ;;  %v3654_v48 = vld [vmem:[%s14840_s5 + $0x1a8] sm:$0xff] }
 0x5b9   :  { %v3523_v60 = vadd.f32 %v10957_v3, %v3409_v42  ;;  %v7380_v3 = vld [vmem:[%s14840_s5 + $0x9e0] sm:$0xff]  ;;  %3805 = vmatpush.msrb.mxu3 %v7130_v1  ;;  %3835 = vmatpush.msra.mxu2 %v3661_v54  ;;  %v2613_v42 = vadd.f32 %v14897_v39, %v10556_v29  ;;  %v7179_v1 = vld [vmem:[%s14840_s5 + $0x398] sm:$0xff] }
 0x5ba   :  { %v11084_v16 = vpop.f32.mrf.mxu3  ;;  %4182 = vmatpush.msrb.mxu0 %v7256_v59  ;;  %3810 = vmatpush.msra.mxu1 %v7191_v19  ;;  %v7376_v7 = vld [vmem:[%s14840_s5 + $0x9c0] sm:$0xff] }
 0x5bb   :  { %v3543_v20 = vadd.f32 %v10881_v50, %v3523_v60  ;;  %3855 = vmatpush.msra.mxu3 %v3662_v5  ;;  %v3653_v13 = vld [vmem:[%s14840_s5 + $0x1a0] sm:$0xff]  ;;  %3836 = vmatpush.msra.mxu2 %v3657_v57  ;;  %v2727_v60 = vadd.f32 %v10809_v49, %v2613_v42  ;;  %v3650_v49 = vld [vmem:[%s14840_s5 + $0x188] sm:$0xff]  ;;  %v7171_v57 = vld [vmem:[%s14840_s5 + $0x358] sm:$0xff] }
 0x5bc   :  { %v3260_v26 = vpop.f32.mrf.mxu2  ;;  %4337 = vmatpush.msra.mxu0 %v7380_v3  ;;  %3811 = vmatpush.msra.mxu1 %v7187_v27  ;;  %v7372_v29 = vld [vmem:[%s14840_s5 + $0x9a0] sm:$0xff]  ;;  %v3069_v3 = vadd.f32 %v10766_v6, %v10813_v47  ;;  %v11181_v27 = vpop.f32.mrf.mxu0 }
 0x5bd   :  { %v3559_v34 = vmax.f32 %v3543_v20, 0.0  ;;  %v3296_v0 = vadd.f32 %v3260_v26, %v3182_v51  ;;  %3856 = vmatpush.msra.mxu3 %v3658_v25  ;;  %v3649_v59 = vld [vmem:[%s14840_s5 + $0x180] sm:$0xff]  ;;  %3837 = vmatpush.msra.mxu2 %v3653_v13  ;;  %v2841_v54 = vadd.f32 %v10818_v12, %v2727_v60  ;;  %v7175_v20 = vld [vmem:[%s14840_s5 + $0x378] sm:$0xff]  ;;  %v3646_v12 = vld [vmem:[%s14840_s5 + $0x168] sm:$0xff] }
 0x5be   :  { %4338 = vmatpush.msra.mxu0 %v7376_v7  ;;  %3812 = vmatpush.msra.mxu1 %v7183_v15  ;;  %v3645_v51 = vld [vmem:[%s14840_s5 + $0x160] sm:$0xff]  ;;  %v3642_v7 = vld [vmem:[%s14840_s5 + $0x148] sm:$0xff] }
 0x5bf   :  { %v3149_v18 = vpop.f32.mrf.mxu1  ;;  %3575 = vst [vmem:[#allocation3 + $0x28] sm:$0xff] %v3559_v34  ;;  %v3410_v56 = vadd.f32 %v11029_v30, %v3296_v0  ;;  %v7368_v30 = vld [vmem:[%s14840_s5 + $0x980] sm:$0xff]  ;;  %3857 = vmatpush.msra.mxu3 %v3654_v48  ;;  %3838 = vmatpush.msra.mxu2 %v3649_v59  ;;  %v2955_v42 = vadd.f32 %v10800_v33, %v2841_v54  ;;  %v3638_v33 = vld [vmem:[%s14840_s5 + $0x128] sm:$0xff] }
 0x5c0   :  { %4339 = vmatpush.msra.mxu0 %v7372_v29  ;;  %3813 = vmatpush.msra.mxu1 %v7179_v1  ;;  %v7364_v6 = vld [vmem:[%s14840_s5 + $0x960] sm:$0xff]  ;;  %v7163_v1 = vld [vmem:[%s14840_s5 + $0x318] sm:$0xff] }
 0x5c1   :  { %v3524_v5 = vadd.f32 %v11027_v53, %v3410_v56  ;;  %v3183_v53 = vadd.f32 %v3149_v18, %v3069_v3  ;;  %3858 = vmatpush.msra.mxu3 %v3650_v49  ;;  %v3641_v26 = vld [vmem:[%s14840_s5 + $0x140] sm:$0xff]  ;;  %3839 = vmatpush.msra.mxu2 %v3645_v51  ;;  %v7167_v18 = vld [vmem:[%s14840_s5 + $0x338] sm:$0xff]  ;;  %v3634_v49 = vld [vmem:[%s14840_s5 + $0x108] sm:$0xff]  ;;  %v3070_v54 = vadd.f32 %v10775_v2, %v2955_v42 }
 0x5c2   :  { %v11163_v19 = vpop.f32.mrf.mxu3  ;;  %4340 = vmatpush.msra.mxu0 %v7368_v30  ;;  %3814 = vmatpush.msra.mxu1 %v7175_v20  ;;  %v7360_v39 = vld [vmem:[%s14840_s5 + $0x940] sm:$0xff] }
 0x5c3   :  { %v3544_v47 = vadd.f32 %v10881_v50, %v3524_v5  ;;  %v14898_v34 = vld [vmem:[#allocation22_spill] sm:$0xff]  ;;  %3859 = vmatpush.msra.mxu3 %v3646_v12  ;;  %3840 = vmatpush.msra.mxu2 %v3641_v26 }
 0x5c4   :  { %v3263_v25 = vpop.f32.mrf.mxu2  ;;  %v2614_v0 = vadd.f32 %v14898_v34, %v10602_v10  ;;  %4341 = vmatpush.msra.mxu0 %v7364_v6  ;;  %v3637_v48 = vld [vmem:[%s14840_s5 + $0x120] sm:$0xff]  ;;  %3815 = vmatpush.msra.mxu1 %v7171_v57  ;;  %v7159_v5 = vld [vmem:[%s14840_s5 + $0x2f8] sm:$0xff]  ;;  %v3626_v57 = vld [vmem:[%s14840_s5 + $0xc8] sm:$0xff] }
 0x5c5   :  { %v3560_v15 = vmax.f32 %v3544_v47, 0.0  ;;  %v3297_v13 = vadd.f32 %v3263_v25, %v3183_v53  ;;  %v7356_v10 = vld [vmem:[%s14840_s5 + $0x920] sm:$0xff]  ;;  %3860 = vmatpush.msra.mxu3 %v3642_v7  ;;  %3841 = vmatpush.msra.mxu2 %v3637_v48  ;;  %v7155_v12 = vld [vmem:[%s14840_s5 + $0x2d8] sm:$0xff]  ;;  %v11255_v47 = vpop.f32.mrf.mxu0 }
 0x5c6   :  { %v2728_v60 = vadd.f32 %v10820_v41, %v2614_v0  ;;  %4342 = vmatpush.msra.mxu0 %v7360_v39  ;;  %v3633_v59 = vld [vmem:[%s14840_s5 + $0x100] sm:$0xff]  ;;  %3816 = vmatpush.msra.mxu1 %v7167_v18  ;;  %v7151_v0 = vld [vmem:[%s14840_s5 + $0x2b8] sm:$0xff] }
 0x5c7   :  { %v3152_v29 = vpop.f32.mrf.mxu1  ;;  %3576 = vst [vmem:[#allocation3 + $0x30] sm:$0xff] %v3560_v15  ;;  %v3411_v56 = vadd.f32 %v11084_v16, %v3297_v13  ;;  %v7352_v41 = vld [vmem:[%s14840_s5 + $0x900] sm:$0xff]  ;;  %3861 = vmatpush.msra.mxu3 %v3638_v33  ;;  %3842 = vmatpush.msra.mxu2 %v3633_v59 }
 0x5c8   :  { %v2842_v16 = vadd.f32 %v10827_v55, %v2728_v60  ;;  %4343 = vmatpush.msra.mxu0 %v7356_v10  ;;  %v3629_v3 = vld [vmem:[%s14840_s5 + $0xe0] sm:$0xff]  ;;  %3817 = vmatpush.msra.mxu1 %v7163_v1  ;;  %v3630_v55 = vld [vmem:[%s14840_s5 + $0xe8] sm:$0xff]  ;;  %v3184_v51 = vadd.f32 %v3152_v29, %v3070_v54  ;;  %v7147_v29 = vld [vmem:[%s14840_s5 + $0x298] sm:$0xff] }
 0x5c9   :  { %v3525_v30 = vadd.f32 %v11096_v22, %v3411_v56  ;;  %v7348_v2 = vld [vmem:[%s14840_s5 + $0x8e0] sm:$0xff]  ;;  %3862 = vmatpush.msra.mxu3 %v3634_v49  ;;  %3843 = vmatpush.msra.mxu2 %v3629_v3  ;;  %v3618_v10 = vld [vmem:[%s14840_s5 + $0x88] sm:$0xff]  ;;  %v7143_v1 = vld [vmem:[%s14840_s5 + $0x278] sm:$0xff] }
 0x5ca   :  { %v11240_v20 = vpop.f32.mrf.mxu3  ;;  %4344 = vmatpush.msra.mxu0 %v7352_v41  ;;  %v3625_v6 = vld [vmem:[%s14840_s5 + $0xc0] sm:$0xff]  ;;  %3818 = vmatpush.msra.mxu1 %v7159_v5  ;;  %v2956_v25 = vadd.f32 %v10811_v40, %v2842_v16  ;;  %v3622_v40 = vld [vmem:[%s14840_s5 + $0xa8] sm:$0xff]  ;;  %v7139_v41 = vld [vmem:[%s14840_s5 + $0x258] sm:$0xff] }
 0x5cb   :  { %v3545_v22 = vadd.f32 %v10881_v50, %v3525_v30  ;;  %v7344_v26 = vld [vmem:[%s14840_s5 + $0x8c0] sm:$0xff]  ;;  %3863 = vmatpush.msra.mxu3 %v3630_v55  ;;  %3844 = vmatpush.msra.mxu2 %v3625_v6  ;;  %v3610_v5 = vld [vmem:[%s14840_s5 + $0x48] sm:$0xff]  ;;  %v7135_v6 = vld [vmem:[%s14840_s5 + $0x238] sm:$0xff] }
 0x5cc   :  { %v3266_v53 = vpop.f32.mrf.mxu2  ;;  %v14899_v7 = vld [vmem:[#allocation23_spill] sm:$0xff]  ;;  %4345 = vmatpush.msra.mxu0 %v7348_v2  ;;  %3819 = vmatpush.msra.mxu1 %v7155_v12  ;;  %v3071_v56 = vadd.f32 %v10785_v17, %v2956_v25  ;;  %v14900_v2 = vld [vmem:[#allocation24_spill] sm:$0xff] }
 0x5cd   :  { %v2615_v39 = vadd.f32 %v14899_v7, %v10649_v11  ;;  %v3561_v42 = vmax.f32 %v3545_v22, 0.0  ;;  %v3298_v34 = vadd.f32 %v3266_v53, %v3184_v51  ;;  %v3621_v15 = vld [vmem:[%s14840_s5 + $0xa0] sm:$0xff]  ;;  %3864 = vmatpush.msra.mxu3 %v3626_v57  ;;  %v2616_v22 = vadd.f32 %v14900_v2, %v10690_v62  ;;  %v3500_v57 = vpop.f32.mrf.mxu0  ;;  %v3606_v62 = vld [vmem:[%s14840_s5 + $0x28] sm:$0xff] }
 0x5ce   :  { %v7340_v11 = vld [vmem:[%s14840_s5 + $0x8a0] sm:$0xff]  ;;  %4346 = vmatpush.msra.mxu0 %v7344_v26  ;;  %3820 = vmatpush.msra.mxu1 %v7151_v0 }
 0x5cf   :  { %v3155_v13 = vpop.f32.mrf.mxu1  ;;  %v2729_v18 = vadd.f32 %v10829_v8, %v2615_v39  ;;  %3577 = vst [vmem:[#allocation3 + $0x38] sm:$0xff] %v3561_v42  ;;  %v3412_v48 = vadd.f32 %v11163_v19, %v3298_v34  ;;  %v3617_v33 = vld [vmem:[%s14840_s5 + $0x80] sm:$0xff]  ;;  %3845 = vmatpush.msra.mxu2 %v3621_v15  ;;  %3865 = vmatpush.msra.mxu3 %v3622_v40  ;;  %v7131_v39 = vld [vmem:[%s14840_s5 + $0x218] sm:$0xff]  ;;  %v3602_v34 = vld [vmem:[%s14840_s5 + $0x8] sm:$0xff] }
 0x5d0   :  { %v7336_v8 = vld [vmem:[%s14840_s5 + $0x880] sm:$0xff]  ;;  %4347 = vmatpush.msra.mxu0 %v7340_v11  ;;  %3821 = vmatpush.msra.mxu1 %v7147_v29  ;;  %v3185_v49 = vadd.f32 %v3155_v13, %v3071_v56  ;;  %v2730_v25 = vadd.f32 %v10838_v35, %v2616_v22  ;;  %v14901_v11 = vld [vmem:[#allocation25_spill] sm:$0xff] }
 0x5d1   :  { %v2843_v19 = vadd.f32 %v10834_v4, %v2729_v18  ;;  %v3526_v60 = vadd.f32 %v11181_v27, %v3412_v48  ;;  %v3613_v59 = vld [vmem:[%s14840_s5 + $0x60] sm:$0xff]  ;;  %3846 = vmatpush.msra.mxu2 %v3617_v33  ;;  %v3614_v4 = vld [vmem:[%s14840_s5 + $0x68] sm:$0xff]  ;;  %3866 = vmatpush.msra.mxu3 %v3618_v10  ;;  %v2617_v18 = vadd.f32 %v14901_v11, %v10732_v45 }
 0x5d2   :  { %v7332_v17 = vld [vmem:[%s14840_s5 + $0x860] sm:$0xff]  ;;  %4348 = vmatpush.msra.mxu0 %v7336_v8  ;;  %v3386_v54 = vpop.f32.mrf.mxu3  ;;  %3822 = vmatpush.msra.mxu1 %v7143_v1 }
 0x5d3   :  { %v3546_v27 = vadd.f32 %v10881_v50, %v3526_v60  ;;  %v3609_v16 = vld [vmem:[%s14840_s5 + $0x40] sm:$0xff]  ;;  %3847 = vmatpush.msra.mxu2 %v3613_v59  ;;  %v2957_v55 = vadd.f32 %v10822_v31, %v2843_v19  ;;  %3867 = vmatpush.msra.mxu3 %v3614_v4  ;;  %v3669_v4 = vld [vmem:[#allocation3 + $0xa] sm:$0x1] }
 0x5d4   :  { %v3269_v30 = vpop.f32.mrf.mxu2  ;;  %v7328_v3 = vld [vmem:[%s14840_s5 + $0x840] sm:$0xff]  ;;  %4349 = vmatpush.msra.mxu0 %v7332_v17  ;;  %3823 = vmatpush.msra.mxu1 %v7139_v41  ;;  %v3671_v17 = vld [vmem:[#allocation3 + $0xb] sm:$0x1] }
 0x5d5   :  { %v3562_v51 = vmax.f32 %v3546_v27, 0.0  ;;  %v3299_v12 = vadd.f32 %v3269_v30, %v3185_v49  ;;  %v3605_v53 = vld [vmem:[%s14840_s5 + $0x20] sm:$0xff]  ;;  %3848 = vmatpush.msra.mxu2 %v3609_v16  ;;  %3868 = vmatpush.msra.mxu3 %v3610_v5  ;;  %v3072_v15 = vadd.f32 %v10793_v24, %v2957_v55  ;;  %v3503_v19 = vpop.f32.mrf.mxu0 }
 0x5d6   :  { %v7324_v31 = vld [vmem:[%s14840_s5 + $0x820] sm:$0xff]  ;;  %4350 = vmatpush.msra.mxu0 %v7328_v3  ;;  %3824 = vmatpush.msra.mxu1 %v7135_v6 }
 0x5d7   :  { %v3158_v26 = vpop.f32.mrf.mxu1  ;;  %3578 = vst [vmem:[#allocation3 + $0x40] sm:$0xff] %v3562_v51  ;;  %v3413_v7 = vadd.f32 %v11240_v20, %v3299_v12  ;;  %v3601_v42 = vld [vmem:[%s14840_s5] sm:$0xff]  ;;  %3849 = vmatpush.msra.mxu2 %v3605_v53  ;;  %v2844_v20 = vadd.f32 %v10843_v21, %v2730_v25  ;;  %3869 = vmatpush.msra.mxu3 %v3606_v62 }
 0x5d8   :  { %v7320_v35 = vld [vmem:[%s14840_s5 + $0x800] sm:$0xff]  ;;  %4351 = vmatpush.msra.mxu0 %v7324_v31  ;;  %3825 = vmatpush.msra.mxu1 %v7131_v39  ;;  %v3186_v40 = vadd.f32 %v3158_v26, %v3072_v15  ;;  %v3675_v62 = vmax.f32 %v3669_v4, %v3671_v17 }
 0x5d9   :  { %v3527_v0 = vadd.f32 %v11255_v47, %v3413_v7  ;;  %3850 = vmatpush.msra.mxu2 %v3601_v42  ;;  %3870 = vmatpush.msra.mxu3 %v3602_v34  ;;  %v2958_v29 = vadd.f32 %v10831_v63, %v2844_v20  ;;  %v2731_v47 = vadd.f32 %v10845_v61, %v2617_v18  ;;  %v4087_v63 = vld [vmem:[#allocation3 + $0xe] sm:$0x1]  ;;  %v14902_v61 = vld [vmem:[#allocation26_spill] sm:$0xff]  ;;  %v3665_v16 = vld [vmem:[#allocation3 + $0x2] sm:$0x1] }
 0x5da   :  { %4352 = vmatpush.msra.mxu0 %v7320_v35  ;;  %v3389_v10 = vpop.f32.mrf.mxu3  ;;  %v2618_v49 = vadd.f32 %v14902_v61, %v10740_v43  ;;  %v4085_v22 = vld [vmem:[#allocation3 + $0x7] sm:$0x1] }
 0x5db   :  { %v3547_v13 = vadd.f32 %v10881_v50, %v3527_v0  ;;  %v2845_v60 = vadd.f32 %v10853_v36, %v2731_v47  ;;  %v3073_v1 = vadd.f32 %v10802_v37, %v2958_v29  ;;  %v4089_v36 = vld [vmem:[#allocation3 + $0xf] sm:$0x1]  ;;  %v4083_v37 = vld [vmem:[#allocation3 + $0x6] sm:$0x1] }
 0x5dc   :  { %v3272_v48 = vpop.f32.mrf.mxu2  ;;  %v2732_v12 = vadd.f32 %v10855_v14, %v2618_v49  ;;  %v4093_v35 = vmax.f32 %v4087_v63, %v4089_v36  ;;  %v4091_v29 = vmax.f32 %v4083_v37, %v4085_v22  ;;  %v7252_v61 = vld [vmem:[%s14840_s5 + $0x5e0] sm:$0xff]  ;;  %v3593_v49 = vld [vmem:[#allocation3 + $0x9] sm:$0x1]  ;;  %v3655_v22 = vld [vmem:[%s14840_s5 + $0x1b0] sm:$0xff] }
 0x5dd   :  { %v3563_v21 = vmax.f32 %v3547_v13, 0.0  ;;  %v3300_v33 = vadd.f32 %v3272_v48, %v3186_v40  ;;  %v2959_v27 = vadd.f32 %v10840_v44, %v2845_v60  ;;  %v3506_v48 = vpop.f32.mrf.mxu0 }
 0x5de   :  { %v3666_v30 = vld [vmem:[#allocation3 + $0x42] sm:$0x1]  ;;  %v3668_v5 = vld [vmem:[#allocation3 + $0x43] sm:$0x1]  ;;  %v4084_v2 = vld [vmem:[#allocation3 + $0x46] sm:$0x1]  ;;  %v2846_v14 = vadd.f32 %v10860_v23, %v2732_v12 }
 0x5df   :  { %v3161_v24 = vpop.f32.mrf.mxu1  ;;  %3579 = vst [vmem:[#allocation3 + $0x48] sm:$0xff] %v3563_v21  ;;  %v3414_v8 = vadd.f32 %v3386_v54, %v3300_v33  ;;  %v3667_v54 = vld [vmem:[#allocation3 + $0x3] sm:$0x1]  ;;  %v4086_v51 = vld [vmem:[#allocation3 + $0x47] sm:$0x1]  ;;  %v3674_v26 = vmax.f32 %v3666_v30, %v3668_v5  ;;  %v3074_v39 = vadd.f32 %v10815_v46, %v2959_v27  ;;  %v3663_v23 = vld [vmem:[%s14840_s5 + $0x1f0] sm:$0xff] }
 0x5e0   :  { %v3187_v45 = vadd.f32 %v3161_v24, %v3073_v1  ;;  %v4092_v34 = vmax.f32 %v4084_v2, %v4086_v51  ;;  %v3673_v13 = vmax.f32 %v3665_v16, %v3667_v54  ;;  %v3587_v11 = vld [vmem:[#allocation3 + $0x40] sm:$0x1]  ;;  %v3589_v18 = vld [vmem:[#allocation3 + $0x41] sm:$0x1]  ;;  %v2960_v4 = vadd.f32 %v10847_v28, %v2846_v14  ;;  %v3659_v30 = vld [vmem:[%s14840_s5 + $0x1d0] sm:$0xff] }
 0x5e1   :  { %v3528_v56 = vadd.f32 %v3500_v57, %v3414_v8  ;;  %v14903_v8 = vld [vmem:[#allocation27_spill] sm:$0xff]  ;;  %v3586_v54 = vld [vmem:[#allocation3] sm:$0x1] }
 0x5e2   :  { %v3392_v42 = vpop.f32.mrf.mxu3  ;;  %v3677_v24 = vmax.f32 %v3673_v13, %v3675_v62  ;;  %v2619_v60 = vadd.f32 %v14903_v8, %v10750_v52  ;;  %v3664_v52 = vld [vmem:[%s14840_s5 + $0x1f8] sm:$0xff]  ;;  %v7248_v2 = vld [vmem:[%s14840_s5 + $0x5c0] sm:$0xff] }
 0x5e3   :  { %v3548_v59 = vadd.f32 %v10881_v50, %v3528_v56  ;;  %v3648_v8 = vld [vmem:[%s14840_s5 + $0x178] sm:$0xff] }
 0x5e4   :  { %v3275_v41 = vpop.f32.mrf.mxu2 }
 0x5e5   :  { %v3564_v3 = vmax.f32 %v3548_v59, 0.0  ;;  %v3301_v55 = vadd.f32 %v3275_v41, %v3187_v45  ;;  %v3591_v59 = vld [vmem:[#allocation3 + $0x8] sm:$0x1]  ;;  %v3596_v45 = vmax.f32 %v3587_v11, %v3589_v18  ;;  %v2733_v41 = vadd.f32 %v10862_v38, %v2619_v60  ;;  %v7444_v38 = vld [vmem:[%s14840_s5 + $0xbe0] sm:$0xff]  ;;  %v11435_v18 = vld [vmem:[#allocation3 + $0x18] sm:$0x1] }
 0x5e6   :  { %v3670_v53 = vld [vmem:[#allocation3 + $0x4a] sm:$0x1]  ;;  %v3672_v44 = vld [vmem:[#allocation3 + $0x4b] sm:$0x1]  ;;  %v4088_v57 = vld [vmem:[#allocation3 + $0x4e] sm:$0x1]  ;;  %v3597_v51 = vmax.f32 %v3591_v59, %v3593_v49 }
 0x5e7   :  { %v3164_v6 = vpop.f32.mrf.mxu1  ;;  %3580 = vst [vmem:[#allocation3 + $0x50] sm:$0xff] %v3564_v3  ;;  %v3415_v43 = vadd.f32 %v3389_v10, %v3301_v55  ;;  %v3676_v31 = vmax.f32 %v3670_v53, %v3672_v44  ;;  %v4090_v25 = vld [vmem:[#allocation3 + $0x4f] sm:$0x1]  ;;  %v3592_v7 = vld [vmem:[#allocation3 + $0x48] sm:$0x1]  ;;  %v3660_v3 = vld [vmem:[%s14840_s5 + $0x1d8] sm:$0xff]  ;;  %v2847_v37 = vadd.f32 %v10867_v58, %v2733_v41 }
 0x5e8   :  { %v4094_v20 = vmax.f32 %v4088_v57, %v4090_v25  ;;  %v3594_v0 = vld [vmem:[#allocation3 + $0x49] sm:$0x1]  ;;  %v3188_v46 = vadd.f32 %v3164_v6, %v3074_v39  ;;  %v3588_v55 = vld [vmem:[#allocation3 + $0x1] sm:$0x1]  ;;  %v3075_v6 = vadd.f32 %v10825_v9, %v2960_v4  ;;  %v3656_v53 = vld [vmem:[%s14840_s5 + $0x1b8] sm:$0xff]  ;;  %v3509_v39 = vpop.f32.mrf.mxu0 }
 0x5e9   :  { %v3529_v15 = vadd.f32 %v3503_v19, %v3415_v43  ;;  %v3678_v40 = vmax.f32 %v3674_v26, %v3676_v31  ;;  %v3598_v33 = vmax.f32 %v3592_v7, %v3594_v0  ;;  %v4095_v19 = vmax.f32 %v4091_v29, %v4093_v35  ;;  %v7440_v58 = vld [vmem:[%s14840_s5 + $0xbc0] sm:$0xff]  ;;  %v3651_v9 = vld [vmem:[%s14840_s5 + $0x190] sm:$0xff]  ;;  %v3652_v7 = vld [vmem:[%s14840_s5 + $0x198] sm:$0xff] }
 0x5ea   :  { %v4096_v21 = vmax.f32 %v4092_v34, %v4094_v20  ;;  %v7244_v44 = vld [vmem:[%s14840_s5 + $0x5a0] sm:$0xff]  ;;  %v3395_v57 = vpop.f32.mrf.mxu3  ;;  %v3595_v43 = vmax.f32 %v3586_v54, %v3588_v55  ;;  %v14905_v35 = vld [vmem:[#allocation28_spill] sm:$0xff] }
 0x5eb   :  { %v3549_v47 = vadd.f32 %v10881_v50, %v3529_v15  ;;  %v3746_v10 = vrot.slane %v3678_v40, 7  ;;  %v3600_v5 = vmax.f32 %v3596_v45, %v3598_v33  ;;  %v7436_v25 = vld [vmem:[%s14840_s5 + $0xba0] sm:$0xff]  ;;  %v3643_v4 = vld [vmem:[%s14840_s5 + $0x150] sm:$0xff] }
 0x5ec   :  { %v3278_v56 = vpop.f32.mrf.mxu2  ;;  %v4164_v1 = vrot.slane %v4096_v21, 7  ;;  %v14904_v34 = vld [vmem:[#allocation7_spill] sm:$0xff]  ;;  %v3599_v14 = vmax.f32 %v3595_v43, %v3597_v51  ;;  %v4254_v41 = vld [vmem:[#allocation3 + $0x11] sm:$0x1] }
 0x5ed   :  { %v3565_v17 = vmax.f32 %v3549_v47, 0.0  ;;  %v3302_v63 = vadd.f32 %v3278_v56, %v3188_v46  ;;  %v11374_v27 = vsel %vm3747_vm1, %v3746_v10, %v3677_v24  ;;  %v3832_v26 = vrot.slane %v3600_v5, 7  ;;  %v7240_v0 = vld [vmem:[%s14840_s5 + $0x580] sm:$0xff]  ;;  %v3647_v47 = vld [vmem:[%s14840_s5 + $0x170] sm:$0xff]  ;;  %v4259_v56 = vld [vmem:[#allocation3 + $0x19] sm:$0x1] }
 0x5ee   :  { %3766 = vmatmul.f32.vlgmr.msrb.gmra.mxu1 %v11374_v27  ;;  %3786 = vmatmul.f32.vlgmr.msrb.gmra.mxu2 %v11374_v27  ;;  %v11386_v28 = vsel %vm3747_vm1, %v4164_v1, %v4095_v19  ;;  %v2620_v20 = vadd.f32 %v14905_v35, %v14904_v34  ;;  %v4253_v15 = vld [vmem:[#allocation3 + $0x50] sm:$0x1]  ;;  %v4255_v13 = vld [vmem:[#allocation3 + $0x51] sm:$0x1]  ;;  %v7236_v60 = vld [vmem:[%s14840_s5 + $0x560] sm:$0xff] }
 0x5ef   :  { %v3167_v16 = vpop.f32.mrf.mxu1  ;;  %3581 = vst [vmem:[#allocation3 + $0x58] sm:$0xff] %v3565_v17  ;;  %v3416_v36 = vadd.f32 %v3392_v42, %v3302_v63  ;;  %3806 = vmatmul.f32.vlgmr.msrb.gmra.mxu3 %v11374_v27  ;;  %3875 = vmatpush.msrb.mxu1 %v3663_v23  ;;  %v2961_v42 = vadd.f32 %v10857_v32, %v2847_v37  ;;  %v7432_v32 = vld [vmem:[%s14840_s5 + $0xb80] sm:$0xff]  ;;  %v14907_v1 = vld [vmem:[#allocation8_spill] sm:$0xff]  ;;  %v3640_v37 = vld [vmem:[%s14840_s5 + $0x138] sm:$0xff] }
 0x5f0   :  { %3895 = vmatpush.msrb.mxu2 %v3664_v52  ;;  %3999 = vmatpush.msrb.mxu3 %v7252_v61  ;;  %v3189_v31 = vadd.f32 %v3167_v16, %v3075_v6  ;;  %v11439_v33 = vsel %vm3747_vm1, %v3832_v26, %v3599_v14  ;;  %v4262_v23 = vmax.f32 %v4253_v15, %v4255_v13  ;;  %v7428_v45 = vld [vmem:[%s14840_s5 + $0xb60] sm:$0xff]  ;;  %v4252_v17 = vld [vmem:[#allocation3 + $0x10] sm:$0x1]  ;;  %v3644_v61 = vld [vmem:[%s14840_s5 + $0x158] sm:$0xff] }
 0x5f1   :  { %v3530_v12 = vadd.f32 %v3506_v48, %v3416_v36  ;;  %4183 = vmatmul.f32.vlgmr.msrb.gmra.mxu0 %v11386_v28  ;;  %3876 = vmatpush.msrb.mxu1 %v3659_v30  ;;  %v14906_v48 = vld [vmem:[#allocation11_spill] sm:$0xff]  ;;  %v3076_v59 = vadd.f32 %v14907_v1, %v2961_v42  ;;  %v14908_v63 = vld [vmem:[#allocation12_spill] sm:$0xff]  ;;  %v4263_v36 = vmax.f32 %v11435_v18, %v4259_v56  ;;  %v3636_v26 = vld [vmem:[%s14840_s5 + $0x118] sm:$0xff] }
 0x5f2   :  { %4505 = vmatpush.msrb.mxu0 %v7444_v38  ;;  %3896 = vmatpush.msrb.mxu2 %v3660_v3  ;;  %v2734_v29 = vadd.f32 %v14906_v48, %v2620_v20  ;;  %v7232_v49 = vld [vmem:[%s14840_s5 + $0x540] sm:$0xff]  ;;  %v3639_v54 = vld [vmem:[%s14840_s5 + $0x130] sm:$0xff]  ;;  %v3398_v5 = vpop.f32.mrf.mxu3  ;;  %v4261_v6 = vmax.f32 %v4252_v17, %v4254_v41  ;;  %v3632_v42 = vld [vmem:[%s14840_s5 + $0xf8] sm:$0xff] }
 0x5f3   :  { %v3550_v62 = vadd.f32 %v10881_v50, %v3530_v12  ;;  %4000 = vmatpush.msrb.mxu3 %v7248_v2  ;;  %3877 = vmatpush.msrb.mxu1 %v3655_v22  ;;  %v7424_v30 = vld [vmem:[%s14840_s5 + $0xb40] sm:$0xff]  ;;  %v3635_v12 = vld [vmem:[%s14840_s5 + $0x110] sm:$0xff]  ;;  %v3624_v48 = vld [vmem:[%s14840_s5 + $0xb8] sm:$0xff] }
 0x5f4   :  { %4506 = vmatpush.msrb.mxu0 %v7440_v58  ;;  %3897 = vmatpush.msrb.mxu2 %v3656_v53  ;;  %v3281_v50 = vpop.f32.mrf.mxu2  ;;  %v11477_v38 = vld [vmem:[%s14839_s4] ss:$0 sm:$0xff]  ;;  %v3512_v53 = vpop.f32.mrf.mxu0  ;;  %v14910_v14 = vld [vmem:[#allocation9_spill] sm:$0xff]  ;;  %s6671_s4 = sshll.u32 %s14846_s11, 4  ;;  %s6672_s4 = int_to_ptr.hbm [resolvable:$true] %s6671_s4 }
 0x5f5   :  { %v3566_v40 = vmax.f32 %v3550_v62, 0.0  ;;  %4001 = vmatpush.msrb.mxu3 %v7244_v44  ;;  %v3303_v11 = vadd.f32 %v3281_v50, %v3189_v31  ;;  %3878 = vmatpush.msrb.mxu1 %v3651_v9  ;;  %v7228_v2 = vld [vmem:[%s14840_s5 + $0x520] sm:$0xff]  ;;  %v3623_v18 = vld [vmem:[%s14840_s5 + $0xb0] sm:$0xff] }
 0x5f6   :  { %4507 = vmatpush.msrb.mxu0 %v7436_v25  ;;  %3898 = vmatpush.msrb.mxu2 %v3652_v7  ;;  %v4258_v46 = vld [vmem:[#allocation3 + $0x58] sm:$0x1]  ;;  %v4260_v24 = vld [vmem:[#allocation3 + $0x59] sm:$0x1]  ;;  %v7420_v22 = vld [vmem:[%s14840_s5 + $0xb20] sm:$0xff]  ;;  %v4265_v7 = vmax.f32 %v4261_v6, %v4263_v36 }
 0x5f7   :  { %v3170_v21 = vpop.f32.mrf.mxu1  ;;  %3582 = vst [vmem:[#allocation3 + $0x60] sm:$0xff] %v3566_v40  ;;  %v3417_v10 = vadd.f32 %v3395_v57, %v3303_v11  ;;  %4002 = vmatpush.msrb.mxu3 %v7240_v0  ;;  %3826 = vmatmul.f32.vlgmr.msra.gmra.mxu1 %v11374_v27  ;;  %v4264_v19 = vmax.f32 %v4258_v46, %v4260_v24  ;;  %v14909_v44 = vld [vmem:[#allocation10_spill] sm:$0xff]  ;;  %v3631_v25 = vld [vmem:[%s14840_s5 + $0xf0] sm:$0xff]  ;;  %v3920_v24 = vld [vmem:[#allocation3 + $0x4c] sm:$0x1] }
 0x5f8   :  { %4508 = vmatpush.msrb.mxu0 %v7432_v32  ;;  %3851 = vmatmul.f32.vlgmr.msra.gmra.mxu2 %v11439_v33  ;;  %v2848_v27 = vadd.f32 %v14908_v63, %v2734_v29  ;;  %v3190_v55 = vadd.f32 %v3170_v21, %v3076_v59  ;;  %v7224_v62 = vld [vmem:[%s14840_s5 + $0x500] sm:$0xff]  ;;  %v3627_v0 = vld [vmem:[%s14840_s5 + $0xd0] sm:$0xff]  ;;  %v3628_v40 = vld [vmem:[%s14840_s5 + $0xd8] sm:$0xff] }
 0x5f9   :  { %v3531_v52 = vadd.f32 %v3509_v39, %v3417_v10  ;;  %3871 = vmatmul.f32.vlgmr.msra.gmra.mxu3 %v11439_v33  ;;  %3879 = vmatpush.msrb.mxu1 %v3647_v47  ;;  %v4266_v16 = vmax.f32 %v4262_v23, %v4264_v19  ;;  %v7416_v31 = vld [vmem:[%s14840_s5 + $0xb00] sm:$0xff]  ;;  %v3922_v10 = vld [vmem:[#allocation3 + $0x4d] sm:$0x1]  ;;  %v4428_v17 = vld [vmem:[#allocation3 + $0x5b] sm:$0x1] }
 0x5fa   :  { %3899 = vmatpush.msrb.mxu2 %v3648_v8  ;;  %4003 = vmatpush.msrb.mxu3 %v7236_v60  ;;  %v2962_v57 = vadd.f32 %v14909_v44, %v2848_v27  ;;  %v7220_v34 = vld [vmem:[%s14840_s5 + $0x4e0] sm:$0xff]  ;;  %v3619_v60 = vld [vmem:[%s14840_s5 + $0x90] sm:$0xff]  ;;  %v3401_v56 = vpop.f32.mrf.mxu3 }
 0x5fb   :  { %v3551_v3 = vadd.f32 %v11477_v38, %v3531_v52  ;;  %4509 = vmatpush.msrb.mxu0 %v7428_v45  ;;  %3880 = vmatpush.msrb.mxu1 %v3643_v4  ;;  %v4334_v58 = vrot.slane %v4266_v16, 7  ;;  %v7412_v50 = vld [vmem:[%s14840_s5 + $0xae0] sm:$0xff]  ;;  %v3620_v45 = vld [vmem:[%s14840_s5 + $0x98] sm:$0xff]  ;;  %v3615_v52 = vld [vmem:[%s14840_s5 + $0x70] sm:$0xff] }
 0x5fc   :  { %3900 = vmatpush.msrb.mxu2 %v3644_v61  ;;  %4004 = vmatpush.msrb.mxu3 %v7232_v49  ;;  %v3284_v51 = vpop.f32.mrf.mxu2  ;;  %v3077_v15 = vadd.f32 %v14910_v14, %v2962_v57  ;;  %v7216_v11 = vld [vmem:[%s14840_s5 + $0x4c0] sm:$0xff]  ;;  %v4426_v4 = vld [vmem:[#allocation3 + $0x5a] sm:$0x1]  ;;  %v3515_v61 = vpop.f32.mrf.mxu0  ;;  %v3926_v49 = vmax.f32 %v3920_v24, %v3922_v10  ;;  %v3611_v36 = vld [vmem:[%s14840_s5 + $0x50] sm:$0xff] }
 0x5fd   :  { %v3567_v9 = vmax.f32 %v3551_v3, 0.0  ;;  %4510 = vmatpush.msrb.mxu0 %v7424_v30  ;;  %3881 = vmatpush.msrb.mxu1 %v3639_v54  ;;  %v3304_v43 = vadd.f32 %v3284_v51, %v3190_v55  ;;  %v11512_v20 = vsel %vm3747_vm1, %v4334_v58, %v4265_v7  ;;  %v7408_v32 = vld [vmem:[%s14840_s5 + $0xac0] sm:$0xff]  ;;  %v3616_v16 = vld [vmem:[%s14840_s5 + $0x78] sm:$0xff]  ;;  %v4422_v30 = vld [vmem:[#allocation3 + $0x52] sm:$0x1] }
 0x5fe   :  { %3901 = vmatpush.msrb.mxu2 %v3640_v37  ;;  %4005 = vmatpush.msrb.mxu3 %v7228_v2  ;;  %v7212_v29 = vld [vmem:[%s14840_s5 + $0x4a0] sm:$0xff]  ;;  %v4424_v54 = vld [vmem:[#allocation3 + $0x53] sm:$0x1]  ;;  %v3919_v3 = vld [vmem:[#allocation3 + $0xc] sm:$0x1]  ;;  %v4432_v37 = vmax.f32 %v4426_v4, %v4428_v17 }
 0x5ff   :  { %3583 = vst [vmem:[#allocation3 + $0x68] sm:$0xff] %v3567_v9  ;;  %4511 = vmatpush.msrb.mxu0 %v7420_v22  ;;  %3882 = vmatpush.msrb.mxu1 %v3635_v12  ;;  %v3418_v39 = vadd.f32 %v3398_v5, %v3304_v43  ;;  %v3173_v35 = vpop.f32.mrf.mxu1  ;;  %v7404_v46 = vld [vmem:[%s14840_s5 + $0xaa0] sm:$0xff]  ;;  %v3612_v51 = vld [vmem:[%s14840_s5 + $0x58] sm:$0xff]  ;;  %v3921_v58 = vld [vmem:[#allocation3 + $0xd] sm:$0x1]  ;;  %v4430_v43 = vmax.f32 %v4422_v30, %v4424_v54 }
 0x600   :  { %3902 = vmatpush.msrb.mxu2 %v3636_v26  ;;  %4006 = vmatpush.msrb.mxu3 %v7224_v62  ;;  %v3191_v21 = vadd.f32 %v3173_v35, %v3077_v15  ;;  %v3916_v23 = vld [vmem:[#allocation3 + $0x44] sm:$0x1]  ;;  %v3918_v19 = vld [vmem:[#allocation3 + $0x45] sm:$0x1]  ;;  %v3607_v44 = vld [vmem:[%s14840_s5 + $0x30] sm:$0xff] }
 0x601   :  { %4512 = vmatpush.msrb.mxu0 %v7416_v31  ;;  %3883 = vmatpush.msrb.mxu1 %v3631_v25  ;;  %v3532_v13 = vadd.f32 %v3512_v53, %v3418_v39  ;;  %v7208_v63 = vld [vmem:[%s14840_s5 + $0x480] sm:$0xff]  ;;  %v3924_v55 = vmax.f32 %v3916_v23, %v3918_v19  ;;  %v4425_v9 = vld [vmem:[#allocation3 + $0x1a] sm:$0x1]  ;;  %v4427_v25 = vld [vmem:[#allocation3 + $0x1b] sm:$0x1]  ;;  %v3925_v39 = vmax.f32 %v3919_v3, %v3921_v58 }
 0x602   :  { %3903 = vmatpush.msrb.mxu2 %v3632_v42  ;;  %4007 = vmatpush.msrb.mxu3 %v7220_v34  ;;  %v7400_v27 = vld [vmem:[%s14840_s5 + $0xa80] sm:$0xff]  ;;  %v3608_v31 = vld [vmem:[%s14840_s5 + $0x38] sm:$0xff]  ;;  %v4421_v42 = vld [vmem:[#allocation3 + $0x12] sm:$0x1]  ;;  %v4434_v34 = vmax.f32 %v4430_v43, %v4432_v37 }
 0x603   :  { %4353 = vmatmul.f32.vlgmr.msra.gmra.mxu0 %v11512_v20  ;;  %v3552_v47 = vadd.f32 %v11477_v38, %v3532_v13  ;;  %3884 = vmatpush.msrb.mxu1 %v3627_v0  ;;  %v7204_v5 = vld [vmem:[%s14840_s5 + $0x460] sm:$0xff]  ;;  %v3928_v57 = vmax.f32 %v3924_v55, %v3926_v49  ;;  %v3604_v0 = vld [vmem:[%s14840_s5 + $0x18] sm:$0xff]  ;;  %v4423_v14 = vld [vmem:[#allocation3 + $0x13] sm:$0x1] }
 0x604   :  { %4513 = vmatpush.msrb.mxu0 %v7412_v50  ;;  %3904 = vmatpush.msrb.mxu2 %v3628_v40  ;;  %v3287_v8 = vpop.f32.mrf.mxu2  ;;  %v7396_v2 = vld [vmem:[%s14840_s5 + $0xa60] sm:$0xff]  ;;  %v7251_v23 = vld [vmem:[%s14840_s5 + $0x5d8] sm:$0xff]  ;;  %v7245_v19 = vld [vmem:[%s14840_s5 + $0x5a8] sm:$0xff] }
 0x605   :  { %v3568_v1 = vmax.f32 %v3552_v47, 0.0  ;;  %4008 = vmatpush.msrb.mxu3 %v7216_v11  ;;  %3885 = vmatpush.msrb.mxu1 %v3623_v18  ;;  %v3305_v59 = vadd.f32 %v3287_v8, %v3191_v21  ;;  %v3915_v12 = vld [vmem:[#allocation3 + $0x4] sm:$0x1]  ;;  %v3917_v6 = vld [vmem:[#allocation3 + $0x5] sm:$0x1]  ;;  %v3996_v40 = vrot.slane %v3928_v57, 7  ;;  %v4431_v11 = vmax.f32 %v4425_v9, %v4427_v25 }
 0x606   :  { %4514 = vmatpush.msrb.mxu0 %v7408_v32  ;;  %3905 = vmatpush.msrb.mxu2 %v3624_v48  ;;  %v7200_v53 = vld [vmem:[%s14840_s5 + $0x440] sm:$0xff]  ;;  %v3923_v13 = vmax.f32 %v3915_v12, %v3917_v6  ;;  %v7253_v48 = vld [vmem:[%s14840_s5 + $0x5e8] sm:$0xff]  ;;  %v4502_v21 = vrot.slane %v4434_v34, 7  ;;  %v7254_v47 = vld [vmem:[%s14840_s5 + $0x5f0] sm:$0xff] }
 0x607   :  { %3584 = vst [vmem:[#allocation3 + $0x70] sm:$0xff] %v3568_v1  ;;  %4009 = vmatpush.msrb.mxu3 %v7212_v29  ;;  %3886 = vmatpush.msrb.mxu1 %v3619_v60  ;;  %v3419_v41 = vadd.f32 %v3401_v56, %v3305_v59  ;;  %v7392_v62 = vld [vmem:[%s14840_s5 + $0xa40] sm:$0xff]  ;;  %v4429_v29 = vmax.f32 %v4421_v42, %v4423_v14  ;;  %v7249_v8 = vld [vmem:[%s14840_s5 + $0x5c8] sm:$0xff]  ;;  %v7250_v56 = vld [vmem:[%s14840_s5 + $0x5d0] sm:$0xff] }
 0x608   :  { %4515 = vmatpush.msrb.mxu0 %v7404_v46  ;;  %3906 = vmatpush.msrb.mxu2 %v3620_v45  ;;  %v7196_v7 = vld [vmem:[%s14840_s5 + $0x420] sm:$0xff]  ;;  %v3927_v18 = vmax.f32 %v3923_v13, %v3925_v39  ;;  %v7255_v46 = vld [vmem:[%s14840_s5 + $0x5f8] sm:$0xff]  ;;  %v7246_v59 = vld [vmem:[%s14840_s5 + $0x5b0] sm:$0xff] }
 0x609   :  { %4010 = vmatpush.msrb.mxu3 %v7208_v63  ;;  %3887 = vmatpush.msrb.mxu1 %v3615_v52  ;;  %v3533_v22 = vadd.f32 %v3515_v61, %v3419_v41  ;;  %v7388_v50 = vld [vmem:[%s14840_s5 + $0xa20] sm:$0xff]  ;;  %v4433_v10 = vmax.f32 %v4429_v29, %v4431_v11  ;;  %v7247_v45 = vld [vmem:[%s14840_s5 + $0x5b8] sm:$0xff]  ;;  %v7241_v4 = vld [vmem:[%s14840_s5 + $0x588] sm:$0xff] }
 0x60a   :  { %4516 = vmatpush.msrb.mxu0 %v7400_v27  ;;  %3907 = vmatpush.msrb.mxu2 %v3616_v16  ;;  %v7192_v15 = vld [vmem:[%s14840_s5 + $0x400] sm:$0xff]  ;;  %v11617_v24 = vsel %vm3747_vm1, %v3996_v40, %v3927_v18  ;;  %v7242_v63 = vld [vmem:[%s14840_s5 + $0x590] sm:$0xff]  ;;  %v7243_v27 = vld [vmem:[%s14840_s5 + $0x598] sm:$0xff] }
 0x60b   :  { %4011 = vmatpush.msrb.mxu3 %v7204_v5  ;;  %v3553_v26 = vadd.f32 %v11477_v38, %v3533_v22  ;;  %3888 = vmatpush.msrb.mxu1 %v3611_v36  ;;  %v3603_v38 = vld [vmem:[%s14840_s5 + $0x10] sm:$0xff]  ;;  %v7384_v32 = vld [vmem:[%s14840_s5 + $0xa00] sm:$0xff]  ;;  %v7237_v52 = vld [vmem:[%s14840_s5 + $0x568] sm:$0xff] }
 0x60c   :  { %4517 = vmatpush.msrb.mxu0 %v7396_v2  ;;  %3908 = vmatpush.msrb.mxu2 %v3612_v51  ;;  %v7508_v60 = vld [vmem:[%s14840_s5 + $0xde0] sm:$0xff]  ;;  %v7238_v49 = vld [vmem:[%s14840_s5 + $0x570] sm:$0xff]  ;;  %v7239_v41 = vld [vmem:[%s14840_s5 + $0x578] sm:$0xff] }
 0x60d   :  { %v3569_v35 = vmax.f32 %v3553_v26, 0.0  ;;  %4012 = vmatpush.msrb.mxu3 %v7200_v53  ;;  %3889 = vmatpush.msrb.mxu1 %v3607_v44  ;;  %v7504_v1 = vld [vmem:[%s14840_s5 + $0xdc0] sm:$0xff]  ;;  %v7233_v16 = vld [vmem:[%s14840_s5 + $0x548] sm:$0xff]  ;;  %v7234_v54 = vld [vmem:[%s14840_s5 + $0x550] sm:$0xff] }
 0x60e   :  { %4518 = vmatpush.msrb.mxu0 %v7392_v62  ;;  %3909 = vmatpush.msrb.mxu2 %v3608_v31  ;;  %v7500_v17 = vld [vmem:[%s14840_s5 + $0xda0] sm:$0xff]  ;;  %v7235_v5 = vld [vmem:[%s14840_s5 + $0x558] sm:$0xff]  ;;  %v7229_v36 = vld [vmem:[%s14840_s5 + $0x528] sm:$0xff] }
 0x60f   :  { %3585 = vst [vmem:[#allocation3 + $0x78] sm:$0xff] %v3569_v35  ;;  %4013 = vmatpush.msrb.mxu3 %v7196_v7  ;;  %3890 = vmatpush.msrb.mxu1 %v3603_v38  ;;  %v7496_v61 = vld [vmem:[%s14840_s5 + $0xd80] sm:$0xff]  ;;  %v7230_v55 = vld [vmem:[%s14840_s5 + $0x530] sm:$0xff]  ;;  %v7231_v37 = vld [vmem:[%s14840_s5 + $0x538] sm:$0xff] }
 0x610   :  { %4519 = vmatpush.msrb.mxu0 %v7388_v50  ;;  %3910 = vmatpush.msrb.mxu2 %v3604_v0  ;;  %v7492_v30 = vld [vmem:[%s14840_s5 + $0xd60] sm:$0xff]  ;;  %v7225_v2 = vld [vmem:[%s14840_s5 + $0x508] sm:$0xff]  ;;  %v7226_v51 = vld [vmem:[%s14840_s5 + $0x510] sm:$0xff] }
 0x611   :  { %4014 = vmatpush.msrb.mxu3 %v7192_v15  ;;  %3891 = vmatmul.f32.vlgmr.msrb.gmra.mxu1 %v11439_v33  ;;  %v7488_v3 = vld [vmem:[%s14840_s5 + $0xd40] sm:$0xff]  ;;  %v7227_v12 = vld [vmem:[%s14840_s5 + $0x518] sm:$0xff]  ;;  %v7221_v6 = vld [vmem:[%s14840_s5 + $0x4e8] sm:$0xff] }
 0x612   :  { %4520 = vmatpush.msrb.mxu0 %v7384_v32  ;;  %3911 = vmatmul.f32.vlgmr.msrb.gmra.mxu2 %v11439_v33  ;;  %v11630_v33 = vsel %vm3747_vm1, %v4502_v21, %v4433_v10  ;;  %v7484_v22 = vld [vmem:[%s14840_s5 + $0xd20] sm:$0xff]  ;;  %v7222_v53 = vld [vmem:[%s14840_s5 + $0x4f0] sm:$0xff]  ;;  %v7223_v44 = vld [vmem:[%s14840_s5 + $0x4f8] sm:$0xff] }
 0x613   :  { %4015 = vmatmul.f32.vlgmr.msrb.gmra.mxu3 %v11617_v24  ;;  %4019 = vmatpush.msra.mxu1 %v7253_v48  ;;  %v7480_v58 = vld [vmem:[%s14840_s5 + $0xd00] sm:$0xff]  ;;  %v7217_v57 = vld [vmem:[%s14840_s5 + $0x4c8] sm:$0xff]  ;;  %v7218_v43 = vld [vmem:[%s14840_s5 + $0x4d0] sm:$0xff] }
 0x614   :  { %4039 = vmatpush.msra.mxu2 %v7254_v47  ;;  %4059 = vmatpush.msra.mxu3 %v7255_v46  ;;  %v7476_v9 = vld [vmem:[%s14840_s5 + $0xce0] sm:$0xff]  ;;  %v7219_v26 = vld [vmem:[%s14840_s5 + $0x4d8] sm:$0xff]  ;;  %v7213_v62 = vld [vmem:[%s14840_s5 + $0x4a8] sm:$0xff] }
 0x615   :  { %4521 = vmatmul.f32.vlgmr.msrb.gmra.mxu0 %v11630_v33  ;;  %4020 = vmatpush.msra.mxu1 %v7249_v8  ;;  %v7472_v31 = vld [vmem:[%s14840_s5 + $0xcc0] sm:$0xff]  ;;  %v7214_v25 = vld [vmem:[%s14840_s5 + $0x4b0] sm:$0xff]  ;;  %v7215_v7 = vld [vmem:[%s14840_s5 + $0x4b8] sm:$0xff] }
 0x616   :  { %4673 = vmatpush.msra.mxu0 %v7508_v60  ;;  %4040 = vmatpush.msra.mxu2 %v7250_v56  ;;  %v7209_v38 = vld [vmem:[%s14840_s5 + $0x488] sm:$0xff]  ;;  %v4594_v39 = vld [vmem:[#allocation3 + $0x5c] sm:$0x1]  ;;  %v7468_v42 = vld [vmem:[%s14840_s5 + $0xca0] sm:$0xff] }
 0x617   :  { %4060 = vmatpush.msra.mxu3 %v7251_v23  ;;  %4021 = vmatpush.msra.mxu1 %v7245_v19  ;;  %v7210_v34 = vld [vmem:[%s14840_s5 + $0x490] sm:$0xff]  ;;  %v4596_v35 = vld [vmem:[#allocation3 + $0x5d] sm:$0x1]  ;;  %v7205_v0 = vld [vmem:[%s14840_s5 + $0x468] sm:$0xff] }
 0x618   :  { %4674 = vmatpush.msra.mxu0 %v7504_v1  ;;  %4041 = vmatpush.msra.mxu2 %v7246_v59  ;;  %v7211_v50 = vld [vmem:[%s14840_s5 + $0x498] sm:$0xff]  ;;  %v4590_v14 = vld [vmem:[#allocation3 + $0x54] sm:$0x1]  ;;  %v7464_v15 = vld [vmem:[%s14840_s5 + $0xc80] sm:$0xff]  ;;  %v4600_v18 = vmax.f32 %v4594_v39, %v4596_v35 }
 0x619   :  { %4061 = vmatpush.msra.mxu3 %v7247_v45  ;;  %4022 = vmatpush.msra.mxu1 %v7241_v4  ;;  %v7206_v13 = vld [vmem:[%s14840_s5 + $0x470] sm:$0xff]  ;;  %v7207_v11 = vld [vmem:[%s14840_s5 + $0x478] sm:$0xff]  ;;  %v7201_v32 = vld [vmem:[%s14840_s5 + $0x448] sm:$0xff] }
 0x61a   :  { %4675 = vmatpush.msra.mxu0 %v7500_v17  ;;  %4042 = vmatpush.msra.mxu2 %v7242_v63  ;;  %v4592_v40 = vld [vmem:[#allocation3 + $0x55] sm:$0x1]  ;;  %v7460_v48 = vld [vmem:[%s14840_s5 + $0xc60] sm:$0xff]  ;;  %v7203_v21 = vld [vmem:[%s14840_s5 + $0x458] sm:$0xff] }
 0x61b   :  { %4062 = vmatpush.msra.mxu3 %v7243_v27  ;;  %4023 = vmatpush.msra.mxu1 %v7237_v52  ;;  %v7202_v29 = vld [vmem:[%s14840_s5 + $0x450] sm:$0xff]  ;;  %v7197_v47 = vld [vmem:[%s14840_s5 + $0x428] sm:$0xff]  ;;  %v4593_v46 = vld [vmem:[#allocation3 + $0x1c] sm:$0x1]  ;;  %v4598_v10 = vmax.f32 %v4590_v14, %v4592_v40 }
 0x61c   :  { %4676 = vmatpush.msra.mxu0 %v7496_v61  ;;  %4043 = vmatpush.msra.mxu2 %v7238_v49  ;;  %v7456_v8 = vld [vmem:[%s14840_s5 + $0xc40] sm:$0xff]  ;;  %v7198_v60 = vld [vmem:[%s14840_s5 + $0x430] sm:$0xff]  ;;  %v4595_v56 = vld [vmem:[#allocation3 + $0x1d] sm:$0x1] }
 0x61d   :  { %4063 = vmatpush.msra.mxu3 %v7239_v41  ;;  %4024 = vmatpush.msra.mxu1 %v7233_v16  ;;  %v7199_v23 = vld [vmem:[%s14840_s5 + $0x438] sm:$0xff]  ;;  %v7193_v19 = vld [vmem:[%s14840_s5 + $0x408] sm:$0xff]  ;;  %v4589_v1 = vld [vmem:[#allocation3 + $0x14] sm:$0x1]  ;;  %v4602_v59 = vmax.f32 %v4598_v10, %v4600_v18  ;;  %v4599_v27 = vmax.f32 %v4593_v46, %v4595_v56 }
 0x61e   :  { %4677 = vmatpush.msra.mxu0 %v7492_v30  ;;  %4044 = vmatpush.msra.mxu2 %v7234_v54  ;;  %v7452_v45 = vld [vmem:[%s14840_s5 + $0xc20] sm:$0xff]  ;;  %v7194_v4 = vld [vmem:[%s14840_s5 + $0x410] sm:$0xff]  ;;  %v7195_v63 = vld [vmem:[%s14840_s5 + $0x418] sm:$0xff] }
 0x61f   :  { %4064 = vmatpush.msra.mxu3 %v7235_v5  ;;  %4025 = vmatpush.msra.mxu1 %v7229_v36  ;;  %v4591_v17 = vld [vmem:[#allocation3 + $0x15] sm:$0x1]  ;;  %v7448_v52 = vld [vmem:[%s14840_s5 + $0xc00] sm:$0xff]  ;;  %v7317_v61 = vld [vmem:[%s14840_s5 + $0x7e8] sm:$0xff]  ;;  %v4670_v41 = vrot.slane %v4602_v59, 7 }
 0x620   :  { %4678 = vmatpush.msra.mxu0 %v7488_v3  ;;  %4045 = vmatpush.msra.mxu2 %v7230_v55  ;;  %v4597_v49 = vmax.f32 %v4589_v1, %v4591_v17  ;;  %v7318_v16 = vld [vmem:[%s14840_s5 + $0x7f0] sm:$0xff]  ;;  %v7319_v30 = vld [vmem:[%s14840_s5 + $0x7f8] sm:$0xff]  ;;  %v7313_v5 = vld [vmem:[%s14840_s5 + $0x7c8] sm:$0xff] }
 0x621   :  { %4065 = vmatpush.msra.mxu3 %v7231_v37  ;;  %4026 = vmatpush.msra.mxu1 %v7225_v2  ;;  %v7572_v36 = vld [vmem:[%s14840_s5 + $0xfe0] sm:$0xff]  ;;  %v7314_v3 = vld [vmem:[%s14840_s5 + $0x7d0] sm:$0xff]  ;;  %v7315_v37 = vld [vmem:[%s14840_s5 + $0x7d8] sm:$0xff] }
 0x622   :  { %4679 = vmatpush.msra.mxu0 %v7484_v22  ;;  %4046 = vmatpush.msra.mxu2 %v7226_v51  ;;  %v4601_v54 = vmax.f32 %v4597_v49, %v4599_v27  ;;  %v7568_v2 = vld [vmem:[%s14840_s5 + $0xfc0] sm:$0xff]  ;;  %v7310_v22 = vld [vmem:[%s14840_s5 + $0x7b0] sm:$0xff]  ;;  %v7311_v51 = vld [vmem:[%s14840_s5 + $0x7b8] sm:$0xff] }
 0x623   :  { %4066 = vmatpush.msra.mxu3 %v7227_v12  ;;  %4027 = vmatpush.msra.mxu1 %v7221_v6  ;;  %v7305_v12 = vld [vmem:[%s14840_s5 + $0x788] sm:$0xff]  ;;  %v7564_v6 = vld [vmem:[%s14840_s5 + $0xfa0] sm:$0xff]  ;;  %v7294_v39 = vld [vmem:[%s14840_s5 + $0x730] sm:$0xff] }
 0x624   :  { %4680 = vmatpush.msra.mxu0 %v7480_v58  ;;  %4047 = vmatpush.msra.mxu2 %v7222_v53  ;;  %v11829_v55 = vsel %vm3747_vm1, %v4670_v41, %v4601_v54  ;;  %v7306_v58 = vld [vmem:[%s14840_s5 + $0x790] sm:$0xff]  ;;  %v7307_v53 = vld [vmem:[%s14840_s5 + $0x798] sm:$0xff]  ;;  %v7548_v35 = vld [vmem:[%s14840_s5 + $0xf20] sm:$0xff] }
 0x625   :  { %4067 = vmatpush.msra.mxu3 %v7223_v44  ;;  %4028 = vmatpush.msra.mxu1 %v7217_v57  ;;  %v7301_v44 = vld [vmem:[%s14840_s5 + $0x768] sm:$0xff]  ;;  %v7560_v57 = vld [vmem:[%s14840_s5 + $0xf80] sm:$0xff]  ;;  %v7287_v40 = vld [vmem:[%s14840_s5 + $0x6f8] sm:$0xff] }
 0x626   :  { %4681 = vmatpush.msra.mxu0 %v7476_v9  ;;  %4048 = vmatpush.msra.mxu2 %v7218_v43  ;;  %v7302_v9 = vld [vmem:[%s14840_s5 + $0x770] sm:$0xff]  ;;  %v7303_v43 = vld [vmem:[%s14840_s5 + $0x778] sm:$0xff]  ;;  %v7285_v14 = vld [vmem:[%s14840_s5 + $0x6e8] sm:$0xff] }
 0x627   :  { %4068 = vmatpush.msra.mxu3 %v7219_v26  ;;  %4029 = vmatpush.msra.mxu1 %v7213_v62  ;;  %v7297_v26 = vld [vmem:[%s14840_s5 + $0x748] sm:$0xff]  ;;  %v7556_v62 = vld [vmem:[%s14840_s5 + $0xf60] sm:$0xff]  ;;  %v7282_v18 = vld [vmem:[%s14840_s5 + $0x6d0] sm:$0xff] }
 0x628   :  { %4682 = vmatpush.msra.mxu0 %v7472_v31  ;;  %4049 = vmatpush.msra.mxu2 %v7214_v25  ;;  %v7298_v31 = vld [vmem:[%s14840_s5 + $0x750] sm:$0xff]  ;;  %v7299_v25 = vld [vmem:[%s14840_s5 + $0x758] sm:$0xff]  ;;  %v7273_v10 = vld [vmem:[%s14840_s5 + $0x688] sm:$0xff] }
 0x629   :  { %4069 = vmatpush.msra.mxu3 %v7215_v7  ;;  %4030 = vmatpush.msra.mxu1 %v7209_v38  ;;  %v7293_v7 = vld [vmem:[%s14840_s5 + $0x728] sm:$0xff]  ;;  %v7552_v38 = vld [vmem:[%s14840_s5 + $0xf40] sm:$0xff]  ;;  %v7279_v46 = vld [vmem:[%s14840_s5 + $0x6b8] sm:$0xff] }
 0x62a   :  { %4683 = vmatpush.msra.mxu0 %v7468_v42  ;;  %4050 = vmatpush.msra.mxu2 %v7210_v34  ;;  %v7295_v42 = vld [vmem:[%s14840_s5 + $0x738] sm:$0xff]  ;;  %v7289_v34 = vld [vmem:[%s14840_s5 + $0x708] sm:$0xff]  ;;  %v7274_v56 = vld [vmem:[%s14840_s5 + $0x690] sm:$0xff] }
 0x62b   :  { %4070 = vmatpush.msra.mxu3 %v7211_v50  ;;  %4031 = vmatpush.msra.mxu1 %v7205_v0  ;;  %v7290_v50 = vld [vmem:[%s14840_s5 + $0x710] sm:$0xff]  ;;  %v7291_v0 = vld [vmem:[%s14840_s5 + $0x718] sm:$0xff]  ;;  %v7269_v1 = vld [vmem:[%s14840_s5 + $0x668] sm:$0xff] }
 0x62c   :  { %4684 = vmatpush.msra.mxu0 %v7464_v15  ;;  %4051 = vmatpush.msra.mxu2 %v7206_v13  ;;  %v7544_v15 = vld [vmem:[%s14840_s5 + $0xf00] sm:$0xff]  ;;  %v7286_v13 = vld [vmem:[%s14840_s5 + $0x6f0] sm:$0xff]  ;;  %v7265_v27 = vld [vmem:[%s14840_s5 + $0x648] sm:$0xff] }
 0x62d   :  { %4071 = vmatpush.msra.mxu3 %v7207_v11  ;;  %4032 = vmatpush.msra.mxu1 %v7201_v32  ;;  %v7281_v11 = vld [vmem:[%s14840_s5 + $0x6c8] sm:$0xff]  ;;  %v7540_v32 = vld [vmem:[%s14840_s5 + $0xee0] sm:$0xff]  ;;  %v4758_v59 = vld [vmem:[#allocation3 + $0x56] sm:$0x1] }
 0x62e   :  { %4685 = vmatpush.msra.mxu0 %v7460_v48  ;;  %4052 = vmatpush.msra.mxu2 %v7202_v29  ;;  %v7283_v48 = vld [vmem:[%s14840_s5 + $0x6d8] sm:$0xff]  ;;  %v7277_v29 = vld [vmem:[%s14840_s5 + $0x6a8] sm:$0xff]  ;;  %v4760_v17 = vld [vmem:[#allocation3 + $0x57] sm:$0x1] }
 0x62f   :  { %4072 = vmatpush.msra.mxu3 %v7203_v21  ;;  %4033 = vmatpush.msra.mxu1 %v7197_v47  ;;  %v7536_v21 = vld [vmem:[%s14840_s5 + $0xec0] sm:$0xff]  ;;  %v7278_v47 = vld [vmem:[%s14840_s5 + $0x6b0] sm:$0xff]  ;;  %v7267_v41 = vld [vmem:[%s14840_s5 + $0x658] sm:$0xff]  ;;  %v4766_v54 = vmax.f32 %v4758_v59, %v4760_v17 }
 0x630   :  { %4686 = vmatpush.msra.mxu0 %v7456_v8  ;;  %4053 = vmatpush.msra.mxu2 %v7198_v60  ;;  %v4762_v8 = vld [vmem:[#allocation3 + $0x5e] sm:$0x1]  ;;  %v7532_v60 = vld [vmem:[%s14840_s5 + $0xea0] sm:$0xff]  ;;  %v7266_v49 = vld [vmem:[%s14840_s5 + $0x650] sm:$0xff] }
 0x631   :  { %4073 = vmatpush.msra.mxu3 %v7199_v23  ;;  %4034 = vmatpush.msra.mxu1 %v7193_v19  ;;  %v4764_v23 = vld [vmem:[#allocation3 + $0x5f] sm:$0x1]  ;;  %v7349_v59 = vld [vmem:[%s14840_s5 + $0x8e8] sm:$0xff] }
 0x632   :  { %4687 = vmatpush.msra.mxu0 %v7452_v45  ;;  %4054 = vmatpush.msra.mxu2 %v7194_v4  ;;  %v7275_v19 = vld [vmem:[%s14840_s5 + $0x698] sm:$0xff]  ;;  %v7528_v45 = vld [vmem:[%s14840_s5 + $0xe80] sm:$0xff]  ;;  %v7270_v4 = vld [vmem:[%s14840_s5 + $0x670] sm:$0xff] }
 0x633   :  { %4074 = vmatpush.msra.mxu3 %v7195_v63  ;;  %4035 = vmatmul.f32.vlgmr.msra.gmra.mxu1 %v11617_v24  ;;  %v7271_v63 = vld [vmem:[%s14840_s5 + $0x678] sm:$0xff] }
 0x634   :  { %4688 = vmatpush.msra.mxu0 %v7448_v52  ;;  %4055 = vmatmul.f32.vlgmr.msra.gmra.mxu2 %v11617_v24  ;;  %v4768_v52 = vmax.f32 %v4762_v8, %v4764_v23  ;;  %v7358_v8 = vld [vmem:[%s14840_s5 + $0x930] sm:$0xff]  ;;  %v7612_v23 = vld [vmem:[%s14840_s5 + $0x1120] sm:$0xff]  ;;  %v7351_v17 = vld [vmem:[%s14840_s5 + $0x8f8] sm:$0xff] }
 0x635   :  { %4075 = vmatmul.f32.vlgmr.msra.gmra.mxu3 %v11617_v24  ;;  %4187 = vmatpush.msrb.mxu1 %v7317_v61  ;;  %v7309_v24 = vld [vmem:[%s14840_s5 + $0x7a8] sm:$0xff]  ;;  %v7524_v61 = vld [vmem:[%s14840_s5 + $0xe60] sm:$0xff] }
 0x636   :  { %4207 = vmatpush.msrb.mxu2 %v7318_v16  ;;  %4227 = vmatpush.msrb.mxu3 %v7319_v30  ;;  %v7261_v16 = vld [vmem:[%s14840_s5 + $0x628] sm:$0xff]  ;;  %v4761_v30 = vld [vmem:[#allocation3 + $0x1e] sm:$0x1] }
 0x637   :  { %4689 = vmatmul.f32.vlgmr.msra.gmra.mxu0 %v11829_v55  ;;  %4188 = vmatpush.msrb.mxu1 %v7313_v5  ;;  %v7520_v5 = vld [vmem:[%s14840_s5 + $0xe40] sm:$0xff] }
 0x638   :  { %4841 = vmatpush.msrb.mxu0 %v7572_v36  ;;  %4208 = vmatpush.msrb.mxu2 %v7314_v3  ;;  %v7262_v36 = vld [vmem:[%s14840_s5 + $0x630] sm:$0xff]  ;;  %v4763_v3 = vld [vmem:[#allocation3 + $0x1f] sm:$0x1] }
 0x639   :  { %4228 = vmatpush.msrb.mxu3 %v7315_v37  ;;  %4189 = vmatpush.msrb.mxu1 %v7309_v24  ;;  %v7263_v37 = vld [vmem:[%s14840_s5 + $0x638] sm:$0xff]  ;;  %v7257_v24 = vld [vmem:[%s14840_s5 + $0x608] sm:$0xff] }
 0x63a   :  { %4842 = vmatpush.msrb.mxu0 %v7568_v2  ;;  %4209 = vmatpush.msrb.mxu2 %v7310_v22  ;;  %v4757_v2 = vld [vmem:[#allocation3 + $0x16] sm:$0x1]  ;;  %v4770_v22 = vmax.f32 %v4766_v54, %v4768_v52  ;;  %v7337_v54 = vld [vmem:[%s14840_s5 + $0x888] sm:$0xff] }
 0x63b   :  { %4229 = vmatpush.msrb.mxu3 %v7311_v51  ;;  %4190 = vmatpush.msrb.mxu1 %v7305_v12  ;;  %v7516_v51 = vld [vmem:[%s14840_s5 + $0xe20] sm:$0xff]  ;;  %v7258_v12 = vld [vmem:[%s14840_s5 + $0x610] sm:$0xff] }
 0x63c   :  { %4843 = vmatpush.msrb.mxu0 %v7564_v6  ;;  %4210 = vmatpush.msrb.mxu2 %v7306_v58  ;;  %v4759_v6 = vld [vmem:[#allocation3 + $0x17] sm:$0x1]  ;;  %v7259_v58 = vld [vmem:[%s14840_s5 + $0x618] sm:$0xff] }
 0x63d   :  { %4230 = vmatpush.msrb.mxu3 %v7307_v53  ;;  %4191 = vmatpush.msrb.mxu1 %v7301_v44  ;;  %v4767_v53 = vmax.f32 %v4761_v30, %v4763_v3  ;;  %v7512_v44 = vld [vmem:[%s14840_s5 + $0xe00] sm:$0xff]  ;;  %v7346_v52 = vld [vmem:[%s14840_s5 + $0x8d0] sm:$0xff]  ;;  %v7343_v30 = vld [vmem:[%s14840_s5 + $0x8b8] sm:$0xff] }
 0x63e   :  { %4844 = vmatpush.msrb.mxu0 %v7560_v57  ;;  %4211 = vmatpush.msrb.mxu2 %v7302_v9  ;;  %v7381_v57 = vld [vmem:[%s14840_s5 + $0x9e8] sm:$0xff]  ;;  %v4765_v9 = vmax.f32 %v4757_v2, %v4759_v6  ;;  %v7338_v3 = vld [vmem:[%s14840_s5 + $0x890] sm:$0xff]  ;;  %v4929_v6 = vld [vmem:[#allocation3 + $0x61] sm:$0x1] }
 0x63f   :  { %4231 = vmatpush.msrb.mxu3 %v7303_v43  ;;  %4192 = vmatpush.msrb.mxu1 %v7297_v26  ;;  %v4838_v43 = vrot.slane %v4770_v22, 7  ;;  %v7382_v26 = vld [vmem:[%s14840_s5 + $0x9f0] sm:$0xff]  ;;  %v7333_v2 = vld [vmem:[%s14840_s5 + $0x868] sm:$0xff]  ;;  %v4927_v22 = vld [vmem:[#allocation3 + $0x60] sm:$0x1] }
 0x640   :  { %4845 = vmatpush.msrb.mxu0 %v7556_v62  ;;  %4212 = vmatpush.msrb.mxu2 %v7298_v31  ;;  %v7383_v62 = vld [vmem:[%s14840_s5 + $0x9f8] sm:$0xff]  ;;  %v4769_v31 = vmax.f32 %v4765_v9, %v4767_v53  ;;  %v7329_v53 = vld [vmem:[%s14840_s5 + $0x848] sm:$0xff]  ;;  %v7330_v9 = vld [vmem:[%s14840_s5 + $0x850] sm:$0xff] }
 0x641   :  { %4232 = vmatpush.msrb.mxu3 %v7299_v25  ;;  %4193 = vmatpush.msrb.mxu1 %v7293_v7  ;;  %v7377_v25 = vld [vmem:[%s14840_s5 + $0x9c8] sm:$0xff]  ;;  %v7636_v7 = vld [vmem:[%s14840_s5 + $0x11e0] sm:$0xff] }
 0x642   :  { %4846 = vmatpush.msrb.mxu0 %v7552_v38  ;;  %4213 = vmatpush.msrb.mxu2 %v7294_v39  ;;  %v7378_v38 = vld [vmem:[%s14840_s5 + $0x9d0] sm:$0xff]  ;;  %v12028_v39 = vsel %vm3747_vm1, %v4838_v43, %v4769_v31  ;;  %v7331_v43 = vld [vmem:[%s14840_s5 + $0x858] sm:$0xff]  ;;  %v4936_v31 = vmax.f32 %v4927_v22, %v4929_v6 }
 0x643   :  { %4233 = vmatpush.msrb.mxu3 %v7295_v42  ;;  %4194 = vmatpush.msrb.mxu1 %v7289_v34  ;;  %v7379_v42 = vld [vmem:[%s14840_s5 + $0x9d8] sm:$0xff]  ;;  %v7632_v34 = vld [vmem:[%s14840_s5 + $0x11c0] sm:$0xff]  ;;  %v7418_v6 = vld [vmem:[%s14840_s5 + $0xb10] sm:$0xff] }
 0x644   :  { %4847 = vmatpush.msrb.mxu0 %v7548_v35  ;;  %4214 = vmatpush.msrb.mxu2 %v7290_v50  ;;  %v7374_v35 = vld [vmem:[%s14840_s5 + $0x9b0] sm:$0xff]  ;;  %v7375_v50 = vld [vmem:[%s14840_s5 + $0x9b8] sm:$0xff] }
 0x645   :  { %4234 = vmatpush.msrb.mxu3 %v7291_v0  ;;  %4195 = vmatpush.msrb.mxu1 %v7285_v14  ;;  %v7369_v0 = vld [vmem:[%s14840_s5 + $0x988] sm:$0xff]  ;;  %v7628_v14 = vld [vmem:[%s14840_s5 + $0x11a0] sm:$0xff]  ;;  %v7423_v22 = vld [vmem:[%s14840_s5 + $0xb38] sm:$0xff] }
 0x646   :  { %4848 = vmatpush.msrb.mxu0 %v7544_v15  ;;  %4215 = vmatpush.msrb.mxu2 %v7286_v13  ;;  %v7370_v15 = vld [vmem:[%s14840_s5 + $0x990] sm:$0xff]  ;;  %v7371_v13 = vld [vmem:[%s14840_s5 + $0x998] sm:$0xff] }
 0x647   :  { %4235 = vmatpush.msrb.mxu3 %v7287_v40  ;;  %4196 = vmatpush.msrb.mxu1 %v7281_v11  ;;  %v7365_v40 = vld [vmem:[%s14840_s5 + $0x968] sm:$0xff]  ;;  %v7624_v11 = vld [vmem:[%s14840_s5 + $0x1180] sm:$0xff] }
 0x648   :  { %4849 = vmatpush.msrb.mxu0 %v7540_v32  ;;  %4216 = vmatpush.msrb.mxu2 %v7282_v18  ;;  %v7366_v32 = vld [vmem:[%s14840_s5 + $0x970] sm:$0xff]  ;;  %v7367_v18 = vld [vmem:[%s14840_s5 + $0x978] sm:$0xff] }
 0x649   :  { %4236 = vmatpush.msrb.mxu3 %v7283_v48  ;;  %4197 = vmatpush.msrb.mxu1 %v7277_v29  ;;  %v7361_v48 = vld [vmem:[%s14840_s5 + $0x948] sm:$0xff]  ;;  %v7620_v29 = vld [vmem:[%s14840_s5 + $0x1160] sm:$0xff] }
 0x64a   :  { %4850 = vmatpush.msrb.mxu0 %v7536_v21  ;;  %4217 = vmatpush.msrb.mxu2 %v7278_v47  ;;  %v7362_v21 = vld [vmem:[%s14840_s5 + $0x950] sm:$0xff]  ;;  %v7363_v47 = vld [vmem:[%s14840_s5 + $0x958] sm:$0xff] }
 0x64b   :  { %4237 = vmatpush.msrb.mxu3 %v7279_v46  ;;  %4198 = vmatpush.msrb.mxu1 %v7273_v10  ;;  %v7357_v46 = vld [vmem:[%s14840_s5 + $0x928] sm:$0xff]  ;;  %v7616_v10 = vld [vmem:[%s14840_s5 + $0x1140] sm:$0xff] }
 0x64c   :  { %4851 = vmatpush.msrb.mxu0 %v7532_v60  ;;  %4218 = vmatpush.msrb.mxu2 %v7274_v56  ;;  %v7359_v60 = vld [vmem:[%s14840_s5 + $0x938] sm:$0xff]  ;;  %v7353_v56 = vld [vmem:[%s14840_s5 + $0x908] sm:$0xff] }
 0x64d   :  { %4238 = vmatpush.msrb.mxu3 %v7275_v19  ;;  %4199 = vmatpush.msrb.mxu1 %v7269_v1  ;;  %v7354_v19 = vld [vmem:[%s14840_s5 + $0x910] sm:$0xff]  ;;  %v7355_v1 = vld [vmem:[%s14840_s5 + $0x918] sm:$0xff] }
 0x64e   :  { %4852 = vmatpush.msrb.mxu0 %v7528_v45  ;;  %4219 = vmatpush.msrb.mxu2 %v7270_v4  ;;  %v7608_v45 = vld [vmem:[%s14840_s5 + $0x1100] sm:$0xff]  ;;  %v7350_v4 = vld [vmem:[%s14840_s5 + $0x8f0] sm:$0xff] }
 0x64f   :  { %4239 = vmatpush.msrb.mxu3 %v7271_v63  ;;  %4200 = vmatpush.msrb.mxu1 %v7265_v27  ;;  %v7345_v63 = vld [vmem:[%s14840_s5 + $0x8c8] sm:$0xff]  ;;  %v7604_v27 = vld [vmem:[%s14840_s5 + $0x10e0] sm:$0xff] }
 0x650   :  { %4853 = vmatpush.msrb.mxu0 %v7524_v61  ;;  %4220 = vmatpush.msrb.mxu2 %v7266_v49  ;;  %v7347_v61 = vld [vmem:[%s14840_s5 + $0x8d8] sm:$0xff]  ;;  %v7341_v49 = vld [vmem:[%s14840_s5 + $0x8a8] sm:$0xff] }
 0x651   :  { %4240 = vmatpush.msrb.mxu3 %v7267_v41  ;;  %4201 = vmatpush.msrb.mxu1 %v7261_v16  ;;  %v7600_v41 = vld [vmem:[%s14840_s5 + $0x10c0] sm:$0xff]  ;;  %v7342_v16 = vld [vmem:[%s14840_s5 + $0x8b0] sm:$0xff] }
 0x652   :  { %4854 = vmatpush.msrb.mxu0 %v7520_v5  ;;  %4221 = vmatpush.msrb.mxu2 %v7262_v36  ;;  %v4932_v5 = vld [vmem:[#allocation3 + $0x68] sm:$0x1]  ;;  %v7596_v36 = vld [vmem:[%s14840_s5 + $0x10a0] sm:$0xff] }
 0x653   :  { %4241 = vmatpush.msrb.mxu3 %v7263_v37  ;;  %4202 = vmatpush.msrb.mxu1 %v7257_v24  ;;  %v4934_v37 = vld [vmem:[#allocation3 + $0x69] sm:$0x1]  ;;  %v7339_v24 = vld [vmem:[%s14840_s5 + $0x898] sm:$0xff] }
 0x654   :  { %4855 = vmatpush.msrb.mxu0 %v7516_v51  ;;  %4222 = vmatpush.msrb.mxu2 %v7258_v12  ;;  %v7592_v51 = vld [vmem:[%s14840_s5 + $0x1080] sm:$0xff]  ;;  %v7334_v12 = vld [vmem:[%s14840_s5 + $0x870] sm:$0xff] }
 0x655   :  { %4242 = vmatpush.msrb.mxu3 %v7259_v58  ;;  %4203 = vmatmul.f32.vlgmr.msrb.gmra.mxu1 %v11386_v28  ;;  %v7335_v58 = vld [vmem:[%s14840_s5 + $0x878] sm:$0xff] }
 0x656   :  { %4856 = vmatpush.msrb.mxu0 %v7512_v44  ;;  %4223 = vmatmul.f32.vlgmr.msrb.gmra.mxu2 %v11386_v28  ;;  %v4938_v44 = vmax.f32 %v4932_v5, %v4934_v37  ;;  %v7684_v5 = vld [vmem:[%s14840_s5 + $0x1360] sm:$0xff]  ;;  %v7421_v37 = vld [vmem:[%s14840_s5 + $0xb28] sm:$0xff] }
 0x657   :  { %4243 = vmatmul.f32.vlgmr.msrb.gmra.mxu3 %v11386_v28  ;;  %4357 = vmatpush.msra.mxu1 %v7381_v57  ;;  %v7373_v28 = vld [vmem:[%s14840_s5 + $0x9a8] sm:$0xff]  ;;  %v7588_v57 = vld [vmem:[%s14840_s5 + $0x1060] sm:$0xff] }
 0x658   :  { %4377 = vmatpush.msra.mxu2 %v7382_v26  ;;  %4397 = vmatpush.msra.mxu3 %v7383_v62  ;;  %v7325_v26 = vld [vmem:[%s14840_s5 + $0x828] sm:$0xff] }
 0x659   :  { %4857 = vmatmul.f32.vlgmr.msrb.gmra.mxu0 %v12028_v39  ;;  %4358 = vmatpush.msra.mxu1 %v7377_v25  ;;  %v4931_v62 = vld [vmem:[#allocation3 + $0x28] sm:$0x1]  ;;  %v7584_v25 = vld [vmem:[%s14840_s5 + $0x1040] sm:$0xff] }
 0x65a   :  { %5011 = vmatpush.msra.mxu0 %v7636_v7  ;;  %4378 = vmatpush.msra.mxu2 %v7378_v38  ;;  %v7326_v7 = vld [vmem:[%s14840_s5 + $0x830] sm:$0xff]  ;;  %v4933_v38 = vld [vmem:[#allocation3 + $0x29] sm:$0x1] }
 0x65b   :  { %4398 = vmatpush.msra.mxu3 %v7379_v42  ;;  %4359 = vmatpush.msra.mxu1 %v7373_v28  ;;  %v7327_v42 = vld [vmem:[%s14840_s5 + $0x838] sm:$0xff]  ;;  %v7321_v28 = vld [vmem:[%s14840_s5 + $0x808] sm:$0xff] }
 0x65c   :  { %5012 = vmatpush.msra.mxu0 %v7632_v34  ;;  %4379 = vmatpush.msra.mxu2 %v7374_v35  ;;  %v4926_v34 = vld [vmem:[#allocation3 + $0x20] sm:$0x1]  ;;  %v4940_v35 = vmax.f32 %v4936_v31, %v4938_v44  ;;  %v7413_v44 = vld [vmem:[%s14840_s5 + $0xae8] sm:$0xff]  ;;  %v7410_v31 = vld [vmem:[%s14840_s5 + $0xad0] sm:$0xff] }
 0x65d   :  { %4399 = vmatpush.msra.mxu3 %v7375_v50  ;;  %4360 = vmatpush.msra.mxu1 %v7369_v0  ;;  %v7580_v0 = vld [vmem:[%s14840_s5 + $0x1020] sm:$0xff] }
 0x65e   :  { %5013 = vmatpush.msra.mxu0 %v7628_v14  ;;  %4380 = vmatpush.msra.mxu2 %v7370_v15  ;;  %v7322_v14 = vld [vmem:[%s14840_s5 + $0x810] sm:$0xff]  ;;  %v4928_v15 = vld [vmem:[#allocation3 + $0x21] sm:$0x1] }
 0x65f   :  { %4400 = vmatpush.msra.mxu3 %v7371_v13  ;;  %4361 = vmatpush.msra.mxu1 %v7365_v40  ;;  %v7323_v13 = vld [vmem:[%s14840_s5 + $0x818] sm:$0xff]  ;;  %v4937_v40 = vmax.f32 %v4931_v62, %v4933_v38  ;;  %v7668_v62 = vld [vmem:[%s14840_s5 + $0x12e0] sm:$0xff] }
 0x660   :  { %5014 = vmatpush.msra.mxu0 %v7624_v11  ;;  %4381 = vmatpush.msra.mxu2 %v7366_v32  ;;  %v7576_v11 = vld [vmem:[%s14840_s5 + $0x1000] sm:$0xff]  ;;  %v7445_v32 = vld [vmem:[%s14840_s5 + $0xbe8] sm:$0xff] }
 0x661   :  { %4401 = vmatpush.msra.mxu3 %v7367_v18  ;;  %4362 = vmatpush.msra.mxu1 %v7361_v48  ;;  %v4935_v18 = vmax.f32 %v4926_v34, %v4928_v15  ;;  %v5008_v48 = vrot.slane %v4940_v35, 7  ;;  %v7664_v38 = vld [vmem:[%s14840_s5 + $0x12c0] sm:$0xff]  ;;  %v7401_v34 = vld [vmem:[%s14840_s5 + $0xa88] sm:$0xff]  ;;  %v7402_v15 = vld [vmem:[%s14840_s5 + $0xa90] sm:$0xff] }
 0x662   :  { %5015 = vmatpush.msra.mxu0 %v7620_v29  ;;  %4382 = vmatpush.msra.mxu2 %v7362_v21  ;;  %v7446_v29 = vld [vmem:[%s14840_s5 + $0xbf0] sm:$0xff]  ;;  %v7447_v21 = vld [vmem:[%s14840_s5 + $0xbf8] sm:$0xff]  ;;  %v5100_v35 = vld [vmem:[#allocation3 + $0x6a] sm:$0x1] }
 0x663   :  { %4402 = vmatpush.msra.mxu3 %v7363_v47  ;;  %4363 = vmatpush.msra.mxu1 %v7357_v46  ;;  %v4939_v47 = vmax.f32 %v4935_v18, %v4937_v40  ;;  %v7441_v46 = vld [vmem:[%s14840_s5 + $0xbc8] sm:$0xff]  ;;  %v7403_v40 = vld [vmem:[%s14840_s5 + $0xa98] sm:$0xff] }
 0x664   :  { %5016 = vmatpush.msra.mxu0 %v7616_v10  ;;  %4383 = vmatpush.msra.mxu2 %v7358_v8  ;;  %v7700_v10 = vld [vmem:[%s14840_s5 + $0x13e0] sm:$0xff]  ;;  %v7442_v8 = vld [vmem:[%s14840_s5 + $0xbd0] sm:$0xff] }
 0x665   :  { %4403 = vmatpush.msra.mxu3 %v7359_v60  ;;  %4364 = vmatpush.msra.mxu1 %v7353_v56  ;;  %v12229_v60 = vsel %vm3747_vm1, %v5008_v48, %v4939_v47  ;;  %v7443_v56 = vld [vmem:[%s14840_s5 + $0xbd8] sm:$0xff]  ;;  %v7656_v48 = vld [vmem:[%s14840_s5 + $0x1280] sm:$0xff] }
 0x666   :  { %5017 = vmatpush.msra.mxu0 %v7612_v23  ;;  %4384 = vmatpush.msra.mxu2 %v7354_v19  ;;  %v7696_v19 = vld [vmem:[%s14840_s5 + $0x13c0] sm:$0xff] }
 0x667   :  { %4404 = vmatpush.msra.mxu3 %v7355_v1  ;;  %4365 = vmatpush.msra.mxu1 %v7349_v59  ;;  %v7438_v1 = vld [vmem:[%s14840_s5 + $0xbb0] sm:$0xff]  ;;  %v7439_v59 = vld [vmem:[%s14840_s5 + $0xbb8] sm:$0xff] }
 0x668   :  { %5018 = vmatpush.msra.mxu0 %v7608_v45  ;;  %4385 = vmatpush.msra.mxu2 %v7350_v4  ;;  %v7433_v45 = vld [vmem:[%s14840_s5 + $0xb88] sm:$0xff] }
 0x669   :  { %4405 = vmatpush.msra.mxu3 %v7351_v17  ;;  %4366 = vmatpush.msra.mxu1 %v7345_v63  ;;  %v7692_v63 = vld [vmem:[%s14840_s5 + $0x13a0] sm:$0xff] }
 0x66a   :  { %5019 = vmatpush.msra.mxu0 %v7604_v27  ;;  %4386 = vmatpush.msra.mxu2 %v7346_v52  ;;  %v7434_v27 = vld [vmem:[%s14840_s5 + $0xb90] sm:$0xff] }
 0x66b   :  { %4406 = vmatpush.msra.mxu3 %v7347_v61  ;;  %4367 = vmatpush.msra.mxu1 %v7341_v49  ;;  %v12238_v23 = vpop.f32.mrf.mxu1  ;;  %v7435_v61 = vld [vmem:[%s14840_s5 + $0xb98] sm:$0xff]  ;;  %v7429_v49 = vld [vmem:[%s14840_s5 + $0xb68] sm:$0xff] }
 0x66c   :  { %5020 = vmatpush.msra.mxu0 %v7600_v41  ;;  %4387 = vmatpush.msra.mxu2 %v7342_v16  ;;  %v7688_v41 = vld [vmem:[%s14840_s5 + $0x1380] sm:$0xff]  ;;  %v7430_v16 = vld [vmem:[%s14840_s5 + $0xb70] sm:$0xff] }
 0x66d   :  { %4407 = vmatpush.msra.mxu3 %v7343_v30  ;;  %4368 = vmatpush.msra.mxu1 %v7337_v54  ;;  %v7431_v30 = vld [vmem:[%s14840_s5 + $0xb78] sm:$0xff]  ;;  %v7425_v54 = vld [vmem:[%s14840_s5 + $0xb48] sm:$0xff] }
 0x66e   :  { %5021 = vmatpush.msra.mxu0 %v7596_v36  ;;  %4388 = vmatpush.msra.mxu2 %v7338_v3  ;;  %v7426_v36 = vld [vmem:[%s14840_s5 + $0xb50] sm:$0xff]  ;;  %v7427_v3 = vld [vmem:[%s14840_s5 + $0xb58] sm:$0xff] }
 0x66f   :  { %4408 = vmatpush.msra.mxu3 %v7339_v24  ;;  %4369 = vmatpush.msra.mxu1 %v7333_v2  ;;  %v7680_v24 = vld [vmem:[%s14840_s5 + $0x1340] sm:$0xff]  ;;  %v7422_v2 = vld [vmem:[%s14840_s5 + $0xb30] sm:$0xff] }
 0x670   :  { %5022 = vmatpush.msra.mxu0 %v7592_v51  ;;  %4389 = vmatpush.msra.mxu2 %v7334_v12  ;;  %v7417_v51 = vld [vmem:[%s14840_s5 + $0xb08] sm:$0xff]  ;;  %v7676_v12 = vld [vmem:[%s14840_s5 + $0x1320] sm:$0xff] }
 0x671   :  { %4409 = vmatpush.msra.mxu3 %v7335_v58  ;;  %4370 = vmatpush.msra.mxu1 %v7329_v53  ;;  %v3787_v4 = vpop.f32.mrf.mxu2  ;;  %v7419_v53 = vld [vmem:[%s14840_s5 + $0xb18] sm:$0xff] }
 0x672   :  { %5023 = vmatpush.msra.mxu0 %v7588_v57  ;;  %4390 = vmatpush.msra.mxu2 %v7330_v9  ;;  %v12193_v50 = vpop.f32.mrf.mxu3  ;;  %v7672_v57 = vld [vmem:[%s14840_s5 + $0x1300] sm:$0xff]  ;;  %v7414_v9 = vld [vmem:[%s14840_s5 + $0xaf0] sm:$0xff] }
 0x673   :  { %4410 = vmatpush.msra.mxu3 %v7331_v43  ;;  %4371 = vmatpush.msra.mxu1 %v7325_v26  ;;  %v7415_v43 = vld [vmem:[%s14840_s5 + $0xaf8] sm:$0xff]  ;;  %v7409_v26 = vld [vmem:[%s14840_s5 + $0xac8] sm:$0xff] }
 0x674   :  { %5024 = vmatpush.msra.mxu0 %v7584_v25  ;;  %4391 = vmatpush.msra.mxu2 %v7326_v7  ;;  %v12308_v58 = vpop.f32.mrf.mxu1  ;;  %v7411_v25 = vld [vmem:[%s14840_s5 + $0xad8] sm:$0xff]  ;;  %v7405_v7 = vld [vmem:[%s14840_s5 + $0xaa8] sm:$0xff] }
 0x675   :  { %4411 = vmatpush.msra.mxu3 %v7327_v42  ;;  %4372 = vmatpush.msra.mxu1 %v7321_v28  ;;  %v7406_v42 = vld [vmem:[%s14840_s5 + $0xab0] sm:$0xff]  ;;  %v7407_v28 = vld [vmem:[%s14840_s5 + $0xab8] sm:$0xff] }
 0x676   :  { %5025 = vmatpush.msra.mxu0 %v7580_v0  ;;  %4392 = vmatpush.msra.mxu2 %v7322_v14  ;;  %v7660_v14 = vld [vmem:[%s14840_s5 + $0x12a0] sm:$0xff] }
 0x677   :  { %4412 = vmatpush.msra.mxu3 %v7323_v13  ;;  %4373 = vmatmul.f32.vlgmr.msra.gmra.mxu1 %v11512_v20  ;;  %v5102_v13 = vld [vmem:[#allocation3 + $0x6b] sm:$0x1] }
 0x678   :  { %5026 = vmatpush.msra.mxu0 %v7576_v11  ;;  %4393 = vmatmul.f32.vlgmr.msra.gmra.mxu2 %v11512_v20  ;;  %v7397_v11 = vld [vmem:[%s14840_s5 + $0xa68] sm:$0xff] }
 0x679   :  { %4413 = vmatmul.f32.vlgmr.msra.gmra.mxu3 %v11512_v20  ;;  %4525 = vmatpush.msrb.mxu1 %v7445_v32  ;;  %v7437_v20 = vld [vmem:[%s14840_s5 + $0xba8] sm:$0xff]  ;;  %v5096_v32 = vld [vmem:[#allocation3 + $0x62] sm:$0x1] }
 0x67a   :  { %4545 = vmatpush.msrb.mxu2 %v7446_v29  ;;  %4565 = vmatpush.msrb.mxu3 %v7447_v21  ;;  %v7398_v29 = vld [vmem:[%s14840_s5 + $0xa70] sm:$0xff]  ;;  %v5098_v21 = vld [vmem:[#allocation3 + $0x63] sm:$0x1] }
 0x67b   :  { %5027 = vmatmul.f32.vlgmr.msra.gmra.mxu0 %v12229_v60  ;;  %4526 = vmatpush.msrb.mxu1 %v7441_v46  ;;  %v3852_v0 = vpop.f32.mrf.mxu2  ;;  %v7399_v46 = vld [vmem:[%s14840_s5 + $0xa78] sm:$0xff] }
 0x67c   :  { %5179 = vmatpush.msrb.mxu0 %v7700_v10  ;;  %4546 = vmatpush.msrb.mxu2 %v7442_v8  ;;  %v3872_v17 = vpop.f32.mrf.mxu3  ;;  %v7393_v10 = vld [vmem:[%s14840_s5 + $0xa48] sm:$0xff]  ;;  %v5106_v8 = vmax.f32 %v5100_v35, %v5102_v13  ;;  %v7756_v35 = vld [vmem:[%s14840_s5 + $0x15a0] sm:$0xff] }
 0x67d   :  { %4566 = vmatpush.msrb.mxu3 %v7443_v56  ;;  %4527 = vmatpush.msrb.mxu1 %v7437_v20  ;;  %v12258_v52 = vadd.f32 %v3872_v17, %v3787_v4  ;;  %v7652_v56 = vld [vmem:[%s14840_s5 + $0x1260] sm:$0xff]  ;;  %v4184_v20 = vpop.f32.mrf.mxu0  ;;  %v7390_v17 = vld [vmem:[%s14840_s5 + $0xa30] sm:$0xff] }
 0x67e   :  { %5180 = vmatpush.msrb.mxu0 %v7696_v19  ;;  %4547 = vmatpush.msrb.mxu2 %v7438_v1  ;;  %v7395_v19 = vld [vmem:[%s14840_s5 + $0xa58] sm:$0xff]  ;;  %v7389_v1 = vld [vmem:[%s14840_s5 + $0xa28] sm:$0xff]  ;;  %v7648_v4 = vld [vmem:[%s14840_s5 + $0x1240] sm:$0xff] }
 0x67f   :  { %4567 = vmatpush.msrb.mxu3 %v7439_v59  ;;  %4528 = vmatpush.msrb.mxu1 %v7433_v45  ;;  %v5099_v59 = vld [vmem:[#allocation3 + $0x2a] sm:$0x1]  ;;  %v5104_v45 = vmax.f32 %v5096_v32, %v5098_v21  ;;  %v7752_v13 = vld [vmem:[%s14840_s5 + $0x1580] sm:$0xff] }
 0x680   :  { %5181 = vmatpush.msrb.mxu0 %v7692_v63  ;;  %4548 = vmatpush.msrb.mxu2 %v7434_v27  ;;  %v5101_v63 = vld [vmem:[#allocation3 + $0x2b] sm:$0x1]  ;;  %v7391_v27 = vld [vmem:[%s14840_s5 + $0xa38] sm:$0xff] }
 0x681   :  { %4568 = vmatpush.msrb.mxu3 %v7435_v61  ;;  %4529 = vmatpush.msrb.mxu1 %v7429_v49  ;;  %v7385_v61 = vld [vmem:[%s14840_s5 + $0xa08] sm:$0xff]  ;;  %v5095_v49 = vld [vmem:[#allocation3 + $0x22] sm:$0x1] }
 0x682   :  { %5182 = vmatpush.msrb.mxu0 %v7688_v41  ;;  %4549 = vmatpush.msrb.mxu2 %v7430_v16  ;;  %v5108_v41 = vmax.f32 %v5104_v45, %v5106_v8  ;;  %v3853_v16 = vadd.f32 %v3852_v0, %v12238_v23  ;;  %v7498_v0 = vld [vmem:[%s14840_s5 + $0xd90] sm:$0xff]  ;;  %v7489_v32 = vld [vmem:[%s14840_s5 + $0xd48] sm:$0xff]  ;;  %v7487_v8 = vld [vmem:[%s14840_s5 + $0xd38] sm:$0xff] }
 0x683   :  { %4569 = vmatpush.msrb.mxu3 %v7431_v30  ;;  %4530 = vmatpush.msrb.mxu1 %v7425_v54  ;;  %v7644_v30 = vld [vmem:[%s14840_s5 + $0x1220] sm:$0xff]  ;;  %v7386_v54 = vld [vmem:[%s14840_s5 + $0xa10] sm:$0xff]  ;;  %v7485_v21 = vld [vmem:[%s14840_s5 + $0xd28] sm:$0xff] }
 0x684   :  { %5183 = vmatpush.msrb.mxu0 %v7684_v5  ;;  %4550 = vmatpush.msrb.mxu2 %v7426_v36  ;;  %v5097_v5 = vld [vmem:[#allocation3 + $0x23] sm:$0x1]  ;;  %v7478_v45 = vld [vmem:[%s14840_s5 + $0xcf0] sm:$0xff] }
 0x685   :  { %4570 = vmatpush.msrb.mxu3 %v7427_v3  ;;  %4531 = vmatpush.msrb.mxu1 %v7421_v37  ;;  %v7387_v3 = vld [vmem:[%s14840_s5 + $0xa18] sm:$0xff]  ;;  %v5105_v37 = vmax.f32 %v5099_v59, %v5101_v63  ;;  %v7736_v59 = vld [vmem:[%s14840_s5 + $0x1500] sm:$0xff] }
 0x686   :  { %5184 = vmatpush.msrb.mxu0 %v7680_v24  ;;  %4551 = vmatpush.msrb.mxu2 %v7422_v2  ;;  %v7640_v2 = vld [vmem:[%s14840_s5 + $0x1200] sm:$0xff] }
 0x687   :  { %4571 = vmatpush.msrb.mxu3 %v7423_v22  ;;  %4532 = vmatpush.msrb.mxu1 %v7417_v51  ;;  %v7509_v51 = vld [vmem:[%s14840_s5 + $0xde8] sm:$0xff]  ;;  %v7732_v63 = vld [vmem:[%s14840_s5 + $0x14e0] sm:$0xff] }
 0x688   :  { %5185 = vmatpush.msrb.mxu0 %v7676_v12  ;;  %4552 = vmatpush.msrb.mxu2 %v7418_v6  ;;  %v5103_v12 = vmax.f32 %v5095_v49, %v5097_v5  ;;  %v5176_v6 = vrot.slane %v5108_v41, 7  ;;  %v7469_v49 = vld [vmem:[%s14840_s5 + $0xca8] sm:$0xff]  ;;  %v7728_v41 = vld [vmem:[%s14840_s5 + $0x14c0] sm:$0xff] }
 0x689   :  { %4572 = vmatpush.msrb.mxu3 %v7419_v53  ;;  %4533 = vmatpush.msrb.mxu1 %v7413_v44  ;;  %v7511_v53 = vld [vmem:[%s14840_s5 + $0xdf8] sm:$0xff]  ;;  %v5268_v5 = vld [vmem:[#allocation3 + $0x6c] sm:$0x1] }
 0x68a   :  { %5186 = vmatpush.msrb.mxu0 %v7672_v57  ;;  %4553 = vmatpush.msrb.mxu2 %v7414_v9  ;;  %v4354_v57 = vpop.f32.mrf.mxu0  ;;  %v5107_v9 = vmax.f32 %v5103_v12, %v5105_v37  ;;  %v5270_v37 = vld [vmem:[#allocation3 + $0x6d] sm:$0x1]  ;;  %v7720_v12 = vld [vmem:[%s14840_s5 + $0x1480] sm:$0xff] }
 0x68b   :  { %4573 = vmatpush.msrb.mxu3 %v7415_v43  ;;  %4534 = vmatpush.msrb.mxu1 %v7409_v26  ;;  %v7505_v43 = vld [vmem:[%s14840_s5 + $0xdc8] sm:$0xff]  ;;  %v7764_v26 = vld [vmem:[%s14840_s5 + $0x15e0] sm:$0xff] }
 0x68c   :  { %5187 = vmatpush.msrb.mxu0 %v7668_v62  ;;  %4554 = vmatpush.msrb.mxu2 %v7410_v31  ;;  %v7506_v62 = vld [vmem:[%s14840_s5 + $0xdd0] sm:$0xff] }
 0x68d   :  { %4574 = vmatpush.msrb.mxu3 %v7411_v25  ;;  %4535 = vmatpush.msrb.mxu1 %v7405_v7  ;;  %v12443_v25 = vsel %vm3747_vm1, %v5176_v6, %v5107_v9  ;;  %v7501_v7 = vld [vmem:[%s14840_s5 + $0xda8] sm:$0xff]  ;;  %v7462_v6 = vld [vmem:[%s14840_s5 + $0xc70] sm:$0xff]  ;;  %v5274_v9 = vmax.f32 %v5268_v5, %v5270_v37  ;;  %v7559_v5 = vld [vmem:[%s14840_s5 + $0xf78] sm:$0xff] }
 0x68e   :  { %5188 = vmatpush.msrb.mxu0 %v7664_v38  ;;  %4555 = vmatpush.msrb.mxu2 %v7406_v42  ;;  %v3892_v18 = vpop.f32.mrf.mxu1  ;;  %v7760_v38 = vld [vmem:[%s14840_s5 + $0x15c0] sm:$0xff]  ;;  %v7502_v42 = vld [vmem:[%s14840_s5 + $0xdb0] sm:$0xff] }
 0x68f   :  { %4575 = vmatpush.msrb.mxu3 %v7407_v28  ;;  %4536 = vmatpush.msrb.mxu1 %v7401_v34  ;;  %v12371_v47 = vadd.f32 %v3892_v18, %v12193_v50  ;;  %v7394_v50 = vld [vmem:[%s14840_s5 + $0xa50] sm:$0xff]  ;;  %v7503_v28 = vld [vmem:[%s14840_s5 + $0xdb8] sm:$0xff]  ;;  %v7497_v34 = vld [vmem:[%s14840_s5 + $0xd88] sm:$0xff] }
 0x690   :  { %5189 = vmatpush.msrb.mxu0 %v7660_v14  ;;  %4556 = vmatpush.msrb.mxu2 %v7402_v15  ;;  %v7499_v14 = vld [vmem:[%s14840_s5 + $0xd98] sm:$0xff]  ;;  %v7493_v15 = vld [vmem:[%s14840_s5 + $0xd68] sm:$0xff]  ;;  %v7748_v18 = vld [vmem:[%s14840_s5 + $0x1560] sm:$0xff] }
 0x691   :  { %4576 = vmatpush.msrb.mxu3 %v7403_v40  ;;  %4537 = vmatpush.msrb.mxu1 %v7397_v11  ;;  %v7494_v40 = vld [vmem:[%s14840_s5 + $0xd70] sm:$0xff]  ;;  %v7495_v11 = vld [vmem:[%s14840_s5 + $0xd78] sm:$0xff] }
 0x692   :  { %5190 = vmatpush.msrb.mxu0 %v7656_v48  ;;  %4557 = vmatpush.msrb.mxu2 %v7398_v29  ;;  %v7490_v48 = vld [vmem:[%s14840_s5 + $0xd50] sm:$0xff]  ;;  %v7491_v29 = vld [vmem:[%s14840_s5 + $0xd58] sm:$0xff] }
 0x693   :  { %4577 = vmatpush.msrb.mxu3 %v7399_v46  ;;  %4538 = vmatpush.msrb.mxu1 %v7393_v10  ;;  %v7744_v46 = vld [vmem:[%s14840_s5 + $0x1540] sm:$0xff]  ;;  %v7486_v10 = vld [vmem:[%s14840_s5 + $0xd30] sm:$0xff] }
 0x694   :  { %5191 = vmatpush.msrb.mxu0 %v7652_v56  ;;  %4558 = vmatpush.msrb.mxu2 %v7394_v50  ;;  %v7481_v56 = vld [vmem:[%s14840_s5 + $0xd08] sm:$0xff]  ;;  %v7740_v50 = vld [vmem:[%s14840_s5 + $0x1520] sm:$0xff]  ;;  %v7554_v37 = vld [vmem:[%s14840_s5 + $0xf50] sm:$0xff] }
 0x695   :  { %4578 = vmatpush.msrb.mxu3 %v7395_v19  ;;  %4539 = vmatpush.msrb.mxu1 %v7389_v1  ;;  %v3912_v36 = vpop.f32.mrf.mxu2  ;;  %v7483_v19 = vld [vmem:[%s14840_s5 + $0xd18] sm:$0xff]  ;;  %v7477_v1 = vld [vmem:[%s14840_s5 + $0xce8] sm:$0xff] }
 0x696   :  { %5192 = vmatpush.msrb.mxu0 %v7648_v4  ;;  %4559 = vmatpush.msrb.mxu2 %v7390_v17  ;;  %v12414_v23 = vadd.f32 %v3912_v36, %v12308_v58  ;;  %v4016_v24 = vpop.f32.mrf.mxu3  ;;  %v7510_v58 = vld [vmem:[%s14840_s5 + $0xdf0] sm:$0xff]  ;;  %v7479_v4 = vld [vmem:[%s14840_s5 + $0xcf8] sm:$0xff]  ;;  %v7473_v17 = vld [vmem:[%s14840_s5 + $0xcc8] sm:$0xff] }
 0x697   :  { %4579 = vmatpush.msrb.mxu3 %v7391_v27  ;;  %4540 = vmatpush.msrb.mxu1 %v7385_v61  ;;  %v4079_v22 = vadd.f32 %v4016_v24, %v3853_v16  ;;  %v7474_v27 = vld [vmem:[%s14840_s5 + $0xcd0] sm:$0xff]  ;;  %v7475_v61 = vld [vmem:[%s14840_s5 + $0xcd8] sm:$0xff]  ;;  %v7724_v36 = vld [vmem:[%s14840_s5 + $0x14a0] sm:$0xff] }
 0x698   :  { %5193 = vmatpush.msrb.mxu0 %v7644_v30  ;;  %4560 = vmatpush.msrb.mxu2 %v7386_v54  ;;  %v7470_v16 = vld [vmem:[%s14840_s5 + $0xcb0] sm:$0xff]  ;;  %v7471_v30 = vld [vmem:[%s14840_s5 + $0xcb8] sm:$0xff]  ;;  %v7465_v54 = vld [vmem:[%s14840_s5 + $0xc88] sm:$0xff] }
 0x699   :  { %4580 = vmatpush.msrb.mxu3 %v7387_v3  ;;  %4541 = vmatmul.f32.vlgmr.msrb.gmra.mxu1 %v11630_v33  ;;  %v4247_v44 = vadd.f32 %v4184_v20, %v4079_v22  ;;  %v7482_v20 = vld [vmem:[%s14840_s5 + $0xd10] sm:$0xff]  ;;  %v7467_v24 = vld [vmem:[%s14840_s5 + $0xc98] sm:$0xff]  ;;  %v5264_v22 = vld [vmem:[#allocation3 + $0x64] sm:$0x1] }
 0x69a   :  { %5194 = vmatpush.msrb.mxu0 %v7640_v2  ;;  %4561 = vmatmul.f32.vlgmr.msrb.gmra.mxu2 %v11630_v33  ;;  %v7466_v3 = vld [vmem:[%s14840_s5 + $0xc90] sm:$0xff]  ;;  %v7461_v2 = vld [vmem:[%s14840_s5 + $0xc68] sm:$0xff] }
 0x69b   :  { %4581 = vmatmul.f32.vlgmr.msrb.gmra.mxu3 %v11630_v33  ;;  %4693 = vmatpush.msra.mxu1 %v7509_v51  ;;  %v12440_v31 = vadd.f32 %v4354_v57, %v4247_v44  ;;  %v7507_v33 = vld [vmem:[%s14840_s5 + $0xdd8] sm:$0xff]  ;;  %v7457_v57 = vld [vmem:[%s14840_s5 + $0xc48] sm:$0xff] }
 0x69c   :  { %4713 = vmatpush.msra.mxu2 %v7510_v58  ;;  %4733 = vmatpush.msra.mxu3 %v7511_v53  ;;  %v5266_v58 = vld [vmem:[#allocation3 + $0x65] sm:$0x1]  ;;  %v7463_v44 = vld [vmem:[%s14840_s5 + $0xc78] sm:$0xff] }
 0x69d   :  { %5195 = vmatmul.f32.vlgmr.msrb.gmra.mxu0 %v12443_v25  ;;  %4694 = vmatpush.msra.mxu1 %v7505_v43  ;;  %v7716_v43 = vld [vmem:[%s14840_s5 + $0x1460] sm:$0xff] }
 0x69e   :  { %5347 = vmatpush.msra.mxu0 %v7764_v26  ;;  %4714 = vmatpush.msra.mxu2 %v7506_v62  ;;  %v7459_v26 = vld [vmem:[%s14840_s5 + $0xc58] sm:$0xff]  ;;  %v7453_v62 = vld [vmem:[%s14840_s5 + $0xc28] sm:$0xff] }
 0x69f   :  { %4734 = vmatpush.msra.mxu3 %v7507_v33  ;;  %4695 = vmatpush.msra.mxu1 %v7501_v7  ;;  %v5267_v33 = vld [vmem:[#allocation3 + $0x2c] sm:$0x1]  ;;  %v5272_v7 = vmax.f32 %v5264_v22, %v5266_v58  ;;  %v7808_v22 = vld [vmem:[%s14840_s5 + $0x1740] sm:$0xff] }
 0x6a0   :  { %5348 = vmatpush.msra.mxu0 %v7760_v38  ;;  %4715 = vmatpush.msra.mxu2 %v7502_v42  ;;  %v7712_v38 = vld [vmem:[%s14840_s5 + $0x1440] sm:$0xff]  ;;  %v7454_v42 = vld [vmem:[%s14840_s5 + $0xc30] sm:$0xff] }
 0x6a1   :  { %4735 = vmatpush.msra.mxu3 %v7503_v28  ;;  %4696 = vmatpush.msra.mxu1 %v7497_v34  ;;  %v5269_v28 = vld [vmem:[#allocation3 + $0x2d] sm:$0x1]  ;;  %v7455_v34 = vld [vmem:[%s14840_s5 + $0xc38] sm:$0xff]  ;;  %v7804_v58 = vld [vmem:[%s14840_s5 + $0x1720] sm:$0xff] }
 0x6a2   :  { %5349 = vmatpush.msra.mxu0 %v7756_v35  ;;  %4716 = vmatpush.msra.mxu2 %v7498_v0  ;;  %v7449_v35 = vld [vmem:[%s14840_s5 + $0xc08] sm:$0xff]  ;;  %v5263_v0 = vld [vmem:[#allocation3 + $0x24] sm:$0x1] }
 0x6a3   :  { %4736 = vmatpush.msra.mxu3 %v7499_v14  ;;  %4697 = vmatpush.msra.mxu1 %v7493_v15  ;;  %v5276_v14 = vmax.f32 %v5272_v7, %v5274_v9  ;;  %v7708_v15 = vld [vmem:[%s14840_s5 + $0x1420] sm:$0xff]  ;;  %v7541_v9 = vld [vmem:[%s14840_s5 + $0xee8] sm:$0xff]  ;;  %v7538_v7 = vld [vmem:[%s14840_s5 + $0xed0] sm:$0xff] }
 0x6a4   :  { %5350 = vmatpush.msra.mxu0 %v7752_v13  ;;  %4717 = vmatpush.msra.mxu2 %v7494_v40  ;;  %v7450_v13 = vld [vmem:[%s14840_s5 + $0xc10] sm:$0xff]  ;;  %v5265_v40 = vld [vmem:[#allocation3 + $0x25] sm:$0x1] }
 0x6a5   :  { %4737 = vmatpush.msra.mxu3 %v7495_v11  ;;  %4698 = vmatpush.msra.mxu1 %v7489_v32  ;;  %v7451_v32 = vld [vmem:[%s14840_s5 + $0xc18] sm:$0xff] }
 0x6a6   :  { %5351 = vmatpush.msra.mxu0 %v7748_v18  ;;  %4718 = vmatpush.msra.mxu2 %v7490_v48  ;;  %v5273_v18 = vmax.f32 %v5267_v33, %v5269_v28  ;;  %v7796_v33 = vld [vmem:[%s14840_s5 + $0x16e0] sm:$0xff] }
 0x6a7   :  { %4738 = vmatpush.msra.mxu3 %v7491_v29  ;;  %4699 = vmatpush.msra.mxu1 %v7485_v21  ;;  %v7704_v21 = vld [vmem:[%s14840_s5 + $0x1400] sm:$0xff] }
 0x6a8   :  { %5352 = vmatpush.msra.mxu0 %v7744_v46  ;;  %4719 = vmatpush.msra.mxu2 %v7486_v10  ;;  %v7573_v10 = vld [vmem:[%s14840_s5 + $0xfe8] sm:$0xff]  ;;  %v7792_v28 = vld [vmem:[%s14840_s5 + $0x16c0] sm:$0xff] }
 0x6a9   :  { %4739 = vmatpush.msra.mxu3 %v7487_v8  ;;  %4700 = vmatpush.msra.mxu1 %v7481_v56  ;;  %v5271_v8 = vmax.f32 %v5263_v0, %v5265_v40  ;;  %v5344_v56 = vrot.slane %v5276_v14, 7  ;;  %v7529_v0 = vld [vmem:[%s14840_s5 + $0xe88] sm:$0xff] }
 0x6aa   :  { %5353 = vmatpush.msra.mxu0 %v7740_v50  ;;  %4720 = vmatpush.msra.mxu2 %v7482_v20  ;;  %v7569_v20 = vld [vmem:[%s14840_s5 + $0xfc8] sm:$0xff] }
 0x6ab   :  { %4740 = vmatpush.msra.mxu3 %v7483_v19  ;;  %4701 = vmatpush.msra.mxu1 %v7477_v1  ;;  %v5275_v50 = vmax.f32 %v5271_v8, %v5273_v18  ;;  %v7828_v19 = vld [vmem:[%s14840_s5 + $0x17e0] sm:$0xff]  ;;  %v7570_v1 = vld [vmem:[%s14840_s5 + $0xfd0] sm:$0xff]  ;;  %v5436_v14 = vld [vmem:[#allocation3 + $0x6e] sm:$0x1] }
 0x6ac   :  { %5354 = vmatpush.msra.mxu0 %v7736_v59  ;;  %4721 = vmatpush.msra.mxu2 %v7478_v45  ;;  %v7571_v45 = vld [vmem:[%s14840_s5 + $0xfd8] sm:$0xff]  ;;  %v5438_v40 = vld [vmem:[#allocation3 + $0x6f] sm:$0x1]  ;;  %v5432_v18 = vld [vmem:[#allocation3 + $0x66] sm:$0x1] }
 0x6ad   :  { %4741 = vmatpush.msra.mxu3 %v7479_v4  ;;  %4702 = vmatpush.msra.mxu1 %v7473_v17  ;;  %v12651_v59 = vsel %vm3747_vm1, %v5344_v56, %v5275_v50  ;;  %v7824_v4 = vld [vmem:[%s14840_s5 + $0x17c0] sm:$0xff]  ;;  %v7566_v17 = vld [vmem:[%s14840_s5 + $0xfb0] sm:$0xff]  ;;  %v5442_v50 = vmax.f32 %v5436_v14, %v5438_v40  ;;  %v7623_v14 = vld [vmem:[%s14840_s5 + $0x1178] sm:$0xff] }
 0x6ae   :  { %5355 = vmatpush.msra.mxu0 %v7732_v63  ;;  %4722 = vmatpush.msra.mxu2 %v7474_v27  ;;  %v7567_v63 = vld [vmem:[%s14840_s5 + $0xfb8] sm:$0xff]  ;;  %v7561_v27 = vld [vmem:[%s14840_s5 + $0xf88] sm:$0xff]  ;;  %v5434_v8 = vld [vmem:[#allocation3 + $0x67] sm:$0x1] }
 0x6af   :  { %4742 = vmatpush.msra.mxu3 %v7475_v61  ;;  %4703 = vmatpush.msra.mxu1 %v7469_v49  ;;  %v7820_v61 = vld [vmem:[%s14840_s5 + $0x17a0] sm:$0xff]  ;;  %v7562_v49 = vld [vmem:[%s14840_s5 + $0xf90] sm:$0xff] }
 0x6b0   :  { %5356 = vmatpush.msra.mxu0 %v7728_v41  ;;  %4723 = vmatpush.msra.mxu2 %v7470_v16  ;;  %v4036_v51 = vpop.f32.mrf.mxu1  ;;  %v7563_v41 = vld [vmem:[%s14840_s5 + $0xf98] sm:$0xff]  ;;  %v7557_v16 = vld [vmem:[%s14840_s5 + $0xf68] sm:$0xff]  ;;  %v7618_v40 = vld [vmem:[%s14840_s5 + $0x1150] sm:$0xff] }
 0x6b1   :  { %4743 = vmatpush.msra.mxu3 %v7471_v30  ;;  %4704 = vmatpush.msra.mxu1 %v7465_v54  ;;  %v12579_v53 = vadd.f32 %v4036_v51, %v12258_v52  ;;  %v7458_v52 = vld [vmem:[%s14840_s5 + $0xc50] sm:$0xff]  ;;  %v7816_v30 = vld [vmem:[%s14840_s5 + $0x1780] sm:$0xff] }
 0x6b2   :  { %5357 = vmatpush.msra.mxu0 %v7724_v36  ;;  %4724 = vmatpush.msra.mxu2 %v7466_v3  ;;  %v7558_v54 = vld [vmem:[%s14840_s5 + $0xf70] sm:$0xff]  ;;  %v7553_v36 = vld [vmem:[%s14840_s5 + $0xf48] sm:$0xff]  ;;  %v7812_v3 = vld [vmem:[%s14840_s5 + $0x1760] sm:$0xff] }
 0x6b3   :  { %4744 = vmatpush.msra.mxu3 %v7467_v24  ;;  %4705 = vmatpush.msra.mxu1 %v7461_v2  ;;  %v7555_v24 = vld [vmem:[%s14840_s5 + $0xf58] sm:$0xff]  ;;  %v7549_v2 = vld [vmem:[%s14840_s5 + $0xf28] sm:$0xff]  ;;  %v7550_v51 = vld [vmem:[%s14840_s5 + $0xf30] sm:$0xff] }
 0x6b4   :  { %5358 = vmatpush.msra.mxu0 %v7720_v12  ;;  %4725 = vmatpush.msra.mxu2 %v7462_v6  ;;  %v7551_v12 = vld [vmem:[%s14840_s5 + $0xf38] sm:$0xff]  ;;  %v7545_v6 = vld [vmem:[%s14840_s5 + $0xf08] sm:$0xff] }
 0x6b5   :  { %4745 = vmatpush.msra.mxu3 %v7463_v44  ;;  %4706 = vmatpush.msra.mxu1 %v7457_v57  ;;  %v7546_v44 = vld [vmem:[%s14840_s5 + $0xf10] sm:$0xff]  ;;  %v7547_v57 = vld [vmem:[%s14840_s5 + $0xf18] sm:$0xff] }
 0x6b6   :  { %5359 = vmatpush.msra.mxu0 %v7716_v43  ;;  %4726 = vmatpush.msra.mxu2 %v7458_v52  ;;  %v7800_v43 = vld [vmem:[%s14840_s5 + $0x1700] sm:$0xff]  ;;  %v7542_v52 = vld [vmem:[%s14840_s5 + $0xef0] sm:$0xff] }
 0x6b7   :  { %4746 = vmatpush.msra.mxu3 %v7459_v26  ;;  %4707 = vmatpush.msra.mxu1 %v7453_v62  ;;  %v4056_v11 = vpop.f32.mrf.mxu2  ;;  %v7543_v26 = vld [vmem:[%s14840_s5 + $0xef8] sm:$0xff]  ;;  %v7537_v62 = vld [vmem:[%s14840_s5 + $0xec8] sm:$0xff] }
 0x6b8   :  { %5360 = vmatpush.msra.mxu0 %v7712_v38  ;;  %4727 = vmatpush.msra.mxu2 %v7454_v42  ;;  %v12621_v48 = vadd.f32 %v4056_v11, %v12371_v47  ;;  %v4076_v29 = vpop.f32.mrf.mxu3  ;;  %v7574_v47 = vld [vmem:[%s14840_s5 + $0xff0] sm:$0xff]  ;;  %v7539_v38 = vld [vmem:[%s14840_s5 + $0xed8] sm:$0xff]  ;;  %v7533_v42 = vld [vmem:[%s14840_s5 + $0xea8] sm:$0xff] }
 0x6b9   :  { %4747 = vmatpush.msra.mxu3 %v7455_v34  ;;  %4708 = vmatpush.msra.mxu1 %v7449_v35  ;;  %v12627_v46 = vadd.f32 %v4076_v29, %v12414_v23  ;;  %v7575_v23 = vld [vmem:[%s14840_s5 + $0xff8] sm:$0xff]  ;;  %v7534_v34 = vld [vmem:[%s14840_s5 + $0xeb0] sm:$0xff] }
 0x6ba   :  { %5361 = vmatpush.msra.mxu0 %v7708_v15  ;;  %4728 = vmatpush.msra.mxu2 %v7450_v13  ;;  %v7535_v35 = vld [vmem:[%s14840_s5 + $0xeb8] sm:$0xff]  ;;  %v7788_v15 = vld [vmem:[%s14840_s5 + $0x16a0] sm:$0xff]  ;;  %v7530_v13 = vld [vmem:[%s14840_s5 + $0xe90] sm:$0xff] }
 0x6bb   :  { %4748 = vmatpush.msra.mxu3 %v7451_v32  ;;  %4709 = vmatmul.f32.vlgmr.msra.gmra.mxu1 %v11829_v55  ;;  %v7531_v11 = vld [vmem:[%s14840_s5 + $0xe98] sm:$0xff]  ;;  %v7525_v32 = vld [vmem:[%s14840_s5 + $0xe68] sm:$0xff] }
 0x6bc   :  { %5362 = vmatpush.msra.mxu0 %v7704_v21  ;;  %4729 = vmatmul.f32.vlgmr.msra.gmra.mxu2 %v11829_v55  ;;  %v7784_v21 = vld [vmem:[%s14840_s5 + $0x1680] sm:$0xff] }
 0x6bd   :  { %4749 = vmatmul.f32.vlgmr.msra.gmra.mxu3 %v11829_v55  ;;  %4861 = vmatpush.msrb.mxu1 %v7573_v10  ;;  %v7565_v55 = vld [vmem:[%s14840_s5 + $0xfa8] sm:$0xff]  ;;  %v7526_v10 = vld [vmem:[%s14840_s5 + $0xe70] sm:$0xff] }
 0x6be   :  { %4881 = vmatpush.msrb.mxu2 %v7574_v47  ;;  %4901 = vmatpush.msrb.mxu3 %v7575_v23  ;;  %v7527_v47 = vld [vmem:[%s14840_s5 + $0xe78] sm:$0xff]  ;;  %v7521_v23 = vld [vmem:[%s14840_s5 + $0xe48] sm:$0xff] }
 0x6bf   :  { %5363 = vmatmul.f32.vlgmr.msra.gmra.mxu0 %v12651_v59  ;;  %4862 = vmatpush.msrb.mxu1 %v7569_v20  ;;  %v7780_v20 = vld [vmem:[%s14840_s5 + $0x1660] sm:$0xff] }
 0x6c0   :  { %5515 = vmatpush.msrb.mxu0 %v7828_v19  ;;  %4882 = vmatpush.msrb.mxu2 %v7570_v1  ;;  %v7523_v19 = vld [vmem:[%s14840_s5 + $0xe58] sm:$0xff]  ;;  %v7517_v1 = vld [vmem:[%s14840_s5 + $0xe28] sm:$0xff] }
 0x6c1   :  { %4902 = vmatpush.msrb.mxu3 %v7571_v45  ;;  %4863 = vmatpush.msrb.mxu1 %v7565_v55  ;;  %v5435_v45 = vld [vmem:[#allocation3 + $0x2e] sm:$0x1]  ;;  %v5440_v55 = vmax.f32 %v5432_v18, %v5434_v8  ;;  %v7872_v18 = vld [vmem:[%s14840_s5 + $0x1940] sm:$0xff] }
 0x6c2   :  { %5516 = vmatpush.msrb.mxu0 %v7824_v4  ;;  %4883 = vmatpush.msrb.mxu2 %v7566_v17  ;;  %v7776_v4 = vld [vmem:[%s14840_s5 + $0x1640] sm:$0xff]  ;;  %v7518_v17 = vld [vmem:[%s14840_s5 + $0xe30] sm:$0xff] }
 0x6c3   :  { %4903 = vmatpush.msrb.mxu3 %v7567_v63  ;;  %4864 = vmatpush.msrb.mxu1 %v7561_v27  ;;  %v5437_v63 = vld [vmem:[#allocation3 + $0x2f] sm:$0x1]  ;;  %v7519_v27 = vld [vmem:[%s14840_s5 + $0xe38] sm:$0xff]  ;;  %v7868_v8 = vld [vmem:[%s14840_s5 + $0x1920] sm:$0xff] }
 0x6c4   :  { %5517 = vmatpush.msrb.mxu0 %v7820_v61  ;;  %4884 = vmatpush.msrb.mxu2 %v7562_v49  ;;  %v7513_v61 = vld [vmem:[%s14840_s5 + $0xe08] sm:$0xff]  ;;  %v5431_v49 = vld [vmem:[#allocation3 + $0x26] sm:$0x1] }
 0x6c5   :  { %4904 = vmatpush.msrb.mxu3 %v7563_v41  ;;  %4865 = vmatpush.msrb.mxu1 %v7557_v16  ;;  %v5444_v41 = vmax.f32 %v5440_v55, %v5442_v50  ;;  %v7772_v16 = vld [vmem:[%s14840_s5 + $0x1620] sm:$0xff]  ;;  %v7605_v50 = vld [vmem:[%s14840_s5 + $0x10e8] sm:$0xff]  ;;  %v7602_v55 = vld [vmem:[%s14840_s5 + $0x10d0] sm:$0xff] }
 0x6c6   :  { %5518 = vmatpush.msrb.mxu0 %v7816_v30  ;;  %4885 = vmatpush.msrb.mxu2 %v7558_v54  ;;  %v7514_v30 = vld [vmem:[%s14840_s5 + $0xe10] sm:$0xff]  ;;  %v5433_v54 = vld [vmem:[#allocation3 + $0x27] sm:$0x1] }
 0x6c7   :  { %4905 = vmatpush.msrb.mxu3 %v7559_v5  ;;  %4866 = vmatpush.msrb.mxu1 %v7553_v36  ;;  %v7515_v36 = vld [vmem:[%s14840_s5 + $0xe18] sm:$0xff] }
 0x6c8   :  { %5519 = vmatpush.msrb.mxu0 %v7812_v3  ;;  %4886 = vmatpush.msrb.mxu2 %v7554_v37  ;;  %v5441_v3 = vmax.f32 %v5435_v45, %v5437_v63  ;;  %v7860_v45 = vld [vmem:[%s14840_s5 + $0x18e0] sm:$0xff] }
 0x6c9   :  { %4906 = vmatpush.msrb.mxu3 %v7555_v24  ;;  %4867 = vmatpush.msrb.mxu1 %v7549_v2  ;;  %v7768_v2 = vld [vmem:[%s14840_s5 + $0x1600] sm:$0xff] }
 0x6ca   :  { %5520 = vmatpush.msrb.mxu0 %v7808_v22  ;;  %4887 = vmatpush.msrb.mxu2 %v7550_v51  ;;  %v7637_v51 = vld [vmem:[%s14840_s5 + $0x11e8] sm:$0xff]  ;;  %v7856_v63 = vld [vmem:[%s14840_s5 + $0x18c0] sm:$0xff] }
 0x6cb   :  { %4907 = vmatpush.msrb.mxu3 %v7551_v12  ;;  %4868 = vmatpush.msrb.mxu1 %v7545_v6  ;;  %v5439_v12 = vmax.f32 %v5431_v49, %v5433_v54  ;;  %v5512_v6 = vrot.slane %v5444_v41, 7  ;;  %v7593_v49 = vld [vmem:[%s14840_s5 + $0x1088] sm:$0xff]  ;;  %v5606_v41 = vld [vmem:[#allocation3 + $0x78] sm:$0x1]  ;;  %v5608_v54 = vld [vmem:[#allocation3 + $0x79] sm:$0x1] }
 0x6cc   :  { %5521 = vmatpush.msrb.mxu0 %v7804_v58  ;;  %4888 = vmatpush.msrb.mxu2 %v7546_v44  ;;  %v7633_v44 = vld [vmem:[%s14840_s5 + $0x11c8] sm:$0xff] }
 0x6cd   :  { %4908 = vmatpush.msrb.mxu3 %v7547_v57  ;;  %4869 = vmatpush.msrb.mxu1 %v7541_v9  ;;  %v5443_v58 = vmax.f32 %v5439_v12, %v5441_v3  ;;  %v7892_v57 = vld [vmem:[%s14840_s5 + $0x19e0] sm:$0xff]  ;;  %v7634_v9 = vld [vmem:[%s14840_s5 + $0x11d0] sm:$0xff] }
 0x6ce   :  { %5522 = vmatpush.msrb.mxu0 %v7800_v43  ;;  %4889 = vmatpush.msrb.mxu2 %v7542_v52  ;;  %v7635_v52 = vld [vmem:[%s14840_s5 + $0x11d8] sm:$0xff]  ;;  %v5601_v3 = vld [vmem:[#allocation3 + $0x70] sm:$0x1]  ;;  %v5603_v12 = vld [vmem:[#allocation3 + $0x71] sm:$0x1] }
 0x6cf   :  { %4909 = vmatpush.msrb.mxu3 %v7543_v26  ;;  %4870 = vmatpush.msrb.mxu1 %v7537_v62  ;;  %v12859_v43 = vsel %vm3747_vm1, %v5512_v6, %v5443_v58  ;;  %v7888_v26 = vld [vmem:[%s14840_s5 + $0x19c0] sm:$0xff]  ;;  %v7630_v62 = vld [vmem:[%s14840_s5 + $0x11b0] sm:$0xff]  ;;  %v5612_v58 = vmax.f32 %v5606_v41, %v5608_v54  ;;  %v7687_v41 = vld [vmem:[%s14840_s5 + $0x1378] sm:$0xff] }
 0x6d0   :  { %5523 = vmatpush.msrb.mxu0 %v7796_v33  ;;  %4890 = vmatpush.msrb.mxu2 %v7538_v7  ;;  %v7631_v33 = vld [vmem:[%s14840_s5 + $0x11b8] sm:$0xff]  ;;  %v7625_v7 = vld [vmem:[%s14840_s5 + $0x1188] sm:$0xff]  ;;  %v7682_v54 = vld [vmem:[%s14840_s5 + $0x1350] sm:$0xff] }
 0x6d1   :  { %4910 = vmatpush.msrb.mxu3 %v7539_v38  ;;  %4871 = vmatpush.msrb.mxu1 %v7533_v42  ;;  %v7884_v38 = vld [vmem:[%s14840_s5 + $0x19a0] sm:$0xff]  ;;  %v7626_v42 = vld [vmem:[%s14840_s5 + $0x1190] sm:$0xff] }
 0x6d2   :  { %5524 = vmatpush.msrb.mxu0 %v7792_v28  ;;  %4891 = vmatpush.msrb.mxu2 %v7534_v34  ;;  %v4204_v29 = vpop.f32.mrf.mxu1  ;;  %v7627_v28 = vld [vmem:[%s14840_s5 + $0x1198] sm:$0xff]  ;;  %v7621_v34 = vld [vmem:[%s14840_s5 + $0x1168] sm:$0xff] }
 0x6d3   :  { %4911 = vmatpush.msrb.mxu3 %v7535_v35  ;;  %4872 = vmatpush.msrb.mxu1 %v7529_v0  ;;  %v12787_v56 = vadd.f32 %v4204_v29, %v12579_v53  ;;  %v7522_v53 = vld [vmem:[%s14840_s5 + $0xe50] sm:$0xff]  ;;  %v7880_v35 = vld [vmem:[%s14840_s5 + $0x1980] sm:$0xff] }
 0x6d4   :  { %5525 = vmatpush.msrb.mxu0 %v7788_v15  ;;  %4892 = vmatpush.msrb.mxu2 %v7530_v13  ;;  %v7622_v0 = vld [vmem:[%s14840_s5 + $0x1170] sm:$0xff]  ;;  %v7617_v15 = vld [vmem:[%s14840_s5 + $0x1148] sm:$0xff]  ;;  %v7876_v13 = vld [vmem:[%s14840_s5 + $0x1960] sm:$0xff] }
 0x6d5   :  { %4912 = vmatpush.msrb.mxu3 %v7531_v11  ;;  %4873 = vmatpush.msrb.mxu1 %v7525_v32  ;;  %v7619_v11 = vld [vmem:[%s14840_s5 + $0x1158] sm:$0xff]  ;;  %v7613_v32 = vld [vmem:[%s14840_s5 + $0x1128] sm:$0xff]  ;;  %v7614_v29 = vld [vmem:[%s14840_s5 + $0x1130] sm:$0xff] }
 0x6d6   :  { %5526 = vmatpush.msrb.mxu0 %v7784_v21  ;;  %4893 = vmatpush.msrb.mxu2 %v7526_v10  ;;  %v7615_v21 = vld [vmem:[%s14840_s5 + $0x1138] sm:$0xff]  ;;  %v7609_v10 = vld [vmem:[%s14840_s5 + $0x1108] sm:$0xff] }
 0x6d7   :  { %4913 = vmatpush.msrb.mxu3 %v7527_v47  ;;  %4874 = vmatpush.msrb.mxu1 %v7521_v23  ;;  %v7610_v47 = vld [vmem:[%s14840_s5 + $0x1110] sm:$0xff]  ;;  %v7611_v23 = vld [vmem:[%s14840_s5 + $0x1118] sm:$0xff] }
 0x6d8   :  { %5527 = vmatpush.msrb.mxu0 %v7780_v20  ;;  %4894 = vmatpush.msrb.mxu2 %v7522_v53  ;;  %v7864_v20 = vld [vmem:[%s14840_s5 + $0x1900] sm:$0xff]  ;;  %v7606_v53 = vld [vmem:[%s14840_s5 + $0x10f0] sm:$0xff] }
 0x6d9   :  { %4914 = vmatpush.msrb.mxu3 %v7523_v19  ;;  %4875 = vmatpush.msrb.mxu1 %v7517_v1  ;;  %v4224_v5 = vpop.f32.mrf.mxu2  ;;  %v7607_v19 = vld [vmem:[%s14840_s5 + $0x10f8] sm:$0xff]  ;;  %v7601_v1 = vld [vmem:[%s14840_s5 + $0x10c8] sm:$0xff] }
 0x6da   :  { %5528 = vmatpush.msrb.mxu0 %v7776_v4  ;;  %4895 = vmatpush.msrb.mxu2 %v7518_v17  ;;  %v12829_v37 = vadd.f32 %v4224_v5, %v12621_v48  ;;  %v4244_v24 = vpop.f32.mrf.mxu3  ;;  %v7638_v48 = vld [vmem:[%s14840_s5 + $0x11f0] sm:$0xff]  ;;  %v7603_v4 = vld [vmem:[%s14840_s5 + $0x10d8] sm:$0xff]  ;;  %v7597_v17 = vld [vmem:[%s14840_s5 + $0x10a8] sm:$0xff] }
 0x6db   :  { %4915 = vmatpush.msrb.mxu3 %v7519_v27  ;;  %4876 = vmatpush.msrb.mxu1 %v7513_v61  ;;  %v12835_v22 = vadd.f32 %v4244_v24, %v12627_v46  ;;  %v7639_v46 = vld [vmem:[%s14840_s5 + $0x11f8] sm:$0xff]  ;;  %v7598_v27 = vld [vmem:[%s14840_s5 + $0x10b0] sm:$0xff] }
 0x6dc   :  { %5529 = vmatpush.msrb.mxu0 %v7772_v16  ;;  %4896 = vmatpush.msrb.mxu2 %v7514_v30  ;;  %v7599_v61 = vld [vmem:[%s14840_s5 + $0x10b8] sm:$0xff]  ;;  %v7852_v16 = vld [vmem:[%s14840_s5 + $0x18a0] sm:$0xff]  ;;  %v7594_v30 = vld [vmem:[%s14840_s5 + $0x1090] sm:$0xff] }
 0x6dd   :  { %4916 = vmatpush.msrb.mxu3 %v7515_v36  ;;  %4877 = vmatmul.f32.vlgmr.msrb.gmra.mxu1 %v12028_v39  ;;  %v7595_v5 = vld [vmem:[%s14840_s5 + $0x1098] sm:$0xff]  ;;  %v7589_v36 = vld [vmem:[%s14840_s5 + $0x1068] sm:$0xff] }
 0x6de   :  { %5530 = vmatpush.msrb.mxu0 %v7768_v2  ;;  %4897 = vmatmul.f32.vlgmr.msrb.gmra.mxu2 %v12028_v39  ;;  %v7848_v2 = vld [vmem:[%s14840_s5 + $0x1880] sm:$0xff] }
 0x6df   :  { %4917 = vmatmul.f32.vlgmr.msrb.gmra.mxu3 %v12028_v39  ;;  %5031 = vmatpush.msra.mxu1 %v7637_v51  ;;  %v7629_v39 = vld [vmem:[%s14840_s5 + $0x11a8] sm:$0xff]  ;;  %v7590_v51 = vld [vmem:[%s14840_s5 + $0x1070] sm:$0xff] }
 0x6e0   :  { %5051 = vmatpush.msra.mxu2 %v7638_v48  ;;  %5071 = vmatpush.msra.mxu3 %v7639_v46  ;;  %v7591_v48 = vld [vmem:[%s14840_s5 + $0x1078] sm:$0xff]  ;;  %v7585_v46 = vld [vmem:[%s14840_s5 + $0x1048] sm:$0xff] }
 0x6e1   :  { %5531 = vmatmul.f32.vlgmr.msrb.gmra.mxu0 %v12859_v43  ;;  %5032 = vmatpush.msra.mxu1 %v7633_v44  ;;  %v7844_v44 = vld [vmem:[%s14840_s5 + $0x1860] sm:$0xff] }
 0x6e2   :  { %5685 = vmatpush.msra.mxu0 %v7892_v57  ;;  %5052 = vmatpush.msra.mxu2 %v7634_v9  ;;  %v7587_v57 = vld [vmem:[%s14840_s5 + $0x1058] sm:$0xff]  ;;  %v7581_v9 = vld [vmem:[%s14840_s5 + $0x1028] sm:$0xff] }
 0x6e3   :  { %5072 = vmatpush.msra.mxu3 %v7635_v52  ;;  %5033 = vmatpush.msra.mxu1 %v7629_v39  ;;  %v5605_v52 = vld [vmem:[#allocation3 + $0x38] sm:$0x1]  ;;  %v5610_v39 = vmax.f32 %v5601_v3, %v5603_v12  ;;  %v7936_v3 = vld [vmem:[%s14840_s5 + $0x1b40] sm:$0xff] }
 0x6e4   :  { %5686 = vmatpush.msra.mxu0 %v7888_v26  ;;  %5053 = vmatpush.msra.mxu2 %v7630_v62  ;;  %v7840_v26 = vld [vmem:[%s14840_s5 + $0x1840] sm:$0xff]  ;;  %v7582_v62 = vld [vmem:[%s14840_s5 + $0x1030] sm:$0xff] }
 0x6e5   :  { %5073 = vmatpush.msra.mxu3 %v7631_v33  ;;  %5034 = vmatpush.msra.mxu1 %v7625_v7  ;;  %v5607_v33 = vld [vmem:[#allocation3 + $0x39] sm:$0x1]  ;;  %v7932_v12 = vld [vmem:[%s14840_s5 + $0x1b20] sm:$0xff] }
 0x6e6   :  { %5687 = vmatpush.msra.mxu0 %v7884_v38  ;;  %5054 = vmatpush.msra.mxu2 %v7626_v42  ;;  %v7583_v7 = vld [vmem:[%s14840_s5 + $0x1038] sm:$0xff]  ;;  %v7577_v38 = vld [vmem:[%s14840_s5 + $0x1008] sm:$0xff]  ;;  %v5600_v42 = vld [vmem:[#allocation3 + $0x30] sm:$0x1] }
 0x6e7   :  { %5074 = vmatpush.msra.mxu3 %v7627_v28  ;;  %5035 = vmatpush.msra.mxu1 %v7621_v34  ;;  %v5614_v28 = vmax.f32 %v5610_v39, %v5612_v58  ;;  %v7836_v34 = vld [vmem:[%s14840_s5 + $0x1820] sm:$0xff]  ;;  %v7669_v58 = vld [vmem:[%s14840_s5 + $0x12e8] sm:$0xff]  ;;  %v7666_v39 = vld [vmem:[%s14840_s5 + $0x12d0] sm:$0xff] }
 0x6e8   :  { %5688 = vmatpush.msra.mxu0 %v7880_v35  ;;  %5055 = vmatpush.msra.mxu2 %v7622_v0  ;;  %v7578_v35 = vld [vmem:[%s14840_s5 + $0x1010] sm:$0xff] }
 0x6e9   :  { %5075 = vmatpush.msra.mxu3 %v7623_v14  ;;  %5036 = vmatpush.msra.mxu1 %v7617_v15  ;;  %v5602_v0 = vld [vmem:[#allocation3 + $0x31] sm:$0x1]  ;;  %v7579_v15 = vld [vmem:[%s14840_s5 + $0x1018] sm:$0xff] }
 0x6ea   :  { %5689 = vmatpush.msra.mxu0 %v7876_v13  ;;  %5056 = vmatpush.msra.mxu2 %v7618_v40  ;;  %v5611_v13 = vmax.f32 %v5605_v52, %v5607_v33  ;;  %v7924_v52 = vld [vmem:[%s14840_s5 + $0x1ae0] sm:$0xff] }
 0x6eb   :  { %5076 = vmatpush.msra.mxu3 %v7619_v11  ;;  %5037 = vmatpush.msra.mxu1 %v7613_v32  ;;  %v7832_v32 = vld [vmem:[%s14840_s5 + $0x1800] sm:$0xff] }
 0x6ec   :  { %5690 = vmatpush.msra.mxu0 %v7872_v18  ;;  %5057 = vmatpush.msra.mxu2 %v7614_v29  ;;  %v7701_v29 = vld [vmem:[%s14840_s5 + $0x13e8] sm:$0xff]  ;;  %v7920_v33 = vld [vmem:[%s14840_s5 + $0x1ac0] sm:$0xff] }
 0x6ed   :  { %5077 = vmatpush.msra.mxu3 %v7615_v21  ;;  %5038 = vmatpush.msra.mxu1 %v7609_v10  ;;  %v5609_v21 = vmax.f32 %v5600_v42, %v5602_v0  ;;  %v5682_v10 = vrot.slane %v5614_v28, 7  ;;  %v7657_v42 = vld [vmem:[%s14840_s5 + $0x1288] sm:$0xff]  ;;  %v5774_v28 = vld [vmem:[#allocation3 + $0x7a] sm:$0x1]  ;;  %v5776_v0 = vld [vmem:[#allocation3 + $0x7b] sm:$0x1] }
 0x6ee   :  { %5691 = vmatpush.msra.mxu0 %v7868_v8  ;;  %5058 = vmatpush.msra.mxu2 %v7610_v47  ;;  %v7697_v47 = vld [vmem:[%s14840_s5 + $0x13c8] sm:$0xff] }
 0x6ef   :  { %5078 = vmatpush.msra.mxu3 %v7611_v23  ;;  %5039 = vmatpush.msra.mxu1 %v7605_v50  ;;  %v5613_v8 = vmax.f32 %v5609_v21, %v5611_v13  ;;  %v7956_v23 = vld [vmem:[%s14840_s5 + $0x1be0] sm:$0xff]  ;;  %v7698_v50 = vld [vmem:[%s14840_s5 + $0x13d0] sm:$0xff]  ;;  %v7655_v21 = vld [vmem:[%s14840_s5 + $0x1278] sm:$0xff] }
 0x6f0   :  { %5692 = vmatpush.msra.mxu0 %v7864_v20  ;;  %5059 = vmatpush.msra.mxu2 %v7606_v53  ;;  %v7699_v53 = vld [vmem:[%s14840_s5 + $0x13d8] sm:$0xff]  ;;  %v5770_v13 = vld [vmem:[#allocation3 + $0x72] sm:$0x1] }
 0x6f1   :  { %5079 = vmatpush.msra.mxu3 %v7607_v19  ;;  %5040 = vmatpush.msra.mxu1 %v7601_v1  ;;  %v13067_v20 = vsel %vm3747_vm1, %v5682_v10, %v5613_v8  ;;  %v7952_v19 = vld [vmem:[%s14840_s5 + $0x1bc0] sm:$0xff]  ;;  %v7694_v1 = vld [vmem:[%s14840_s5 + $0x13b0] sm:$0xff]  ;;  %v7649_v10 = vld [vmem:[%s14840_s5 + $0x1248] sm:$0xff] }
 0x6f2   :  { %5693 = vmatpush.msra.mxu0 %v7860_v45  ;;  %5060 = vmatpush.msra.mxu2 %v7602_v55  ;;  %v7695_v45 = vld [vmem:[%s14840_s5 + $0x13b8] sm:$0xff]  ;;  %v7689_v55 = vld [vmem:[%s14840_s5 + $0x1388] sm:$0xff]  ;;  %v7650_v8 = vld [vmem:[%s14840_s5 + $0x1250] sm:$0xff] }
 0x6f3   :  { %5080 = vmatpush.msra.mxu3 %v7603_v4  ;;  %5041 = vmatpush.msra.mxu1 %v7597_v17  ;;  %v7948_v4 = vld [vmem:[%s14840_s5 + $0x1ba0] sm:$0xff]  ;;  %v7690_v17 = vld [vmem:[%s14840_s5 + $0x1390] sm:$0xff] }
 0x6f4   :  { %5694 = vmatpush.msra.mxu0 %v7856_v63  ;;  %5061 = vmatpush.msra.mxu2 %v7598_v27  ;;  %v4374_v24 = vpop.f32.mrf.mxu1  ;;  %v7691_v63 = vld [vmem:[%s14840_s5 + $0x1398] sm:$0xff]  ;;  %v7685_v27 = vld [vmem:[%s14840_s5 + $0x1368] sm:$0xff] }
 0x6f5   :  { %5081 = vmatpush.msra.mxu3 %v7599_v61  ;;  %5042 = vmatpush.msra.mxu1 %v7593_v49  ;;  %v12995_v6 = vadd.f32 %v4374_v24, %v12787_v56  ;;  %v7586_v56 = vld [vmem:[%s14840_s5 + $0x1050] sm:$0xff]  ;;  %v7944_v61 = vld [vmem:[%s14840_s5 + $0x1b80] sm:$0xff] }
 0x6f6   :  { %5695 = vmatpush.msra.mxu0 %v7852_v16  ;;  %5062 = vmatpush.msra.mxu2 %v7594_v30  ;;  %v7686_v49 = vld [vmem:[%s14840_s5 + $0x1370] sm:$0xff]  ;;  %v7681_v16 = vld [vmem:[%s14840_s5 + $0x1348] sm:$0xff]  ;;  %v7940_v30 = vld [vmem:[%s14840_s5 + $0x1b60] sm:$0xff] }
 0x6f7   :  { %5082 = vmatpush.msra.mxu3 %v7595_v5  ;;  %5043 = vmatpush.msra.mxu1 %v7589_v36  ;;  %v7683_v5 = vld [vmem:[%s14840_s5 + $0x1358] sm:$0xff]  ;;  %v7677_v36 = vld [vmem:[%s14840_s5 + $0x1328] sm:$0xff]  ;;  %v7678_v24 = vld [vmem:[%s14840_s5 + $0x1330] sm:$0xff] }
 0x6f8   :  { %5696 = vmatpush.msra.mxu0 %v7848_v2  ;;  %5063 = vmatpush.msra.mxu2 %v7590_v51  ;;  %v7679_v2 = vld [vmem:[%s14840_s5 + $0x1338] sm:$0xff]  ;;  %v7673_v51 = vld [vmem:[%s14840_s5 + $0x1308] sm:$0xff] }
 0x6f9   :  { %5083 = vmatpush.msra.mxu3 %v7591_v48  ;;  %5044 = vmatpush.msra.mxu1 %v7585_v46  ;;  %v7674_v48 = vld [vmem:[%s14840_s5 + $0x1310] sm:$0xff]  ;;  %v7675_v46 = vld [vmem:[%s14840_s5 + $0x1318] sm:$0xff] }
 0x6fa   :  { %5697 = vmatpush.msra.mxu0 %v7844_v44  ;;  %5064 = vmatpush.msra.mxu2 %v7586_v56  ;;  %v7928_v44 = vld [vmem:[%s14840_s5 + $0x1b00] sm:$0xff]  ;;  %v7670_v56 = vld [vmem:[%s14840_s5 + $0x12f0] sm:$0xff] }
 0x6fb   :  { %5084 = vmatpush.msra.mxu3 %v7587_v57  ;;  %5045 = vmatpush.msra.mxu1 %v7581_v9  ;;  %v4394_v14 = vpop.f32.mrf.mxu2  ;;  %v7671_v57 = vld [vmem:[%s14840_s5 + $0x12f8] sm:$0xff]  ;;  %v7665_v9 = vld [vmem:[%s14840_s5 + $0x12c8] sm:$0xff] }
 0x6fc   :  { %5698 = vmatpush.msra.mxu0 %v7840_v26  ;;  %5065 = vmatpush.msra.mxu2 %v7582_v62  ;;  %v13037_v40 = vadd.f32 %v4394_v14, %v12829_v37  ;;  %v4414_v11 = vpop.f32.mrf.mxu3  ;;  %v7702_v37 = vld [vmem:[%s14840_s5 + $0x13f0] sm:$0xff]  ;;  %v7667_v26 = vld [vmem:[%s14840_s5 + $0x12d8] sm:$0xff]  ;;  %v7661_v62 = vld [vmem:[%s14840_s5 + $0x12a8] sm:$0xff] }
 0x6fd   :  { %5085 = vmatpush.msra.mxu3 %v7583_v7  ;;  %5046 = vmatpush.msra.mxu1 %v7577_v38  ;;  %v13043_v18 = vadd.f32 %v4414_v11, %v12835_v22  ;;  %v7703_v22 = vld [vmem:[%s14840_s5 + $0x13f8] sm:$0xff]  ;;  %v7662_v7 = vld [vmem:[%s14840_s5 + $0x12b0] sm:$0xff]  ;;  %v7912_v11 = vld [vmem:[%s14840_s5 + $0x1a80] sm:$0xff] }
 0x6fe   :  { %5699 = vmatpush.msra.mxu0 %v7836_v34  ;;  %5066 = vmatpush.msra.mxu2 %v7578_v35  ;;  %v7663_v38 = vld [vmem:[%s14840_s5 + $0x12b8] sm:$0xff]  ;;  %v7916_v34 = vld [vmem:[%s14840_s5 + $0x1aa0] sm:$0xff]  ;;  %v7658_v35 = vld [vmem:[%s14840_s5 + $0x1290] sm:$0xff] }
 0x6ff   :  { %5086 = vmatpush.msra.mxu3 %v7579_v15  ;;  %5047 = vmatmul.f32.vlgmr.msra.gmra.mxu1 %v12229_v60  ;;  %v7659_v14 = vld [vmem:[%s14840_s5 + $0x1298] sm:$0xff]  ;;  %v7653_v15 = vld [vmem:[%s14840_s5 + $0x1268] sm:$0xff] }
 0x700   :  { %5700 = vmatpush.msra.mxu0 %v7832_v32  ;;  %5067 = vmatmul.f32.vlgmr.msra.gmra.mxu2 %v12229_v60  ;;  %v7654_v32 = vld [vmem:[%s14840_s5 + $0x1270] sm:$0xff] }
 0x701   :  { %5087 = vmatmul.f32.vlgmr.msra.gmra.mxu3 %v12229_v60  ;;  %5199 = vmatpush.msrb.mxu1 %v7701_v29  ;;  %v7693_v60 = vld [vmem:[%s14840_s5 + $0x13a8] sm:$0xff]  ;;  %v5772_v29 = vld [vmem:[#allocation3 + $0x73] sm:$0x1] }
 0x702   :  { %5219 = vmatpush.msrb.mxu2 %v7702_v37  ;;  %5239 = vmatpush.msrb.mxu3 %v7703_v22  ;;  %v5780_v37 = vmax.f32 %v5774_v28, %v5776_v0  ;;  %v7908_v22 = vld [vmem:[%s14840_s5 + $0x1a60] sm:$0xff]  ;;  %v7746_v28 = vld [vmem:[%s14840_s5 + $0x1550] sm:$0xff] }
 0x703   :  { %5701 = vmatmul.f32.vlgmr.msra.gmra.mxu0 %v13067_v20  ;;  %5200 = vmatpush.msrb.mxu1 %v7697_v47  ;;  %v7651_v47 = vld [vmem:[%s14840_s5 + $0x1258] sm:$0xff]  ;;  %v8000_v0 = vld [vmem:[%s14840_s5 + $0x1d40] sm:$0xff] }
 0x704   :  { %5853 = vmatpush.msrb.mxu0 %v7956_v23  ;;  %5220 = vmatpush.msrb.mxu2 %v7698_v50  ;;  %v7645_v23 = vld [vmem:[%s14840_s5 + $0x1228] sm:$0xff]  ;;  %v5773_v50 = vld [vmem:[#allocation3 + $0x3a] sm:$0x1] }
 0x705   :  { %5240 = vmatpush.msrb.mxu3 %v7699_v53  ;;  %5201 = vmatpush.msrb.mxu1 %v7693_v60  ;;  %v5778_v53 = vmax.f32 %v5770_v13, %v5772_v29  ;;  %v7904_v60 = vld [vmem:[%s14840_s5 + $0x1a40] sm:$0xff]  ;;  %v7737_v13 = vld [vmem:[%s14840_s5 + $0x1508] sm:$0xff]  ;;  %v7739_v29 = vld [vmem:[%s14840_s5 + $0x1518] sm:$0xff] }
 0x706   :  { %5854 = vmatpush.msrb.mxu0 %v7952_v19  ;;  %5221 = vmatpush.msrb.mxu2 %v7694_v1  ;;  %v7646_v19 = vld [vmem:[%s14840_s5 + $0x1230] sm:$0xff]  ;;  %v5775_v1 = vld [vmem:[#allocation3 + $0x3b] sm:$0x1] }
 0x707   :  { %5241 = vmatpush.msrb.mxu3 %v7695_v45  ;;  %5202 = vmatpush.msrb.mxu1 %v7689_v55  ;;  %v7647_v45 = vld [vmem:[%s14840_s5 + $0x1238] sm:$0xff]  ;;  %v7641_v55 = vld [vmem:[%s14840_s5 + $0x1208] sm:$0xff] }
 0x708   :  { %5855 = vmatpush.msrb.mxu0 %v7948_v4  ;;  %5222 = vmatpush.msrb.mxu2 %v7690_v17  ;;  %v5769_v4 = vld [vmem:[#allocation3 + $0x32] sm:$0x1]  ;;  %v5782_v17 = vmax.f32 %v5778_v53, %v5780_v37  ;;  %v7725_v53 = vld [vmem:[%s14840_s5 + $0x14a8] sm:$0xff] }
 0x709   :  { %5242 = vmatpush.msrb.mxu3 %v7691_v63  ;;  %5203 = vmatpush.msrb.mxu1 %v7685_v27  ;;  %v7900_v63 = vld [vmem:[%s14840_s5 + $0x1a20] sm:$0xff]  ;;  %v7642_v27 = vld [vmem:[%s14840_s5 + $0x1210] sm:$0xff] }
 0x70a   :  { %5856 = vmatpush.msrb.mxu0 %v7944_v61  ;;  %5223 = vmatpush.msrb.mxu2 %v7686_v49  ;;  %v5771_v61 = vld [vmem:[#allocation3 + $0x33] sm:$0x1]  ;;  %v7643_v49 = vld [vmem:[%s14840_s5 + $0x1218] sm:$0xff] }
 0x70b   :  { %5243 = vmatpush.msrb.mxu3 %v7687_v41  ;;  %5204 = vmatpush.msrb.mxu1 %v7681_v16  ;;  %v5779_v41 = vmax.f32 %v5773_v50, %v5775_v1  ;;  %v7896_v16 = vld [vmem:[%s14840_s5 + $0x1a00] sm:$0xff]  ;;  %v7734_v37 = vld [vmem:[%s14840_s5 + $0x14f0] sm:$0xff]  ;;  %v7731_v50 = vld [vmem:[%s14840_s5 + $0x14d8] sm:$0xff] }
 0x70c   :  { %5857 = vmatpush.msrb.mxu0 %v7940_v30  ;;  %5224 = vmatpush.msrb.mxu2 %v7682_v54  ;;  %v7765_v30 = vld [vmem:[%s14840_s5 + $0x15e8] sm:$0xff]  ;;  %v5777_v54 = vmax.f32 %v5769_v4, %v5771_v61  ;;  %v7727_v1 = vld [vmem:[%s14840_s5 + $0x14b8] sm:$0xff]  ;;  %v7980_v4 = vld [vmem:[%s14840_s5 + $0x1ca0] sm:$0xff] }
 0x70d   :  { %5244 = vmatpush.msrb.mxu3 %v7683_v5  ;;  %5205 = vmatpush.msrb.mxu1 %v7677_v36  ;;  %v5850_v5 = vrot.slane %v5782_v17, 7  ;;  %v7766_v36 = vld [vmem:[%s14840_s5 + $0x15f0] sm:$0xff]  ;;  %v7717_v61 = vld [vmem:[%s14840_s5 + $0x1468] sm:$0xff] }
 0x70e   :  { %5858 = vmatpush.msrb.mxu0 %v7936_v3  ;;  %5225 = vmatpush.msrb.mxu2 %v7678_v24  ;;  %v7767_v3 = vld [vmem:[%s14840_s5 + $0x15f8] sm:$0xff]  ;;  %v5781_v24 = vmax.f32 %v5777_v54, %v5779_v41  ;;  %v7722_v17 = vld [vmem:[%s14840_s5 + $0x1490] sm:$0xff]  ;;  %v7976_v41 = vld [vmem:[%s14840_s5 + $0x1c80] sm:$0xff] }
 0x70f   :  { %5245 = vmatpush.msrb.mxu3 %v7679_v2  ;;  %5206 = vmatpush.msrb.mxu1 %v7673_v51  ;;  %v7761_v2 = vld [vmem:[%s14840_s5 + $0x15c8] sm:$0xff]  ;;  %v8020_v51 = vld [vmem:[%s14840_s5 + $0x1de0] sm:$0xff]  ;;  %v7719_v54 = vld [vmem:[%s14840_s5 + $0x1478] sm:$0xff] }
 0x710   :  { %5859 = vmatpush.msrb.mxu0 %v7932_v12  ;;  %5226 = vmatpush.msrb.mxu2 %v7674_v48  ;;  %v7762_v12 = vld [vmem:[%s14840_s5 + $0x15d0] sm:$0xff]  ;;  %v13266_v48 = vsel %vm3747_vm1, %v5850_v5, %v5781_v24  ;;  %v7713_v5 = vld [vmem:[%s14840_s5 + $0x1448] sm:$0xff] }
 0x711   :  { %5246 = vmatpush.msrb.mxu3 %v7675_v46  ;;  %5207 = vmatpush.msrb.mxu1 %v7669_v58  ;;  %v7763_v46 = vld [vmem:[%s14840_s5 + $0x15d8] sm:$0xff]  ;;  %v8016_v58 = vld [vmem:[%s14840_s5 + $0x1dc0] sm:$0xff]  ;;  %v7714_v24 = vld [vmem:[%s14840_s5 + $0x1450] sm:$0xff] }
 0x712   :  { %5860 = vmatpush.msrb.mxu0 %v7928_v44  ;;  %5227 = vmatpush.msrb.mxu2 %v7670_v56  ;;  %v7758_v44 = vld [vmem:[%s14840_s5 + $0x15b0] sm:$0xff]  ;;  %v7759_v56 = vld [vmem:[%s14840_s5 + $0x15b8] sm:$0xff] }
 0x713   :  { %5247 = vmatpush.msrb.mxu3 %v7671_v57  ;;  %5208 = vmatpush.msrb.mxu1 %v7665_v9  ;;  %v7753_v57 = vld [vmem:[%s14840_s5 + $0x1588] sm:$0xff]  ;;  %v8012_v9 = vld [vmem:[%s14840_s5 + $0x1da0] sm:$0xff] }
 0x714   :  { %5861 = vmatpush.msrb.mxu0 %v7924_v52  ;;  %5228 = vmatpush.msrb.mxu2 %v7666_v39  ;;  %v7754_v52 = vld [vmem:[%s14840_s5 + $0x1590] sm:$0xff]  ;;  %v7755_v39 = vld [vmem:[%s14840_s5 + $0x1598] sm:$0xff] }
 0x715   :  { %5248 = vmatpush.msrb.mxu3 %v7667_v26  ;;  %5209 = vmatpush.msrb.mxu1 %v7661_v62  ;;  %v7749_v26 = vld [vmem:[%s14840_s5 + $0x1568] sm:$0xff]  ;;  %v8008_v62 = vld [vmem:[%s14840_s5 + $0x1d80] sm:$0xff] }
 0x716   :  { %5862 = vmatpush.msrb.mxu0 %v7920_v33  ;;  %5229 = vmatpush.msrb.mxu2 %v7662_v7  ;;  %v7750_v33 = vld [vmem:[%s14840_s5 + $0x1570] sm:$0xff]  ;;  %v7751_v7 = vld [vmem:[%s14840_s5 + $0x1578] sm:$0xff] }
 0x717   :  { %5249 = vmatpush.msrb.mxu3 %v7663_v38  ;;  %5210 = vmatpush.msrb.mxu1 %v7657_v42  ;;  %v7745_v38 = vld [vmem:[%s14840_s5 + $0x1548] sm:$0xff]  ;;  %v8004_v42 = vld [vmem:[%s14840_s5 + $0x1d60] sm:$0xff] }
 0x718   :  { %5863 = vmatpush.msrb.mxu0 %v7916_v34  ;;  %5230 = vmatpush.msrb.mxu2 %v7658_v35  ;;  %v7747_v34 = vld [vmem:[%s14840_s5 + $0x1558] sm:$0xff]  ;;  %v7741_v35 = vld [vmem:[%s14840_s5 + $0x1528] sm:$0xff] }
 0x719   :  { %5250 = vmatpush.msrb.mxu3 %v7659_v14  ;;  %5211 = vmatpush.msrb.mxu1 %v7653_v15  ;;  %v7742_v14 = vld [vmem:[%s14840_s5 + $0x1530] sm:$0xff]  ;;  %v7743_v15 = vld [vmem:[%s14840_s5 + $0x1538] sm:$0xff] }
 0x71a   :  { %5864 = vmatpush.msrb.mxu0 %v7912_v11  ;;  %5231 = vmatpush.msrb.mxu2 %v7654_v32  ;;  %v7996_v11 = vld [vmem:[%s14840_s5 + $0x1d20] sm:$0xff]  ;;  %v7738_v32 = vld [vmem:[%s14840_s5 + $0x1510] sm:$0xff] }
 0x71b   :  { %5251 = vmatpush.msrb.mxu3 %v7655_v21  ;;  %5212 = vmatpush.msrb.mxu1 %v7649_v10  ;;  %v7733_v21 = vld [vmem:[%s14840_s5 + $0x14e8] sm:$0xff]  ;;  %v7992_v10 = vld [vmem:[%s14840_s5 + $0x1d00] sm:$0xff] }
 0x71c   :  { %5865 = vmatpush.msrb.mxu0 %v7908_v22  ;;  %5232 = vmatpush.msrb.mxu2 %v7650_v8  ;;  %v7735_v22 = vld [vmem:[%s14840_s5 + $0x14f8] sm:$0xff]  ;;  %v7729_v8 = vld [vmem:[%s14840_s5 + $0x14c8] sm:$0xff] }
 0x71d   :  { %5252 = vmatpush.msrb.mxu3 %v7651_v47  ;;  %5213 = vmatpush.msrb.mxu1 %v7645_v23  ;;  %v7988_v47 = vld [vmem:[%s14840_s5 + $0x1ce0] sm:$0xff]  ;;  %v7730_v23 = vld [vmem:[%s14840_s5 + $0x14d0] sm:$0xff] }
 0x71e   :  { %5866 = vmatpush.msrb.mxu0 %v7904_v60  ;;  %5233 = vmatpush.msrb.mxu2 %v7646_v19  ;;  %v7984_v60 = vld [vmem:[%s14840_s5 + $0x1cc0] sm:$0xff]  ;;  %v7726_v19 = vld [vmem:[%s14840_s5 + $0x14b0] sm:$0xff] }
 0x71f   :  { %5253 = vmatpush.msrb.mxu3 %v7647_v45  ;;  %5214 = vmatpush.msrb.mxu1 %v7641_v55  ;;  %v7721_v45 = vld [vmem:[%s14840_s5 + $0x1488] sm:$0xff]  ;;  %v5942_v55 = vld [vmem:[#allocation3 + $0x7c] sm:$0x1] }
 0x720   :  { %5867 = vmatpush.msrb.mxu0 %v7900_v63  ;;  %5234 = vmatpush.msrb.mxu2 %v7642_v27  ;;  %v5944_v63 = vld [vmem:[#allocation3 + $0x7d] sm:$0x1] }
 0x721   :  { %5254 = vmatpush.msrb.mxu3 %v7643_v49  ;;  %5215 = vmatmul.f32.vlgmr.msrb.gmra.mxu1 %v12443_v25  ;;  %v7723_v27 = vld [vmem:[%s14840_s5 + $0x1498] sm:$0xff]  ;;  %v5938_v49 = vld [vmem:[#allocation3 + $0x74] sm:$0x1] }
 0x722   :  { %5868 = vmatpush.msrb.mxu0 %v7896_v16  ;;  %5235 = vmatmul.f32.vlgmr.msrb.gmra.mxu2 %v12443_v25  ;;  %v7718_v16 = vld [vmem:[%s14840_s5 + $0x1470] sm:$0xff] }
 0x723   :  { %5255 = vmatmul.f32.vlgmr.msrb.gmra.mxu3 %v12443_v25  ;;  %5367 = vmatpush.msra.mxu1 %v7765_v30  ;;  %v7757_v25 = vld [vmem:[%s14840_s5 + $0x15a8] sm:$0xff]  ;;  %v5940_v30 = vld [vmem:[#allocation3 + $0x75] sm:$0x1] }
 0x724   :  { %5387 = vmatpush.msra.mxu2 %v7766_v36  ;;  %5407 = vmatpush.msra.mxu3 %v7767_v3  ;;  %v5948_v36 = vmax.f32 %v5942_v55, %v5944_v63  ;;  %v7972_v3 = vld [vmem:[%s14840_s5 + $0x1c60] sm:$0xff]  ;;  %v7810_v55 = vld [vmem:[%s14840_s5 + $0x1750] sm:$0xff] }
 0x725   :  { %5869 = vmatmul.f32.vlgmr.msrb.gmra.mxu0 %v13266_v48  ;;  %5368 = vmatpush.msra.mxu1 %v7761_v2  ;;  %v7715_v2 = vld [vmem:[%s14840_s5 + $0x1458] sm:$0xff]  ;;  %v8064_v63 = vld [vmem:[%s14840_s5 + $0x1f40] sm:$0xff] }
 0x726   :  { %6021 = vmatpush.msra.mxu0 %v8020_v51  ;;  %5388 = vmatpush.msra.mxu2 %v7762_v12  ;;  %v7709_v51 = vld [vmem:[%s14840_s5 + $0x1428] sm:$0xff]  ;;  %v5941_v12 = vld [vmem:[#allocation3 + $0x3c] sm:$0x1] }
 0x727   :  { %5408 = vmatpush.msra.mxu3 %v7763_v46  ;;  %5369 = vmatpush.msra.mxu1 %v7757_v25  ;;  %v5946_v46 = vmax.f32 %v5938_v49, %v5940_v30  ;;  %v7968_v25 = vld [vmem:[%s14840_s5 + $0x1c40] sm:$0xff]  ;;  %v7801_v49 = vld [vmem:[%s14840_s5 + $0x1708] sm:$0xff]  ;;  %v7803_v30 = vld [vmem:[%s14840_s5 + $0x1718] sm:$0xff] }
 0x728   :  { %6022 = vmatpush.msra.mxu0 %v8016_v58  ;;  %5389 = vmatpush.msra.mxu2 %v7758_v44  ;;  %v7710_v58 = vld [vmem:[%s14840_s5 + $0x1430] sm:$0xff]  ;;  %v5943_v44 = vld [vmem:[#allocation3 + $0x3d] sm:$0x1] }
 0x729   :  { %5409 = vmatpush.msra.mxu3 %v7759_v56  ;;  %5370 = vmatpush.msra.mxu1 %v7753_v57  ;;  %v7711_v56 = vld [vmem:[%s14840_s5 + $0x1438] sm:$0xff]  ;;  %v7705_v57 = vld [vmem:[%s14840_s5 + $0x1408] sm:$0xff] }
 0x72a   :  { %6023 = vmatpush.msra.mxu0 %v8012_v9  ;;  %5390 = vmatpush.msra.mxu2 %v7754_v52  ;;  %v5937_v9 = vld [vmem:[#allocation3 + $0x34] sm:$0x1]  ;;  %v5950_v52 = vmax.f32 %v5946_v46, %v5948_v36  ;;  %v7789_v46 = vld [vmem:[%s14840_s5 + $0x16a8] sm:$0xff] }
 0x72b   :  { %5410 = vmatpush.msra.mxu3 %v7755_v39  ;;  %5371 = vmatpush.msra.mxu1 %v7749_v26  ;;  %v7964_v39 = vld [vmem:[%s14840_s5 + $0x1c20] sm:$0xff]  ;;  %v7706_v26 = vld [vmem:[%s14840_s5 + $0x1410] sm:$0xff] }
 0x72c   :  { %6024 = vmatpush.msra.mxu0 %v8008_v62  ;;  %5391 = vmatpush.msra.mxu2 %v7750_v33  ;;  %v5939_v62 = vld [vmem:[#allocation3 + $0x35] sm:$0x1]  ;;  %v7707_v33 = vld [vmem:[%s14840_s5 + $0x1418] sm:$0xff] }
 0x72d   :  { %5411 = vmatpush.msra.mxu3 %v7751_v7  ;;  %5372 = vmatpush.msra.mxu1 %v7745_v38  ;;  %v5947_v7 = vmax.f32 %v5941_v12, %v5943_v44  ;;  %v7960_v38 = vld [vmem:[%s14840_s5 + $0x1c00] sm:$0xff]  ;;  %v7798_v36 = vld [vmem:[%s14840_s5 + $0x16f0] sm:$0xff]  ;;  %v7795_v12 = vld [vmem:[%s14840_s5 + $0x16d8] sm:$0xff] }
 0x72e   :  { %6025 = vmatpush.msra.mxu0 %v8004_v42  ;;  %5392 = vmatpush.msra.mxu2 %v7746_v28  ;;  %v7829_v42 = vld [vmem:[%s14840_s5 + $0x17e8] sm:$0xff]  ;;  %v5945_v28 = vmax.f32 %v5937_v9, %v5939_v62  ;;  %v7791_v44 = vld [vmem:[%s14840_s5 + $0x16b8] sm:$0xff]  ;;  %v8044_v9 = vld [vmem:[%s14840_s5 + $0x1ea0] sm:$0xff] }
 0x72f   :  { %5412 = vmatpush.msra.mxu3 %v7747_v34  ;;  %5373 = vmatpush.msra.mxu1 %v7741_v35  ;;  %v6018_v34 = vrot.slane %v5950_v52, 7  ;;  %v7830_v35 = vld [vmem:[%s14840_s5 + $0x17f0] sm:$0xff]  ;;  %v7781_v62 = vld [vmem:[%s14840_s5 + $0x1668] sm:$0xff] }
 0x730   :  { %6026 = vmatpush.msra.mxu0 %v8000_v0  ;;  %5393 = vmatpush.msra.mxu2 %v7742_v14  ;;  %v7831_v0 = vld [vmem:[%s14840_s5 + $0x17f8] sm:$0xff]  ;;  %v5949_v14 = vmax.f32 %v5945_v28, %v5947_v7  ;;  %v7786_v52 = vld [vmem:[%s14840_s5 + $0x1690] sm:$0xff]  ;;  %v8040_v7 = vld [vmem:[%s14840_s5 + $0x1e80] sm:$0xff] }
 0x731   :  { %5413 = vmatpush.msra.mxu3 %v7743_v15  ;;  %5374 = vmatpush.msra.mxu1 %v7737_v13  ;;  %v7825_v15 = vld [vmem:[%s14840_s5 + $0x17c8] sm:$0xff]  ;;  %v8084_v13 = vld [vmem:[%s14840_s5 + $0x1fe0] sm:$0xff]  ;;  %v7783_v28 = vld [vmem:[%s14840_s5 + $0x1678] sm:$0xff] }
 0x732   :  { %6027 = vmatpush.msra.mxu0 %v7996_v11  ;;  %5394 = vmatpush.msra.mxu2 %v7738_v32  ;;  %v7826_v11 = vld [vmem:[%s14840_s5 + $0x17d0] sm:$0xff]  ;;  %v13465_v32 = vsel %vm3747_vm1, %v6018_v34, %v5949_v14  ;;  %v7777_v34 = vld [vmem:[%s14840_s5 + $0x1648] sm:$0xff] }
 0x733   :  { %5414 = vmatpush.msra.mxu3 %v7739_v29  ;;  %5375 = vmatpush.msra.mxu1 %v7733_v21  ;;  %v7827_v29 = vld [vmem:[%s14840_s5 + $0x17d8] sm:$0xff]  ;;  %v8080_v21 = vld [vmem:[%s14840_s5 + $0x1fc0] sm:$0xff]  ;;  %v7778_v14 = vld [vmem:[%s14840_s5 + $0x1650] sm:$0xff] }
 0x734   :  { %6028 = vmatpush.msra.mxu0 %v7992_v10  ;;  %5395 = vmatpush.msra.mxu2 %v7734_v37  ;;  %v7822_v10 = vld [vmem:[%s14840_s5 + $0x17b0] sm:$0xff]  ;;  %v7823_v37 = vld [vmem:[%s14840_s5 + $0x17b8] sm:$0xff] }
 0x735   :  { %5415 = vmatpush.msra.mxu3 %v7735_v22  ;;  %5376 = vmatpush.msra.mxu1 %v7729_v8  ;;  %v7817_v22 = vld [vmem:[%s14840_s5 + $0x1788] sm:$0xff]  ;;  %v8076_v8 = vld [vmem:[%s14840_s5 + $0x1fa0] sm:$0xff] }
 0x736   :  { %6029 = vmatpush.msra.mxu0 %v7988_v47  ;;  %5396 = vmatpush.msra.mxu2 %v7730_v23  ;;  %v7818_v47 = vld [vmem:[%s14840_s5 + $0x1790] sm:$0xff]  ;;  %v7819_v23 = vld [vmem:[%s14840_s5 + $0x1798] sm:$0xff] }
 0x737   :  { %5416 = vmatpush.msra.mxu3 %v7731_v50  ;;  %5377 = vmatpush.msra.mxu1 %v7725_v53  ;;  %v7813_v50 = vld [vmem:[%s14840_s5 + $0x1768] sm:$0xff]  ;;  %v8072_v53 = vld [vmem:[%s14840_s5 + $0x1f80] sm:$0xff] }
 0x738   :  { %6030 = vmatpush.msra.mxu0 %v7984_v60  ;;  %5397 = vmatpush.msra.mxu2 %v7726_v19  ;;  %v7814_v60 = vld [vmem:[%s14840_s5 + $0x1770] sm:$0xff]  ;;  %v7815_v19 = vld [vmem:[%s14840_s5 + $0x1778] sm:$0xff] }
 0x739   :  { %5417 = vmatpush.msra.mxu3 %v7727_v1  ;;  %5378 = vmatpush.msra.mxu1 %v7721_v45  ;;  %v7809_v1 = vld [vmem:[%s14840_s5 + $0x1748] sm:$0xff]  ;;  %v8068_v45 = vld [vmem:[%s14840_s5 + $0x1f60] sm:$0xff] }
 0x73a   :  { %6031 = vmatpush.msra.mxu0 %v7980_v4  ;;  %5398 = vmatpush.msra.mxu2 %v7722_v17  ;;  %v7811_v4 = vld [vmem:[%s14840_s5 + $0x1758] sm:$0xff]  ;;  %v7805_v17 = vld [vmem:[%s14840_s5 + $0x1728] sm:$0xff] }
 0x73b   :  { %5418 = vmatpush.msra.mxu3 %v7723_v27  ;;  %5379 = vmatpush.msra.mxu1 %v7717_v61  ;;  %v7806_v27 = vld [vmem:[%s14840_s5 + $0x1730] sm:$0xff]  ;;  %v7807_v61 = vld [vmem:[%s14840_s5 + $0x1738] sm:$0xff] }
 0x73c   :  { %6032 = vmatpush.msra.mxu0 %v7976_v41  ;;  %5399 = vmatpush.msra.mxu2 %v7718_v16  ;;  %v8060_v41 = vld [vmem:[%s14840_s5 + $0x1f20] sm:$0xff]  ;;  %v7802_v16 = vld [vmem:[%s14840_s5 + $0x1710] sm:$0xff] }
 0x73d   :  { %5419 = vmatpush.msra.mxu3 %v7719_v54  ;;  %5380 = vmatpush.msra.mxu1 %v7713_v5  ;;  %v7797_v54 = vld [vmem:[%s14840_s5 + $0x16e8] sm:$0xff]  ;;  %v8056_v5 = vld [vmem:[%s14840_s5 + $0x1f00] sm:$0xff] }
 0x73e   :  { %6033 = vmatpush.msra.mxu0 %v7972_v3  ;;  %5400 = vmatpush.msra.mxu2 %v7714_v24  ;;  %v7799_v3 = vld [vmem:[%s14840_s5 + $0x16f8] sm:$0xff]  ;;  %v7793_v24 = vld [vmem:[%s14840_s5 + $0x16c8] sm:$0xff] }
 0x73f   :  { %5420 = vmatpush.msra.mxu3 %v7715_v2  ;;  %5381 = vmatpush.msra.mxu1 %v7709_v51  ;;  %v8052_v2 = vld [vmem:[%s14840_s5 + $0x1ee0] sm:$0xff]  ;;  %v7794_v51 = vld [vmem:[%s14840_s5 + $0x16d0] sm:$0xff] }
 0x740   :  { %6034 = vmatpush.msra.mxu0 %v7968_v25  ;;  %5401 = vmatpush.msra.mxu2 %v7710_v58  ;;  %v8048_v25 = vld [vmem:[%s14840_s5 + $0x1ec0] sm:$0xff]  ;;  %v7790_v58 = vld [vmem:[%s14840_s5 + $0x16b0] sm:$0xff] }
 0x741   :  { %5421 = vmatpush.msra.mxu3 %v7711_v56  ;;  %5382 = vmatpush.msra.mxu1 %v7705_v57  ;;  %v7785_v56 = vld [vmem:[%s14840_s5 + $0x1688] sm:$0xff]  ;;  %v6110_v57 = vld [vmem:[#allocation3 + $0x7e] sm:$0x1] }
 0x742   :  { %6035 = vmatpush.msra.mxu0 %v7964_v39  ;;  %5402 = vmatpush.msra.mxu2 %v7706_v26  ;;  %v6112_v39 = vld [vmem:[#allocation3 + $0x7f] sm:$0x1] }
 0x743   :  { %5422 = vmatpush.msra.mxu3 %v7707_v33  ;;  %5383 = vmatmul.f32.vlgmr.msra.gmra.mxu1 %v12651_v59  ;;  %v7787_v26 = vld [vmem:[%s14840_s5 + $0x1698] sm:$0xff]  ;;  %v6106_v33 = vld [vmem:[#allocation3 + $0x76] sm:$0x1] }
 0x744   :  { %6036 = vmatpush.msra.mxu0 %v7960_v38  ;;  %5403 = vmatmul.f32.vlgmr.msra.gmra.mxu2 %v12651_v59  ;;  %v7782_v38 = vld [vmem:[%s14840_s5 + $0x1670] sm:$0xff] }
 0x745   :  { %5423 = vmatmul.f32.vlgmr.msra.gmra.mxu3 %v12651_v59  ;;  %5535 = vmatpush.msrb.mxu1 %v7829_v42  ;;  %v7821_v59 = vld [vmem:[%s14840_s5 + $0x17a8] sm:$0xff]  ;;  %v6108_v42 = vld [vmem:[#allocation3 + $0x77] sm:$0x1] }
 0x746   :  { %5555 = vmatpush.msrb.mxu2 %v7830_v35  ;;  %5575 = vmatpush.msrb.mxu3 %v7831_v0  ;;  %v6116_v35 = vmax.f32 %v6110_v57, %v6112_v39  ;;  %v8036_v0 = vld [vmem:[%s14840_s5 + $0x1e60] sm:$0xff]  ;;  %v7865_v57 = vld [vmem:[%s14840_s5 + $0x1908] sm:$0xff] }
 0x747   :  { %6037 = vmatmul.f32.vlgmr.msra.gmra.mxu0 %v13465_v32  ;;  %5536 = vmatpush.msrb.mxu1 %v7825_v15  ;;  %v7779_v15 = vld [vmem:[%s14840_s5 + $0x1658] sm:$0xff]  ;;  %v7861_v39 = vld [vmem:[%s14840_s5 + $0x18e8] sm:$0xff] }
 0x748   :  { %6189 = vmatpush.msrb.mxu0 %v8084_v13  ;;  %5556 = vmatpush.msrb.mxu2 %v7826_v11  ;;  %v7773_v13 = vld [vmem:[%s14840_s5 + $0x1628] sm:$0xff]  ;;  %v6109_v11 = vld [vmem:[#allocation3 + $0x3e] sm:$0x1] }
 0x749   :  { %5576 = vmatpush.msrb.mxu3 %v7827_v29  ;;  %5537 = vmatpush.msrb.mxu1 %v7821_v59  ;;  %v6114_v29 = vmax.f32 %v6106_v33, %v6108_v42  ;;  %v8032_v59 = vld [vmem:[%s14840_s5 + $0x1e40] sm:$0xff]  ;;  %v7857_v33 = vld [vmem:[%s14840_s5 + $0x18c8] sm:$0xff] }
 0x74a   :  { %6190 = vmatpush.msrb.mxu0 %v8080_v21  ;;  %5557 = vmatpush.msrb.mxu2 %v7822_v10  ;;  %v7774_v21 = vld [vmem:[%s14840_s5 + $0x1630] sm:$0xff]  ;;  %v6111_v10 = vld [vmem:[#allocation3 + $0x3f] sm:$0x1]  ;;  %v7853_v42 = vld [vmem:[%s14840_s5 + $0x18a8] sm:$0xff] }
 0x74b   :  { %5577 = vmatpush.msrb.mxu3 %v7823_v37  ;;  %5538 = vmatpush.msrb.mxu1 %v7817_v22  ;;  %v7775_v37 = vld [vmem:[%s14840_s5 + $0x1638] sm:$0xff]  ;;  %v7769_v22 = vld [vmem:[%s14840_s5 + $0x1608] sm:$0xff] }
 0x74c   :  { %6191 = vmatpush.msrb.mxu0 %v8076_v8  ;;  %5558 = vmatpush.msrb.mxu2 %v7818_v47  ;;  %v6105_v8 = vld [vmem:[#allocation3 + $0x36] sm:$0x1]  ;;  %v6118_v47 = vmax.f32 %v6114_v29, %v6116_v35  ;;  %v7849_v35 = vld [vmem:[%s14840_s5 + $0x1888] sm:$0xff] }
 0x74d   :  { %5578 = vmatpush.msrb.mxu3 %v7819_v23  ;;  %5539 = vmatpush.msrb.mxu1 %v7813_v50  ;;  %v8028_v23 = vld [vmem:[%s14840_s5 + $0x1e20] sm:$0xff]  ;;  %v7770_v50 = vld [vmem:[%s14840_s5 + $0x1610] sm:$0xff]  ;;  %v7841_v29 = vld [vmem:[%s14840_s5 + $0x1848] sm:$0xff] }
 0x74e   :  { %6192 = vmatpush.msrb.mxu0 %v8072_v53  ;;  %5559 = vmatpush.msrb.mxu2 %v7814_v60  ;;  %v6107_v53 = vld [vmem:[#allocation3 + $0x37] sm:$0x1]  ;;  %v7771_v60 = vld [vmem:[%s14840_s5 + $0x1618] sm:$0xff] }
 0x74f   :  { %5579 = vmatpush.msrb.mxu3 %v7815_v19  ;;  %5540 = vmatpush.msrb.mxu1 %v7809_v1  ;;  %v6115_v19 = vmax.f32 %v6109_v11, %v6111_v10  ;;  %v8024_v1 = vld [vmem:[%s14840_s5 + $0x1e00] sm:$0xff]  ;;  %v7847_v11 = vld [vmem:[%s14840_s5 + $0x1878] sm:$0xff]  ;;  %v7837_v10 = vld [vmem:[%s14840_s5 + $0x1828] sm:$0xff] }
 0x750   :  { %6193 = vmatpush.msrb.mxu0 %v8068_v45  ;;  %5560 = vmatpush.msrb.mxu2 %v7810_v55  ;;  %v7893_v45 = vld [vmem:[%s14840_s5 + $0x19e8] sm:$0xff]  ;;  %v6113_v55 = vmax.f32 %v6105_v8, %v6107_v53  ;;  %v7958_v53 = vld [vmem:[%s14840_s5 + $0x1bf0] sm:$0xff] }
 0x751   :  { %5580 = vmatpush.msrb.mxu3 %v7811_v4  ;;  %5541 = vmatpush.msrb.mxu1 %v7805_v17  ;;  %v6186_v4 = vrot.slane %v6118_v47, 7  ;;  %v7894_v17 = vld [vmem:[%s14840_s5 + $0x19f0] sm:$0xff]  ;;  %v7833_v8 = vld [vmem:[%s14840_s5 + $0x1808] sm:$0xff] }
 0x752   :  { %6194 = vmatpush.msrb.mxu0 %v8064_v63  ;;  %5561 = vmatpush.msrb.mxu2 %v7806_v27  ;;  %v7895_v63 = vld [vmem:[%s14840_s5 + $0x19f8] sm:$0xff]  ;;  %v6117_v27 = vmax.f32 %v6113_v55, %v6115_v19  ;;  %v7834_v47 = vld [vmem:[%s14840_s5 + $0x1810] sm:$0xff]  ;;  %v7953_v19 = vld [vmem:[%s14840_s5 + $0x1bc8] sm:$0xff] }
 0x753   :  { %5581 = vmatpush.msrb.mxu3 %v7807_v61  ;;  %5542 = vmatpush.msrb.mxu1 %v7801_v49  ;;  %v7889_v61 = vld [vmem:[%s14840_s5 + $0x19c8] sm:$0xff]  ;;  %v7890_v49 = vld [vmem:[%s14840_s5 + $0x19d0] sm:$0xff] }
 0x754   :  { %6195 = vmatpush.msrb.mxu0 %v8060_v41  ;;  %5562 = vmatpush.msrb.mxu2 %v7802_v16  ;;  %v7891_v41 = vld [vmem:[%s14840_s5 + $0x19d8] sm:$0xff]  ;;  %v13664_v16 = vsel %vm3747_vm1, %v6186_v4, %v6117_v27  ;;  %v7949_v55 = vld [vmem:[%s14840_s5 + $0x1ba8] sm:$0xff] }
 0x755   :  { %5582 = vmatpush.msrb.mxu3 %v7803_v30  ;;  %5543 = vmatpush.msrb.mxu1 %v7797_v54  ;;  %v7885_v30 = vld [vmem:[%s14840_s5 + $0x19a8] sm:$0xff]  ;;  %v7887_v54 = vld [vmem:[%s14840_s5 + $0x19b8] sm:$0xff] }
 0x756   :  { %6196 = vmatpush.msrb.mxu0 %v8056_v5  ;;  %5563 = vmatpush.msrb.mxu2 %v7798_v36  ;;  %v7881_v5 = vld [vmem:[%s14840_s5 + $0x1988] sm:$0xff]  ;;  %v7882_v36 = vld [vmem:[%s14840_s5 + $0x1990] sm:$0xff]  ;;  %v7951_v4 = vld [vmem:[%s14840_s5 + $0x1bb8] sm:$0xff] }
 0x757   :  { %5583 = vmatpush.msrb.mxu3 %v7799_v3  ;;  %5544 = vmatpush.msrb.mxu1 %v7793_v24  ;;  %v7883_v3 = vld [vmem:[%s14840_s5 + $0x1998] sm:$0xff]  ;;  %v7877_v24 = vld [vmem:[%s14840_s5 + $0x1968] sm:$0xff] }
 0x758   :  { %6197 = vmatpush.msrb.mxu0 %v8052_v2  ;;  %5564 = vmatpush.msrb.mxu2 %v7794_v51  ;;  %v7878_v2 = vld [vmem:[%s14840_s5 + $0x1970] sm:$0xff]  ;;  %v7879_v51 = vld [vmem:[%s14840_s5 + $0x1978] sm:$0xff] }
 0x759   :  { %5584 = vmatpush.msrb.mxu3 %v7795_v12  ;;  %5545 = vmatpush.msrb.mxu1 %v7789_v46  ;;  %v7873_v12 = vld [vmem:[%s14840_s5 + $0x1948] sm:$0xff]  ;;  %v7874_v46 = vld [vmem:[%s14840_s5 + $0x1950] sm:$0xff]  ;;  %v7947_v27 = vld [vmem:[%s14840_s5 + $0x1b98] sm:$0xff] }
 0x75a   :  { %6198 = vmatpush.msrb.mxu0 %v8048_v25  ;;  %5565 = vmatpush.msrb.mxu2 %v7790_v58  ;;  %v7875_v25 = vld [vmem:[%s14840_s5 + $0x1958] sm:$0xff]  ;;  %v7869_v58 = vld [vmem:[%s14840_s5 + $0x1928] sm:$0xff] }
 0x75b   :  { %5585 = vmatpush.msrb.mxu3 %v7791_v44  ;;  %5546 = vmatpush.msrb.mxu1 %v7785_v56  ;;  %v7870_v44 = vld [vmem:[%s14840_s5 + $0x1930] sm:$0xff]  ;;  %v7871_v56 = vld [vmem:[%s14840_s5 + $0x1938] sm:$0xff] }
 0x75c   :  { %6199 = vmatpush.msrb.mxu0 %v8044_v9  ;;  %5566 = vmatpush.msrb.mxu2 %v7786_v52  ;;  %v7866_v9 = vld [vmem:[%s14840_s5 + $0x1910] sm:$0xff]  ;;  %v7867_v52 = vld [vmem:[%s14840_s5 + $0x1918] sm:$0xff] }
 0x75d   :  { %5586 = vmatpush.msrb.mxu3 %v7787_v26  ;;  %5547 = vmatpush.msrb.mxu1 %v7781_v62  ;;  %v7862_v26 = vld [vmem:[%s14840_s5 + $0x18f0] sm:$0xff]  ;;  %v7863_v62 = vld [vmem:[%s14840_s5 + $0x18f8] sm:$0xff] }
 0x75e   :  { %6200 = vmatpush.msrb.mxu0 %v8040_v7  ;;  %5567 = vmatpush.msrb.mxu2 %v7782_v38  ;;  %v7858_v7 = vld [vmem:[%s14840_s5 + $0x18d0] sm:$0xff]  ;;  %v7859_v38 = vld [vmem:[%s14840_s5 + $0x18d8] sm:$0xff] }
 0x75f   :  { %5587 = vmatpush.msrb.mxu3 %v7783_v28  ;;  %5548 = vmatpush.msrb.mxu1 %v7777_v34  ;;  %v7854_v28 = vld [vmem:[%s14840_s5 + $0x18b0] sm:$0xff]  ;;  %v7855_v34 = vld [vmem:[%s14840_s5 + $0x18b8] sm:$0xff] }
 0x760   :  { %6201 = vmatpush.msrb.mxu0 %v8036_v0  ;;  %5568 = vmatpush.msrb.mxu2 %v7778_v14  ;;  %v7850_v0 = vld [vmem:[%s14840_s5 + $0x1890] sm:$0xff]  ;;  %v7851_v14 = vld [vmem:[%s14840_s5 + $0x1898] sm:$0xff] }
 0x761   :  { %5588 = vmatpush.msrb.mxu3 %v7779_v15  ;;  %5549 = vmatpush.msrb.mxu1 %v7773_v13  ;;  %v7845_v15 = vld [vmem:[%s14840_s5 + $0x1868] sm:$0xff]  ;;  %v7846_v13 = vld [vmem:[%s14840_s5 + $0x1870] sm:$0xff] }
 0x762   :  { %6202 = vmatpush.msrb.mxu0 %v8032_v59  ;;  %5569 = vmatpush.msrb.mxu2 %v7774_v21  ;;  %v7842_v59 = vld [vmem:[%s14840_s5 + $0x1850] sm:$0xff]  ;;  %v7843_v21 = vld [vmem:[%s14840_s5 + $0x1858] sm:$0xff] }
 0x763   :  { %5589 = vmatpush.msrb.mxu3 %v7775_v37  ;;  %5550 = vmatpush.msrb.mxu1 %v7769_v22  ;;  %v7838_v37 = vld [vmem:[%s14840_s5 + $0x1830] sm:$0xff]  ;;  %v7839_v22 = vld [vmem:[%s14840_s5 + $0x1838] sm:$0xff] }
 0x764   :  { %6203 = vmatpush.msrb.mxu0 %v8028_v23  ;;  %5570 = vmatpush.msrb.mxu2 %v7770_v50  ;;  %v7835_v23 = vld [vmem:[%s14840_s5 + $0x1818] sm:$0xff]  ;;  %v7957_v50 = vld [vmem:[%s14840_s5 + $0x1be8] sm:$0xff] }
 0x765   :  { %5590 = vmatpush.msrb.mxu3 %v7771_v60  ;;  %5551 = vmatmul.f32.vlgmr.msrb.gmra.mxu1 %v12859_v43  ;;  %v7959_v60 = vld [vmem:[%s14840_s5 + $0x1bf8] sm:$0xff] }
 0x766   :  { %6204 = vmatpush.msrb.mxu0 %v8024_v1  ;;  %5571 = vmatmul.f32.vlgmr.msrb.gmra.mxu2 %v12859_v43  ;;  %v7954_v1 = vld [vmem:[%s14840_s5 + $0x1bd0] sm:$0xff] }
 0x767   :  { %5591 = vmatmul.f32.vlgmr.msrb.gmra.mxu3 %v12859_v43  ;;  %5705 = vmatpush.msra.mxu1 %v7893_v45  ;;  %v7886_v43 = vld [vmem:[%s14840_s5 + $0x19b0] sm:$0xff]  ;;  %v7955_v45 = vld [vmem:[%s14840_s5 + $0x1bd8] sm:$0xff] }
 0x768   :  { %5725 = vmatpush.msra.mxu2 %v7894_v17  ;;  %5745 = vmatpush.msra.mxu3 %v7895_v63  ;;  %v7945_v17 = vld [vmem:[%s14840_s5 + $0x1b88] sm:$0xff]  ;;  %v7946_v63 = vld [vmem:[%s14840_s5 + $0x1b90] sm:$0xff] }
 0x769   :  { %6205 = vmatmul.f32.vlgmr.msrb.gmra.mxu0 %v13664_v16  ;;  %5706 = vmatpush.msra.mxu1 %v7889_v61  ;;  %v7941_v61 = vld [vmem:[%s14840_s5 + $0x1b68] sm:$0xff] }
 0x76a   :  { %5726 = vmatpush.msra.mxu2 %v7890_v49  ;;  %5746 = vmatpush.msra.mxu3 %v7891_v41  ;;  %v7942_v49 = vld [vmem:[%s14840_s5 + $0x1b70] sm:$0xff]  ;;  %v7943_v41 = vld [vmem:[%s14840_s5 + $0x1b78] sm:$0xff] }
 0x76b   :  { %5707 = vmatpush.msra.mxu1 %v7885_v30  ;;  %v7937_v30 = vld [vmem:[%s14840_s5 + $0x1b48] sm:$0xff] }
 0x76c   :  { %5727 = vmatpush.msra.mxu2 %v7886_v43  ;;  %5747 = vmatpush.msra.mxu3 %v7887_v54  ;;  %v7938_v43 = vld [vmem:[%s14840_s5 + $0x1b50] sm:$0xff]  ;;  %v7939_v54 = vld [vmem:[%s14840_s5 + $0x1b58] sm:$0xff] }
 0x76d   :  { %5708 = vmatpush.msra.mxu1 %v7881_v5  ;;  %v7933_v5 = vld [vmem:[%s14840_s5 + $0x1b28] sm:$0xff] }
 0x76e   :  { %5728 = vmatpush.msra.mxu2 %v7882_v36  ;;  %5748 = vmatpush.msra.mxu3 %v7883_v3  ;;  %v7934_v36 = vld [vmem:[%s14840_s5 + $0x1b30] sm:$0xff]  ;;  %v7935_v3 = vld [vmem:[%s14840_s5 + $0x1b38] sm:$0xff] }
 0x76f   :  { %5709 = vmatpush.msra.mxu1 %v7877_v24  ;;  %v7929_v24 = vld [vmem:[%s14840_s5 + $0x1b08] sm:$0xff] }
 0x770   :  { %5729 = vmatpush.msra.mxu2 %v7878_v2  ;;  %5749 = vmatpush.msra.mxu3 %v7879_v51  ;;  %v7930_v2 = vld [vmem:[%s14840_s5 + $0x1b10] sm:$0xff]  ;;  %v7931_v51 = vld [vmem:[%s14840_s5 + $0x1b18] sm:$0xff] }
 0x771   :  { %5710 = vmatpush.msra.mxu1 %v7873_v12  ;;  %v7925_v12 = vld [vmem:[%s14840_s5 + $0x1ae8] sm:$0xff] }
 0x772   :  { %5730 = vmatpush.msra.mxu2 %v7874_v46  ;;  %5750 = vmatpush.msra.mxu3 %v7875_v25  ;;  %v13871_v46 = vpop.f32.mrf.mxu0  ;;  %v7926_v25 = vld [vmem:[%s14840_s5 + $0x1af0] sm:$0xff] }
 0x773   :  { %5711 = vmatpush.msra.mxu1 %v7869_v58  ;;  %v7927_v58 = vld [vmem:[%s14840_s5 + $0x1af8] sm:$0xff] }
 0x774   :  { %5731 = vmatpush.msra.mxu2 %v7870_v44  ;;  %5751 = vmatpush.msra.mxu3 %v7871_v56  ;;  %v7921_v44 = vld [vmem:[%s14840_s5 + $0x1ac8] sm:$0xff]  ;;  %v7922_v56 = vld [vmem:[%s14840_s5 + $0x1ad0] sm:$0xff] }
 0x775   :  { %5712 = vmatpush.msra.mxu1 %v7865_v57  ;;  %v7923_v57 = vld [vmem:[%s14840_s5 + $0x1ad8] sm:$0xff] }
 0x776   :  { %5732 = vmatpush.msra.mxu2 %v7866_v9  ;;  %5752 = vmatpush.msra.mxu3 %v7867_v52  ;;  %v7917_v9 = vld [vmem:[%s14840_s5 + $0x1aa8] sm:$0xff]  ;;  %v7918_v52 = vld [vmem:[%s14840_s5 + $0x1ab0] sm:$0xff] }
 0x777   :  { %5713 = vmatpush.msra.mxu1 %v7861_v39  ;;  %v7919_v39 = vld [vmem:[%s14840_s5 + $0x1ab8] sm:$0xff] }
 0x778   :  { %5733 = vmatpush.msra.mxu2 %v7862_v26  ;;  %5753 = vmatpush.msra.mxu3 %v7863_v62  ;;  %v6321_v26 = vld [vmem:[%s14842_s7 + $0xf0] sm:$0xff]  ;;  %v7913_v62 = vld [vmem:[%s14840_s5 + $0x1a88] sm:$0xff] }
 0x779   :  { %5714 = vmatpush.msra.mxu1 %v7857_v33  ;;  %v7914_v33 = vld [vmem:[%s14840_s5 + $0x1a90] sm:$0xff]  ;;  %6425 = vmatpush.msra.mxu0 %v6321_v26  ;;  %v6295_v26 = vld [vmem:[%s14842_s7 + $0x20] sm:$0xff] }
 0x77a   :  { %5734 = vmatpush.msra.mxu2 %v7858_v7  ;;  %5754 = vmatpush.msra.mxu3 %v7859_v38  ;;  %v7915_v7 = vld [vmem:[%s14840_s5 + $0x1a98] sm:$0xff]  ;;  %v6319_v38 = vld [vmem:[%s14842_s7 + $0xe0] sm:$0xff] }
 0x77b   :  { %5715 = vmatpush.msra.mxu1 %v7853_v42  ;;  %v7909_v42 = vld [vmem:[%s14840_s5 + $0x1a68] sm:$0xff]  ;;  %6426 = vmatpush.msra.mxu0 %v6319_v38  ;;  %v6293_v38 = vld [vmem:[%s14842_s7 + $0x10] sm:$0xff] }
 0x77c   :  { %5735 = vmatpush.msra.mxu2 %v7854_v28  ;;  %5755 = vmatpush.msra.mxu3 %v7855_v34  ;;  %v13915_v28 = vpop.f32.mrf.mxu0  ;;  %v7910_v34 = vld [vmem:[%s14840_s5 + $0x1a70] sm:$0xff] }
 0x77d   :  { %5716 = vmatpush.msra.mxu1 %v7849_v35  ;;  %v7911_v35 = vld [vmem:[%s14840_s5 + $0x1a78] sm:$0xff] }
 0x77e   :  { %5736 = vmatpush.msra.mxu2 %v7850_v0  ;;  %5756 = vmatpush.msra.mxu3 %v7851_v14  ;;  %v6317_v0 = vld [vmem:[%s14842_s7 + $0xd0] sm:$0xff]  ;;  %v7905_v14 = vld [vmem:[%s14840_s5 + $0x1a48] sm:$0xff] }
 0x77f   :  { %5717 = vmatpush.msra.mxu1 %v7845_v15  ;;  %v7906_v15 = vld [vmem:[%s14840_s5 + $0x1a50] sm:$0xff]  ;;  %6427 = vmatpush.msra.mxu0 %v6317_v0  ;;  %v6291_v0 = vld [vmem:[%s14842_s7] sm:$0xff] }
 0x780   :  { %5737 = vmatpush.msra.mxu2 %v7846_v13  ;;  %5757 = vmatpush.msra.mxu3 %v7847_v11  ;;  %v7907_v13 = vld [vmem:[%s14840_s5 + $0x1a58] sm:$0xff]  ;;  %v6315_v11 = vld [vmem:[%s14842_s7 + $0xc0] sm:$0xff] }
 0x781   :  { %5718 = vmatpush.msra.mxu1 %v7841_v29  ;;  %v7901_v29 = vld [vmem:[%s14840_s5 + $0x1a28] sm:$0xff]  ;;  %6428 = vmatpush.msra.mxu0 %v6315_v11  ;;  %v6322_v11 = vld [vmem:[%s14842_s7 + $0xf8] sm:$0xff] }
 0x782   :  { %5738 = vmatpush.msra.mxu2 %v7842_v59  ;;  %5758 = vmatpush.msra.mxu3 %v7843_v21  ;;  %v7902_v59 = vld [vmem:[%s14840_s5 + $0x1a30] sm:$0xff]  ;;  %v7903_v21 = vld [vmem:[%s14840_s5 + $0x1a38] sm:$0xff] }
 0x783   :  { %5719 = vmatpush.msra.mxu1 %v7837_v10  ;;  %v6313_v10 = vld [vmem:[%s14842_s7 + $0xb0] sm:$0xff] }
 0x784   :  { %5739 = vmatpush.msra.mxu2 %v7838_v37  ;;  %5759 = vmatpush.msra.mxu3 %v7839_v22  ;;  %v7897_v37 = vld [vmem:[%s14840_s5 + $0x1a08] sm:$0xff]  ;;  %v7898_v22 = vld [vmem:[%s14840_s5 + $0x1a10] sm:$0xff] }
 0x785   :  { %5720 = vmatpush.msra.mxu1 %v7833_v8  ;;  %v7899_v8 = vld [vmem:[%s14840_s5 + $0x1a18] sm:$0xff]  ;;  %6429 = vmatpush.msra.mxu0 %v6313_v10  ;;  %v7973_v10 = vld [vmem:[%s14840_s5 + $0x1c68] sm:$0xff] }
 0x786   :  { %5740 = vmatpush.msra.mxu2 %v7834_v47  ;;  %5760 = vmatpush.msra.mxu3 %v7835_v23  ;;  %v6311_v47 = vld [vmem:[%s14842_s7 + $0xa0] sm:$0xff]  ;;  %v13962_v23 = vpop.f32.mrf.mxu0 }
 0x787   :  { %5721 = vmatmul.f32.vlgmr.msra.gmra.mxu1 %v13067_v20  ;;  %5741 = vmatmul.f32.vlgmr.msra.gmra.mxu2 %v13067_v20 }
 0x788   :  { %5761 = vmatmul.f32.vlgmr.msra.gmra.mxu3 %v13067_v20  ;;  %5873 = vmatpush.msrb.mxu1 %v7957_v50  ;;  %v7950_v20 = vld [vmem:[%s14840_s5 + $0x1bb0] sm:$0xff]  ;;  %v8021_v50 = vld [vmem:[%s14840_s5 + $0x1de8] sm:$0xff] }
 0x789   :  { %5893 = vmatpush.msrb.mxu2 %v7958_v53  ;;  %5913 = vmatpush.msrb.mxu3 %v7959_v60  ;;  %v8022_v53 = vld [vmem:[%s14840_s5 + $0x1df0] sm:$0xff]  ;;  %v8023_v60 = vld [vmem:[%s14840_s5 + $0x1df8] sm:$0xff] }
 0x78a   :  { %5874 = vmatpush.msrb.mxu1 %v7953_v19  ;;  %6430 = vmatpush.msra.mxu0 %v6311_v47  ;;  %v8017_v19 = vld [vmem:[%s14840_s5 + $0x1dc8] sm:$0xff] }
 0x78b   :  { %5894 = vmatpush.msrb.mxu2 %v7954_v1  ;;  %5914 = vmatpush.msrb.mxu3 %v7955_v45  ;;  %v6309_v1 = vld [vmem:[%s14842_s7 + $0x90] sm:$0xff]  ;;  %v7969_v47 = vld [vmem:[%s14840_s5 + $0x1c48] sm:$0xff] }
 0x78c   :  { %5875 = vmatpush.msrb.mxu1 %v7949_v55  ;;  %v8018_v45 = vld [vmem:[%s14840_s5 + $0x1dd0] sm:$0xff]  ;;  %v8019_v55 = vld [vmem:[%s14840_s5 + $0x1dd8] sm:$0xff]  ;;  %6431 = vmatpush.msra.mxu0 %v6309_v1  ;;  %v6316_v1 = vld [vmem:[%s14842_s7 + $0xc8] sm:$0xff] }
 0x78d   :  { %5895 = vmatpush.msrb.mxu2 %v7950_v20  ;;  %5915 = vmatpush.msrb.mxu3 %v7951_v4  ;;  %v8013_v20 = vld [vmem:[%s14840_s5 + $0x1da8] sm:$0xff]  ;;  %v6307_v4 = vld [vmem:[%s14842_s7 + $0x80] sm:$0xff] }
 0x78e   :  { %5876 = vmatpush.msrb.mxu1 %v7945_v17  ;;  %v8015_v17 = vld [vmem:[%s14840_s5 + $0x1db8] sm:$0xff]  ;;  %6432 = vmatpush.msra.mxu0 %v6307_v4 }
 0x78f   :  { %5896 = vmatpush.msrb.mxu2 %v7946_v63  ;;  %5916 = vmatpush.msrb.mxu3 %v7947_v27  ;;  %v8009_v63 = vld [vmem:[%s14840_s5 + $0x1d88] sm:$0xff]  ;;  %v6305_v27 = vld [vmem:[%s14842_s7 + $0x70] sm:$0xff]  ;;  %v6314_v4 = vld [vmem:[%s14842_s7 + $0xb8] sm:$0xff] }
 0x790   :  { %5877 = vmatpush.msrb.mxu1 %v7941_v61  ;;  %v8010_v61 = vld [vmem:[%s14840_s5 + $0x1d90] sm:$0xff]  ;;  %6433 = vmatpush.msra.mxu0 %v6305_v27  ;;  %v8085_v27 = vld [vmem:[%s14840_s5 + $0x1fe8] sm:$0xff] }
 0x791   :  { %5897 = vmatpush.msrb.mxu2 %v7942_v49  ;;  %5917 = vmatpush.msrb.mxu3 %v7943_v41  ;;  %v8011_v49 = vld [vmem:[%s14840_s5 + $0x1d98] sm:$0xff]  ;;  %v14012_v41 = vpop.f32.mrf.mxu0 }
 0x792   :  { %5878 = vmatpush.msrb.mxu1 %v7937_v30  ;;  %v8005_v30 = vld [vmem:[%s14840_s5 + $0x1d68] sm:$0xff] }
 0x793   :  { %5898 = vmatpush.msrb.mxu2 %v7938_v43  ;;  %5918 = vmatpush.msrb.mxu3 %v7939_v54  ;;  %v6303_v43 = vld [vmem:[%s14842_s7 + $0x60] sm:$0xff]  ;;  %v8006_v54 = vld [vmem:[%s14840_s5 + $0x1d70] sm:$0xff] }
 0x794   :  { %5879 = vmatpush.msrb.mxu1 %v7933_v5  ;;  %v8007_v5 = vld [vmem:[%s14840_s5 + $0x1d78] sm:$0xff]  ;;  %6434 = vmatpush.msra.mxu0 %v6303_v43  ;;  %v6312_v43 = vld [vmem:[%s14842_s7 + $0xa8] sm:$0xff] }
 0x795   :  { %5899 = vmatpush.msrb.mxu2 %v7934_v36  ;;  %5919 = vmatpush.msrb.mxu3 %v7935_v3  ;;  %v8001_v36 = vld [vmem:[%s14840_s5 + $0x1d48] sm:$0xff]  ;;  %v6301_v3 = vld [vmem:[%s14842_s7 + $0x50] sm:$0xff] }
 0x796   :  { %5880 = vmatpush.msrb.mxu1 %v7929_v24  ;;  %v8002_v24 = vld [vmem:[%s14840_s5 + $0x1d50] sm:$0xff]  ;;  %6435 = vmatpush.msra.mxu0 %v6301_v3  ;;  %v6310_v3 = vld [vmem:[%s14842_s7 + $0x98] sm:$0xff] }
 0x797   :  { %5900 = vmatpush.msrb.mxu2 %v7930_v2  ;;  %5920 = vmatpush.msrb.mxu3 %v7931_v51  ;;  %v8003_v2 = vld [vmem:[%s14840_s5 + $0x1d58] sm:$0xff]  ;;  %v7997_v51 = vld [vmem:[%s14840_s5 + $0x1d28] sm:$0xff] }
 0x798   :  { %5881 = vmatpush.msrb.mxu1 %v7925_v12  ;;  %v6299_v12 = vld [vmem:[%s14842_s7 + $0x40] sm:$0xff] }
 0x799   :  { %5901 = vmatpush.msrb.mxu2 %v7926_v25  ;;  %5921 = vmatpush.msrb.mxu3 %v7927_v58  ;;  %v7998_v25 = vld [vmem:[%s14840_s5 + $0x1d30] sm:$0xff]  ;;  %v7999_v58 = vld [vmem:[%s14840_s5 + $0x1d38] sm:$0xff] }
 0x79a   :  { %5882 = vmatpush.msrb.mxu1 %v7921_v44  ;;  %v7993_v44 = vld [vmem:[%s14840_s5 + $0x1d08] sm:$0xff]  ;;  %6436 = vmatpush.msra.mxu0 %v6299_v12 }
 0x79b   :  { %5902 = vmatpush.msrb.mxu2 %v7922_v56  ;;  %5922 = vmatpush.msrb.mxu3 %v7923_v57  ;;  %v6297_v56 = vld [vmem:[%s14842_s7 + $0x30] sm:$0xff] }
 0x79c   :  { %5883 = vmatpush.msrb.mxu1 %v7917_v9  ;;  %v7994_v57 = vld [vmem:[%s14840_s5 + $0x1d10] sm:$0xff]  ;;  %v7995_v9 = vld [vmem:[%s14840_s5 + $0x1d18] sm:$0xff]  ;;  %6437 = vmatpush.msra.mxu0 %v6297_v56 }
 0x79d   :  { %5903 = vmatpush.msrb.mxu2 %v7918_v52  ;;  %5923 = vmatpush.msrb.mxu3 %v7919_v39  ;;  %v14062_v52 = vpop.f32.mrf.mxu0  ;;  %v7989_v39 = vld [vmem:[%s14840_s5 + $0x1ce8] sm:$0xff]  ;;  %v6306_v56 = vld [vmem:[%s14842_s7 + $0x78] sm:$0xff] }
 0x79e   :  { %5884 = vmatpush.msrb.mxu1 %v7913_v62  ;;  %v7990_v62 = vld [vmem:[%s14840_s5 + $0x1cf0] sm:$0xff]  ;;  %6438 = vmatpush.msra.mxu0 %v6295_v26  ;;  %v6304_v26 = vld [vmem:[%s14842_s7 + $0x68] sm:$0xff] }
 0x79f   :  { %5904 = vmatpush.msrb.mxu2 %v7914_v33  ;;  %5924 = vmatpush.msrb.mxu3 %v7915_v7  ;;  %v7991_v33 = vld [vmem:[%s14840_s5 + $0x1cf8] sm:$0xff]  ;;  %v7985_v7 = vld [vmem:[%s14840_s5 + $0x1cc8] sm:$0xff] }
 0x7a0   :  { %5885 = vmatpush.msrb.mxu1 %v7909_v42  ;;  %v7986_v42 = vld [vmem:[%s14840_s5 + $0x1cd0] sm:$0xff]  ;;  %6439 = vmatpush.msra.mxu0 %v6293_v38  ;;  %v8061_v38 = vld [vmem:[%s14840_s5 + $0x1f28] sm:$0xff] }
 0x7a1   :  { %5905 = vmatpush.msrb.mxu2 %v7910_v34  ;;  %5925 = vmatpush.msrb.mxu3 %v7911_v35  ;;  %v7987_v34 = vld [vmem:[%s14840_s5 + $0x1cd8] sm:$0xff]  ;;  %v7981_v35 = vld [vmem:[%s14840_s5 + $0x1ca8] sm:$0xff] }
 0x7a2   :  { %5886 = vmatpush.msrb.mxu1 %v7905_v14  ;;  %v7982_v14 = vld [vmem:[%s14840_s5 + $0x1cb0] sm:$0xff]  ;;  %6440 = vmatpush.msra.mxu0 %v6291_v0  ;;  %v6300_v0 = vld [vmem:[%s14842_s7 + $0x48] sm:$0xff] }
 0x7a3   :  { %5906 = vmatpush.msrb.mxu2 %v7906_v15  ;;  %5926 = vmatpush.msrb.mxu3 %v7907_v13  ;;  %v7983_v15 = vld [vmem:[%s14840_s5 + $0x1cb8] sm:$0xff]  ;;  %v7977_v13 = vld [vmem:[%s14840_s5 + $0x1c88] sm:$0xff] }
 0x7a4   :  { %5887 = vmatpush.msrb.mxu1 %v7901_v29  ;;  %v7978_v29 = vld [vmem:[%s14840_s5 + $0x1c90] sm:$0xff]  ;;  %6505 = vmatpush.msrb.mxu0 %v6322_v11  ;;  %v8053_v11 = vld [vmem:[%s14840_s5 + $0x1ee8] sm:$0xff] }
 0x7a5   :  { %5907 = vmatpush.msrb.mxu2 %v7902_v59  ;;  %5927 = vmatpush.msrb.mxu3 %v7903_v21  ;;  %v7979_v59 = vld [vmem:[%s14840_s5 + $0x1c98] sm:$0xff]  ;;  %v14112_v21 = vpop.f32.mrf.mxu0 }
 0x7a6   :  { %5888 = vmatpush.msrb.mxu1 %v7897_v37  ;;  %v6320_v37 = vld [vmem:[%s14842_s7 + $0xe8] sm:$0xff] }
 0x7a7   :  { %5908 = vmatpush.msrb.mxu2 %v7898_v22  ;;  %5928 = vmatpush.msrb.mxu3 %v7899_v8  ;;  %v7974_v22 = vld [vmem:[%s14840_s5 + $0x1c70] sm:$0xff]  ;;  %v7975_v8 = vld [vmem:[%s14840_s5 + $0x1c78] sm:$0xff] }
 0x7a8   :  { %5889 = vmatmul.f32.vlgmr.msrb.gmra.mxu1 %v13266_v48  ;;  %5909 = vmatmul.f32.vlgmr.msrb.gmra.mxu2 %v13266_v48 }
 0x7a9   :  { %5929 = vmatmul.f32.vlgmr.msrb.gmra.mxu3 %v13266_v48  ;;  %6041 = vmatpush.msra.mxu1 %v8021_v50  ;;  %v8014_v48 = vld [vmem:[%s14840_s5 + $0x1db0] sm:$0xff]  ;;  %v6318_v50 = vld [vmem:[%s14842_s7 + $0xd8] sm:$0xff] }
 0x7aa   :  { %6061 = vmatpush.msra.mxu2 %v8022_v53  ;;  %6081 = vmatpush.msra.mxu3 %v8023_v60  ;;  %v7970_v53 = vld [vmem:[%s14840_s5 + $0x1c50] sm:$0xff]  ;;  %v7971_v60 = vld [vmem:[%s14840_s5 + $0x1c58] sm:$0xff] }
 0x7ab   :  { %6042 = vmatpush.msra.mxu1 %v8017_v19  ;;  %6506 = vmatpush.msrb.mxu0 %v6320_v37  ;;  %v7965_v19 = vld [vmem:[%s14840_s5 + $0x1c28] sm:$0xff] }
 0x7ac   :  { %6062 = vmatpush.msra.mxu2 %v8018_v45  ;;  %6082 = vmatpush.msra.mxu3 %v8019_v55  ;;  %v7966_v45 = vld [vmem:[%s14840_s5 + $0x1c30] sm:$0xff]  ;;  %v7967_v55 = vld [vmem:[%s14840_s5 + $0x1c38] sm:$0xff]  ;;  %v8049_v37 = vld [vmem:[%s14840_s5 + $0x1ec8] sm:$0xff] }
 0x7ad   :  { %6043 = vmatpush.msra.mxu1 %v8013_v20  ;;  %6507 = vmatpush.msrb.mxu0 %v6318_v50  ;;  %v7961_v20 = vld [vmem:[%s14840_s5 + $0x1c08] sm:$0xff] }
 0x7ae   :  { %6063 = vmatpush.msra.mxu2 %v8014_v48  ;;  %6083 = vmatpush.msra.mxu3 %v8015_v17  ;;  %v7962_v48 = vld [vmem:[%s14840_s5 + $0x1c10] sm:$0xff]  ;;  %v7963_v17 = vld [vmem:[%s14840_s5 + $0x1c18] sm:$0xff]  ;;  %v8045_v50 = vld [vmem:[%s14840_s5 + $0x1ea8] sm:$0xff] }
 0x7af   :  { %6044 = vmatpush.msra.mxu1 %v8009_v63  ;;  %6508 = vmatpush.msrb.mxu0 %v6316_v1  ;;  %v14162_v63 = vpop.f32.mrf.mxu0  ;;  %v8041_v1 = vld [vmem:[%s14840_s5 + $0x1e88] sm:$0xff] }
 0x7b0   :  { %6064 = vmatpush.msra.mxu2 %v8010_v61  ;;  %6084 = vmatpush.msra.mxu3 %v8011_v49  ;;  %v8086_v61 = vld [vmem:[%s14840_s5 + $0x1ff0] sm:$0xff]  ;;  %v8087_v49 = vld [vmem:[%s14840_s5 + $0x1ff8] sm:$0xff] }
 0x7b1   :  { %6045 = vmatpush.msra.mxu1 %v8005_v30  ;;  %6509 = vmatpush.msrb.mxu0 %v6314_v4  ;;  %v8081_v30 = vld [vmem:[%s14840_s5 + $0x1fc8] sm:$0xff] }
 0x7b2   :  { %6065 = vmatpush.msra.mxu2 %v8006_v54  ;;  %6085 = vmatpush.msra.mxu3 %v8007_v5  ;;  %v8082_v54 = vld [vmem:[%s14840_s5 + $0x1fd0] sm:$0xff]  ;;  %v8083_v5 = vld [vmem:[%s14840_s5 + $0x1fd8] sm:$0xff] }
 0x7b3   :  { %6046 = vmatpush.msra.mxu1 %v8001_v36  ;;  %v8077_v36 = vld [vmem:[%s14840_s5 + $0x1fa8] sm:$0xff]  ;;  %6510 = vmatpush.msrb.mxu0 %v6312_v43  ;;  %v14340_v43 = vld [vmem:[%s14841_s6] sm:$0xf] }
 0x7b4   :  { %6066 = vmatpush.msra.mxu2 %v8002_v24  ;;  %6086 = vmatpush.msra.mxu3 %v8003_v2  ;;  %v8079_v24 = vld [vmem:[%s14840_s5 + $0x1fb8] sm:$0xff]  ;;  %v8073_v2 = vld [vmem:[%s14840_s5 + $0x1f88] sm:$0xff] }
 0x7b5   :  { %6047 = vmatpush.msra.mxu1 %v7997_v51  ;;  %v6308_v51 = vld [vmem:[%s14842_s7 + $0x88] sm:$0xff]  ;;  %6511 = vmatpush.msrb.mxu0 %v6310_v3  ;;  %v8031_v3 = vld [vmem:[%s14840_s5 + $0x1e38] sm:$0xff] }
 0x7b6   :  { %6067 = vmatpush.msra.mxu2 %v7998_v25  ;;  %6087 = vmatpush.msra.mxu3 %v7999_v58  ;;  %v8074_v25 = vld [vmem:[%s14840_s5 + $0x1f90] sm:$0xff]  ;;  %v8075_v58 = vld [vmem:[%s14840_s5 + $0x1f98] sm:$0xff] }
 0x7b7   :  { %6048 = vmatpush.msra.mxu1 %v7993_v44  ;;  %v14206_v12 = vpop.f32.mrf.mxu0  ;;  %v8069_v44 = vld [vmem:[%s14840_s5 + $0x1f68] sm:$0xff]  ;;  %6512 = vmatpush.msrb.mxu0 %v6308_v51  ;;  %v8026_v51 = vld [vmem:[%s14840_s5 + $0x1e10] sm:$0xff] }
 0x7b8   :  { %6068 = vmatpush.msra.mxu2 %v7994_v57  ;;  %6088 = vmatpush.msra.mxu3 %v7995_v9  ;;  %v8070_v57 = vld [vmem:[%s14840_s5 + $0x1f70] sm:$0xff]  ;;  %v8071_v9 = vld [vmem:[%s14840_s5 + $0x1f78] sm:$0xff] }
 0x7b9   :  { %6049 = vmatpush.msra.mxu1 %v7989_v39  ;;  %v8065_v39 = vld [vmem:[%s14840_s5 + $0x1f48] sm:$0xff]  ;;  %6513 = vmatpush.msrb.mxu0 %v6306_v56 }
 0x7ba   :  { %6069 = vmatpush.msra.mxu2 %v7990_v62  ;;  %6089 = vmatpush.msra.mxu3 %v7991_v33  ;;  %v8066_v62 = vld [vmem:[%s14840_s5 + $0x1f50] sm:$0xff]  ;;  %v8067_v33 = vld [vmem:[%s14840_s5 + $0x1f58] sm:$0xff] }
 0x7bb   :  { %6050 = vmatpush.msra.mxu1 %v7985_v7  ;;  %v4585_v7 = vadd.f32 %v13871_v46, %v12440_v31  ;;  %6514 = vmatpush.msrb.mxu0 %v6304_v26  ;;  %v8057_v46 = vld [vmem:[%s14840_s5 + $0x1f08] sm:$0xff]  ;;  %v6349_v26 = vld [vmem:[%s14842_s7 + $0x1d0] sm:$0xff] }
 0x7bc   :  { %6070 = vmatpush.msra.mxu2 %v7986_v42  ;;  %6090 = vmatpush.msra.mxu3 %v7987_v34  ;;  %v6302_v42 = vld [vmem:[%s14842_s7 + $0x58] sm:$0xff]  ;;  %v8062_v34 = vld [vmem:[%s14840_s5 + $0x1f30] sm:$0xff] }
 0x7bd   :  { %6051 = vmatpush.msra.mxu1 %v7981_v35  ;;  %v8063_v35 = vld [vmem:[%s14840_s5 + $0x1f38] sm:$0xff]  ;;  %v4753_v31 = vadd.f32 %v13915_v28, %v4585_v7  ;;  %6515 = vmatpush.msrb.mxu0 %v6302_v42  ;;  %v6381_v7 = vld [vmem:[%s14842_s7 + $0x2d0] sm:$0xff]  ;;  %v6347_v42 = vld [vmem:[%s14842_s7 + $0x1c0] sm:$0xff] }
 0x7be   :  { %6071 = vmatpush.msra.mxu2 %v7982_v14  ;;  %6091 = vmatpush.msra.mxu3 %v7983_v15  ;;  %v8058_v15 = vld [vmem:[%s14840_s5 + $0x1f10] sm:$0xff]  ;;  %v8059_v28 = vld [vmem:[%s14840_s5 + $0x1f18] sm:$0xff] }
 0x7bf   :  { %6052 = vmatpush.msra.mxu1 %v7977_v13  ;;  %v5870_v14 = vpop.f32.mrf.mxu0  ;;  %v4921_v13 = vadd.f32 %v13962_v23, %v4753_v31  ;;  %6516 = vmatpush.msrb.mxu0 %v6300_v0  ;;  %v6345_v31 = vld [vmem:[%s14842_s7 + $0x1b0] sm:$0xff] }
 0x7c0   :  { %6072 = vmatpush.msra.mxu2 %v7978_v29  ;;  %6092 = vmatpush.msra.mxu3 %v7979_v59  ;;  %v6298_v29 = vld [vmem:[%s14842_s7 + $0x38] sm:$0xff]  ;;  %v8054_v59 = vld [vmem:[%s14840_s5 + $0x1ef0] sm:$0xff] }
 0x7c1   :  { %6053 = vmatpush.msra.mxu1 %v7973_v10  ;;  %v8055_v10 = vld [vmem:[%s14840_s5 + $0x1ef8] sm:$0xff]  ;;  %v5091_v23 = vadd.f32 %v14012_v41, %v4921_v13  ;;  %6517 = vmatpush.msrb.mxu0 %v6298_v29  ;;  %v6409_v0 = vld [vmem:[%s14842_s7 + $0x3b0] sm:$0xff]  ;;  %v6339_v13 = vld [vmem:[%s14842_s7 + $0x180] sm:$0xff]  ;;  %v14422_v29 = vpop.f32.mrf.mxu3 }
 0x7c2   :  { %6073 = vmatpush.msra.mxu2 %v7974_v22  ;;  %6093 = vmatpush.msra.mxu3 %v7975_v8  ;;  %v6296_v22 = vld [vmem:[%s14842_s7 + $0x28] sm:$0xff]  ;;  %v8050_v8 = vld [vmem:[%s14840_s5 + $0x1ed0] sm:$0xff] }
 0x7c3   :  { %6054 = vmatpush.msra.mxu1 %v7969_v47  ;;  %v8051_v47 = vld [vmem:[%s14840_s5 + $0x1ed8] sm:$0xff]  ;;  %v5259_v41 = vadd.f32 %v14062_v52, %v5091_v23  ;;  %6518 = vmatpush.msrb.mxu0 %v6296_v22  ;;  %v6337_v22 = vld [vmem:[%s14842_s7 + $0x170] sm:$0xff] }
 0x7c4   :  { %6074 = vmatpush.msra.mxu2 %v7970_v53  ;;  %6094 = vmatpush.msra.mxu3 %v7971_v60  ;;  %v6294_v53 = vld [vmem:[%s14842_s7 + $0x18] sm:$0xff]  ;;  %v8046_v60 = vld [vmem:[%s14840_s5 + $0x1eb0] sm:$0xff] }
 0x7c5   :  { %6055 = vmatpush.msra.mxu1 %v7965_v19  ;;  %v8047_v19 = vld [vmem:[%s14840_s5 + $0x1eb8] sm:$0xff]  ;;  %v5427_v52 = vadd.f32 %v14112_v21, %v5259_v41  ;;  %6519 = vmatpush.msrb.mxu0 %v6294_v53  ;;  %v6335_v41 = vld [vmem:[%s14842_s7 + $0x160] sm:$0xff]  ;;  %v6405_v53 = vld [vmem:[%s14842_s7 + $0x390] sm:$0xff] }
 0x7c6   :  { %6075 = vmatpush.msra.mxu2 %v7966_v45  ;;  %6095 = vmatpush.msra.mxu3 %v7967_v55  ;;  %v6292_v45 = vld [vmem:[%s14842_s7 + $0x8] sm:$0xff]  ;;  %v8043_v21 = vld [vmem:[%s14840_s5 + $0x1e98] sm:$0xff] }
 0x7c7   :  { %6056 = vmatpush.msra.mxu1 %v7961_v20  ;;  %v6038_v55 = vpop.f32.mrf.mxu0  ;;  %v8042_v20 = vld [vmem:[%s14840_s5 + $0x1e90] sm:$0xff]  ;;  %v5595_v4 = vadd.f32 %v14162_v63, %v5427_v52  ;;  %6520 = vmatpush.msrb.mxu0 %v6292_v45  ;;  %v8033_v63 = vld [vmem:[%s14840_s5 + $0x1e48] sm:$0xff]  ;;  %v6403_v52 = vld [vmem:[%s14842_s7 + $0x380] sm:$0xff] }
 0x7c8   :  { %6076 = vmatpush.msra.mxu2 %v7962_v48  ;;  %6096 = vmatpush.msra.mxu3 %v7963_v17  ;;  %v8037_v48 = vld [vmem:[%s14840_s5 + $0x1e68] sm:$0xff]  ;;  %v8038_v17 = vld [vmem:[%s14840_s5 + $0x1e70] sm:$0xff] }
 0x7c9   :  { %6057 = vmatmul.f32.vlgmr.msra.gmra.mxu1 %v13465_v32  ;;  %6077 = vmatmul.f32.vlgmr.msra.gmra.mxu2 %v13465_v32  ;;  %v14428_v23 = vpop.f32.mrf.mxu3 }
 0x7ca   :  { %6097 = vmatmul.f32.vlgmr.msra.gmra.mxu3 %v13465_v32  ;;  %6209 = vmatpush.msrb.mxu1 %v8085_v27  ;;  %v8078_v32 = vld [vmem:[%s14840_s5 + $0x1fb0] sm:$0xff]  ;;  %v8039_v27 = vld [vmem:[%s14840_s5 + $0x1e78] sm:$0xff] }
 0x7cb   :  { %6229 = vmatpush.msrb.mxu2 %v8086_v61  ;;  %6249 = vmatpush.msrb.mxu3 %v8087_v49  ;;  %v5765_v61 = vadd.f32 %v14206_v12, %v5595_v4  ;;  %v8034_v49 = vld [vmem:[%s14840_s5 + $0x1e50] sm:$0xff]  ;;  %v8027_v12 = vld [vmem:[%s14840_s5 + $0x1e18] sm:$0xff] }
 0x7cc   :  { %6210 = vmatpush.msrb.mxu1 %v8081_v30  ;;  %v8035_v30 = vld [vmem:[%s14840_s5 + $0x1e58] sm:$0xff] }
 0x7cd   :  { %6230 = vmatpush.msrb.mxu2 %v8082_v54  ;;  %6250 = vmatpush.msrb.mxu3 %v8083_v5  ;;  %v5933_v54 = vadd.f32 %v5870_v14, %v5765_v61  ;;  %v8029_v5 = vld [vmem:[%s14840_s5 + $0x1e28] sm:$0xff]  ;;  %v6343_v14 = vld [vmem:[%s14842_s7 + $0x1a0] sm:$0xff] }
 0x7ce   :  { %6211 = vmatpush.msrb.mxu1 %v8077_v36  ;;  %v8030_v36 = vld [vmem:[%s14840_s5 + $0x1e30] sm:$0xff]  ;;  %v6327_v61 = vld [vmem:[%s14842_s7 + $0x120] sm:$0xff] }
 0x7cf   :  { %6231 = vmatpush.msrb.mxu2 %v8078_v32  ;;  %6251 = vmatpush.msrb.mxu3 %v8079_v24  ;;  %v6101_v32 = vadd.f32 %v6038_v55, %v5933_v54  ;;  %v8025_v24 = vld [vmem:[%s14840_s5 + $0x1e08] sm:$0xff]  ;;  %v6331_v55 = vld [vmem:[%s14842_s7 + $0x140] sm:$0xff] }
 0x7d0   :  { %6212 = vmatpush.msrb.mxu1 %v8073_v2  ;;  %v6275_v2 = vperm.slane %v14340_v43, 0  ;;  %v6363_v54 = vld [vmem:[%s14842_s7 + $0x240] sm:$0xff] }
 0x7d1   :  { %6232 = vmatpush.msrb.mxu2 %v8074_v25  ;;  %6252 = vmatpush.msrb.mxu3 %v8075_v58  ;;  %v14461_v45 = vpop.f32.mrf.mxu3 }
 0x7d2   :  { %6213 = vmatpush.msrb.mxu1 %v8069_v44 }
 0x7d3   :  { %6233 = vmatpush.msrb.mxu2 %v8070_v57  ;;  %6253 = vmatpush.msrb.mxu3 %v8071_v9  ;;  %v6353_v57 = vld [vmem:[%s14842_s7 + $0x1f0] sm:$0xff]  ;;  %v6351_v9 = vld [vmem:[%s14842_s7 + $0x1e0] sm:$0xff] }
 0x7d4   :  { %6214 = vmatpush.msrb.mxu1 %v8065_v39  ;;  %v6385_v39 = vld [vmem:[%s14842_s7 + $0x2f0] sm:$0xff] }
 0x7d5   :  { %6234 = vmatpush.msrb.mxu2 %v8066_v62  ;;  %6254 = vmatpush.msrb.mxu3 %v8067_v33  ;;  %v6383_v62 = vld [vmem:[%s14842_s7 + $0x2e0] sm:$0xff] }
 0x7d6   :  { %6215 = vmatpush.msrb.mxu1 %v8061_v38  ;;  %v6415_v33 = vld [vmem:[%s14842_s7 + $0x3e0] sm:$0xff]  ;;  %v6413_v38 = vld [vmem:[%s14842_s7 + $0x3d0] sm:$0xff] }
 0x7d7   :  { %6235 = vmatpush.msrb.mxu2 %v8062_v34  ;;  %6255 = vmatpush.msrb.mxu3 %v8063_v35  ;;  %v6379_v34 = vld [vmem:[%s14842_s7 + $0x2c0] sm:$0xff] }
 0x7d8   :  { %6216 = vmatpush.msrb.mxu1 %v8057_v46  ;;  %v6411_v35 = vld [vmem:[%s14842_s7 + $0x3c0] sm:$0xff]  ;;  %v6377_v46 = vld [vmem:[%s14842_s7 + $0x2b0] sm:$0xff] }
 0x7d9   :  { %6236 = vmatpush.msrb.mxu2 %v8058_v15  ;;  %6256 = vmatpush.msrb.mxu3 %v8059_v28  ;;  %v14412_v15 = vpop.f32.mrf.mxu1  ;;  %v6341_v28 = vld [vmem:[%s14842_s7 + $0x190] sm:$0xff] }
 0x7da   :  { %6217 = vmatpush.msrb.mxu1 %v8053_v11  ;;  %v14420_v11 = vpop.f32.mrf.mxu2 }
 0x7db   :  { %6237 = vmatpush.msrb.mxu2 %v8054_v59  ;;  %6257 = vmatpush.msrb.mxu3 %v8055_v10 }
 0x7dc   :  { %6218 = vmatpush.msrb.mxu1 %v8049_v37 }
 0x7dd   :  { %6238 = vmatpush.msrb.mxu2 %v8050_v8  ;;  %6258 = vmatpush.msrb.mxu3 %v8051_v47  ;;  %v6375_v8 = vld [vmem:[%s14842_s7 + $0x2a0] sm:$0xff] }
 0x7de   :  { %6219 = vmatpush.msrb.mxu1 %v8045_v50  ;;  %v6407_v47 = vld [vmem:[%s14842_s7 + $0x3a0] sm:$0xff]  ;;  %v6373_v50 = vld [vmem:[%s14842_s7 + $0x290] sm:$0xff] }
 0x7df   :  { %6239 = vmatpush.msrb.mxu2 %v8046_v60  ;;  %6259 = vmatpush.msrb.mxu3 %v8047_v19  ;;  %v6333_v60 = vld [vmem:[%s14842_s7 + $0x150] sm:$0xff]  ;;  %v6371_v19 = vld [vmem:[%s14842_s7 + $0x280] sm:$0xff] }
 0x7e0   :  { %6220 = vmatpush.msrb.mxu1 %v8041_v1 }
 0x7e1   :  { %6240 = vmatpush.msrb.mxu2 %v8042_v20  ;;  %6260 = vmatpush.msrb.mxu3 %v8043_v21  ;;  %v14424_v59 = vpop.f32.mrf.mxu1  ;;  %v6369_v20 = vld [vmem:[%s14842_s7 + $0x270] sm:$0xff] }
 0x7e2   :  { %6221 = vmatpush.msrb.mxu1 %v8037_v48  ;;  %v14426_v10 = vpop.f32.mrf.mxu2  ;;  %v6401_v21 = vld [vmem:[%s14842_s7 + $0x370] sm:$0xff] }
 0x7e3   :  { %6241 = vmatpush.msrb.mxu2 %v8038_v17  ;;  %6261 = vmatpush.msrb.mxu3 %v8039_v27  ;;  %v6329_v48 = vld [vmem:[%s14842_s7 + $0x130] sm:$0xff]  ;;  %v6367_v17 = vld [vmem:[%s14842_s7 + $0x260] sm:$0xff] }
 0x7e4   :  { %6222 = vmatpush.msrb.mxu1 %v8033_v63  ;;  %v6399_v27 = vld [vmem:[%s14842_s7 + $0x360] sm:$0xff]  ;;  %v6365_v63 = vld [vmem:[%s14842_s7 + $0x250] sm:$0xff] }
 0x7e5   :  { %6242 = vmatpush.msrb.mxu2 %v8034_v49  ;;  %6262 = vmatpush.msrb.mxu3 %v8035_v30  ;;  %v6397_v49 = vld [vmem:[%s14842_s7 + $0x350] sm:$0xff] }
 0x7e6   :  { %6223 = vmatpush.msrb.mxu1 %v8029_v5  ;;  %v6206_v25 = vpop.f32.mrf.mxu0  ;;  %v6325_v30 = vld [vmem:[%s14842_s7 + $0x110] sm:$0xff]  ;;  %v6395_v5 = vld [vmem:[%s14842_s7 + $0x340] sm:$0xff] }
 0x7e7   :  { %6243 = vmatpush.msrb.mxu2 %v8030_v36  ;;  %6263 = vmatpush.msrb.mxu3 %v8031_v3  ;;  %v6269_v58 = vadd.f32 %v6206_v25, %v6101_v32  ;;  %v6323_v36 = vld [vmem:[%s14842_s7 + $0x100] sm:$0xff]  ;;  %v6361_v3 = vld [vmem:[%s14842_s7 + $0x230] sm:$0xff] }
 0x7e8   :  { %6224 = vmatpush.msrb.mxu1 %v8025_v24  ;;  %v6393_v24 = vld [vmem:[%s14842_s7 + $0x330] sm:$0xff] }
 0x7e9   :  { %6244 = vmatpush.msrb.mxu2 %v8026_v51  ;;  %6264 = vmatpush.msrb.mxu3 %v8027_v12  ;;  %v6283_v44 = vadd.f32 %v6275_v2, %v6269_v58  ;;  %v14430_v37 = vpop.f32.mrf.mxu1  ;;  %v6354_v2 = vld [vmem:[%s14842_s7 + $0x1f8] sm:$0xff]  ;;  %v14515_v51 = vpop.f32.mrf.mxu3  ;;  %v6359_v12 = vld [vmem:[%s14842_s7 + $0x220] sm:$0xff] }
 0x7ea   :  { %6225 = vmatmul.f32.vlgmr.msrb.gmra.mxu1 %v13664_v16  ;;  %6245 = vmatmul.f32.vlgmr.msrb.gmra.mxu2 %v13664_v16  ;;  %v14459_v1 = vpop.f32.mrf.mxu2  ;;  %v6391_v58 = vld [vmem:[%s14842_s7 + $0x320] sm:$0xff] }
 0x7eb   :  { %6265 = vmatmul.f32.vlgmr.msrb.gmra.mxu3 %v13664_v16  ;;  %v6287_v56 = vmax.f32 %v6283_v44, 0.0  ;;  %6445 = vmatpush.msra.mxu1 %v6353_v57  ;;  %v6417_v16 = vld [vmem:[%s14842_s7 + $0x3f0] sm:$0xff]  ;;  %v6352_v44 = vld [vmem:[%s14842_s7 + $0x1e8] sm:$0xff] }
 0x7ec   :  { %6465 = vmatpush.msra.mxu2 %v6385_v39  ;;  %6485 = vmatpush.msra.mxu3 %v6417_v16  ;;  %v6389_v57 = vld [vmem:[%s14842_s7 + $0x310] sm:$0xff]  ;;  %v6355_v39 = vld [vmem:[%s14842_s7 + $0x200] sm:$0xff] }
 0x7ed   :  { %6441 = vmatmul.f32.vlgmr.msra.gmra.mxu0 %v6287_v56  ;;  %6446 = vmatpush.msra.mxu1 %v6351_v9  ;;  %v6350_v9 = vld [vmem:[%s14842_s7 + $0x1d8] sm:$0xff]  ;;  %v6387_v16 = vld [vmem:[%s14842_s7 + $0x300] sm:$0xff] }
 0x7ee   :  { %6466 = vmatpush.msra.mxu2 %v6383_v62  ;;  %6486 = vmatpush.msra.mxu3 %v6415_v33  ;;  %v6386_v62 = vld [vmem:[%s14842_s7 + $0x2f8] sm:$0xff] }
 0x7ef   :  { %6447 = vmatpush.msra.mxu1 %v6349_v26  ;;  %v6348_v26 = vld [vmem:[%s14842_s7 + $0x1c8] sm:$0xff]  ;;  %v6418_v33 = vld [vmem:[%s14842_s7 + $0x3f8] sm:$0xff] }
 0x7f0   :  { %6467 = vmatpush.msra.mxu2 %v6381_v7  ;;  %6487 = vmatpush.msra.mxu3 %v6413_v38  ;;  %v6346_v38 = vld [vmem:[%s14842_s7 + $0x1b8] sm:$0xff] }
 0x7f1   :  { %6448 = vmatpush.msra.mxu1 %v6347_v42  ;;  %v14472_v4 = vpop.f32.mrf.mxu1  ;;  %v14557_v42 = vpop.f32.mrf.mxu3 }
 0x7f2   :  { %6468 = vmatpush.msra.mxu2 %v6379_v34  ;;  %6488 = vmatpush.msra.mxu3 %v6411_v35  ;;  %v14507_v32 = vpop.f32.mrf.mxu2  ;;  %v6384_v34 = vld [vmem:[%s14842_s7 + $0x2e8] sm:$0xff] }
 0x7f3   :  { %6449 = vmatpush.msra.mxu1 %v6345_v31  ;;  %v6416_v35 = vld [vmem:[%s14842_s7 + $0x3e8] sm:$0xff] }
 0x7f4   :  { %6469 = vmatpush.msra.mxu2 %v6377_v46  ;;  %6489 = vmatpush.msra.mxu3 %v6409_v0  ;;  %v6344_v46 = vld [vmem:[%s14842_s7 + $0x1a8] sm:$0xff]  ;;  %v6382_v0 = vld [vmem:[%s14842_s7 + $0x2d8] sm:$0xff] }
 0x7f5   :  { %6521 = vmatmul.f32.vlgmr.msrb.gmra.mxu0 %v6287_v56  ;;  %6450 = vmatpush.msra.mxu1 %v6343_v14  ;;  %v6357_v56 = vld [vmem:[%s14842_s7 + $0x210] sm:$0xff]  ;;  %v6414_v14 = vld [vmem:[%s14842_s7 + $0x3d8] sm:$0xff] }
 0x7f6   :  { %6470 = vmatpush.msra.mxu2 %v6375_v8  ;;  %6490 = vmatpush.msra.mxu3 %v6407_v47  ;;  %v6340_v8 = vld [vmem:[%s14842_s7 + $0x188] sm:$0xff]  ;;  %v6378_v47 = vld [vmem:[%s14842_s7 + $0x2b8] sm:$0xff] }
 0x7f7   :  { %6451 = vmatpush.msra.mxu1 %v6341_v28  ;;  %v6342_v28 = vld [vmem:[%s14842_s7 + $0x198] sm:$0xff] }
 0x7f8   :  { %6471 = vmatpush.msra.mxu2 %v6373_v50  ;;  %6491 = vmatpush.msra.mxu3 %v6405_v53 }
 0x7f9   :  { %6452 = vmatpush.msra.mxu1 %v6339_v13  ;;  %v14520_v25 = vpop.f32.mrf.mxu1  ;;  %v6380_v13 = vld [vmem:[%s14842_s7 + $0x2c8] sm:$0xff]  ;;  %v14596_v53 = vpop.f32.mrf.mxu3 }
 0x7fa   :  { %6472 = vmatpush.msra.mxu2 %v6371_v19  ;;  %6492 = vmatpush.msra.mxu3 %v6403_v52  ;;  %v14552_v7 = vpop.f32.mrf.mxu2  ;;  %v6338_v19 = vld [vmem:[%s14842_s7 + $0x178] sm:$0xff]  ;;  %v6376_v52 = vld [vmem:[%s14842_s7 + $0x2a8] sm:$0xff] }
 0x7fb   :  { %6453 = vmatpush.msra.mxu1 %v6337_v22  ;;  %v6412_v22 = vld [vmem:[%s14842_s7 + $0x3c8] sm:$0xff] }
 0x7fc   :  { %6473 = vmatpush.msra.mxu2 %v6369_v20  ;;  %6493 = vmatpush.msra.mxu3 %v6401_v21  ;;  %v6336_v21 = vld [vmem:[%s14842_s7 + $0x168] sm:$0xff] }
 0x7fd   :  { %6454 = vmatpush.msra.mxu1 %v6335_v41  ;;  %v6410_v41 = vld [vmem:[%s14842_s7 + $0x3b8] sm:$0xff] }
 0x7fe   :  { %6474 = vmatpush.msra.mxu2 %v6367_v17  ;;  %6494 = vmatpush.msra.mxu3 %v6399_v27  ;;  %v6406_v17 = vld [vmem:[%s14842_s7 + $0x398] sm:$0xff] }
 0x7ff   :  { %6455 = vmatpush.msra.mxu1 %v6333_v60 }
 0x800   :  { %6475 = vmatpush.msra.mxu2 %v6365_v63  ;;  %6495 = vmatpush.msra.mxu3 %v6397_v49  ;;  %v6372_v63 = vld [vmem:[%s14842_s7 + $0x288] sm:$0xff] }
 0x801   :  { %6456 = vmatpush.msra.mxu1 %v6331_v55  ;;  %v14565_v31 = vpop.f32.mrf.mxu1  ;;  %v6408_v55 = vld [vmem:[%s14842_s7 + $0x3a8] sm:$0xff]  ;;  %v14620_v27 = vpop.f32.mrf.mxu3 }
 0x802   :  { %6476 = vmatpush.msra.mxu2 %v6363_v54  ;;  %6496 = vmatpush.msra.mxu3 %v6395_v5  ;;  %v14594_v50 = vpop.f32.mrf.mxu2  ;;  %v6332_v54 = vld [vmem:[%s14842_s7 + $0x148] sm:$0xff]  ;;  %v6370_v5 = vld [vmem:[%s14842_s7 + $0x278] sm:$0xff] }
 0x803   :  { %6457 = vmatpush.msra.mxu1 %v6329_v48  ;;  %v6374_v48 = vld [vmem:[%s14842_s7 + $0x298] sm:$0xff] }
 0x804   :  { %6477 = vmatpush.msra.mxu2 %v6361_v3  ;;  %6497 = vmatpush.msra.mxu3 %v6393_v24  ;;  %v4586_v3 = vadd.f32 %v14412_v15, %v12995_v6  ;;  %v6330_v24 = vld [vmem:[%s14842_s7 + $0x138] sm:$0xff]  ;;  %v6328_v6 = vld [vmem:[%s14842_s7 + $0x128] sm:$0xff] }
 0x805   :  { %6458 = vmatpush.msra.mxu1 %v6327_v61  ;;  %v6334_v61 = vld [vmem:[%s14842_s7 + $0x158] sm:$0xff] }
 0x806   :  { %6478 = vmatpush.msra.mxu2 %v6359_v12  ;;  %6498 = vmatpush.msra.mxu3 %v6391_v58  ;;  %v6400_v58 = vld [vmem:[%s14842_s7 + $0x368] sm:$0xff]  ;;  %v6366_v15 = vld [vmem:[%s14842_s7 + $0x258] sm:$0xff] }
 0x807   :  { %6459 = vmatpush.msra.mxu1 %v6325_v30  ;;  %v6404_v30 = vld [vmem:[%s14842_s7 + $0x388] sm:$0xff] }
 0x808   :  { %6479 = vmatpush.msra.mxu2 %v6357_v56  ;;  %6499 = vmatpush.msra.mxu3 %v6389_v57  ;;  %v6398_v57 = vld [vmem:[%s14842_s7 + $0x358] sm:$0xff] }
 0x809   :  { %6460 = vmatpush.msra.mxu1 %v6323_v36  ;;  %v14598_v60 = vpop.f32.mrf.mxu1  ;;  %v6402_v36 = vld [vmem:[%s14842_s7 + $0x378] sm:$0xff] }
 0x80a   :  { %6480 = vmatpush.msra.mxu2 %v6355_v39  ;;  %6500 = vmatpush.msra.mxu3 %v6387_v16  ;;  %v14609_v20 = vpop.f32.mrf.mxu2  ;;  %v6326_v39 = vld [vmem:[%s14842_s7 + $0x118] sm:$0xff]  ;;  %v6364_v16 = vld [vmem:[%s14842_s7 + $0x248] sm:$0xff] }
 0x80b   :  { %6525 = vmatpush.msrb.mxu1 %v6354_v2  ;;  %v6368_v2 = vld [vmem:[%s14842_s7 + $0x268] sm:$0xff]  ;;  %v14662_v56 = vpop.f32.mrf.mxu3 }
 0x80c   :  { %6545 = vmatpush.msrb.mxu2 %v6386_v62  ;;  %6565 = vmatpush.msrb.mxu3 %v6418_v33  ;;  %v6324_v62 = vld [vmem:[%s14842_s7 + $0x108] sm:$0xff]  ;;  %v6362_v33 = vld [vmem:[%s14842_s7 + $0x238] sm:$0xff] }
 0x80d   :  { %6526 = vmatpush.msrb.mxu1 %v6352_v44  ;;  %v4754_v44 = vadd.f32 %v14424_v59, %v4586_v3 }
 0x80e   :  { %6546 = vmatpush.msrb.mxu2 %v6384_v34  ;;  %6566 = vmatpush.msrb.mxu3 %v6416_v35  ;;  %v6394_v34 = vld [vmem:[%s14842_s7 + $0x338] sm:$0xff]  ;;  %v4588_v35 = vadd.f32 %v14422_v29, %v13043_v18 }
 0x80f   :  { %6527 = vmatpush.msrb.mxu1 %v6350_v9  ;;  %v4922_v59 = vadd.f32 %v14430_v37, %v4754_v44  ;;  %v6358_v18 = vld [vmem:[%s14842_s7 + $0x218] sm:$0xff] }
 0x810   :  { %6547 = vmatpush.msrb.mxu2 %v6382_v0  ;;  %6567 = vmatpush.msrb.mxu3 %v6414_v14  ;;  %v6602_v29 = vld [vmem:[%s14844_s9 + $0x78] sm:$0xff] }
 0x811   :  { %6528 = vmatpush.msrb.mxu1 %v6348_v26  ;;  %v14628_v49 = vpop.f32.mrf.mxu1  ;;  %v6396_v26 = vld [vmem:[%s14842_s7 + $0x348] sm:$0xff]  ;;  %v5092_v37 = vadd.f32 %v14472_v4, %v4922_v59  ;;  %v4756_v4 = vadd.f32 %v14428_v23, %v4588_v35  ;;  %v6390_v23 = vld [vmem:[%s14842_s7 + $0x318] sm:$0xff]  ;;  %6623 = vmatpush.msra.mxu0 %v6602_v29 }
 0x812   :  { %6548 = vmatpush.msrb.mxu2 %v6380_v13  ;;  %6568 = vmatpush.msrb.mxu3 %v6412_v22  ;;  %v14650_v12 = vpop.f32.mrf.mxu2  ;;  %v6614_v35 = vld [vmem:[%s14844_s9 + $0xd8] sm:$0xff] }
 0x813   :  { %6529 = vmatpush.msrb.mxu1 %v6346_v38  ;;  %v4587_v38 = vadd.f32 %v14420_v11, %v13037_v40  ;;  %v5260_v40 = vadd.f32 %v14520_v25, %v5092_v37  ;;  %v6392_v11 = vld [vmem:[%s14842_s7 + $0x328] sm:$0xff]  ;;  %v4924_v22 = vadd.f32 %v14461_v45, %v4756_v4  ;;  %v6615_v37 = vld [vmem:[%s14844_s9 + $0xe0] sm:$0xff]  ;;  %v6610_v29 = vld [vmem:[%s14844_s9 + $0xb8] sm:$0xff] }
 0x814   :  { %6549 = vmatpush.msrb.mxu2 %v6378_v47  ;;  %6569 = vmatpush.msrb.mxu3 %v6410_v41  ;;  %v6356_v47 = vld [vmem:[%s14842_s7 + $0x208] sm:$0xff]  ;;  %v6591_v4 = vld [vmem:[%s14844_s9 + $0x20] sm:$0xff] }
 0x815   :  { %6530 = vmatpush.msrb.mxu1 %v6344_v46  ;;  %v6360_v46 = vld [vmem:[%s14842_s7 + $0x228] sm:$0xff]  ;;  %v4755_v0 = vadd.f32 %v14426_v10, %v4587_v38  ;;  %v6601_v10 = vld [vmem:[%s14844_s9 + $0x70] sm:$0xff]  ;;  %v5094_v45 = vadd.f32 %v14515_v51, %v4924_v22  ;;  %v6595_v38 = vld [vmem:[%s14844_s9 + $0x40] sm:$0xff] }
 0x816   :  { %6550 = vmatpush.msrb.mxu2 %v6376_v52  ;;  %6570 = vmatpush.msrb.mxu3 %v6408_v55  ;;  %v6599_v52 = vld [vmem:[%s14844_s9 + $0x60] sm:$0xff] }
 0x817   :  { %6531 = vmatpush.msrb.mxu1 %v6342_v28  ;;  %v4923_v25 = vadd.f32 %v14459_v1, %v4755_v0  ;;  %v5428_v28 = vadd.f32 %v14565_v31, %v5260_v40  ;;  %v6600_v1 = vld [vmem:[%s14844_s9 + $0x68] sm:$0xff]  ;;  %6624 = vmatpush.msra.mxu0 %v6601_v10  ;;  %v6613_v0 = vld [vmem:[%s14844_s9 + $0xd0] sm:$0xff]  ;;  %v6607_v22 = vld [vmem:[%s14844_s9 + $0xa0] sm:$0xff] }
 0x818   :  { %6551 = vmatpush.msrb.mxu2 %v6374_v48  ;;  %6571 = vmatpush.msrb.mxu3 %v6406_v17  ;;  %v6592_v40 = vld [vmem:[%s14844_s9 + $0x28] sm:$0xff]  ;;  %v6589_v10 = vld [vmem:[%s14844_s9 + $0x10] sm:$0xff] }
 0x819   :  { %6532 = vmatpush.msrb.mxu1 %v6340_v8  ;;  %v5093_v31 = vadd.f32 %v14507_v32, %v4923_v25  ;;  %v5596_v41 = vadd.f32 %v14598_v60, %v5428_v28  ;;  %6625 = vmatpush.msra.mxu0 %v6600_v1  ;;  %v5262_v32 = vadd.f32 %v14557_v42, %v5094_v45  ;;  %v6598_v60 = vld [vmem:[%s14844_s9 + $0x58] sm:$0xff]  ;;  %v6609_v25 = vld [vmem:[%s14844_s9 + $0xb0] sm:$0xff]  ;;  %v6588_v28 = vld [vmem:[%s14844_s9 + $0x8] sm:$0xff] }
 0x81a   :  { %6552 = vmatpush.msrb.mxu2 %v6372_v63  ;;  %6572 = vmatpush.msrb.mxu3 %v6404_v30  ;;  %v6276_v30 = vperm.slane %v14340_v43, 1  ;;  %v6604_v1 = vld [vmem:[%s14844_s9 + $0x88] sm:$0xff] }
 0x81b   :  { %6533 = vmatpush.msrb.mxu1 %v6338_v19  ;;  %v6388_v19 = vld [vmem:[%s14842_s7 + $0x308] sm:$0xff]  ;;  %v5261_v55 = vadd.f32 %v14552_v7, %v5093_v31  ;;  %6626 = vmatpush.msra.mxu0 %v6599_v52  ;;  %v5430_v17 = vadd.f32 %v14596_v53, %v5262_v32  ;;  %v6597_v7 = vld [vmem:[%s14844_s9 + $0x50] sm:$0xff]  ;;  %v6603_v31 = vld [vmem:[%s14844_s9 + $0x80] sm:$0xff] }
 0x81c   :  { %6553 = vmatpush.msrb.mxu2 %v6370_v5  ;;  %6573 = vmatpush.msrb.mxu3 %v6402_v36 }
 0x81d   :  { %6534 = vmatpush.msrb.mxu1 %v6336_v21  ;;  %v5766_v21 = vadd.f32 %v14628_v49, %v5596_v41  ;;  %v5429_v51 = vadd.f32 %v14594_v50, %v5261_v55  ;;  %6627 = vmatpush.msra.mxu0 %v6598_v60  ;;  %v6419_v41 = vld [vmem:[%s14843_s8] sm:$0x3] }
 0x81e   :  { %6554 = vmatpush.msrb.mxu2 %v6368_v2  ;;  %6574 = vmatpush.msrb.mxu3 %v6400_v58  ;;  %v6421_v45 = vperm.slane %v6419_v41, 0  ;;  %v6422_v60 = vperm.slane %v6419_v41, 1 }
 0x81f   :  { %6535 = vmatpush.msrb.mxu1 %v6334_v61  ;;  %v5597_v63 = vadd.f32 %v14609_v20, %v5429_v51  ;;  %6628 = vmatpush.msra.mxu0 %v6597_v7  ;;  %v6277_v20 = vperm.slane %v14340_v43, 2 }
 0x820   :  { %6555 = vmatpush.msrb.mxu2 %v6366_v15  ;;  %6575 = vmatpush.msrb.mxu3 %v6398_v57  ;;  %v6618_v15 = vld [vmem:[%s14844_s9 + $0xf8] sm:$0xff]  ;;  %v6278_v57 = vperm.slane %v14340_v43, 3  ;;  %v6596_v43 = vld [vmem:[%s14844_s9 + $0x48] sm:$0xff] }
 0x821   :  { %6536 = vmatpush.msrb.mxu1 %v6332_v54  ;;  %v5598_v54 = vadd.f32 %v14620_v27, %v5430_v17  ;;  %v5767_v50 = vadd.f32 %v14650_v12, %v5597_v63  ;;  %6629 = vmatpush.msra.mxu0 %v6596_v43 }
 0x822   :  { %6556 = vmatpush.msrb.mxu2 %v6364_v16  ;;  %6576 = vmatpush.msrb.mxu3 %v6396_v26 }
 0x823   :  { %6537 = vmatpush.msrb.mxu1 %v6330_v24  ;;  %v5768_v53 = vadd.f32 %v14662_v56, %v5598_v54  ;;  %v6617_v56 = vld [vmem:[%s14844_s9 + $0xf0] sm:$0xff]  ;;  %6630 = vmatpush.msra.mxu0 %v6595_v38 }
 0x824   :  { %6557 = vmatpush.msrb.mxu2 %v6362_v33  ;;  %6577 = vmatpush.msrb.mxu3 %v6394_v34  ;;  %v6616_v33 = vld [vmem:[%s14844_s9 + $0xe8] sm:$0xff]  ;;  %v6594_v34 = vld [vmem:[%s14844_s9 + $0x38] sm:$0xff] }
 0x825   :  { %v5890_v9 = vpop.f32.mrf.mxu1  ;;  %6538 = vmatpush.msrb.mxu1 %v6328_v6  ;;  %6631 = vmatpush.msra.mxu0 %v6594_v34 }
 0x826   :  { %6558 = vmatpush.msrb.mxu2 %v6360_v46  ;;  %6578 = vmatpush.msrb.mxu3 %v6392_v11  ;;  %v5934_v48 = vadd.f32 %v5890_v9, %v5766_v21  ;;  %v6593_v46 = vld [vmem:[%s14844_s9 + $0x30] sm:$0xff]  ;;  %v6612_v11 = vld [vmem:[%s14844_s9 + $0xc8] sm:$0xff] }
 0x827   :  { %6539 = vmatpush.msrb.mxu1 %v6326_v39  ;;  %6632 = vmatpush.msra.mxu0 %v6593_v46 }
 0x828   :  { %6559 = vmatpush.msrb.mxu2 %v6358_v18  ;;  %6579 = vmatpush.msrb.mxu3 %v6390_v23  ;;  %v6590_v18 = vld [vmem:[%s14844_s9 + $0x18] sm:$0xff]  ;;  %v6587_v23 = vld [vmem:[%s14844_s9] sm:$0xff] }
 0x829   :  { %6540 = vmatpush.msrb.mxu1 %v6324_v62  ;;  %6633 = vmatpush.msra.mxu0 %v6592_v40 }
 0x82a   :  { %6560 = vmatpush.msrb.mxu2 %v6356_v47  ;;  %6580 = vmatpush.msrb.mxu3 %v6388_v19  ;;  %v6605_v47 = vld [vmem:[%s14844_s9 + $0x90] sm:$0xff] }
 0x82b   :  { %v5910_v14 = vpop.f32.mrf.mxu2  ;;  %6634 = vmatpush.msra.mxu0 %v6591_v4 }
 0x82c   :  { %v5930_v13 = vpop.f32.mrf.mxu3  ;;  %v5935_v3 = vadd.f32 %v5910_v14, %v5767_v50  ;;  %v6611_v14 = vld [vmem:[%s14844_s9 + $0xc0] sm:$0xff] }
 0x82d   :  { %v5936_v2 = vadd.f32 %v5930_v13, %v5768_v53  ;;  %6635 = vmatpush.msra.mxu0 %v6590_v18  ;;  %v6608_v13 = vld [vmem:[%s14844_s9 + $0xa8] sm:$0xff]  ;;  %v8092_v53 = vld [vmem:[%s14845_s10] ss:$0 sm:$0xff] }
 0x82f   :  { %6636 = vmatpush.msra.mxu0 %v6589_v10 }
 0x831   :  { %6637 = vmatpush.msra.mxu0 %v6588_v28 }
 0x833   :  { %6638 = vmatpush.msra.mxu0 %v6587_v23 }
 0x846   :  { %v6058_v8 = vpop.f32.mrf.mxu1 }
 0x847   :  { %v6102_v49 = vadd.f32 %v6058_v8, %v5934_v48  ;;  %v6606_v8 = vld [vmem:[%s14844_s9 + $0x98] sm:$0xff] }
 0x84c   :  { %v6078_v61 = vpop.f32.mrf.mxu2 }
 0x84d   :  { %v6098_v42 = vpop.f32.mrf.mxu3  ;;  %v6103_v58 = vadd.f32 %v6078_v61, %v5935_v3 }
 0x84e   :  { %v6104_v44 = vadd.f32 %v6098_v42, %v5936_v2 }
 0x867   :  { %v6226_v5 = vpop.f32.mrf.mxu1 }
 0x868   :  { %v6270_v36 = vadd.f32 %v6226_v5, %v6102_v49 }
 0x86a   :  { %v6284_v24 = vadd.f32 %v6276_v30, %v6270_v36  ;;  %v6442_v19 = vpop.f32.mrf.mxu0 }
 0x86b   :  { %v6443_v55 = vadd.f32 %v6442_v19, %v6421_v45 }
 0x86c   :  { %v6288_v6 = vmax.f32 %v6284_v24, 0.0 }
 0x86d   :  { %v6246_v27 = vpop.f32.mrf.mxu2 }
 0x86e   :  { %v6271_v12 = vadd.f32 %v6246_v27, %v6103_v58  ;;  %v6266_v9 = vpop.f32.mrf.mxu3  ;;  %6461 = vmatmul.f32.vlgmr.msra.gmra.mxu1 %v6288_v6 }
 0x86f   :  { %v6272_v39 = vadd.f32 %v6266_v9, %v6104_v44  ;;  %6643 = vmatpush.msra.mxu1 %v6618_v15 }
 0x870   :  { %v6285_v16 = vadd.f32 %v6277_v20, %v6271_v12 }
 0x871   :  { %v6286_v59 = vadd.f32 %v6278_v57, %v6272_v39  ;;  %6644 = vmatpush.msra.mxu1 %v6617_v56 }
 0x872   :  { %v6289_v26 = vmax.f32 %v6285_v16, 0.0  ;;  %v6522_v17 = vpop.f32.mrf.mxu0 }
 0x873   :  { %v6290_v62 = vmax.f32 %v6286_v59, 0.0  ;;  %6645 = vmatpush.msra.mxu1 %v6616_v33  ;;  %v6523_v63 = vadd.f32 %v6522_v17, %v6422_v60 }
 0x874   :  { %6481 = vmatmul.f32.vlgmr.msra.gmra.mxu2 %v6289_v26 }
 0x875   :  { %6501 = vmatmul.f32.vlgmr.msra.gmra.mxu3 %v6290_v62  ;;  %6646 = vmatpush.msra.mxu1 %v6615_v37 }
 0x876   :  { %6541 = vmatmul.f32.vlgmr.msrb.gmra.mxu1 %v6288_v6 }
 0x877   :  { %6647 = vmatpush.msra.mxu1 %v6614_v35 }
 0x879   :  { %6648 = vmatpush.msra.mxu1 %v6613_v0 }
 0x87b   :  { %6649 = vmatpush.msra.mxu1 %v6612_v11 }
 0x87c   :  { %6561 = vmatmul.f32.vlgmr.msrb.gmra.mxu2 %v6289_v26 }
 0x87d   :  { %6581 = vmatmul.f32.vlgmr.msrb.gmra.mxu3 %v6290_v62  ;;  %6650 = vmatpush.msra.mxu1 %v6611_v14 }
 0x87f   :  { %6651 = vmatpush.msra.mxu1 %v6610_v29 }
 0x881   :  { %6652 = vmatpush.msra.mxu1 %v6609_v25 }
 0x883   :  { %6653 = vmatpush.msra.mxu1 %v6608_v13 }
 0x885   :  { %6654 = vmatpush.msra.mxu1 %v6607_v22 }
 0x887   :  { %6655 = vmatpush.msra.mxu1 %v6606_v8 }
 0x889   :  { %6656 = vmatpush.msra.mxu1 %v6605_v47 }
 0x88b   :  { %6657 = vmatpush.msra.mxu1 %v6604_v1 }
 0x88d   :  { %6658 = vmatpush.msra.mxu1 %v6603_v31 }
 0x8eb   :  { %v6462_v52 = vpop.f32.mrf.mxu1 }
 0x8ec   :  { %v6463_v21 = vadd.f32 %v6462_v52, %v6443_v55 }
 0x8f3   :  { %v6542_v7 = vpop.f32.mrf.mxu1 }
 0x8f4   :  { %v6543_v42 = vadd.f32 %v6542_v7, %v6523_v63 }
 0x8f7   :  { %v6482_v32 = vpop.f32.mrf.mxu2 }
 0x8f8   :  { %v6483_v51 = vadd.f32 %v6482_v32, %v6463_v21  ;;  %v6502_v48 = vpop.f32.mrf.mxu3 }
 0x8fa   :  { %v6503_v61 = vadd.f32 %v6502_v48, %v6483_v51 }
 0x8fc   :  { %v6585_v49 = vmax.f32 %v6503_v61, 0.0 }
 0x8fe   :  { %6639 = vmatmul.f32.vlgmr.msra.gmra.mxu0 %v6585_v49 }
 0x8ff   :  { %v6562_v30 = vpop.f32.mrf.mxu2 }
 0x900   :  { %v6563_v54 = vadd.f32 %v6562_v30, %v6543_v42  ;;  %v6582_v5 = vpop.f32.mrf.mxu3 }
 0x902   :  { %v6583_v50 = vadd.f32 %v6582_v5, %v6563_v54 }
 0x904   :  { %v6586_v36 = vmax.f32 %v6583_v50, 0.0 }
 0x906   :  { %6659 = vmatmul.f32.vlgmr.msra.gmra.mxu1 %v6586_v36 }
 0x97b   :  { %v6640_v3 = vpop.f32.mrf.mxu0 }
 0x97c   :  { %v6641_v24 = vadd.f32 %v8092_v53, %v6640_v3 }
 0x983   :  { %v6660_v2 = vpop.f32.mrf.mxu1 }
 0x984   :  { %v6661_v58 = vadd.f32 %v6660_v2, %v6641_v24 }
 0x986   :  { %6663 = vst [vmem:[#allocation4] sm:$0x3] %v6661_v58 }
 0x987   :  { %6674 = dma.vmem_to_hbm [thread:$0]  %s6670_s24, 32, %s6672_s4, [#allocation5]  }
 0x988   :  { %8120 = dma.done.wait [#allocation5], 32  }
 0x989   :  { %8121 = vsyncadd [#allocation5], 4294967264 }
 0x98a   :  { %6679 = vsyncpa [#allocation5], 1 }

</bundles_post_ra>
